<compile_context>
chip_gen: v6e
topology: v6e:2x2x1
jax: 0.10.0
libtpu: 0.0.40
codegen_flags: <defaults>
</compile_context>

<pallas_src>
import functools

import numpy as np
import jax
import jax.numpy as jnp
from jax.experimental import pallas as pl
from jax.experimental.pallas import tpu as pltpu


# Margin (in flattened-position rows) around the activation buffers so that every
# 3x3 tap is an in-bounds static slice; must be >= padded_width + 1.
_MARGIN = 32
_LANE = 128          # lane-pad the classifier output for a dense 128-wide store


# ------------------------------ fused kernel ------------------------------- #

def _fused_model_kernel(xp_ref, w1_ref, b1_ref, w2_ref, b2_ref,
                        mask_ref, pool_ref, wfc_ref, bfc_ref,
                        o_ref, f1p_ref, *, gw, margin):
    """conv1(3x3,s1)+ReLU -> conv2(3x3)+ReLU -> pool -> linear, one batch element.

    Activations are flattened over padded spatial positions P = Gh*Gw with `margin`
    zero rows on each side, so tap (di, dj) of a 3x3 conv is the static slice
    rows [margin + di*gw + dj, ... + P).  conv2 is evaluated at every stride-1
    position; the pool row then both selects the stride-2 grid and averages it.
    """
    p_flat = mask_ref.shape[0]
    shifts = [di * gw + dj for di in (-1, 0, 1) for dj in (-1, 0, 1)]

    # ---- stage 1: 3x3 conv + bias + ReLU over all padded positions (bf16 dots, f32 acc)
    acc1 = jnp.zeros((p_flat, w1_ref.shape[2]), jnp.float32)
    for t, s in enumerate(shifts):
        tap = xp_ref[pl.ds(margin + s, p_flat), :]                 # (P, Cin) bf16
        acc1 = acc1 + jnp.dot(tap, w1_ref[t],
                              preferred_element_type=jnp.float32)
    # zero the 1-pixel ring so it acts as conv2's zero padding
    f1 = jnp.maximum(acc1 + b1_ref[...], 0.0) * mask_ref[...]      # (P, C1) f32

    # park f1 (with zero margins) in VMEM scratch; conv2 reads shifted views of it
    # (f32 scratch keeps the unaligned sublane slices on the cheapest load path)
    f1p_ref[...] = jnp.zeros_like(f1p_ref)
    f1p_ref[pl.ds(margin, p_flat), :] = f1

    # ---- stage 2: 3x3 conv + bias + ReLU (stride 2 is applied by the pool row)
    acc2 = jnp.zeros((p_flat, w2_ref.shape[2]), jnp.float32)
    for t, s in enumerate(shifts):
        tap = f1p_ref[pl.ds(margin + s, p_flat), :].astype(jnp.bfloat16)
        acc2 = acc2 + jnp.dot(tap, w2_ref[t],
                              preferred_element_type=jnp.float32)
    f2 = jnp.maximum(acc2 + b2_ref[...], 0.0)                      # (P, C2) f32

    # ---- stride-2 subsample + global average pool as a single MXU matvec
    pooled = jnp.dot(pool_ref[...], f2,
                     preferred_element_type=jnp.float32)           # (1, C2)

    # ---- classifier head; output lane dim padded to 128 for a dense store
    o_ref[...] = (jnp.dot(pooled, wfc_ref[...],
                          preferred_element_type=jnp.float32)
                  + bfc_ref[...]).astype(o_ref.dtype)


# ------------------------------ glue helpers ------------------------------- #

def _make_selectors(H, W):
    """Interior mask (zeroes the conv-pad ring) and the stride-2 average-pool row."""
    Gh, Gw = H + 2, W + 2
    P = Gh * Gw
    hp = np.arange(Gh)[:, None]
    wp = np.arange(Gw)[None, :]
    interior = (hp >= 1) & (hp <= H) & (wp >= 1) & (wp <= W)
    mask = interior.astype(np.float32).reshape(P, 1)

    Ho = (H + 2 - 3) // 2 + 1
    Wo = (W + 2 - 3) // 2 + 1
    sel = np.zeros((Gh, Gw), np.float32)
    sel[1:2 * Ho:2, 1:2 * Wo:2] = 1.0 / (Ho * Wo)
    pool_row = sel.reshape(1, P)
    return mask, pool_row


@jax.jit
def inference_model_forward(x_nchw, params):
    """forward(x): features = backbone(x)[-1]; scores = classifier(features)."""
    B, Cin, H, W = x_nchw.shape
    w1, b1 = params["w1"], params["b1"]            # (3,3,Cin,C1), (C1,)
    w2, b2 = params["w2"], params["b2"]            # (3,3,C1,C2), (C2,)
    wfc, bfc = params["w_fc"], params["b_fc"]      # (C2,NC), (NC,)
    C1, C2, NC = w1.shape[-1], w2.shape[-1], wfc.shape[-1]
    Gh, Gw = H + 2, W + 2
    P = Gh * Gw
    PX = P + 2 * _MARGIN
    NCP = max(_LANE, ((NC + _LANE - 1) // _LANE) * _LANE)

    # ---- cheap XLA layout prep; all heavy lifting happens inside the kernel ----
    x = jnp.transpose(x_nchw, (0, 2, 3, 1))                         # NCHW -> NHWC
    xp = jnp.pad(x, ((0, 0), (1, 1), (1, 1), (0, 0)))               # conv-1 zero pad
    xp = xp.reshape(B, P, Cin)                                      # flatten positions
    xp = jnp.pad(xp, ((0, 0), (_MARGIN, _MARGIN), (0, 0)))          # slice margins
    xp = xp.astype(jnp.bfloat16)

    w1t = w1.reshape(9, Cin, C1).astype(jnp.bfloat16)               # tap-major weights
    w2t = w2.reshape(9, C1, C2).astype(jnp.bfloat16)
    b1r = b1.reshape(1, C1).astype(jnp.float32)
    b2r = b2.reshape(1, C2).astype(jnp.float32)
    wfc_p = jnp.zeros((C2, NCP), jnp.float32).at[:, :NC].set(wfc)   # lane-pad head
    bfc_p = jnp.zeros((1, NCP), jnp.float32).at[0, :NC].set(bfc)

    mask_np, pool_np = _make_selectors(H, W)
    mask = jnp.asarray(mask_np)
    pool_row = jnp.asarray(pool_np)

    kernel = functools.partial(_fused_model_kernel, gw=Gw, margin=_MARGIN)

    out = pl.pallas_call(
        kernel,
        out_shape=jax.ShapeDtypeStruct((B, 1, NCP), jnp.float32),
        grid=(B,),
        in_specs=[
            pl.BlockSpec((None, PX, Cin), lambda b: (b, 0, 0)),     # padded flat input
            pl.BlockSpec((9, Cin, C1), lambda b: (0, 0, 0)),        # conv1 weights
            pl.BlockSpec((1, C1), lambda b: (0, 0)),                # conv1 bias
            pl.BlockSpec((9, C1, C2), lambda b: (0, 0, 0)),         # conv2 weights
            pl.BlockSpec((1, C2), lambda b: (0, 0)),                # conv2 bias
            pl.BlockSpec((P, 1), lambda b: (0, 0)),                 # interior mask
            pl.BlockSpec((1, P), lambda b: (0, 0)),                 # stride-2 pool row
            pl.BlockSpec((C2, NCP), lambda b: (0, 0)),              # fc weight (padded)
            pl.BlockSpec((1, NCP), lambda b: (0, 0)),               # fc bias (padded)
        ],
        out_specs=pl.BlockSpec((None, 1, NCP), lambda b: (b, 0, 0)),
        scratch_shapes=[pltpu.VMEM((PX, C1), jnp.float32)],         # padded f1 buffer
        compiler_params=pltpu.CompilerParams(
            dimension_semantics=("parallel",)),                     # v7x: 1 batch / core
    )(xp, w1t, b1r, w2t, b2r, mask, pool_row, wfc_p, bfc_p)

    return out[:, 0, :NC]                                           # [B, num_classes]


# ------------------------------- params / ref ------------------------------ #

def init_params(key, cin=4, c1=8, c2=16, num_classes=10):
    k1, k2, k3, k4, k5, k6 = jax.random.split(key, 6)
    return {
        "w1": jax.random.normal(k1, (3, 3, cin, c1), jnp.float32) * 0.1,
        "b1": jax.random.normal(k2, (c1,), jnp.float32) * 0.01,
        "w2": jax.random.normal(k3, (3, 3, c1, c2), jnp.float32) * 0.1,
        "b2": jax.random.normal(k4, (c2,), jnp.float32) * 0.01,
        "w_fc": jax.random.normal(k5, (c2, num_classes), jnp.float32) * 0.1,
        "b_fc": jax.random.normal(k6, (num_classes,), jnp.float32) * 0.01,
    }


def _reference_forward(x_nchw, params):
    """Plain-XLA reference with the same bf16 operand rounding as the kernel."""
    hi = jax.lax.Precision.HIGHEST

    def rt(v):                                    # bf16 round-trip (operand precision)
        return v.astype(jnp.bfloat16).astype(jnp.float32)

    def conv(xx, w, b, stride):
        y = jax.lax.conv_general_dilated(
            rt(xx), rt(w), window_strides=(stride, stride),
            padding=((1, 1), (1, 1)),
            dimension_numbers=("NHWC", "HWIO", "NHWC"),
            precision=hi)
        return jnp.maximum(y + b, 0.0)

    x = jnp.transpose(x_nchw, (0, 2, 3, 1))
    f1 = conv(x, params["w1"], params["b1"], 1)
    f2 = conv(f1, params["w2"], params["b2"], 2)
    pooled = jnp.mean(f2, axis=(1, 2))
    return jnp.dot(pooled, params["w_fc"], precision=hi) + params["b_fc"]


if __name__ == "__main__":
    key = jax.random.PRNGKey(0)
    kx, kp = jax.random.split(key)

    # small shapes: batch=2, channels=4, spatial=16x16 (PyTorch NCHW input)
    x = jax.random.normal(kx, (2, 4, 16, 16), jnp.float32)
    params = init_params(kp)

    scores = inference_model_forward(x, params)
    scores = jax.block_until_ready(scores)

    ref = _reference_forward(x, params)
    assert scores.shape == (2, 10)
    assert jnp.allclose(scores, ref, atol=2e-3, rtol=2e-3), "mismatch vs reference"

    print("KERNEL_OK")
</pallas_src>

<mosaic_0001>
module attributes {stable_mosaic.version = 11 : i64} {
  func.func @_fused_model_kernel(%arg0: i32, %arg1: memref<1x388x4xbf16, #tpu.memory_space<vmem>>, %arg2: memref<9x4x8xbf16, #tpu.memory_space<vmem>>, %arg3: memref<1x8xf32, #tpu.memory_space<vmem>>, %arg4: memref<9x8x16xbf16, #tpu.memory_space<vmem>>, %arg5: memref<1x16xf32, #tpu.memory_space<vmem>>, %arg6: memref<324x1xf32, #tpu.memory_space<vmem>>, %arg7: memref<1x324xf32, #tpu.memory_space<vmem>>, %arg8: memref<16x128xf32, #tpu.memory_space<vmem>>, %arg9: memref<1x128xf32, #tpu.memory_space<vmem>>, %arg10: memref<1x1x128xf32, #tpu.memory_space<vmem>>, %arg11: memref<388x8xf32, #tpu.memory_space<vmem>>) attributes {dimension_semantics = [#tpu.dimension_semantics<parallel>], iteration_bounds = array<i64: 2>, scalar_prefetch = 0 : i64, scratch_operands = 1 : i64, tpu.core_type = #tpu.core_type<tc>, window_params = [{transform_indices = @transform_0, window_bounds = array<i64: 1, 388, 4>}, {pipeline_mode = #tpu.pipeline_mode<synchronous>, transform_indices = @transform_1, window_bounds = array<i64: 9, 4, 8>}, {pipeline_mode = #tpu.pipeline_mode<synchronous>, transform_indices = @transform_2, window_bounds = array<i64: 1, 8>}, {pipeline_mode = #tpu.pipeline_mode<synchronous>, transform_indices = @transform_3, window_bounds = array<i64: 9, 8, 16>}, {pipeline_mode = #tpu.pipeline_mode<synchronous>, transform_indices = @transform_4, window_bounds = array<i64: 1, 16>}, {pipeline_mode = #tpu.pipeline_mode<synchronous>, transform_indices = @transform_5, window_bounds = array<i64: 324, 1>}, {pipeline_mode = #tpu.pipeline_mode<synchronous>, transform_indices = @transform_6, window_bounds = array<i64: 1, 324>}, {pipeline_mode = #tpu.pipeline_mode<synchronous>, transform_indices = @transform_7, window_bounds = array<i64: 16, 128>}, {pipeline_mode = #tpu.pipeline_mode<synchronous>, transform_indices = @transform_8, window_bounds = array<i64: 1, 128>}, {transform_indices = @transform_9, window_bounds = array<i64: 1, 1, 128>}]} {
    %cst = arith.constant 0.000000e+00 : f32
    %0 = vector.broadcast %cst : f32 to vector<324x8xf32>
    %c0 = arith.constant 0 : index
    %c13 = arith.constant 13 : index
    %c0_0 = arith.constant 0 : index
    %1 = vector.load %arg1[%c0, %c13, %c0_0] : memref<1x388x4xbf16, #tpu.memory_space<vmem>>, vector<1x324x4xbf16>
    %2 = vector.shape_cast %1 : vector<1x324x4xbf16> to vector<324x4xbf16>
    %c0_1 = arith.constant 0 : index
    %c0_2 = arith.constant 0 : index
    %c0_3 = arith.constant 0 : index
    %3 = vector.load %arg2[%c0_1, %c0_2, %c0_3] : memref<9x4x8xbf16, #tpu.memory_space<vmem>>, vector<1x4x8xbf16>
    %4 = vector.shape_cast %3 : vector<1x4x8xbf16> to vector<4x8xbf16>
    %cst_4 = arith.constant dense<0.000000e+00> : vector<324x8xf32>
    %5 = tpu.matmul %2, %4, %cst_4 {dimension_numbers = #tpu.dot_dimension_numbers<[1], [0], [0], [1], [0, 0, 1, 1], [], []>} : vector<324x4xbf16>, vector<4x8xbf16>, vector<324x8xf32> -> vector<324x8xf32>
    %6 = arith.addf %0, %5 : vector<324x8xf32>
    %c0_5 = arith.constant 0 : index
    %c14 = arith.constant 14 : index
    %c0_6 = arith.constant 0 : index
    %7 = vector.load %arg1[%c0_5, %c14, %c0_6] : memref<1x388x4xbf16, #tpu.memory_space<vmem>>, vector<1x324x4xbf16>
    %8 = vector.shape_cast %7 : vector<1x324x4xbf16> to vector<324x4xbf16>
    %c1 = arith.constant 1 : index
    %c0_7 = arith.constant 0 : index
    %c0_8 = arith.constant 0 : index
    %9 = vector.load %arg2[%c1, %c0_7, %c0_8] : memref<9x4x8xbf16, #tpu.memory_space<vmem>>, vector<1x4x8xbf16>
    %10 = vector.shape_cast %9 : vector<1x4x8xbf16> to vector<4x8xbf16>
    %cst_9 = arith.constant dense<0.000000e+00> : vector<324x8xf32>
    %11 = tpu.matmul %8, %10, %cst_9 {dimension_numbers = #tpu.dot_dimension_numbers<[1], [0], [0], [1], [0, 0, 1, 1], [], []>} : vector<324x4xbf16>, vector<4x8xbf16>, vector<324x8xf32> -> vector<324x8xf32>
    %12 = arith.addf %6, %11 : vector<324x8xf32>
    %c0_10 = arith.constant 0 : index
    %c15 = arith.constant 15 : index
    %c0_11 = arith.constant 0 : index
    %13 = vector.load %arg1[%c0_10, %c15, %c0_11] : memref<1x388x4xbf16, #tpu.memory_space<vmem>>, vector<1x324x4xbf16>
    %14 = vector.shape_cast %13 : vector<1x324x4xbf16> to vector<324x4xbf16>
    %c2 = arith.constant 2 : index
    %c0_12 = arith.constant 0 : index
    %c0_13 = arith.constant 0 : index
    %15 = vector.load %arg2[%c2, %c0_12, %c0_13] : memref<9x4x8xbf16, #tpu.memory_space<vmem>>, vector<1x4x8xbf16>
    %16 = vector.shape_cast %15 : vector<1x4x8xbf16> to vector<4x8xbf16>
    %cst_14 = arith.constant dense<0.000000e+00> : vector<324x8xf32>
    %17 = tpu.matmul %14, %16, %cst_14 {dimension_numbers = #tpu.dot_dimension_numbers<[1], [0], [0], [1], [0, 0, 1, 1], [], []>} : vector<324x4xbf16>, vector<4x8xbf16>, vector<324x8xf32> -> vector<324x8xf32>
    %18 = arith.addf %12, %17 : vector<324x8xf32>
    %c0_15 = arith.constant 0 : index
    %c31 = arith.constant 31 : index
    %c0_16 = arith.constant 0 : index
    %19 = vector.load %arg1[%c0_15, %c31, %c0_16] : memref<1x388x4xbf16, #tpu.memory_space<vmem>>, vector<1x324x4xbf16>
    %20 = vector.shape_cast %19 : vector<1x324x4xbf16> to vector<324x4xbf16>
    %c3 = arith.constant 3 : index
    %c0_17 = arith.constant 0 : index
    %c0_18 = arith.constant 0 : index
    %21 = vector.load %arg2[%c3, %c0_17, %c0_18] : memref<9x4x8xbf16, #tpu.memory_space<vmem>>, vector<1x4x8xbf16>
    %22 = vector.shape_cast %21 : vector<1x4x8xbf16> to vector<4x8xbf16>
    %cst_19 = arith.constant dense<0.000000e+00> : vector<324x8xf32>
    %23 = tpu.matmul %20, %22, %cst_19 {dimension_numbers = #tpu.dot_dimension_numbers<[1], [0], [0], [1], [0, 0, 1, 1], [], []>} : vector<324x4xbf16>, vector<4x8xbf16>, vector<324x8xf32> -> vector<324x8xf32>
    %24 = arith.addf %18, %23 : vector<324x8xf32>
    %c0_20 = arith.constant 0 : index
    %c32 = arith.constant 32 : index
    %c0_21 = arith.constant 0 : index
    %25 = vector.load %arg1[%c0_20, %c32, %c0_21] : memref<1x388x4xbf16, #tpu.memory_space<vmem>>, vector<1x324x4xbf16>
    %26 = vector.shape_cast %25 : vector<1x324x4xbf16> to vector<324x4xbf16>
    %c4 = arith.constant 4 : index
    %c0_22 = arith.constant 0 : index
    %c0_23 = arith.constant 0 : index
    %27 = vector.load %arg2[%c4, %c0_22, %c0_23] : memref<9x4x8xbf16, #tpu.memory_space<vmem>>, vector<1x4x8xbf16>
    %28 = vector.shape_cast %27 : vector<1x4x8xbf16> to vector<4x8xbf16>
    %cst_24 = arith.constant dense<0.000000e+00> : vector<324x8xf32>
    %29 = tpu.matmul %26, %28, %cst_24 {dimension_numbers = #tpu.dot_dimension_numbers<[1], [0], [0], [1], [0, 0, 1, 1], [], []>} : vector<324x4xbf16>, vector<4x8xbf16>, vector<324x8xf32> -> vector<324x8xf32>
    %30 = arith.addf %24, %29 : vector<324x8xf32>
    %c0_25 = arith.constant 0 : index
    %c33 = arith.constant 33 : index
    %c0_26 = arith.constant 0 : index
    %31 = vector.load %arg1[%c0_25, %c33, %c0_26] : memref<1x388x4xbf16, #tpu.memory_space<vmem>>, vector<1x324x4xbf16>
    %32 = vector.shape_cast %31 : vector<1x324x4xbf16> to vector<324x4xbf16>
    %c5 = arith.constant 5 : index
    %c0_27 = arith.constant 0 : index
    %c0_28 = arith.constant 0 : index
    %33 = vector.load %arg2[%c5, %c0_27, %c0_28] : memref<9x4x8xbf16, #tpu.memory_space<vmem>>, vector<1x4x8xbf16>
    %34 = vector.shape_cast %33 : vector<1x4x8xbf16> to vector<4x8xbf16>
    %cst_29 = arith.constant dense<0.000000e+00> : vector<324x8xf32>
    %35 = tpu.matmul %32, %34, %cst_29 {dimension_numbers = #tpu.dot_dimension_numbers<[1], [0], [0], [1], [0, 0, 1, 1], [], []>} : vector<324x4xbf16>, vector<4x8xbf16>, vector<324x8xf32> -> vector<324x8xf32>
    %36 = arith.addf %30, %35 : vector<324x8xf32>
    %c0_30 = arith.constant 0 : index
    %c49 = arith.constant 49 : index
    %c0_31 = arith.constant 0 : index
    %37 = vector.load %arg1[%c0_30, %c49, %c0_31] : memref<1x388x4xbf16, #tpu.memory_space<vmem>>, vector<1x324x4xbf16>
    %38 = vector.shape_cast %37 : vector<1x324x4xbf16> to vector<324x4xbf16>
    %c6 = arith.constant 6 : index
    %c0_32 = arith.constant 0 : index
    %c0_33 = arith.constant 0 : index
    %39 = vector.load %arg2[%c6, %c0_32, %c0_33] : memref<9x4x8xbf16, #tpu.memory_space<vmem>>, vector<1x4x8xbf16>
    %40 = vector.shape_cast %39 : vector<1x4x8xbf16> to vector<4x8xbf16>
    %cst_34 = arith.constant dense<0.000000e+00> : vector<324x8xf32>
    %41 = tpu.matmul %38, %40, %cst_34 {dimension_numbers = #tpu.dot_dimension_numbers<[1], [0], [0], [1], [0, 0, 1, 1], [], []>} : vector<324x4xbf16>, vector<4x8xbf16>, vector<324x8xf32> -> vector<324x8xf32>
    %42 = arith.addf %36, %41 : vector<324x8xf32>
    %c0_35 = arith.constant 0 : index
    %c50 = arith.constant 50 : index
    %c0_36 = arith.constant 0 : index
    %43 = vector.load %arg1[%c0_35, %c50, %c0_36] : memref<1x388x4xbf16, #tpu.memory_space<vmem>>, vector<1x324x4xbf16>
    %44 = vector.shape_cast %43 : vector<1x324x4xbf16> to vector<324x4xbf16>
    %c7 = arith.constant 7 : index
    %c0_37 = arith.constant 0 : index
    %c0_38 = arith.constant 0 : index
    %45 = vector.load %arg2[%c7, %c0_37, %c0_38] : memref<9x4x8xbf16, #tpu.memory_space<vmem>>, vector<1x4x8xbf16>
    %46 = vector.shape_cast %45 : vector<1x4x8xbf16> to vector<4x8xbf16>
    %cst_39 = arith.constant dense<0.000000e+00> : vector<324x8xf32>
    %47 = tpu.matmul %44, %46, %cst_39 {dimension_numbers = #tpu.dot_dimension_numbers<[1], [0], [0], [1], [0, 0, 1, 1], [], []>} : vector<324x4xbf16>, vector<4x8xbf16>, vector<324x8xf32> -> vector<324x8xf32>
    %48 = arith.addf %42, %47 : vector<324x8xf32>
    %c0_40 = arith.constant 0 : index
    %c51 = arith.constant 51 : index
    %c0_41 = arith.constant 0 : index
    %49 = vector.load %arg1[%c0_40, %c51, %c0_41] : memref<1x388x4xbf16, #tpu.memory_space<vmem>>, vector<1x324x4xbf16>
    %50 = vector.shape_cast %49 : vector<1x324x4xbf16> to vector<324x4xbf16>
    %c8 = arith.constant 8 : index
    %c0_42 = arith.constant 0 : index
    %c0_43 = arith.constant 0 : index
    %51 = vector.load %arg2[%c8, %c0_42, %c0_43] : memref<9x4x8xbf16, #tpu.memory_space<vmem>>, vector<1x4x8xbf16>
    %52 = vector.shape_cast %51 : vector<1x4x8xbf16> to vector<4x8xbf16>
    %cst_44 = arith.constant dense<0.000000e+00> : vector<324x8xf32>
    %53 = tpu.matmul %50, %52, %cst_44 {dimension_numbers = #tpu.dot_dimension_numbers<[1], [0], [0], [1], [0, 0, 1, 1], [], []>} : vector<324x4xbf16>, vector<4x8xbf16>, vector<324x8xf32> -> vector<324x8xf32>
    %54 = arith.addf %48, %53 : vector<324x8xf32>
    %c0_45 = arith.constant 0 : index
    %c0_46 = arith.constant 0 : index
    %55 = vector.load %arg3[%c0_45, %c0_46] : memref<1x8xf32, #tpu.memory_space<vmem>>, vector<1x8xf32>
    %56 = vector.broadcast %55 : vector<1x8xf32> to vector<324x8xf32>
    %57 = arith.addf %54, %56 : vector<324x8xf32>
    %cst_47 = arith.constant 0.000000e+00 : f32
    %58 = vector.broadcast %cst_47 : f32 to vector<324x8xf32>
    %59 = arith.maximumf %57, %58 : vector<324x8xf32>
    %c0_48 = arith.constant 0 : index
    %c0_49 = arith.constant 0 : index
    %60 = vector.load %arg6[%c0_48, %c0_49] : memref<324x1xf32, #tpu.memory_space<vmem>>, vector<324x1xf32>
    %61 = vector.broadcast %60 : vector<324x1xf32> to vector<324x8xf32>
    %62 = arith.mulf %59, %61 : vector<324x8xf32>
    %cst_50 = arith.constant 0.000000e+00 : f32
    %63 = vector.broadcast %cst_50 : f32 to vector<388x8xf32>
    %c0_51 = arith.constant 0 : index
    %c0_52 = arith.constant 0 : index
    %64 = vector.load %arg11[%c0_51, %c0_52] : memref<388x8xf32, #tpu.memory_space<vmem>>, vector<388x8xf32>
    tpu.vector_store %arg11[%c0_51, %c0_52], %63 {strides = array<i32>} : memref<388x8xf32, #tpu.memory_space<vmem>>, vector<388x8xf32>,
    %c32_53 = arith.constant 32 : index
    %c0_54 = arith.constant 0 : index
    %65 = vector.load %arg11[%c32_53, %c0_54] : memref<388x8xf32, #tpu.memory_space<vmem>>, vector<324x8xf32>
    tpu.vector_store %arg11[%c32_53, %c0_54], %62 {strides = array<i32>} : memref<388x8xf32, #tpu.memory_space<vmem>>, vector<324x8xf32>,
    %cst_55 = arith.constant 0.000000e+00 : f32
    %66 = vector.broadcast %cst_55 : f32 to vector<324x16xf32>
    %c13_56 = arith.constant 13 : index
    %c0_57 = arith.constant 0 : index
    %67 = vector.load %arg11[%c13_56, %c0_57] : memref<388x8xf32, #tpu.memory_space<vmem>>, vector<324x8xf32>
    %68 = arith.truncf %67 : vector<324x8xf32> to vector<324x8xbf16>
    %c0_58 = arith.constant 0 : index
    %c0_59 = arith.constant 0 : index
    %c0_60 = arith.constant 0 : index
    %69 = vector.load %arg4[%c0_58, %c0_59, %c0_60] : memref<9x8x16xbf16, #tpu.memory_space<vmem>>, vector<1x8x16xbf16>
    %70 = vector.shape_cast %69 : vector<1x8x16xbf16> to vector<8x16xbf16>
    %cst_61 = arith.constant dense<0.000000e+00> : vector<324x16xf32>
    %71 = tpu.matmul %68, %70, %cst_61 {dimension_numbers = #tpu.dot_dimension_numbers<[1], [0], [0], [1], [0, 0, 1, 1], [], []>} : vector<324x8xbf16>, vector<8x16xbf16>, vector<324x16xf32> -> vector<324x16xf32>
    %72 = arith.addf %66, %71 : vector<324x16xf32>
    %c14_62 = arith.constant 14 : index
    %c0_63 = arith.constant 0 : index
    %73 = vector.load %arg11[%c14_62, %c0_63] : memref<388x8xf32, #tpu.memory_space<vmem>>, vector<324x8xf32>
    %74 = arith.truncf %73 : vector<324x8xf32> to vector<324x8xbf16>
    %c1_64 = arith.constant 1 : index
    %c0_65 = arith.constant 0 : index
    %c0_66 = arith.constant 0 : index
    %75 = vector.load %arg4[%c1_64, %c0_65, %c0_66] : memref<9x8x16xbf16, #tpu.memory_space<vmem>>, vector<1x8x16xbf16>
    %76 = vector.shape_cast %75 : vector<1x8x16xbf16> to vector<8x16xbf16>
    %cst_67 = arith.constant dense<0.000000e+00> : vector<324x16xf32>
    %77 = tpu.matmul %74, %76, %cst_67 {dimension_numbers = #tpu.dot_dimension_numbers<[1], [0], [0], [1], [0, 0, 1, 1], [], []>} : vector<324x8xbf16>, vector<8x16xbf16>, vector<324x16xf32> -> vector<324x16xf32>
    %78 = arith.addf %72, %77 : vector<324x16xf32>
    %c15_68 = arith.constant 15 : index
    %c0_69 = arith.constant 0 : index
    %79 = vector.load %arg11[%c15_68, %c0_69] : memref<388x8xf32, #tpu.memory_space<vmem>>, vector<324x8xf32>
    %80 = arith.truncf %79 : vector<324x8xf32> to vector<324x8xbf16>
    %c2_70 = arith.constant 2 : index
    %c0_71 = arith.constant 0 : index
    %c0_72 = arith.constant 0 : index
    %81 = vector.load %arg4[%c2_70, %c0_71, %c0_72] : memref<9x8x16xbf16, #tpu.memory_space<vmem>>, vector<1x8x16xbf16>
    %82 = vector.shape_cast %81 : vector<1x8x16xbf16> to vector<8x16xbf16>
    %cst_73 = arith.constant dense<0.000000e+00> : vector<324x16xf32>
    %83 = tpu.matmul %80, %82, %cst_73 {dimension_numbers = #tpu.dot_dimension_numbers<[1], [0], [0], [1], [0, 0, 1, 1], [], []>} : vector<324x8xbf16>, vector<8x16xbf16>, vector<324x16xf32> -> vector<324x16xf32>
    %84 = arith.addf %78, %83 : vector<324x16xf32>
    %c31_74 = arith.constant 31 : index
    %c0_75 = arith.constant 0 : index
    %85 = vector.load %arg11[%c31_74, %c0_75] : memref<388x8xf32, #tpu.memory_space<vmem>>, vector<324x8xf32>
    %86 = arith.truncf %85 : vector<324x8xf32> to vector<324x8xbf16>
    %c3_76 = arith.constant 3 : index
    %c0_77 = arith.constant 0 : index
    %c0_78 = arith.constant 0 : index
    %87 = vector.load %arg4[%c3_76, %c0_77, %c0_78] : memref<9x8x16xbf16, #tpu.memory_space<vmem>>, vector<1x8x16xbf16>
    %88 = vector.shape_cast %87 : vector<1x8x16xbf16> to vector<8x16xbf16>
    %cst_79 = arith.constant dense<0.000000e+00> : vector<324x16xf32>
    %89 = tpu.matmul %86, %88, %cst_79 {dimension_numbers = #tpu.dot_dimension_numbers<[1], [0], [0], [1], [0, 0, 1, 1], [], []>} : vector<324x8xbf16>, vector<8x16xbf16>, vector<324x16xf32> -> vector<324x16xf32>
    %90 = arith.addf %84, %89 : vector<324x16xf32>
    %c32_80 = arith.constant 32 : index
    %c0_81 = arith.constant 0 : index
    %91 = vector.load %arg11[%c32_80, %c0_81] : memref<388x8xf32, #tpu.memory_space<vmem>>, vector<324x8xf32>
    %92 = arith.truncf %91 : vector<324x8xf32> to vector<324x8xbf16>
    %c4_82 = arith.constant 4 : index
    %c0_83 = arith.constant 0 : index
    %c0_84 = arith.constant 0 : index
    %93 = vector.load %arg4[%c4_82, %c0_83, %c0_84] : memref<9x8x16xbf16, #tpu.memory_space<vmem>>, vector<1x8x16xbf16>
    %94 = vector.shape_cast %93 : vector<1x8x16xbf16> to vector<8x16xbf16>
    %cst_85 = arith.constant dense<0.000000e+00> : vector<324x16xf32>
    %95 = tpu.matmul %92, %94, %cst_85 {dimension_numbers = #tpu.dot_dimension_numbers<[1], [0], [0], [1], [0, 0, 1, 1], [], []>} : vector<324x8xbf16>, vector<8x16xbf16>, vector<324x16xf32> -> vector<324x16xf32>
    %96 = arith.addf %90, %95 : vector<324x16xf32>
    %c33_86 = arith.constant 33 : index
    %c0_87 = arith.constant 0 : index
    %97 = vector.load %arg11[%c33_86, %c0_87] : memref<388x8xf32, #tpu.memory_space<vmem>>, vector<324x8xf32>
    %98 = arith.truncf %97 : vector<324x8xf32> to vector<324x8xbf16>
    %c5_88 = arith.constant 5 : index
    %c0_89 = arith.constant 0 : index
    %c0_90 = arith.constant 0 : index
    %99 = vector.load %arg4[%c5_88, %c0_89, %c0_90] : memref<9x8x16xbf16, #tpu.memory_space<vmem>>, vector<1x8x16xbf16>
    %100 = vector.shape_cast %99 : vector<1x8x16xbf16> to vector<8x16xbf16>
    %cst_91 = arith.constant dense<0.000000e+00> : vector<324x16xf32>
    %101 = tpu.matmul %98, %100, %cst_91 {dimension_numbers = #tpu.dot_dimension_numbers<[1], [0], [0], [1], [0, 0, 1, 1], [], []>} : vector<324x8xbf16>, vector<8x16xbf16>, vector<324x16xf32> -> vector<324x16xf32>
    %102 = arith.addf %96, %101 : vector<324x16xf32>
    %c49_92 = arith.constant 49 : index
    %c0_93 = arith.constant 0 : index
    %103 = vector.load %arg11[%c49_92, %c0_93] : memref<388x8xf32, #tpu.memory_space<vmem>>, vector<324x8xf32>
    %104 = arith.truncf %103 : vector<324x8xf32> to vector<324x8xbf16>
    %c6_94 = arith.constant 6 : index
    %c0_95 = arith.constant 0 : index
    %c0_96 = arith.constant 0 : index
    %105 = vector.load %arg4[%c6_94, %c0_95, %c0_96] : memref<9x8x16xbf16, #tpu.memory_space<vmem>>, vector<1x8x16xbf16>
    %106 = vector.shape_cast %105 : vector<1x8x16xbf16> to vector<8x16xbf16>
    %cst_97 = arith.constant dense<0.000000e+00> : vector<324x16xf32>
    %107 = tpu.matmul %104, %106, %cst_97 {dimension_numbers = #tpu.dot_dimension_numbers<[1], [0], [0], [1], [0, 0, 1, 1], [], []>} : vector<324x8xbf16>, vector<8x16xbf16>, vector<324x16xf32> -> vector<324x16xf32>
    %108 = arith.addf %102, %107 : vector<324x16xf32>
    %c50_98 = arith.constant 50 : index
    %c0_99 = arith.constant 0 : index
    %109 = vector.load %arg11[%c50_98, %c0_99] : memref<388x8xf32, #tpu.memory_space<vmem>>, vector<324x8xf32>
    %110 = arith.truncf %109 : vector<324x8xf32> to vector<324x8xbf16>
    %c7_100 = arith.constant 7 : index
    %c0_101 = arith.constant 0 : index
    %c0_102 = arith.constant 0 : index
    %111 = vector.load %arg4[%c7_100, %c0_101, %c0_102] : memref<9x8x16xbf16, #tpu.memory_space<vmem>>, vector<1x8x16xbf16>
    %112 = vector.shape_cast %111 : vector<1x8x16xbf16> to vector<8x16xbf16>
    %cst_103 = arith.constant dense<0.000000e+00> : vector<324x16xf32>
    %113 = tpu.matmul %110, %112, %cst_103 {dimension_numbers = #tpu.dot_dimension_numbers<[1], [0], [0], [1], [0, 0, 1, 1], [], []>} : vector<324x8xbf16>, vector<8x16xbf16>, vector<324x16xf32> -> vector<324x16xf32>
    %114 = arith.addf %108, %113 : vector<324x16xf32>
    %c51_104 = arith.constant 51 : index
    %c0_105 = arith.constant 0 : index
    %115 = vector.load %arg11[%c51_104, %c0_105] : memref<388x8xf32, #tpu.memory_space<vmem>>, vector<324x8xf32>
    %116 = arith.truncf %115 : vector<324x8xf32> to vector<324x8xbf16>
    %c8_106 = arith.constant 8 : index
    %c0_107 = arith.constant 0 : index
    %c0_108 = arith.constant 0 : index
    %117 = vector.load %arg4[%c8_106, %c0_107, %c0_108] : memref<9x8x16xbf16, #tpu.memory_space<vmem>>, vector<1x8x16xbf16>
    %118 = vector.shape_cast %117 : vector<1x8x16xbf16> to vector<8x16xbf16>
    %cst_109 = arith.constant dense<0.000000e+00> : vector<324x16xf32>
    %119 = tpu.matmul %116, %118, %cst_109 {dimension_numbers = #tpu.dot_dimension_numbers<[1], [0], [0], [1], [0, 0, 1, 1], [], []>} : vector<324x8xbf16>, vector<8x16xbf16>, vector<324x16xf32> -> vector<324x16xf32>
    %120 = arith.addf %114, %119 : vector<324x16xf32>
    %c0_110 = arith.constant 0 : index
    %c0_111 = arith.constant 0 : index
    %121 = vector.load %arg5[%c0_110, %c0_111] : memref<1x16xf32, #tpu.memory_space<vmem>>, vector<1x16xf32>
    %122 = vector.broadcast %121 : vector<1x16xf32> to vector<324x16xf32>
    %123 = arith.addf %120, %122 : vector<324x16xf32>
    %cst_112 = arith.constant 0.000000e+00 : f32
    %124 = vector.broadcast %cst_112 : f32 to vector<324x16xf32>
    %125 = arith.maximumf %123, %124 : vector<324x16xf32>
    %c0_113 = arith.constant 0 : index
    %c0_114 = arith.constant 0 : index
    %126 = vector.load %arg7[%c0_113, %c0_114] : memref<1x324xf32, #tpu.memory_space<vmem>>, vector<1x324xf32>
    %cst_115 = arith.constant dense<0.000000e+00> : vector<1x16xf32>
    %127 = tpu.matmul %126, %125, %cst_115 {dimension_numbers = #tpu.dot_dimension_numbers<[1], [0], [0], [1], [0, 0, 1, 1], [], []>} : vector<1x324xf32>, vector<324x16xf32>, vector<1x16xf32> -> vector<1x16xf32>
    %c0_116 = arith.constant 0 : index
    %c0_117 = arith.constant 0 : index
    %128 = vector.load %arg8[%c0_116, %c0_117] : memref<16x128xf32, #tpu.memory_space<vmem>>, vector<16x128xf32>
    %cst_118 = arith.constant dense<0.000000e+00> : vector<1x128xf32>
    %129 = tpu.matmul %127, %128, %cst_118 {dimension_numbers = #tpu.dot_dimension_numbers<[1], [0], [0], [1], [0, 0, 1, 1], [], []>} : vector<1x16xf32>, vector<16x128xf32>, vector<1x128xf32> -> vector<1x128xf32>
    %c0_119 = arith.constant 0 : index
    %c0_120 = arith.constant 0 : index
    %130 = vector.load %arg9[%c0_119, %c0_120] : memref<1x128xf32, #tpu.memory_space<vmem>>, vector<1x128xf32>
    %131 = arith.addf %129, %130 : vector<1x128xf32>
    %c0_121 = arith.constant 0 : index
    %c0_122 = arith.constant 0 : index
    %c0_123 = arith.constant 0 : index
    %132 = vector.load %arg10[%c0_121, %c0_122, %c0_123] : memref<1x1x128xf32, #tpu.memory_space<vmem>>, vector<1x1x128xf32>
    %133 = vector.shape_cast %132 : vector<1x1x128xf32> to vector<1x128xf32>
    %134 = vector.shape_cast %131 : vector<1x128xf32> to vector<1x1x128xf32>
    tpu.vector_store %arg10[%c0_121, %c0_122, %c0_123], %134 {strides = array<i32>} : memref<1x1x128xf32, #tpu.memory_space<vmem>>, vector<1x1x128xf32>,
    return
  }
  func.func @transform_0(%arg0: i32) -> (i32, i32, i32) {
    %c0_i32 = arith.constant 0 : i32
    %c0_i32_0 = arith.constant 0 : i32
    %c0_i32_1 = arith.constant 0 : i32
    return %arg0, %c0_i32, %c0_i32_0 : i32, i32, i32
  }
  func.func @transform_1(%arg0: i32) -> (i32, i32, i32) {
    %c0_i32 = arith.constant 0 : i32
    %c0_i32_0 = arith.constant 0 : i32
    %c0_i32_1 = arith.constant 0 : i32
    %c0_i32_2 = arith.constant 0 : i32
    return %c0_i32, %c0_i32_0, %c0_i32_1 : i32, i32, i32
  }
  func.func @transform_2(%arg0: i32) -> (i32, i32) {
    %c0_i32 = arith.constant 0 : i32
    %c0_i32_0 = arith.constant 0 : i32
    %c0_i32_1 = arith.constant 0 : i32
    return %c0_i32, %c0_i32_0 : i32, i32
  }
  func.func @transform_3(%arg0: i32) -> (i32, i32, i32) {
    %c0_i32 = arith.constant 0 : i32
    %c0_i32_0 = arith.constant 0 : i32
    %c0_i32_1 = arith.constant 0 : i32
    %c0_i32_2 = arith.constant 0 : i32
    return %c0_i32, %c0_i32_0, %c0_i32_1 : i32, i32, i32
  }
  func.func @transform_4(%arg0: i32) -> (i32, i32) {
    %c0_i32 = arith.constant 0 : i32
    %c0_i32_0 = arith.constant 0 : i32
    %c0_i32_1 = arith.constant 0 : i32
    return %c0_i32, %c0_i32_0 : i32, i32
  }
  func.func @transform_5(%arg0: i32) -> (i32, i32) {
    %c0_i32 = arith.constant 0 : i32
    %c0_i32_0 = arith.constant 0 : i32
    %c0_i32_1 = arith.constant 0 : i32
    return %c0_i32, %c0_i32_0 : i32, i32
  }
  func.func @transform_6(%arg0: i32) -> (i32, i32) {
    %c0_i32 = arith.constant 0 : i32
    %c0_i32_0 = arith.constant 0 : i32
    %c0_i32_1 = arith.constant 0 : i32
    return %c0_i32, %c0_i32_0 : i32, i32
  }
  func.func @transform_7(%arg0: i32) -> (i32, i32) {
    %c0_i32 = arith.constant 0 : i32
    %c0_i32_0 = arith.constant 0 : i32
    %c0_i32_1 = arith.constant 0 : i32
    return %c0_i32, %c0_i32_0 : i32, i32
  }
  func.func @transform_8(%arg0: i32) -> (i32, i32) {
    %c0_i32 = arith.constant 0 : i32
    %c0_i32_0 = arith.constant 0 : i32
    %c0_i32_1 = arith.constant 0 : i32
    return %c0_i32, %c0_i32_0 : i32, i32
  }
  func.func @transform_9(%arg0: i32) -> (i32, i32, i32) {
    %c0_i32 = arith.constant 0 : i32
    %c0_i32_0 = arith.constant 0 : i32
    %c0_i32_1 = arith.constant 0 : i32
    return %arg0, %c0_i32, %c0_i32_0 : i32, i32, i32
  }
}

</mosaic_0001>

<bundles_post_ra>
// kernel: inference_model_forward.1
= control target key start
LH: loop header
LB: loop body
LE: loop exit
PB: predicated region body
PF: predicated region fallthrough
CT: control target
= control target key end

     0   :  { %14 = vsyncpa [#allocation4], 0  ;;  %s15219_s0 = inlined_call_operand.vmem [shape: bf16[2,388,4], index: 0, kind: input, shape index: {}]   ;;  %s15220_s1 = inlined_call_operand.vmem [shape: bf16[9,4,8], index: 1, kind: input, shape index: {}]   ;;  %s15221_s2 = inlined_call_operand.vmem [shape: f32[1,8], index: 2, kind: input, shape index: {}]   ;;  %s15222_s3 = inlined_call_operand.vmem [shape: bf16[9,8,16], index: 3, kind: input, shape index: {}]   ;;  %s15223_s4 = inlined_call_operand.vmem [shape: f32[1,16], index: 4, kind: input, shape index: {}]   ;;  %s15224_s5 = inlined_call_operand.vmem [shape: f32[324,1], index: 5, kind: input, shape index: {}]   ;;  %s15225_s6 = inlined_call_operand.vmem [shape: f32[1,324], index: 6, kind: input, shape index: {}]   ;;  %s15226_s7 = inlined_call_operand.vmem [shape: f32[16,128], index: 7, kind: input, shape index: {}]   ;;  %s15227_s8 = inlined_call_operand.vmem [shape: f32[1,128], index: 8, kind: input, shape index: {}]   ;;  %s15228_s9 = inlined_call_operand.hbm [shape: f32[2,1,128], index: 9, kind: output, shape index: {}]  }
   0x1   :  { %16 = vsyncpa [#allocation4 + $0x1], 0  ;;  %s11366_s30 = smov 0   ;;  %s11368_s10 = smov 0  }
   0x2   :  { %s11370_s11 = smov 0   ;;  %s11372_s12 = smov 0  }
   0x3 LB: > { %s11387_s13 = sadd.s32 4294967295, %s11310_s12   ;;  %s8596_s14 = sadd.s32 4294967294, %s11310_s12   ;;  %s11310_s12 = sphi %s11372_s12, %s15496_s12   ;;  %s11306_s11 = sphi %s11370_s11, %s15495_s11   ;;  %s11302_s10 = sphi %s11368_s10, %s15494_s10   ;;  %s11298_s30 = sphi %s11366_s30, %s15493_s30  }
   0x4   : > { %s11391_s15 = sadd.s32 1, %s11310_s12   ;;  %s223_s16 = sadd.s32 1, %s11306_s11 }
   0x5   : > { %s220_s17 = ssub.s32 %s11310_s12, %s11391_s15  ;;  %p233_p0 = scmp.ne.s32.totalorder %s11306_s11, %s11302_s10 }
   0x6   : > { %p221_p1 = scmp.eq.s32.totalorder %s220_s17, 0  ;;  %p234_p2 = scmp.eq.s32.totalorder %s11387_s13, 1 }
   0x7   : > { %p239_p3 = scmp.ne.s32.totalorder %s11302_s10, %s11298_s30  ;;  %p240_p4 = scmp.eq.s32.totalorder %s8596_s14, 1 }
   0x8   : > { %s11402_s18 = scalar_select %p221_p1, %s11306_s11, %s223_s16  }
   0x9   : > { %p11404_p5 = por %p234_p2, %p233_p0  ;;  %p11408_p6 = por %p240_p4, %p239_p3 }
   0xa   : > { %p8599_p7 = scmp.ge.s32.totalorder %s11310_s12, 1  ;;  %p290_p8 = scmp.lt.s32.totalorder %s11310_s12, 3 }
   0xc   : > { %p291_p9 = pnand %p8599_p7, %p290_p8 }
   0xe   : > { %294 = sbr.rel (%p291_p9) target bundleno = 2362 (0x93a), region = 56 }
  0x13   : > { %v8601_v0 = vld [vmem:[%s15220_s1 + $0x2] sm:$0x3]  ;;  %vm588_vm0 = vcmask 1041408   ;;  %p325_p10 = scmp.lt.s32.totalorder %s11387_s13, 1  ;;  %v15255_v1 = vmov 0.0   ;;  %vm11313_vm1 = vmmov 0  }
  0x14   : > { %9536 = vmatprep.subr.bf16.mxu0 %v15255_v1  ;;  %v590_v2 = vsel %vm588_vm0, %v8601_v0, 0  ;;  %9538 = vmatprep.mubr.msk.bf16.mxu0 %vm11313_vm1, %v15255_v1  ;;  %v373_v3 = vld [vmem:[%s15220_s1] sm:$0x3]  ;;  %vm482_vm2 = vcmask 1044480   ;;  %vm524_vm3 = vcmask 31744   ;;  %vm3718_vm7 = vcmask 1046528  }
  0x15   : > { %9537 = vmatpush3.bf16.msra.mxu0 %v590_v2  ;;  %s326_s25 = scalar_select %p325_p10, %s11387_s13, 1  ;;  %9622 = vmatprep.subr.bf16.mxu1 %v15255_v1  ;;  %v1048_v4 = vsel %vm588_vm0, %v373_v3, 0  ;;  %vm795_vm4 = vsmask.f32 5376  ;;  %v8666_v0 = vld [vmem:[%s15220_s1 + $0x4] sm:$0x3] }
  0x16   : > { %9623 = vmatpush3.bf16.msra.mxu1 %v1048_v4  ;;  %9624 = vmatprep.mubr.msk.bf16.mxu1 %vm11313_vm1, %v15255_v1  ;;  %vm1256_vm5 = vsmask.f32 4352  ;;  %vm2637_vm6 = vsmask.f32 7424  ;;  %vm4073_vm8 = vsmask.f32 6400 }
  0x17   : > { %s11112_s26 = smul.u32 196, %s326_s25  ;;  %9708 = vmatprep.subr.bf16.mxu0 %v15255_v1  ;;  %9794 = vmatprep.subr.bf16.mxu1 %v15255_v1  ;;  %vm5132_vm9 = vcmask 1043456   ;;  %vm4850_vm10 = vcmask 64512   ;;  %vm4899_vm11 = vcmask 60416   ;;  %vm8304_vm12 = vcmask 556032   ;;  %s323_s17 = sand.u32 1, %s11302_s10  }
  0x18   : > { %vm8453_vm13 = vcmask 130048   ;;  %s9089_s23 = sshll.u32 %s11387_s13, 4  ;;  %s324_s24 = scalar_lea.vmem [#allocation3], %s323_s17 }
  0x19   : > { %s11435_s29 = scalar_lea.vmem %s15219_s0, %s11112_s26  ;;  %s8541_s25 = sshll.u32 %s324_s24, 4  ;;  %s8542_s25 = int_to_ptr.vmem [resolvable:$true] %s8541_s25 }
  0x1a   : > { %v332_v5 = vld [vmem:[%s11435_s29 + $0x8] sm:$0xf]  ;;  %v374_v6 = vld [vmem:[%s11435_s29 + $0x4] sm:$0x8]  ;;  %v11440_v7 = vld [vmem:[%s11435_s29 + $0xc] sm:$0xff]   ;;  %s15184_s28 = scalar_lea.hbm %s15228_s9, %s9089_s23  ;;  %s8529_s14 = scalar_lea.sflag [#allocation4], %s323_s17 }
  0x1b   : > { %v331_v8 = vld [vmem:[%s11435_s29 + $0x4] sm:$0xc]  ;;  %v11443_v9 = vcombine.low %v374_v6, %v332_v5  ;;  %v484_v11 = vrot.slane %v11440_v7, 3  ;;  %v805_v12 = vshrl.u32 %v11440_v7, 16  ;;  %v808_v13 = vshll.u32 %v11440_v7, 16  ;;  %v11449_v14 = vld [vmem:[%s11435_s29 + $0x14] sm:$0xff]  }
  0x1c   : > { %v8644_v10 = vcombine.low %v331_v8, %v332_v5  ;;  %v814_v24 = vshrl.u32 %v11449_v14, 16  ;;  %v817_v25 = vshll.u32 %v11449_v14, 16  ;;  %v486_v27 = vrot.slane %v11449_v14, 3  ;;  %v11464_v28 = vld [vmem:[%s11435_s29 + $0x1c] sm:$0xff]   ;;  %v11487_v40 = vld [vmem:[%s11435_s29 + $0x24] sm:$0xff]   ;;  %v11505_v49 = vld [vmem:[%s11435_s29 + $0x2c] sm:$0xff]  }
  0x1d   : > { %v483_v15 = vrot.slane %v11443_v9, 3  ;;  %v807_v18 = vrot.slane %v805_v12, 2  ;;  %v810_v19 = vrot.slane %v808_v13, 3  ;;  %v823_v34 = vshrl.u32 %v11464_v28, 16  ;;  %v11515_v54 = vld [vmem:[%s11435_s29 + $0x34] sm:$0xff]   ;;  %v11532_v63 = vld [vmem:[%s11435_s29 + $0x3c] sm:$0xff]  }
  0x1e   : > { %v797_v16 = vshrl.u32 %v8644_v10, 16  ;;  %v800_v17 = vshll.u32 %v8644_v10, 16  ;;  %v816_v29 = vrot.slane %v814_v24, 2  ;;  %v819_v30 = vrot.slane %v817_v25, 3  ;;  %s11315_s16 = smov [#allocation3]  }
  0x1f   : > { %v485_v20 = vsel %vm482_vm2, %v483_v15, %v484_v11  ;;  %v811_v23 = vor.u32 %v810_v19, %v807_v18  ;;  %v487_v32 = vsel %vm482_vm2, %v484_v11, %v486_v27  ;;  %v826_v35 = vshll.u32 %v11464_v28, 16  ;;  %v11564_v19 = vld [vmem:[%s11435_s29 + $0x44] sm:$0xff]   ;;  %s11254_s13 = sshll.u32 %s11315_s16, 4  ;;  %s11255_s13 = int_to_ptr.vmem [resolvable:$false] %s11254_s13 }
  0x20   : > { %v799_v21 = vrot.slane %v797_v16, 2  ;;  %v802_v22 = vrot.slane %v800_v17, 3  ;;  %9539 = vmatmul.mubr.msk.bf16.vlgmr.msra.gmra.mxu0 %vm524_vm3, %v485_v20  ;;  %v820_v33 = vor.u32 %v819_v30, %v816_v29  ;;  %v488_v37 = vrot.slane %v11464_v28, 3  ;;  %s11256_s21 = scalar_lea.vmem %s11255_s13, 32  ;;  %p11257_p0 = scmp.lt.s32.totalorder %s8542_s25, %s11255_s13 }
  0x21   : > { %9542 = vmatprep.mubr.msk.bf16.mxu0 %vm11313_vm1, %v15255_v1  ;;  %v825_v38 = vrot.slane %v823_v34, 2  ;;  %v828_v39 = vrot.slane %v826_v35, 3  ;;  %v832_v43 = vshrl.u32 %v11487_v40, 16  ;;  %v835_v44 = vshll.u32 %v11487_v40, 16 }
  0x22   : > { %v803_v26 = vor.u32 %v802_v22, %v799_v21  ;;  %v821_v36 = vsel %vm795_vm4, %v811_v23, %v820_v33  ;;  %v489_v41 = vsel %vm482_vm2, %v486_v27, %v488_v37  ;;  %v490_v46 = vrot.slane %v11487_v40, 3 }
  0x23   : > { %v829_v42 = vor.u32 %v828_v39, %v825_v38  ;;  %v834_v47 = vrot.slane %v832_v43, 2  ;;  %v837_v48 = vrot.slane %v835_v44, 3  ;;  %v841_v52 = vshrl.u32 %v11505_v49, 16 }
  0x24   : > { %v812_v31 = vsel %vm795_vm4, %v803_v26, %v811_v23  ;;  %v491_v50 = vsel %vm482_vm2, %v488_v37, %v490_v46  ;;  %v844_v53 = vshll.u32 %v11505_v49, 16  ;;  %v492_v56 = vrot.slane %v11505_v49, 3  ;;  %v8689_v23 = vld [vmem:[%s15220_s1 + $0x6] sm:$0x3] }
  0x25   : > { %9625 = vmatmul.mubr.msk.bf16.vlgmr.msra.gmra.mxu1 %vm524_vm3, %v812_v31  ;;  %v830_v45 = vsel %vm795_vm4, %v820_v33, %v829_v42  ;;  %v838_v51 = vor.u32 %v837_v48, %v834_v47  ;;  %v843_v57 = vrot.slane %v841_v52, 2  ;;  %v850_v59 = vshrl.u32 %v11515_v54, 16  ;;  %v11581_v31 = vld [vmem:[%s11435_s29 + $0x10] sm:$0xf] }
  0x26   : > { %9628 = vmatprep.mubr.msk.bf16.mxu1 %vm11313_vm1, %v15255_v1  ;;  %v846_v58 = vrot.slane %v844_v53, 3  ;;  %v493_v60 = vsel %vm482_vm2, %v490_v46, %v492_v56  ;;  %v853_v62 = vshll.u32 %v11515_v54, 16  ;;  %v494_v2 = vrot.slane %v11515_v54, 3 }
  0x27   : > { %v839_v55 = vsel %vm795_vm4, %v829_v42, %v838_v51  ;;  %v852_v3 = vrot.slane %v850_v59, 2  ;;  %v859_v6 = vshrl.u32 %v11532_v63, 16  ;;  %v1414_v8 = vsel %vm588_vm0, %v8666_v0, 0  ;;  %v11602_v42 = vld [vmem:[%s11435_s29 + $0x4c] sm:$0xff]  }
  0x28   : > { %9543 = vmatmul.mubr.msk.bf16.gmra.mxu0 %vm524_vm3, %v487_v32  ;;  %v847_v61 = vor.u32 %v846_v58, %v843_v57  ;;  %v855_v5 = vrot.slane %v853_v62, 3  ;;  %v1265_v10 = vrot.slane %v805_v12, 3  ;;  %v1266_v11 = vrot.slane %v808_v13, 4  ;;  %v11584_v32 = vld [vmem:[%s11435_s29 + $0x14] sm:$0xf] }
  0x29   : > { %9546 = vmatprep.mubr.msk.bf16.mxu0 %vm11313_vm1, %v15255_v1  ;;  %9709 = vmatpush3.bf16.msra.mxu0 %v1414_v8  ;;  %v495_v15 = vsel %vm482_vm2, %v492_v56, %v494_v2  ;;  %v496_v16 = vrot.slane %v11532_v63, 3  ;;  %v15253_v17 = vshll.u32 %v11532_v63, 16  ;;  %v861_v12 = vrot.slane %v859_v6, 2  ;;  %v11651_v8 = vld [vmem:[%s11435_s29 + $0x20] sm:$0xf] }
  0x2a   : > { %v848_v4 = vsel %vm795_vm4, %v838_v51, %v847_v61  ;;  %9880 = vmatprep.subr.bf16.mxu0 %v15255_v1  ;;  %v856_v18 = vor.u32 %v855_v5, %v852_v3  ;;  %v1258_v7 = vshrl.u32 %v11443_v9, 16  ;;  %v1261_v13 = vshll.u32 %v11443_v9, 16  ;;  %v11619_v51 = vld [vmem:[%s11435_s29 + $0x1c] sm:$0xf]  ;;  %v11648_v5 = vld [vmem:[%s11435_s29 + $0x54] sm:$0xff]  }
  0x2b   : > { %v1267_v22 = vor.u32 %v1266_v11, %v1265_v10  ;;  %v864_v26 = vrot.slane %v15253_v17, 3  ;;  %v2058_v27 = vsel %vm588_vm0, %v8689_v23, 0  ;;  %v1269_v33 = vrot.slane %v814_v24, 3  ;;  %v11654_v10 = vld [vmem:[%s11435_s29 + $0x24] sm:$0xf] }
  0x2c   : > { %v1260_v20 = vrot.slane %v1258_v7, 3  ;;  %v1263_v21 = vrot.slane %v1261_v13, 4  ;;  %v857_v9 = vsel %vm795_vm4, %v847_v61, %v856_v18  ;;  %9795 = vmatpush3.bf16.msra.mxu1 %v2058_v27  ;;  %v497_v37 = vsel %vm482_vm2, %v494_v2, %v496_v16 }
  0x2d   : > { %9629 = vmatmul.mubr.msk.bf16.gmra.mxu1 %vm524_vm3, %v821_v36  ;;  %9966 = vmatprep.subr.bf16.mxu1 %v15255_v1  ;;  %v1270_v36 = vrot.slane %v817_v25, 4  ;;  %v11594_v38 = vcombine.low %v11581_v31, %v11584_v32  ;;  %v865_v39 = vor.u32 %v864_v26, %v861_v12  ;;  %v15249_v24 = vshll.u32 %v11564_v19, 16 }
  0x2e   : > { %9632 = vmatprep.mubr.msk.bf16.mxu1 %vm11313_vm1, %v15255_v1  ;;  %v1264_v29 = vor.u32 %v1263_v21, %v1260_v20  ;;  %v498_v25 = vrot.slane %v11564_v19, 3  ;;  %v1274_v56 = vrot.slane %v826_v35, 4  ;;  %v15245_v28 = vshll.u32 %v11602_v42, 16  ;;  %v11676_v20 = vld [vmem:[%s11435_s29 + $0x5c] sm:$0xff]  }
  0x2f   : > { %v1271_v14 = vor.u32 %v1270_v36, %v1269_v33  ;;  %v866_v46 = vsel %vm795_vm4, %v856_v18, %v865_v39  ;;  %v873_v48 = vrot.slane %v15249_v24, 3  ;;  %v500_v0 = vrot.slane %v11602_v42, 3  ;;  %v11693_v33 = vld [vmem:[%s11435_s29 + $0x28] sm:$0xf]  ;;  %v11696_v36 = vld [vmem:[%s11435_s29 + $0x2c] sm:$0xf] }
  0x30   : > { %9547 = vmatmul.mubr.msk.bf16.gmra.mxu0 %vm524_vm3, %v489_v41  ;;  %v11578_v30 = vsel %vm1256_vm5, %v1264_v29, %v1267_v22  ;;  %v15250_v41 = vshrl.u32 %v11564_v19, 16  ;;  %v499_v57 = vsel %vm482_vm2, %v496_v16, %v498_v25  ;;  %v1277_v11 = vrot.slane %v832_v43, 3 }
  0x31   : > { %9550 = vmatprep.mubr.msk.bf16.mxu0 %vm11313_vm1, %v15255_v1  ;;  %v501_v16 = vsel %vm482_vm2, %v498_v25, %v500_v0  ;;  %v11664_v18 = vcombine.low %v11651_v8, %v11654_v10  ;;  %v15242_v7 = vshrl.u32 %v11648_v5, 16  ;;  %v15239_v43 = vshll.u32 %v11648_v5, 16 }
  0x32   : > { %v870_v47 = vrot.slane %v15250_v41, 2  ;;  %v502_v13 = vrot.slane %v11648_v5, 3  ;;  %v1281_v26 = vrot.slane %v841_v52, 3  ;;  %v1282_v27 = vrot.slane %v844_v53, 4 }
  0x33   : > { %v891_v23 = vrot.slane %v15239_v43, 3  ;;  %v15236_v29 = vshrl.u32 %v11676_v20, 16  ;;  %v15233_v49 = vshll.u32 %v11676_v20, 16  ;;  %v11703_v53 = vcombine.low %v11693_v33, %v11696_v36 }
  0x35   : > { %9633 = vmatmul.mubr.msk.bf16.gmra.mxu1 %vm524_vm3, %v830_v45  ;;  %v11605_v45 = vsel %vm1256_vm5, %v1267_v22, %v1271_v14  ;;  %v888_v22 = vrot.slane %v15242_v7, 2 }
  0x36   : > { %9636 = vmatprep.mubr.msk.bf16.mxu1 %vm11313_vm1, %v15255_v1 }
  0x37   : > { %v892_v52 = vor.u32 %v891_v23, %v888_v22 }
  0x38   : > { %9551 = vmatmul.mubr.msk.bf16.gmra.mxu0 %vm524_vm3, %v491_v50  ;;  %v11616_v50 = vld [vmem:[%s11435_s29 + $0x18] sm:$0xf] }
  0x39   : > { %9554 = vmatprep.mubr.msk.bf16.mxu0 %vm11313_vm1, %v15255_v1  ;;  %v11629_v58 = vcombine.low %v11616_v50, %v11619_v51 }
  0x3d   : > { %9637 = vmatmul.mubr.msk.bf16.gmra.mxu1 %vm524_vm3, %v839_v55  ;;  %v1273_v55 = vrot.slane %v823_v34, 3  ;;  %v15246_v34 = vshrl.u32 %v11602_v42, 16 }
  0x3e   : > { %9640 = vmatprep.mubr.msk.bf16.mxu1 %vm11313_vm1, %v15255_v1 }
  0x3f   : > { %v1275_v35 = vor.u32 %v1274_v56, %v1273_v55  ;;  %v879_v3 = vrot.slane %v15246_v34, 2  ;;  %v11726_v56 = vld [vmem:[%s11435_s29 + $0x30] sm:$0xf]  ;;  %v11896_v34 = vld [vmem:[%s11435_s29 + $0xa4] sm:$0xf] }
  0x40   : > { %9555 = vmatmul.mubr.msk.bf16.gmra.mxu0 %vm524_vm3, %v493_v60  ;;  %v874_v60 = vor.u32 %v873_v48, %v870_v47  ;;  %v900_v47 = vrot.slane %v15233_v49, 3  ;;  %v11721_v48 = vld [vmem:[%s11435_s29 + $0x64] sm:$0xff]  }
  0x41   : > { %9558 = vmatprep.mubr.msk.bf16.mxu0 %vm11313_vm1, %v15255_v1  ;;  %v11636_v61 = vsel %vm1256_vm5, %v1271_v14, %v1275_v35  ;;  %v504_v14 = vrot.slane %v11676_v20, 3 }
  0x42   : > { %v875_v2 = vsel %vm795_vm4, %v865_v39, %v874_v60 }
  0x43   : > { %v505_v55 = vsel %vm482_vm2, %v502_v13, %v504_v14 }
  0x45   : > { %9641 = vmatmul.mubr.msk.bf16.gmra.mxu1 %vm524_vm3, %v848_v4  ;;  %v882_v4 = vrot.slane %v15245_v28, 3 }
  0x46   : > { %9644 = vmatprep.mubr.msk.bf16.mxu1 %vm11313_vm1, %v15255_v1 }
  0x47   : > { %v883_v12 = vor.u32 %v882_v4, %v879_v3  ;;  %v506_v3 = vrot.slane %v11721_v48, 3 }
  0x48   : > { %9559 = vmatmul.mubr.msk.bf16.gmra.mxu0 %vm524_vm3, %v495_v15  ;;  %v1278_v15 = vrot.slane %v835_v44, 4 }
  0x49   : > { %9562 = vmatprep.mubr.msk.bf16.mxu0 %vm11313_vm1, %v15255_v1  ;;  %v884_v21 = vsel %vm795_vm4, %v874_v60, %v883_v12  ;;  %v893_v25 = vsel %vm795_vm4, %v883_v12, %v892_v52  ;;  %v507_v12 = vsel %vm482_vm2, %v504_v14, %v506_v3 }
  0x4a   : > { %v1279_v40 = vor.u32 %v1278_v15, %v1277_v11 }
  0x4c   : > { %v11671_v44 = vsel %vm1256_vm5, %v1275_v35, %v1279_v40  ;;  %v15232_v35 = vshrl.u32 %v11721_v48, 16 }
  0x4d   : > { %9645 = vmatmul.mubr.msk.bf16.gmra.mxu1 %vm524_vm3, %v857_v9  ;;  %v503_v9 = vsel %vm482_vm2, %v500_v0, %v502_v13  ;;  %v15231_v0 = vshll.u32 %v11721_v48, 16  ;;  %v11757_v13 = vld [vmem:[%s11435_s29 + $0x3c] sm:$0xf] }
  0x4e   : > { %9648 = vmatprep.mubr.msk.bf16.mxu1 %vm11313_vm1, %v15255_v1  ;;  %v906_v11 = vrot.slane %v15232_v35, 2 }
  0x4f   : > { %v909_v15 = vrot.slane %v15231_v0, 3  ;;  %v11815_v0 = vld [vmem:[%s11435_s29 + $0x7c] sm:$0xff]  }
  0x50   : > { %9563 = vmatmul.mubr.msk.bf16.gmra.mxu0 %vm524_vm3, %v497_v37  ;;  %v11705_v37 = vor.u32 %v1282_v27, %v1281_v26  ;;  %v11768_v27 = vld [vmem:[%s11435_s29 + $0x74] sm:$0xff]   ;;  %v15237_v35 = vshrl.u32 %v11815_v0, 16  ;;  %v15238_v49 = vshll.u32 %v11815_v0, 16 }
  0x51   : > { %9566 = vmatprep.mubr.msk.bf16.mxu0 %vm11313_vm1, %v15255_v1 }
  0x52   : > { %v11709_v39 = vsel %vm1256_vm5, %v1279_v40, %v11705_v37  ;;  %v11754_v40 = vld [vmem:[%s11435_s29 + $0x38] sm:$0xf] }
  0x53   : > { %v11765_v26 = vcombine.low %v11754_v40, %v11757_v13 }
  0x55   : > { %9649 = vmatmul.mubr.msk.bf16.gmra.mxu1 %vm524_vm3, %v866_v46  ;;  %v897_v46 = vrot.slane %v15236_v29, 2 }
  0x56   : > { %9652 = vmatprep.mubr.msk.bf16.mxu1 %vm11313_vm1, %v15255_v1 }
  0x57   : > { %v901_v60 = vor.u32 %v900_v47, %v897_v46  ;;  %v15234_v46 = vshrl.u32 %v11768_v27, 16  ;;  %v11781_v47 = vld [vmem:[%s11435_s29 + $0x40] sm:$0xf] }
  0x58   : > { %9567 = vmatmul.mubr.msk.bf16.gmra.mxu0 %vm524_vm3, %v499_v57  ;;  %v11729_v57 = vld [vmem:[%s11435_s29 + $0x34] sm:$0xf] }
  0x59   : > { %9570 = vmatprep.mubr.msk.bf16.mxu0 %vm11313_vm1, %v15255_v1  ;;  %v902_v4 = vsel %vm795_vm4, %v892_v52, %v901_v60 }
  0x5d   : > { %9653 = vmatmul.mubr.msk.bf16.gmra.mxu1 %vm524_vm3, %v875_v2  ;;  %v11737_v2 = vcombine.low %v11726_v56, %v11729_v57 }
  0x5e   : > { %9656 = vmatprep.mubr.msk.bf16.mxu1 %vm11313_vm1, %v15255_v1 }
  0x60   : > { %9571 = vmatmul.mubr.msk.bf16.gmra.mxu0 %vm524_vm3, %v501_v16  ;;  %v11749_v16 = vld [vmem:[%s11435_s29 + $0x6c] sm:$0xff]  }
  0x61   : > { %9574 = vmatprep.mubr.msk.bf16.mxu0 %vm11313_vm1, %v15255_v1  ;;  %v15230_v22 = vshrl.u32 %v11749_v16, 16  ;;  %v15229_v23 = vshll.u32 %v11749_v16, 16 }
  0x63   : > { %v915_v14 = vrot.slane %v15230_v22, 2  ;;  %v510_v22 = vrot.slane %v11768_v27, 3 }
  0x65   : > { %9657 = vmatmul.mubr.msk.bf16.gmra.mxu1 %vm524_vm3, %v884_v21  ;;  %v910_v21 = vor.u32 %v909_v15, %v906_v11  ;;  %v11792_v11 = vld [vmem:[%s11435_s29 + $0x4c] sm:$0xf] }
  0x66   : > { %9660 = vmatprep.mubr.msk.bf16.mxu1 %vm11313_vm1, %v15255_v1 }
  0x67   : > { %v911_v52 = vsel %vm795_vm4, %v901_v60, %v910_v21  ;;  %v11789_v60 = vld [vmem:[%s11435_s29 + $0x48] sm:$0xf] }
  0x68   : > { %9575 = vmatmul.mubr.msk.bf16.gmra.mxu0 %vm524_vm3, %v503_v9  ;;  %v508_v9 = vrot.slane %v11749_v16, 3 }
  0x69   : > { %9578 = vmatprep.mubr.msk.bf16.mxu0 %vm11313_vm1, %v15255_v1 }
  0x6d   : > { %9661 = vmatmul.mubr.msk.bf16.gmra.mxu1 %vm524_vm3, %v893_v25  ;;  %v918_v25 = vrot.slane %v15229_v23, 3 }
  0x6e   : > { %9664 = vmatprep.mubr.msk.bf16.mxu1 %vm11313_vm1, %v15255_v1 }
  0x6f   : > { %v919_v15 = vor.u32 %v918_v25, %v915_v14  ;;  %v924_v14 = vrot.slane %v15234_v46, 2 }
  0x70   : > { %9579 = vmatmul.mubr.msk.bf16.gmra.mxu0 %vm524_vm3, %v505_v55  ;;  %v509_v55 = vsel %vm482_vm2, %v506_v3, %v508_v9 }
  0x71   : > { %9582 = vmatprep.mubr.msk.bf16.mxu0 %vm11313_vm1, %v15255_v1  ;;  %v920_v3 = vsel %vm795_vm4, %v910_v21, %v919_v15 }
  0x75   : > { %9665 = vmatmul.mubr.msk.bf16.gmra.mxu1 %vm524_vm3, %v902_v4  ;;  %v11786_v4 = vld [vmem:[%s11435_s29 + $0x44] sm:$0xf] }
  0x76   : > { %9668 = vmatprep.mubr.msk.bf16.mxu1 %vm11313_vm1, %v15255_v1  ;;  %v11799_v23 = vcombine.low %v11781_v47, %v11786_v4  ;;  %v8697_v54 = vcombine.low %v11786_v4, %v11789_v60 }
  0x78   : > { %9583 = vmatmul.mubr.msk.bf16.gmra.mxu0 %vm524_vm3, %v507_v12  ;;  %v15235_v12 = vshll.u32 %v11768_v27, 16  ;;  %v1872_v4 = vshll.u32 %v8697_v54, 16 }
  0x79   : > { %9586 = vmatprep.mubr.msk.bf16.mxu0 %vm11313_vm1, %v15255_v1 }
  0x7a   : > { %v927_v25 = vrot.slane %v15235_v12, 3  ;;  %v512_v12 = vrot.slane %v11815_v0, 3 }
  0x7c   : > { %v928_v21 = vor.u32 %v927_v25, %v924_v14  ;;  %v11833_v14 = vld [vmem:[%s11435_s29 + $0x84] sm:$0xff]   ;;  %v513_v25 = vsel %vm482_vm2, %v510_v22, %v512_v12 }
  0x7d   : > { %9669 = vmatmul.mubr.msk.bf16.gmra.mxu1 %vm524_vm3, %v911_v52  ;;  %v11803_v52 = vcombine.low %v11789_v60, %v11792_v11  ;;  %v15241_v29 = vshll.u32 %v11833_v14, 16 }
  0x7e   : > { %9672 = vmatprep.mubr.msk.bf16.mxu1 %vm11313_vm1, %v15255_v1  ;;  %v929_v46 = vsel %vm795_vm4, %v919_v15, %v928_v21 }
  0x80   : > { %9587 = vmatmul.mubr.msk.bf16.gmra.mxu0 %vm524_vm3, %v509_v55  ;;  %v511_v55 = vsel %vm482_vm2, %v508_v9, %v510_v22  ;;  %v933_v9 = vrot.slane %v15237_v35, 2 }
  0x81   : > { %9590 = vmatprep.mubr.msk.bf16.mxu0 %vm11313_vm1, %v15255_v1 }
  0x85   : > { %9673 = vmatmul.mubr.msk.bf16.gmra.mxu1 %vm524_vm3, %v920_v3  ;;  %v936_v3 = vrot.slane %v15238_v49, 3  ;;  %v514_v49 = vrot.slane %v11833_v14, 3 }
  0x86   : > { %9676 = vmatprep.mubr.msk.bf16.mxu1 %vm11313_vm1, %v15255_v1 }
  0x87   : > { %v937_v15 = vor.u32 %v936_v3, %v933_v9  ;;  %v11851_v9 = vld [vmem:[%s11435_s29 + $0x8c] sm:$0xff]   ;;  %v515_v3 = vsel %vm482_vm2, %v512_v12, %v514_v49 }
  0x88   : > { %9591 = vmatmul.mubr.msk.bf16.gmra.mxu0 %vm524_vm3, %v511_v55  ;;  %v15240_v55 = vshrl.u32 %v11833_v14, 16  ;;  %v15243_v43 = vshll.u32 %v11851_v9, 16 }
  0x89   : > { %9594 = vmatprep.mubr.msk.bf16.mxu0 %vm11313_vm1, %v15255_v1  ;;  %v938_v35 = vsel %vm795_vm4, %v928_v21, %v937_v15 }
  0x8a   : > { %v942_v22 = vrot.slane %v15240_v55, 2  ;;  %v954_v12 = vrot.slane %v15243_v43, 3 }
  0x8d   : > { %9677 = vmatmul.mubr.msk.bf16.gmra.mxu1 %vm524_vm3, %v929_v46  ;;  %v945_v46 = vrot.slane %v15241_v29, 3  ;;  %v516_v29 = vrot.slane %v11851_v9, 3 }
  0x8e   : > { %9680 = vmatprep.mubr.msk.bf16.mxu1 %vm11313_vm1, %v15255_v1 }
  0x8f   : > { %v946_v21 = vor.u32 %v945_v46, %v942_v22  ;;  %v11869_v22 = vld [vmem:[%s11435_s29 + $0x94] sm:$0xff]   ;;  %v517_v46 = vsel %vm482_vm2, %v514_v49, %v516_v29 }
  0x90   : > { %9595 = vmatmul.mubr.msk.bf16.gmra.mxu0 %vm524_vm3, %v513_v25  ;;  %v15244_v25 = vshrl.u32 %v11851_v9, 16  ;;  %v15248_v7 = vshll.u32 %v11869_v22, 16 }
  0x91   : > { %9598 = vmatprep.mubr.msk.bf16.mxu0 %vm11313_vm1, %v15255_v1  ;;  %v947_v55 = vsel %vm795_vm4, %v937_v15, %v946_v21 }
  0x95   : > { %9681 = vmatmul.mubr.msk.bf16.gmra.mxu1 %vm524_vm3, %v938_v35  ;;  %v951_v35 = vrot.slane %v15244_v25, 2 }
  0x96   : > { %9684 = vmatprep.mubr.msk.bf16.mxu1 %vm11313_vm1, %v15255_v1 }
  0x97   : > { %v955_v15 = vor.u32 %v954_v12, %v951_v35  ;;  %v963_v35 = vrot.slane %v15248_v7, 3  ;;  %v11887_v12 = vld [vmem:[%s11435_s29 + $0x9c] sm:$0xff]  }
  0x98   : > { %9599 = vmatmul.mubr.msk.bf16.gmra.mxu0 %vm524_vm3, %v515_v3  ;;  %v15247_v3 = vshrl.u32 %v11869_v22, 16  ;;  %v15252_v28 = vshll.u32 %v11887_v12, 16  ;;  %v520_v7 = vrot.slane %v11887_v12, 3 }
  0x99   : > { %9602 = vmatprep.mubr.msk.bf16.mxu0 %vm11313_vm1, %v15255_v1  ;;  %v956_v43 = vsel %vm795_vm4, %v946_v21, %v955_v15 }
  0x9a   : > { %v960_v49 = vrot.slane %v15247_v3, 2  ;;  %v372_v3 = vld [vmem:[%s11435_s29 + $0xa8] sm:$0x1] }
  0x9c   : > { %v964_v21 = vor.u32 %v963_v35, %v960_v49  ;;  %v8622_v49 = vcombine.low %v11896_v34, %v372_v3 }
  0x9d   : > { %9685 = vmatmul.mubr.msk.bf16.gmra.mxu1 %vm524_vm3, %v947_v55  ;;  %v518_v55 = vrot.slane %v11869_v22, 3 }
  0x9e   : > { %9688 = vmatprep.mubr.msk.bf16.mxu1 %vm11313_vm1, %v15255_v1  ;;  %v965_v24 = vsel %vm795_vm4, %v955_v15, %v964_v21  ;;  %v976_v35 = vshrl.u32 %v8622_v49, 16  ;;  %v979_v41 = vshll.u32 %v8622_v49, 16 }
  0x9f   : > { %v519_v25 = vsel %vm482_vm2, %v516_v29, %v518_v55  ;;  %v972_v29 = vrot.slane %v15252_v28, 3  ;;  %v522_v28 = vrot.slane %v8622_v49, 3 }
  0xa0   : > { %9603 = vmatmul.mubr.msk.bf16.gmra.mxu0 %vm524_vm3, %v517_v46  ;;  %v15251_v46 = vshrl.u32 %v11887_v12, 16  ;;  %v978_v3 = vrot.slane %v976_v35, 2  ;;  %v981_v17 = vrot.slane %v979_v41, 3  ;;  %v8691_v41 = vcombine.low %v11584_v32, %v11616_v50 }
  0xa1   : > { %9606 = vmatprep.mubr.msk.bf16.mxu0 %vm11313_vm1, %v15255_v1  ;;  %v8692_v32 = vcombine.low %v11619_v51, %v11651_v8  ;;  %v8693_v51 = vcombine.low %v11654_v10, %v11693_v33  ;;  %v8694_v10 = vcombine.low %v11696_v36, %v11726_v56  ;;  %v8695_v36 = vcombine.low %v11729_v57, %v11754_v40 }
  0xa2   : > { %v1818_v49 = vshll.u32 %v8691_v41, 16 }
  0xa4   : > { %v1820_v35 = vrot.slane %v1818_v49, 4  ;;  %v1845_v49 = vshll.u32 %v8694_v10, 16 }
  0xa5   : > { %9689 = vmatmul.mubr.msk.bf16.gmra.mxu1 %vm524_vm3, %v956_v43  ;;  %v969_v43 = vrot.slane %v15251_v46, 2 }
  0xa6   : > { %9692 = vmatprep.mubr.msk.bf16.mxu1 %vm11313_vm1, %v15255_v1 }
  0xa7   : > { %v973_v15 = vor.u32 %v972_v29, %v969_v43  ;;  %v1657_v43 = vld [vmem:[%s11435_s29 + $0xc] sm:$0x8] }
  0xa8   : > { %9607 = vmatmul.mubr.msk.bf16.gmra.mxu0 %vm524_vm3, %v519_v25  ;;  %v521_v25 = vsel %vm482_vm2, %v518_v55, %v520_v7  ;;  %v982_v55 = vor.u32 %v981_v17, %v978_v3  ;;  %v8690_v29 = vcombine.low %v1657_v43, %v11581_v31  ;;  %v1827_v43 = vshll.u32 %v8692_v32, 16 }
  0xa9   : > { %9610 = vmatprep.mubr.msk.bf16.mxu0 %vm11313_vm1, %v15255_v1  ;;  %v974_v46 = vsel %vm795_vm4, %v964_v21, %v973_v15 }
  0xaa   : > { %v983_v21 = vsel %vm795_vm4, %v973_v15, %v982_v55  ;;  %v1810_v17 = vshll.u32 %v8690_v29, 16 }
  0xad   : > { %9693 = vmatmul.mubr.msk.bf16.gmra.mxu1 %vm524_vm3, %v965_v24  ;;  %v523_v24 = vsel %vm482_vm2, %v520_v7, %v522_v28  ;;  %v1807_v7 = vshrl.u32 %v8690_v29, 16 }
  0xae   : > { %9696 = vmatprep.mubr.msk.bf16.mxu1 %vm11313_vm1, %v15255_v1 }
  0xaf   : > { %v1809_v31 = vrot.slane %v1807_v7, 3 }
  0xb0   : > { %9611 = vmatmul.mubr.msk.bf16.gmra.mxu0 %vm524_vm3, %v521_v25  ;;  %v1812_v25 = vrot.slane %v1810_v17, 4 }
  0xb1   : > { %9614 = vmatprep.mubr.msk.bf16.mxu0 %vm11313_vm1, %v15255_v1 }
  0xb2   : > { %v1813_v50 = vor.u32 %v1812_v25, %v1809_v31  ;;  %v1847_v25 = vrot.slane %v1845_v49, 4 }
  0xb5   : > { %9697 = vmatmul.mubr.msk.bf16.gmra.mxu1 %vm524_vm3, %v974_v46  ;;  %v1815_v46 = vshrl.u32 %v8691_v41, 16  ;;  %v1836_v41 = vshll.u32 %v8693_v51, 16 }
  0xb6   : > { %9700 = vmatprep.mubr.msk.bf16.mxu1 %vm11313_vm1, %v15255_v1 }
  0xb7   : > { %v1817_v15 = vrot.slane %v1815_v46, 3  ;;  %v1838_v17 = vrot.slane %v1836_v41, 4  ;;  %v1842_v46 = vshrl.u32 %v8694_v10, 16 }
  0xb8   : > { %9615 = vmatmul.mubr.msk.bf16.gmra.mxu0 %vm524_vm3, %v523_v24  ;;  %v1824_v24 = vshrl.u32 %v8692_v32, 16  ;;  %v8696_v32 = vcombine.low %v11757_v13, %v11781_v47 }
  0xb9   : > { %9618 = vmatprep.mubr.msk.bf16.mxu0 %vm11313_vm1, %v15255_v1  ;;  %v1821_v3 = vor.u32 %v1820_v35, %v1817_v15  ;;  %v1844_v31 = vrot.slane %v1842_v46, 3  ;;  %v1851_v15 = vshrl.u32 %v8695_v36, 16  ;;  %v1854_v35 = vshll.u32 %v8695_v36, 16 }
  0xba   : > { %v1826_v29 = vrot.slane %v1824_v24, 3  ;;  %v1869_v36 = vshrl.u32 %v8697_v54, 16 }
  0xbb   : > { %v1848_v56 = vor.u32 %v1847_v25, %v1844_v31  ;;  %v1853_v40 = vrot.slane %v1851_v15, 3  ;;  %v1856_v24 = vrot.slane %v1854_v35, 4  ;;  %v15309_v15 = vshll.u32 %v11532_v63, 16 }
  0xbc   : > { %v1871_v63 = vrot.slane %v1869_v36, 3 }
  0xbd   : > { %9701 = vmatmul.mubr.msk.bf16.gmra.mxu1 %vm524_vm3, %v983_v21  ;;  %v1829_v21 = vrot.slane %v1827_v43, 4  ;;  %v1290_v35 = vrot.slane %v15309_v15, 4 }
  0xbe   : > { %9704 = vmatprep.mubr.msk.bf16.mxu1 %vm11313_vm1, %v15255_v1 }
  0xbf   : > { %v1830_v8 = vor.u32 %v1829_v21, %v1826_v29  ;;  %v1863_v29 = vshll.u32 %v8696_v32, 16  ;;  %v1286_v21 = vrot.slane %v853_v62, 4 }
  0xc0   : > { %9619 = vmatmul.mubr.msk.bf16.gmra.mxu0 %vm524_vm3, %v522_v28  ;;  %v1822_v28 = vsel %vm1256_vm5, %v1813_v50, %v1821_v3 }
  0xc1   : > { %9710 = vmatprep.mubr.msk.bf16.mxu0 %vm11313_vm1, %v15255_v1 }
  0xc5   : > { %9705 = vmatmul.mubr.msk.bf16.gmra.mxu1 %vm524_vm3, %v982_v55  ;;  %v1833_v55 = vshrl.u32 %v8693_v51, 16 }
  0xc6   : > { %9796 = vmatprep.mubr.msk.bf16.mxu1 %vm11313_vm1, %v15255_v1 }
  0xc7   : > { %v1835_v7 = vrot.slane %v1833_v55, 3 }
  0xc8   : > { %9711 = vmatmul.mubr.msk.bf16.vlgmr.msra.gmra.mxu0 %vm524_vm3, %v11578_v30  ;;  %v1831_v30 = vsel %vm1256_vm5, %v1821_v3, %v1830_v8 }
  0xc9   : > { %9714 = vmatprep.mubr.msk.bf16.mxu0 %vm11313_vm1, %v15255_v1  ;;  %v1839_v33 = vor.u32 %v1838_v17, %v1835_v7  ;;  %v1865_v7 = vrot.slane %v1863_v29, 4  ;;  %v1874_v29 = vrot.slane %v1872_v4, 4  ;;  %v12041_v4 = vld [vmem:[%s11435_s29 + $0x54] sm:$0xf] }
  0xcb   : > { %v1849_v57 = vsel %vm1256_vm5, %v1839_v33, %v1848_v56 }
  0xcd   : > { %9797 = vmatmul.mubr.msk.bf16.vlgmr.msra.gmra.mxu1 %vm524_vm3, %v1822_v28  ;;  %v1860_v28 = vshrl.u32 %v8696_v32, 16  ;;  %v2640_v32 = vshll.u32 %v11594_v38, 16 }
  0xce   : > { %9800 = vmatprep.mubr.msk.bf16.mxu1 %vm11313_vm1, %v15255_v1 }
  0xd0   : > { %9715 = vmatmul.mubr.msk.bf16.gmra.mxu0 %vm524_vm3, %v11605_v45  ;;  %v1840_v45 = vsel %vm1256_vm5, %v1830_v8, %v1839_v33  ;;  %v1857_v8 = vor.u32 %v1856_v24, %v1853_v40  ;;  %v2638_v40 = vshrl.u32 %v11594_v38, 16  ;;  %v2642_v24 = vrot.slane %v2640_v32, 1 }
  0xd1   : > { %9718 = vmatprep.mubr.msk.bf16.mxu0 %vm11313_vm1, %v15255_v1  ;;  %v2651_v32 = vshll.u32 %v11664_v18, 16 }
  0xd2   : > { %v1858_v62 = vsel %vm1256_vm5, %v1848_v56, %v1857_v8  ;;  %v1289_v56 = vrot.slane %v859_v6, 3 }
  0xd5   : > { %9801 = vmatmul.mubr.msk.bf16.gmra.mxu1 %vm524_vm3, %v1831_v30  ;;  %v1862_v30 = vrot.slane %v1860_v28, 3 }
  0xd6   : > { %9804 = vmatprep.mubr.msk.bf16.mxu1 %vm11313_vm1, %v15255_v1 }
  0xd8   : > { %9719 = vmatmul.mubr.msk.bf16.gmra.mxu0 %vm524_vm3, %v11636_v61  ;;  %v8732_v61 = vld [vmem:[%s15220_s1 + $0x8] sm:$0x3] }
  0xd9   : > { %9722 = vmatprep.mubr.msk.bf16.mxu0 %vm11313_vm1, %v15255_v1  ;;  %v2388_v50 = vsel %vm588_vm0, %v8732_v61, 0  ;;  %v1674_v61 = vld [vmem:[%s11435_s29 + $0x50] sm:$0xf] }
  0xda   : > { %9881 = vmatpush3.bf16.msra.mxu0 %v2388_v50 }
  0xdb   : > { %10052 = vmatprep.subr.bf16.mxu0 %v15255_v1 }
  0xdd   : > { %9805 = vmatmul.mubr.msk.bf16.gmra.mxu1 %vm524_vm3, %v1840_v45  ;;  %v1866_v45 = vor.u32 %v1865_v7, %v1862_v30 }
  0xde   : > { %9808 = vmatprep.mubr.msk.bf16.mxu1 %vm11313_vm1, %v15255_v1 }
  0xe0   : > { %v626_v3 = vpop.f32.mrf.mxu0  ;;  %9723 = vmatmul.mubr.msk.bf16.gmra.mxu0 %vm524_vm3, %v11671_v44  ;;  %v1285_v44 = vrot.slane %v850_v59, 3 }
  0xe1   : > { %9726 = vmatprep.mubr.msk.bf16.mxu0 %vm11313_vm1, %v15255_v1 }
  0xe2   : > { %v9540_v43 = vpop.f32.mrf.mxu0  ;;  %v1287_v33 = vor.u32 %v1286_v21, %v1285_v44  ;;  %v1291_v21 = vor.u32 %v1290_v35, %v1289_v56  ;;  %v1676_v56 = vld [vmem:[%s11435_s29 + $0x58] sm:$0xf] }
  0xe3   : > { %v2644_v43 = vshll.u32 %v11629_v58, 16 }
  0xe4   : > { %v629_v13 = vpop.f32.mrf.mxu0 }
  0xe5   : > { %v1084_v47 = vpop.f32.mrf.mxu1  ;;  %9809 = vmatmul.mubr.msk.bf16.gmra.mxu1 %vm524_vm3, %v1849_v57  ;;  %v8775_v57 = vld [vmem:[%s15220_s1 + $0xa] sm:$0x3] }
  0xe6   : > { %v11987_v51 = vadd.f32 %v1084_v47, %v626_v3  ;;  %9812 = vmatprep.mubr.msk.bf16.mxu1 %vm11313_vm1, %v15255_v1  ;;  %v9541_v55 = vpop.f32.mrf.mxu0  ;;  %v2849_v47 = vsel %vm588_vm0, %v8775_v57, 0 }
  0xe7   : > { %v9626_v41 = vpop.f32.mrf.mxu1  ;;  %9967 = vmatpush3.bf16.msra.mxu1 %v2849_v47  ;;  %v2646_v55 = vrot.slane %v2644_v43, 1 }
  0xe8   : > { %v634_v17 = vpop.f32.mrf.mxu0  ;;  %9727 = vmatmul.mubr.msk.bf16.gmra.mxu0 %vm524_vm3, %v11709_v39  ;;  %v1288_v39 = vsel %vm1256_vm5, %v11705_v37, %v1287_v33  ;;  %v1867_v37 = vsel %vm1256_vm5, %v1857_v8, %v1866_v45  ;;  %v2643_v8 = vor.u32 %v2642_v24, %v2638_v40  ;;  %10138 = vmatprep.subr.bf16.mxu1 %v15255_v1 }
  0xe9   : > { %v1087_v10 = vpop.f32.mrf.mxu1  ;;  %9730 = vmatprep.mubr.msk.bf16.mxu0 %vm11313_vm1, %v15255_v1 }
  0xea   : > { %v11995_v59 = vadd.f32 %v1087_v10, %v629_v13  ;;  %v9544_v46 = vpop.f32.mrf.mxu0  ;;  %v8698_v13 = vcombine.low %v11792_v11, %v1674_v61  ;;  %v12028_v11 = vsel %vm2637_vm6, %v2643_v8, %v2646_v55  ;;  %v1875_v10 = vor.u32 %v1874_v29, %v1871_v63 }
  0xeb   : > { %v9627_v49 = vpop.f32.mrf.mxu1  ;;  %v2648_v61 = vshrl.u32 %v11629_v58, 16 }
  0xec   : > { %v637_v31 = vpop.f32.mrf.mxu0  ;;  %v1878_v54 = vshrl.u32 %v8698_v13, 16  ;;  %v1292_v49 = vsel %vm1256_vm5, %v1287_v33, %v1291_v21 }
  0xed   : > { %v1092_v25 = vpop.f32.mrf.mxu1  ;;  %9813 = vmatmul.mubr.msk.bf16.gmra.mxu1 %vm524_vm3, %v1858_v62  ;;  %v1881_v62 = vshll.u32 %v8698_v13, 16  ;;  %v2650_v43 = vor.u32 %v2648_v61, %v2646_v55  ;;  %v15312_v55 = vshrl.u32 %v11602_v42, 16 }
  0xee   : > { %v12003_v60 = vadd.f32 %v1092_v25, %v634_v17  ;;  %9816 = vmatprep.mubr.msk.bf16.mxu1 %vm11313_vm1, %v15255_v1  ;;  %v9545_v50 = vpop.f32.mrf.mxu0 }
  0xef   : > { %v9630_v3 = vpop.f32.mrf.mxu1  ;;  %v1883_v57 = vrot.slane %v1881_v62, 4 }
  0xf0   : > { %v642_v6 = vpop.f32.mrf.mxu0  ;;  %9731 = vmatmul.mubr.msk.bf16.gmra.mxu0 %vm524_vm3, %v1288_v39  ;;  %v15311_v39 = vshll.u32 %v11564_v19, 16  ;;  %v1876_v3 = vsel %vm1256_vm5, %v1866_v45, %v1875_v10 }
  0xf1   : > { %v1095_v28 = vpop.f32.mrf.mxu1  ;;  %9734 = vmatprep.mubr.msk.bf16.mxu0 %vm11313_vm1, %v15255_v1 }
  0xf2   : > { %v12022_v44 = vadd.f32 %v1095_v28, %v637_v31  ;;  %v9548_v41 = vpop.f32.mrf.mxu0  ;;  %v15310_v31 = vshrl.u32 %v11564_v19, 16  ;;  %v1294_v36 = vrot.slane %v15311_v39, 4  ;;  %v8699_v19 = vcombine.low %v12041_v4, %v1676_v56 }
  0xf3   : > { %v9631_v30 = vpop.f32.mrf.mxu1  ;;  %v2658_v56 = vshll.u32 %v11703_v53, 16 }
  0xf4   : > { %v645_v7 = vpop.f32.mrf.mxu0  ;;  %v1293_v25 = vrot.slane %v15310_v31, 3  ;;  %v1887_v8 = vshrl.u32 %v8699_v19, 16  ;;  %v1890_v41 = vshll.u32 %v8699_v19, 16  ;;  %v1678_v31 = vld [vmem:[%s11435_s29 + $0x60] sm:$0xf] }
  0xf5   : > { %v1100_v17 = vpop.f32.mrf.mxu1  ;;  %9817 = vmatmul.mubr.msk.bf16.gmra.mxu1 %vm524_vm3, %v1867_v37  ;;  %v1880_v37 = vrot.slane %v1878_v54, 3  ;;  %v15313_v54 = vshll.u32 %v11602_v42, 16 }
  0xf6   : > { %v12031_v46 = vadd.f32 %v1100_v17, %v642_v6  ;;  %9820 = vmatprep.mubr.msk.bf16.mxu1 %vm11313_vm1, %v15255_v1  ;;  %v9549_v15 = vpop.f32.mrf.mxu0  ;;  %v1295_v24 = vor.u32 %v1294_v36, %v1293_v25  ;;  %v2653_v6 = vrot.slane %v2651_v32, 1  ;;  %v1297_v17 = vrot.slane %v15312_v55, 3 }
  0xf7   : > { %v9634_v35 = vpop.f32.mrf.mxu1  ;;  %v1884_v47 = vor.u32 %v1883_v57, %v1880_v37  ;;  %v1298_v62 = vrot.slane %v15313_v54, 4  ;;  %v2655_v36 = vshrl.u32 %v11664_v18, 16  ;;  %v1889_v61 = vrot.slane %v1887_v8, 3  ;;  %v12093_v54 = vld [vmem:[%s11435_s29 + $0x64] sm:$0xf] }
  0xf8   : > { %v650_v50 = vpop.f32.mrf.mxu0  ;;  %9735 = vmatmul.mubr.msk.bf16.gmra.mxu0 %vm524_vm3, %v1292_v49  ;;  %v12054_v29 = vsel %vm2637_vm6, %v2650_v43, %v2653_v6  ;;  %v12067_v49 = vld [vmem:[%s11435_s29 + $0x5c] sm:$0xf]  ;;  %v1892_v32 = vrot.slane %v1890_v41, 4  ;;  %v2660_v37 = vrot.slane %v2658_v56, 1  ;;  %v15315_v55 = vshll.u32 %v11648_v5, 16 }
  0xf9   : > { %v1103_v33 = vpop.f32.mrf.mxu1  ;;  %9738 = vmatprep.mubr.msk.bf16.mxu0 %vm11313_vm1, %v15255_v1  ;;  %v1885_v35 = vsel %vm1256_vm5, %v1875_v10, %v1884_v47  ;;  %v8700_v42 = vcombine.low %v12067_v49, %v1678_v31 }
  0xfa   : > { %v12049_v40 = vadd.f32 %v1103_v33, %v645_v7  ;;  %v9552_v28 = vpop.f32.mrf.mxu0  ;;  %v1296_v7 = vsel %vm1256_vm5, %v1291_v21, %v1295_v24  ;;  %v1299_v33 = vor.u32 %v1298_v62, %v1297_v17  ;;  %v1302_v17 = vrot.slane %v15315_v55, 4  ;;  %v12096_v62 = vld [vmem:[%s11435_s29 + $0x68] sm:$0xf] }
  0xfb   : > { %v9635_v63 = vpop.f32.mrf.mxu1 }
  0xfc   : > { %v653_v45 = vpop.f32.mrf.mxu0  ;;  %v1893_v63 = vor.u32 %v1892_v32, %v1889_v61  ;;  %v1300_v41 = vsel %vm1256_vm5, %v1295_v24, %v1299_v33 }
  0xfd   : > { %v1108_v13 = vpop.f32.mrf.mxu1  ;;  %9821 = vmatmul.mubr.msk.bf16.gmra.mxu1 %vm524_vm3, %v1876_v3  ;;  %v2657_v3 = vor.u32 %v2655_v36, %v2653_v6  ;;  %v15314_v6 = vshrl.u32 %v11648_v5, 16  ;;  %v2665_v36 = vshll.u32 %v11737_v2, 16  ;;  %v8701_v5 = vcombine.low %v12093_v54, %v12096_v62 }
  0xfe   : > { %v12057_v30 = vadd.f32 %v1108_v13, %v650_v50  ;;  %9824 = vmatprep.mubr.msk.bf16.mxu1 %vm11313_vm1, %v15255_v1  ;;  %v9553_v25 = vpop.f32.mrf.mxu0  ;;  %v1899_v13 = vshll.u32 %v8700_v42, 16 }
  0xff   : > { %v9638_v39 = vpop.f32.mrf.mxu1  ;;  %v12080_v43 = vsel %vm2637_vm6, %v2657_v3, %v2660_v37  ;;  %v2667_v3 = vrot.slane %v2665_v36, 1 }
 0x100   : > { %v658_v15 = vpop.f32.mrf.mxu0  ;;  %9739 = vmatmul.mubr.msk.bf16.gmra.mxu0 %vm524_vm3, %v1296_v7  ;;  %v1301_v7 = vrot.slane %v15314_v6, 3  ;;  %v2662_v39 = vshrl.u32 %v11703_v53, 16 }
 0x101   : > { %v1111_v21 = vpop.f32.mrf.mxu1  ;;  %9742 = vmatprep.mubr.msk.bf16.mxu0 %vm11313_vm1, %v15255_v1 }
 0x102   : > { %v12075_v50 = vadd.f32 %v1111_v21, %v653_v45  ;;  %v9556_v57 = vpop.f32.mrf.mxu0  ;;  %v1896_v45 = vshrl.u32 %v8700_v42, 16  ;;  %v1303_v32 = vor.u32 %v1302_v17, %v1301_v7  ;;  %v2664_v42 = vor.u32 %v2662_v39, %v2660_v37  ;;  %v12125_v39 = vld [vmem:[%s11435_s29 + $0x70] sm:$0xf] }
 0x103   : > { %v9639_v19 = vpop.f32.mrf.mxu1  ;;  %v15316_v37 = vshrl.u32 %v11676_v20, 16  ;;  %v15317_v17 = vshll.u32 %v11676_v20, 16  ;;  %15318 = vst [vmem:[#allocation6_spill] sm:$0xff] %v12125_v39 }
 0x104   : > { %v661_v10 = vpop.f32.mrf.mxu0  ;;  %v1898_v21 = vrot.slane %v1896_v45, 3  ;;  %v1304_v7 = vsel %vm1256_vm5, %v1299_v33, %v1303_v32 }
 0x105   : > { %v1116_v28 = vpop.f32.mrf.mxu1  ;;  %9825 = vmatmul.mubr.msk.bf16.gmra.mxu1 %vm524_vm3, %v1885_v35  ;;  %v1901_v35 = vrot.slane %v1899_v13, 4  ;;  %v1305_v55 = vrot.slane %v15316_v37, 3 }
 0x106   : > { %v12083_v8 = vadd.f32 %v1116_v28, %v658_v15  ;;  %9828 = vmatprep.mubr.msk.bf16.mxu1 %vm11313_vm1, %v15255_v1  ;;  %v9557_v31 = vpop.f32.mrf.mxu0  ;;  %v1894_v15 = vsel %vm1256_vm5, %v1884_v47, %v1893_v63  ;;  %v12109_v28 = vsel %vm2637_vm6, %v2664_v42, %v2667_v3 }
 0x107   : > { %v9642_v25 = vpop.f32.mrf.mxu1  ;;  %v1902_v13 = vor.u32 %v1901_v35, %v1898_v21  ;;  %v1306_v31 = vrot.slane %v15317_v17, 4 }
 0x108   : > { %v666_v24 = vpop.f32.mrf.mxu0  ;;  %9743 = vmatmul.mubr.msk.bf16.gmra.mxu0 %vm524_vm3, %v1300_v41  ;;  %v1908_v41 = vshll.u32 %v8701_v5, 16  ;;  %v12122_v25 = vld [vmem:[%s11435_s29 + $0x6c] sm:$0xf] }
 0x109   : > { %v1119_v56 = vpop.f32.mrf.mxu1  ;;  %9746 = vmatprep.mubr.msk.bf16.mxu0 %vm11313_vm1, %v15255_v1  ;;  %v1903_v35 = vsel %vm1256_vm5, %v1893_v63, %v1902_v13  ;;  %v8702_v20 = vcombine.low %v12122_v25, %v12125_v39 }
 0x10a   : > { %v12104_v61 = vadd.f32 %v1119_v56, %v661_v10  ;;  %v9560_v57 = vpop.f32.mrf.mxu0  ;;  %v1905_v10 = vshrl.u32 %v8701_v5, 16  ;;  %v1910_v42 = vrot.slane %v1908_v41, 4 }
 0x10b   : > { %v9643_v19 = vpop.f32.mrf.mxu1 }
 0x10c   : > { %v669_v47 = vpop.f32.mrf.mxu0  ;;  %v1907_v5 = vrot.slane %v1905_v10, 3  ;;  %v1307_v19 = vor.u32 %v1306_v31, %v1305_v55 }
 0x10d   : > { %v1124_v45 = vpop.f32.mrf.mxu1  ;;  %9829 = vmatmul.mubr.msk.bf16.gmra.mxu1 %vm524_vm3, %v1894_v15  ;;  %v2672_v15 = vshll.u32 %v11765_v26, 16 }
 0x10e   : > { %v12112_v6 = vadd.f32 %v1124_v45, %v666_v24  ;;  %9832 = vmatprep.mubr.msk.bf16.mxu1 %vm11313_vm1, %v15255_v1  ;;  %v9561_v36 = vpop.f32.mrf.mxu0  ;;  %v2669_v24 = vshrl.u32 %v11737_v2, 16  ;;  %v1911_v41 = vor.u32 %v1910_v42, %v1907_v5  ;;  %v1308_v55 = vsel %vm1256_vm5, %v1303_v32, %v1307_v19 }
 0x10f   : > { %v9646_v56 = vpop.f32.mrf.mxu1  ;;  %v2674_v37 = vrot.slane %v2672_v15, 1  ;;  %v2679_v42 = vshll.u32 %v11799_v23, 16 }
 0x110   : > { %v674_v33 = vpop.f32.mrf.mxu0  ;;  %9747 = vmatmul.mubr.msk.bf16.gmra.mxu0 %vm524_vm3, %v1304_v7  ;;  %v2671_v45 = vor.u32 %v2669_v24, %v2667_v3  ;;  %v1917_v56 = vshll.u32 %v8702_v20, 16  ;;  %v15321_v3 = vshrl.u32 %v11721_v48, 16  ;;  %v15322_v24 = vshll.u32 %v11721_v48, 16 }
 0x111   : > { %v1127_v21 = vpop.f32.mrf.mxu1  ;;  %9750 = vmatprep.mubr.msk.bf16.mxu0 %vm11313_vm1, %v15255_v1  ;;  %v2681_v39 = vrot.slane %v2679_v42, 1  ;;  %v12180_v42 = vld [vmem:[%s11435_s29 + $0x7c] sm:$0xf] }
 0x112   : > { %v12133_v57 = vadd.f32 %v1127_v21, %v669_v47  ;;  %v9564_v17 = vpop.f32.mrf.mxu0  ;;  %v12138_v7 = vsel %vm2637_vm6, %v2671_v45, %v2674_v37  ;;  %v1914_v47 = vshrl.u32 %v8702_v20, 16  ;;  %v1309_v31 = vrot.slane %v15321_v3, 3  ;;  %v12151_v45 = vld [vmem:[%s11435_s29 + $0x74] sm:$0xf] }
 0x113   : > { %v9647_v36 = vpop.f32.mrf.mxu1  ;;  %v1310_v15 = vrot.slane %v15322_v24, 4  ;;  %15323 = vst [vmem:[#allocation9_spill] sm:$0xff] %v12151_v45  ;;  %v12154_v17 = vld [vmem:[%s11435_s29 + $0x78] sm:$0xf]  ;;  %v1919_v3 = vrot.slane %v1917_v56, 4 }
 0x114   : > { %15319 = vst [vmem:[#allocation7_spill] sm:$0xff] %v12133_v57  ;;  %v677_v63 = vpop.f32.mrf.mxu0  ;;  %15324 = vst [vmem:[#allocation10_spill] sm:$0xff] %v12154_v17  ;;  %v1912_v36 = vsel %vm1256_vm5, %v1902_v13, %v1911_v41  ;;  %v8703_v48 = vcombine.low %v12151_v45, %v12154_v17 }
 0x115   : > { %v1132_v10 = vpop.f32.mrf.mxu1  ;;  %9833 = vmatmul.mubr.msk.bf16.gmra.mxu1 %vm524_vm3, %v1903_v35 }
 0x116   : > { %v12141_v21 = vadd.f32 %v1132_v10, %v674_v33  ;;  %9836 = vmatprep.mubr.msk.bf16.mxu1 %vm11313_vm1, %v15255_v1  ;;  %v9565_v35 = vpop.f32.mrf.mxu0  ;;  %v2676_v33 = vshrl.u32 %v11765_v26, 16  ;;  %v1916_v10 = vrot.slane %v1914_v47, 3 }
 0x117   : > { %v9650_v5 = vpop.f32.mrf.mxu1  ;;  %v1311_v35 = vor.u32 %v1310_v15, %v1309_v31 }
 0x118   : > { %15320 = vst [vmem:[#allocation8_spill] sm:$0xff] %v12141_v21  ;;  %v682_v32 = vpop.f32.mrf.mxu0  ;;  %9751 = vmatmul.mubr.msk.bf16.gmra.mxu0 %vm524_vm3, %v1308_v55  ;;  %v2678_v5 = vor.u32 %v2676_v33, %v2674_v37  ;;  %v1920_v56 = vor.u32 %v1919_v3, %v1916_v10  ;;  %v1923_v37 = vshrl.u32 %v8703_v48, 16  ;;  %v1926_v33 = vshll.u32 %v8703_v48, 16 }
 0x119   : > { %v1135_v20 = vpop.f32.mrf.mxu1  ;;  %9754 = vmatprep.mubr.msk.bf16.mxu0 %vm11313_vm1, %v15255_v1  ;;  %v15327_v1 = vshll.u32 %v11749_v16, 16  ;;  %v2683_v3 = vshrl.u32 %v11799_v23, 16 }
 0x11a   : > { %v12162_v24 = vadd.f32 %v1135_v20, %v677_v63  ;;  %v9568_v21 = vpop.f32.mrf.mxu0  ;;  %v12167_v55 = vsel %vm2637_vm6, %v2678_v5, %v2681_v39  ;;  %v15326_v63 = vshrl.u32 %v11749_v16, 16  ;;  %v12183_v5 = vld [vmem:[%s11435_s29 + $0x80] sm:$0xf]  ;;  %v2686_v16 = vshll.u32 %v11803_v52, 16 }
 0x11b   : > { %v9651_v57 = vpop.f32.mrf.mxu1  ;;  %v1314_v31 = vrot.slane %v15327_v1, 4  ;;  %v1312_v21 = vsel %vm1256_vm5, %v1307_v19, %v1311_v35  ;;  %15330 = vst [vmem:[#allocation13_spill] sm:$0xff] %v12183_v5  ;;  %v1921_v19 = vsel %vm1256_vm5, %v1911_v41, %v1920_v56  ;;  %v8704_v48 = vcombine.low %v12180_v42, %v12183_v5  ;;  %v12212_v5 = vld [vmem:[%s11435_s29 + $0x84] sm:$0xf] }
 0x11c   : > { %15325 = vst [vmem:[#allocation11_spill] sm:$0xff] %v12162_v24  ;;  %v685_v13 = vpop.f32.mrf.mxu0  ;;  %v1313_v20 = vrot.slane %v15326_v63, 3  ;;  %v15329_v57 = vmov 0.0   ;;  %15334 = vst [vmem:[#allocation15_spill] sm:$0xff] %v12212_v5 }
 0x11d   : > { %v1140_v47 = vpop.f32.mrf.mxu1  ;;  %9837 = vmatmul.mubr.msk.bf16.gmra.mxu1 %vm524_vm3, %v1912_v36  ;;  %4855 = vst.msk [vmem:[#allocation2 + $0x20] sm:$0xff] %vm4850_vm10, %v15329_v57  ;;  %4852 = vst.msk [vmem:[#allocation2 + $0x8] sm:$0xff] %vm4850_vm10, %v15329_v57 }
 0x11e   : > { %v12174_v15 = vadd.f32 %v1140_v47, %v682_v32  ;;  %9840 = vmatprep.mubr.msk.bf16.mxu1 %vm11313_vm1, %v15329_v57  ;;  %v9569_v36 = vpop.f32.mrf.mxu0  ;;  %v1315_v32 = vor.u32 %v1314_v31, %v1313_v20  ;;  %v1925_v47 = vrot.slane %v1923_v37, 3  ;;  %v1932_v37 = vshrl.u32 %v8704_v48, 16  ;;  %4853 = vst.msk [vmem:[#allocation2 + $0x10] sm:$0xff] %vm4850_vm10, %v15329_v57  ;;  %4854 = vst.msk [vmem:[#allocation2 + $0x18] sm:$0xff] %vm4850_vm10, %v15329_v57 }
 0x11f   : > { %v9654_v10 = vpop.f32.mrf.mxu1  ;;  %v1928_v36 = vrot.slane %v1926_v33, 4  ;;  %4856 = vst.msk [vmem:[#allocation2 + $0x28] sm:$0xff] %vm4850_vm10, %v15329_v57  ;;  %4857 = vst.msk [vmem:[#allocation2 + $0x30] sm:$0xff] %vm4850_vm10, %v15329_v57 }
 0x120   : > { %15328 = vst [vmem:[#allocation12_spill] sm:$0xff] %v12174_v15  ;;  %v690_v1 = vpop.f32.mrf.mxu0  ;;  %9755 = vmatmul.mubr.msk.bf16.gmra.mxu0 %vm524_vm3, %v1312_v21  ;;  %v2685_v10 = vor.u32 %v2683_v3, %v2681_v39  ;;  %v12195_v15 = vrot.slane %v2686_v16, 1  ;;  %v1935_v21 = vshll.u32 %v8704_v48, 16  ;;  %v15333_v3 = vshll.u32 %v11768_v27, 16  ;;  %4858 = vst.msk [vmem:[#allocation2 + $0x38] sm:$0xff] %vm4850_vm10, %v15329_v57 }
 0x121   : > { %v1143_v63 = vpop.f32.mrf.mxu1  ;;  %9758 = vmatprep.mubr.msk.bf16.mxu0 %vm11313_vm1, %v15329_v57  ;;  %v1929_v39 = vor.u32 %v1928_v36, %v1925_v47  ;;  %4859 = vst.msk [vmem:[#allocation2 + $0x40] sm:$0xff] %vm4850_vm10, %v15329_v57  ;;  %4860 = vst.msk [vmem:[#allocation2 + $0x48] sm:$0xff] %vm4850_vm10, %v15329_v57 }
 0x122   : > { %v12191_v17 = vadd.f32 %v1143_v63, %v685_v13  ;;  %v9572_v45 = vpop.f32.mrf.mxu0  ;;  %v12199_v41 = vsel %vm2637_vm6, %v2685_v10, %v12195_v15  ;;  %v1316_v13 = vsel %vm1256_vm5, %v1311_v35, %v1315_v32  ;;  %v1318_v16 = vrot.slane %v15333_v3, 4  ;;  %4861 = vst.msk [vmem:[#allocation2 + $0x50] sm:$0xff] %vm4850_vm10, %v15329_v57  ;;  %4862 = vst.msk [vmem:[#allocation2 + $0x58] sm:$0xff] %vm4850_vm10, %v15329_v57 }
 0x123   : > { %v9655_v24 = vpop.f32.mrf.mxu1  ;;  %v15332_v45 = vshrl.u32 %v11768_v27, 16  ;;  %v1930_v47 = vsel %vm1256_vm5, %v1920_v56, %v1929_v39  ;;  %v15337_v56 = vshll.u32 %v11815_v0, 16  ;;  %4863 = vst.msk [vmem:[#allocation2 + $0x60] sm:$0xff] %vm4850_vm10, %v15329_v57  ;;  %4864 = vst.msk [vmem:[#allocation2 + $0x68] sm:$0xff] %vm4850_vm10, %v15329_v57 }
 0x124   : > { %v693_v20 = vpop.f32.mrf.mxu0  ;;  %4865 = vst.msk [vmem:[#allocation2 + $0x70] sm:$0xff] %vm4850_vm10, %v15329_v57  ;;  %4866 = vst.msk [vmem:[#allocation2 + $0x78] sm:$0xff] %vm4850_vm10, %v15329_v57 }
 0x125   : > { %v1148_v31 = vpop.f32.mrf.mxu1  ;;  %9841 = vmatmul.mubr.msk.bf16.gmra.mxu1 %vm524_vm3, %v1921_v19  ;;  %v1317_v24 = vrot.slane %v15332_v45, 3  ;;  %v12215_v19 = vld [vmem:[%s11435_s29 + $0x88] sm:$0xf]  ;;  %4867 = vst.msk [vmem:[#allocation2 + $0x80] sm:$0xff] %vm4850_vm10, %v15329_v57  ;;  %4868 = vst.msk [vmem:[#allocation2 + $0x88] sm:$0xff] %vm4850_vm10, %v15329_v57 }
 0x126   : > { %v12203_v33 = vadd.f32 %v1148_v31, %v690_v1  ;;  %9844 = vmatprep.mubr.msk.bf16.mxu1 %vm11313_vm1, %v15329_v57  ;;  %v9573_v63 = vpop.f32.mrf.mxu0  ;;  %15335 = vst [vmem:[#allocation16_spill] sm:$0xff] %v12215_v19  ;;  %v1934_v1 = vrot.slane %v1932_v37, 3  ;;  %v1937_v31 = vrot.slane %v1935_v21, 4  ;;  %v8705_v36 = vcombine.low %v12212_v5, %v12215_v19  ;;  %v12236_v5 = vld [vmem:[%s11435_s29 + $0x8c] sm:$0xf]  ;;  %4869 = vst.msk [vmem:[#allocation2 + $0x90] sm:$0xff] %vm4850_vm10, %v15329_v57 }
 0x127   : > { %v9658_v10 = vpop.f32.mrf.mxu1  ;;  %v1319_v27 = vor.u32 %v1318_v16, %v1317_v24  ;;  %v1322_v21 = vrot.slane %v15337_v56, 4  ;;  %15339 = vst [vmem:[#allocation18_spill] sm:$0xff] %v12236_v5  ;;  %4870 = vst.msk [vmem:[#allocation2 + $0x98] sm:$0xff] %vm4850_vm10, %v15329_v57 }
 0x128   : > { %15331 = vst [vmem:[#allocation14_spill] sm:$0xff] %v12203_v33  ;;  %v698_v35 = vpop.f32.mrf.mxu0  ;;  %9759 = vmatmul.mubr.msk.bf16.gmra.mxu0 %vm524_vm3, %v1316_v13  ;;  %v1938_v13 = vor.u32 %v1937_v31, %v1934_v1  ;;  %v1941_v16 = vshrl.u32 %v8705_v36, 16  ;;  %v12239_v1 = vld [vmem:[%s11435_s29 + $0x90] sm:$0xf]  ;;  %4871 = vst.msk [vmem:[#allocation2 + $0xa0] sm:$0xff] %vm4850_vm10, %v15329_v57 }
 0x129   : > { %v1151_v48 = vpop.f32.mrf.mxu1  ;;  %9762 = vmatprep.mubr.msk.bf16.mxu0 %vm11313_vm1, %v15329_v57  ;;  %v1320_v24 = vsel %vm1256_vm5, %v1315_v32, %v1319_v27  ;;  %15340 = vst [vmem:[#allocation19_spill] sm:$0xff] %v12239_v1  ;;  %4872 = vst.msk [vmem:[#allocation2 + $0xa8] sm:$0xff] %vm4850_vm10, %v15329_v57 }
 0x12a   : > { %v12218_v33 = vadd.f32 %v1151_v48, %v693_v20  ;;  %v9576_v45 = vpop.f32.mrf.mxu0  ;;  %v15336_v20 = vshrl.u32 %v11815_v0, 16  ;;  %v1939_v0 = vsel %vm1256_vm5, %v1929_v39, %v1938_v13  ;;  %v1943_v32 = vrot.slane %v1941_v16, 3  ;;  %4873 = vst.msk [vmem:[#allocation2 + $0xb0] sm:$0xff] %vm4850_vm10, %v15329_v57  ;;  %4874 = vst.msk [vmem:[#allocation2 + $0xb8] sm:$0xff] %vm4850_vm10, %v15329_v57 }
 0x12b   : > { %v9659_v3 = vpop.f32.mrf.mxu1  ;;  %v1944_v45 = vshll.u32 %v8705_v36, 16  ;;  %4875 = vst.msk [vmem:[#allocation2 + $0xc0] sm:$0xff] %vm4850_vm10, %v15329_v57  ;;  %4876 = vst.msk [vmem:[#allocation2 + $0xc8] sm:$0xff] %vm4850_vm10, %v15329_v57 }
 0x12c   : > { %v701_v63 = vpop.f32.mrf.mxu0  ;;  %v1321_v37 = vrot.slane %v15336_v20, 3  ;;  %4877 = vst.msk [vmem:[#allocation2 + $0xd0] sm:$0xff] %vm4850_vm10, %v15329_v57  ;;  %4878 = vst.msk [vmem:[#allocation2 + $0xd8] sm:$0xff] %vm4850_vm10, %v15329_v57 }
 0x12d   : > { %v1156_v10 = vpop.f32.mrf.mxu1  ;;  %9845 = vmatmul.mubr.msk.bf16.gmra.mxu1 %vm524_vm3, %v1930_v47  ;;  %v1946_v36 = vrot.slane %v1944_v45, 4  ;;  %4879 = vst.msk [vmem:[#allocation2 + $0xe0] sm:$0xff] %vm4850_vm10, %v15329_v57  ;;  %4880 = vst.msk [vmem:[#allocation2 + $0xe8] sm:$0xff] %vm4850_vm10, %v15329_v57 }
 0x12e   : > { %v12230_v48 = vadd.f32 %v1156_v10, %v698_v35  ;;  %9848 = vmatprep.mubr.msk.bf16.mxu1 %vm11313_vm1, %v15329_v57  ;;  %v9577_v3 = vpop.f32.mrf.mxu0  ;;  %v1323_v35 = vor.u32 %v1322_v21, %v1321_v37  ;;  %v15343_v21 = vshll.u32 %v11833_v14, 16  ;;  %4881 = vst.msk [vmem:[#allocation2 + $0xf0] sm:$0xff] %vm4850_vm10, %v15329_v57  ;;  %4882 = vst.msk [vmem:[#allocation2 + $0xf8] sm:$0xff] %vm4850_vm10, %v15329_v57 }
 0x12f   : > { %v9662_v19 = vpop.f32.mrf.mxu1  ;;  %v1947_v45 = vor.u32 %v1946_v36, %v1943_v32  ;;  %4883 = vst.msk [vmem:[#allocation2 + $0x100] sm:$0xff] %vm4850_vm10, %v15329_v57  ;;  %4884 = vst.msk [vmem:[#allocation2 + $0x108] sm:$0xff] %vm4850_vm10, %v15329_v57 }
 0x130   : > { %15338 = vst [vmem:[#allocation17_spill] sm:$0xff] %v12230_v48  ;;  %v706_v31 = vpop.f32.mrf.mxu0  ;;  %9763 = vmatmul.mubr.msk.bf16.gmra.mxu0 %vm524_vm3, %v1320_v24  ;;  %v8706_v19 = vcombine.low %v12236_v5, %v12239_v1  ;;  %v1324_v39 = vsel %vm1256_vm5, %v1319_v27, %v1323_v35  ;;  %v1326_v24 = vrot.slane %v15343_v21, 4  ;;  %v12263_v1 = vld [vmem:[%s11435_s29 + $0x98] sm:$0xf]  ;;  %4885 = vst.msk [vmem:[#allocation2 + $0x110] sm:$0xff] %vm4850_vm10, %v15329_v57 }
 0x131   : > { %v1159_v47 = vpop.f32.mrf.mxu1  ;;  %9766 = vmatprep.mubr.msk.bf16.mxu0 %vm11313_vm1, %v15329_v57  ;;  %15345 = vst [vmem:[#allocation22_spill] sm:$0xff] %v12263_v1  ;;  %v1948_v32 = vsel %vm1256_vm5, %v1938_v13, %v1947_v45  ;;  %4886 = vst.msk [vmem:[#allocation2 + $0x118] sm:$0xff] %vm4850_vm10, %v15329_v57 }
 0x132   : > { %v12243_v10 = vadd.f32 %v1159_v47, %v701_v63  ;;  %v9580_v20 = vpop.f32.mrf.mxu0  ;;  %v15342_v63 = vshrl.u32 %v11833_v14, 16  ;;  %v1950_v47 = vshrl.u32 %v8706_v19, 16  ;;  %4887 = vst.msk [vmem:[#allocation2 + $0x120] sm:$0xff] %vm4850_vm10, %v15329_v57  ;;  %4888 = vst.msk [vmem:[#allocation2 + $0x128] sm:$0xff] %vm4850_vm10, %v15329_v57 }
 0x133   : > { %v9663_v56 = vpop.f32.mrf.mxu1  ;;  %v1953_v20 = vshll.u32 %v8706_v19, 16  ;;  %4889 = vst.msk [vmem:[#allocation2 + $0x130] sm:$0xff] %vm4850_vm10, %v15329_v57  ;;  %4890 = vst.msk [vmem:[#allocation2 + $0x138] sm:$0xff] %vm4850_vm10, %v15329_v57 }
 0x134   : > { %15341 = vst [vmem:[#allocation20_spill] sm:$0xff] %v12243_v10  ;;  %v709_v3 = vpop.f32.mrf.mxu0  ;;  %v1325_v37 = vrot.slane %v15342_v63, 3  ;;  %v12260_v56 = vld [vmem:[%s11435_s29 + $0x94] sm:$0xf]  ;;  %v1952_v36 = vrot.slane %v1950_v47, 3  ;;  %4891 = vst.msk [vmem:[#allocation2 + $0x140] sm:$0xff] %vm4850_vm10, %v15329_v57 }
 0x135   : > { %v1164_v48 = vpop.f32.mrf.mxu1  ;;  %9849 = vmatmul.mubr.msk.bf16.gmra.mxu1 %vm524_vm3, %v1939_v0  ;;  %15344 = vst [vmem:[#allocation21_spill] sm:$0xff] %v12260_v56  ;;  %v1955_v19 = vrot.slane %v1953_v20, 4  ;;  %v15348_v20 = vshll.u32 %v11851_v9, 16  ;;  %4892 = vst.msk [vmem:[#allocation2 + $0x148] sm:$0xff] %vm4850_vm10, %v15329_v57 }
 0x136   : > { %v12255_v16 = vadd.f32 %v1164_v48, %v706_v31  ;;  %9852 = vmatprep.mubr.msk.bf16.mxu1 %vm11313_vm1, %v15329_v57  ;;  %v9581_v0 = vpop.f32.mrf.mxu0  ;;  %v1327_v14 = vor.u32 %v1326_v24, %v1325_v37  ;;  %v8707_v48 = vcombine.low %v12260_v56, %v12263_v1  ;;  %v15347_v24 = vshrl.u32 %v11851_v9, 16  ;;  %v12284_v56 = vld [vmem:[%s11435_s29 + $0x9c] sm:$0xf]  ;;  %4893 = vst.msk [vmem:[#allocation2 + $0x150] sm:$0xff] %vm4850_vm10, %v15329_v57 }
 0x137   : > { %v9666_v27 = vpop.f32.mrf.mxu1  ;;  %v1956_v13 = vor.u32 %v1955_v19, %v1952_v36  ;;  %15349 = vst [vmem:[#allocation24_spill] sm:$0xff] %v12284_v56  ;;  %4894 = vst.msk [vmem:[#allocation2 + $0x158] sm:$0xff] %vm4850_vm10, %v15329_v57 }
 0x138   : > { %v714_v10 = vpop.f32.mrf.mxu0  ;;  %9767 = vmatmul.mubr.msk.bf16.gmra.mxu0 %vm524_vm3, %v1324_v39  ;;  %v1328_v39 = vsel %vm1256_vm5, %v1323_v35, %v1327_v14  ;;  %v1959_v37 = vshrl.u32 %v8707_v48, 16  ;;  %v1329_v47 = vrot.slane %v15347_v24, 3  ;;  %4895 = vst.msk [vmem:[#allocation2 + $0x160] sm:$0xff] %vm4850_vm10, %v15329_v57  ;;  %4896 = vst.msk [vmem:[#allocation2 + $0x168] sm:$0xff] %vm4850_vm10, %v15329_v57 }
 0x139   : > { %v1167_v5 = vpop.f32.mrf.mxu1  ;;  %9770 = vmatprep.mubr.msk.bf16.mxu0 %vm11313_vm1, %v15329_v57  ;;  %v1957_v36 = vsel %vm1256_vm5, %v1947_v45, %v1956_v13  ;;  %4897 = vst.msk [vmem:[#allocation2 + $0x170] sm:$0xff] %vm4850_vm10, %v15329_v57 }
 0x13a   : > { %v12268_v31 = vadd.f32 %v1167_v5, %v709_v3  ;;  %v9584_v63 = vpop.f32.mrf.mxu0  ;;  %v1962_v5 = vshll.u32 %v8707_v48, 16 }
 0x13b   : > { %v9667_v21 = vpop.f32.mrf.mxu1  ;;  %v1330_v63 = vrot.slane %v15348_v20, 4 }
 0x13c   : > { %v717_v0 = vpop.f32.mrf.mxu0 }
 0x13d   : > { %v1172_v27 = vpop.f32.mrf.mxu1  ;;  %9853 = vmatmul.mubr.msk.bf16.gmra.mxu1 %vm524_vm3, %v1948_v32  ;;  %v12287_v32 = vld [vmem:[%s11435_s29 + $0xa0] sm:$0xf]  ;;  %v1331_v9 = vor.u32 %v1330_v63, %v1329_v47 }
 0x13e   : > { %v12275_v3 = vadd.f32 %v1172_v27, %v714_v10  ;;  %9856 = vmatprep.mubr.msk.bf16.mxu1 %vm11313_vm1, %v15329_v57  ;;  %v9585_v21 = vpop.f32.mrf.mxu0  ;;  %15350 = vst [vmem:[#allocation25_spill] sm:$0xff] %v12287_v32  ;;  %v1961_v10 = vrot.slane %v1959_v37, 3  ;;  %v1964_v27 = vrot.slane %v1962_v5, 4  ;;  %v15352_v37 = vshrl.u32 %v11869_v22, 16 }
 0x13f   : > { %v9670_v1 = vpop.f32.mrf.mxu1  ;;  %v15353_v5 = vshll.u32 %v11869_v22, 16  ;;  %v1332_v47 = vsel %vm1256_vm5, %v1327_v14, %v1331_v9 }
 0x140   : > { %15346 = vst [vmem:[#allocation23_spill] sm:$0xff] %v12275_v3  ;;  %v722_v35 = vpop.f32.mrf.mxu0  ;;  %9771 = vmatmul.mubr.msk.bf16.gmra.mxu0 %vm524_vm3, %v1328_v39  ;;  %v8708_v1 = vcombine.low %v12284_v56, %v12287_v32  ;;  %v1333_v45 = vrot.slane %v15352_v37, 3  ;;  %v12311_v32 = vld [vmem:[%s11435_s29 + $0xa8] sm:$0xf] }
 0x141   : > { %v1175_v48 = vpop.f32.mrf.mxu1  ;;  %9774 = vmatprep.mubr.msk.bf16.mxu0 %vm11313_vm1, %v15329_v57  ;;  %v1334_v21 = vrot.slane %v15353_v5, 4  ;;  %15356 = vst [vmem:[#allocation29_spill] sm:$0xff] %v12311_v32 }
 0x142   : > { %v12290_v3 = vadd.f32 %v1175_v48, %v717_v0  ;;  %v9588_v19 = vpop.f32.mrf.mxu0  ;;  %v1965_v0 = vor.u32 %v1964_v27, %v1961_v10  ;;  %v1968_v63 = vshrl.u32 %v8708_v1, 16 }
 0x143   : > { %v9671_v24 = vpop.f32.mrf.mxu1  ;;  %v1971_v19 = vshll.u32 %v8708_v1, 16  ;;  %v1335_v1 = vor.u32 %v1334_v21, %v1333_v45 }
 0x144   : > { %15351 = vst [vmem:[#allocation26_spill] sm:$0xff] %v12290_v3  ;;  %v725_v20 = vpop.f32.mrf.mxu0  ;;  %v12308_v24 = vld [vmem:[%s11435_s29 + $0xa4] sm:$0xf]  ;;  %v1966_v22 = vsel %vm1256_vm5, %v1956_v13, %v1965_v0  ;;  %v15358_v13 = vshrl.u32 %v11887_v12, 16 }
 0x145   : > { %v1180_v39 = vpop.f32.mrf.mxu1  ;;  %9857 = vmatmul.mubr.msk.bf16.gmra.mxu1 %vm524_vm3, %v1957_v36  ;;  %15355 = vst [vmem:[#allocation28_spill] sm:$0xff] %v12308_v24  ;;  %v1250_v36 = vld [vmem:[%s11435_s29 + $0xa8] sm:$0x3]  ;;  %v8709_v14 = vcombine.low %v12308_v24, %v12311_v32  ;;  %v1973_v5 = vrot.slane %v1971_v19, 4 }
 0x146   : > { %v12302_v48 = vadd.f32 %v1180_v39, %v722_v35  ;;  %9860 = vmatprep.mubr.msk.bf16.mxu1 %vm11313_vm1, %v15329_v57  ;;  %v9589_v10 = vpop.f32.mrf.mxu0  ;;  %v1970_v39 = vrot.slane %v1968_v63, 3  ;;  %v1336_v63 = vsel %vm1256_vm5, %v1331_v9, %v1335_v1 }
 0x147   : > { %v9674_v27 = vpop.f32.mrf.mxu1  ;;  %v1977_v24 = vshrl.u32 %v8709_v14, 16  ;;  %v1980_v45 = vshll.u32 %v8709_v14, 16 }
 0x148   : > { %15354 = vst [vmem:[#allocation27_spill] sm:$0xff] %v12302_v48  ;;  %v730_v37 = vpop.f32.mrf.mxu0  ;;  %9775 = vmatmul.mubr.msk.bf16.gmra.mxu0 %vm524_vm3, %v1332_v47  ;;  %v8667_v48 = vcombine.low %v11896_v34, %v1250_v36  ;;  %v1974_v34 = vor.u32 %v1973_v5, %v1970_v39 }
 0x149   : > { %v1183_v3 = vpop.f32.mrf.mxu1  ;;  %9778 = vmatprep.mubr.msk.bf16.mxu0 %vm11313_vm1, %v15329_v57  ;;  %v1979_v14 = vrot.slane %v1977_v24, 3 }
 0x14a   : > { %v12318_v35 = vadd.f32 %v1183_v3, %v725_v20  ;;  %v9592_v10 = vpop.f32.mrf.mxu0  ;;  %v1337_v3 = vrot.slane %v15358_v13, 3  ;;  %v15359_v20 = vshll.u32 %v11887_v12, 16  ;;  %v1975_v9 = vsel %vm1256_vm5, %v1965_v0, %v1974_v34 }
 0x14b   : > { %v9675_v27 = vpop.f32.mrf.mxu1  ;;  %v12334_v10 = vld [vmem:[%s11435_s29 + $0xac] sm:$0xf]  ;;  %v1345_v39 = vshll.u32 %v8667_v48, 16 }
 0x14c   : > { %15357 = vst [vmem:[#allocation30_spill] sm:$0xff] %v12318_v35  ;;  %v733_v47 = vpop.f32.mrf.mxu0  ;;  %v1338_v32 = vrot.slane %v15359_v20, 4 }
 0x14d   : > { %v1188_v56 = vpop.f32.mrf.mxu1  ;;  %9861 = vmatmul.mubr.msk.bf16.gmra.mxu1 %vm524_vm3, %v1966_v22  ;;  %v12337_v22 = vld [vmem:[%s11435_s29 + $0xb0] sm:$0x3]  ;;  %v1347_v0 = vrot.slane %v1345_v39, 4 }
 0x14e   : > { %v12328_v21 = vadd.f32 %v1188_v56, %v730_v37  ;;  %9864 = vmatprep.mubr.msk.bf16.mxu1 %vm11313_vm1, %v15329_v57  ;;  %v9593_v19 = vpop.f32.mrf.mxu0  ;;  %15361 = vst [vmem:[#allocation32_spill] sm:$0xff] %v12337_v22  ;;  %v1339_v12 = vor.u32 %v1338_v32, %v1337_v3  ;;  %v1982_v56 = vrot.slane %v1980_v45, 4  ;;  %v1342_v37 = vshrl.u32 %v8667_v48, 16 }
 0x14f   : > { %v9678_v36 = vpop.f32.mrf.mxu1  ;;  %v8710_v5 = vcombine.low %v12334_v10, %v12337_v22 }
 0x150   : > { %15360 = vst [vmem:[#allocation31_spill] sm:$0xff] %v12328_v21  ;;  %v738_v27 = vpop.f32.mrf.mxu0  ;;  %9779 = vmatmul.mubr.msk.bf16.gmra.mxu0 %vm524_vm3, %v1336_v63  ;;  %v1340_v32 = vsel %vm1256_vm5, %v1335_v1, %v1339_v12  ;;  %v1983_v24 = vor.u32 %v1982_v56, %v1979_v14 }
 0x151   : > { %v1191_v13 = vpop.f32.mrf.mxu1  ;;  %9782 = vmatprep.mubr.msk.bf16.mxu0 %vm11313_vm1, %v15329_v57  ;;  %v1986_v48 = vshrl.u32 %v8710_v5, 16  ;;  %v1989_v45 = vshll.u32 %v8710_v5, 16 }
 0x152   : > { %v12340_v20 = vadd.f32 %v1191_v13, %v733_v47  ;;  %v9596_v19 = vpop.f32.mrf.mxu0  ;;  %v1344_v47 = vrot.slane %v1342_v37, 3 }
 0x153   : > { %v9679_v36 = vpop.f32.mrf.mxu1  ;;  %v1988_v1 = vrot.slane %v1986_v48, 3 }
 0x154   : > { %v741_v21 = vpop.f32.mrf.mxu0 }
 0x155   : > { %v1196_v35 = vpop.f32.mrf.mxu1  ;;  %9865 = vmatmul.mubr.msk.bf16.gmra.mxu1 %vm524_vm3, %v1975_v9  ;;  %v1984_v9 = vsel %vm1256_vm5, %v1974_v34, %v1983_v24 }
 0x156   : > { %v12349_v3 = vadd.f32 %v1196_v35, %v738_v27  ;;  %9868 = vmatprep.mubr.msk.bf16.mxu1 %vm11313_vm1, %v15329_v57  ;;  %v9597_v63 = vpop.f32.mrf.mxu0  ;;  %v1348_v35 = vor.u32 %v1347_v0, %v1344_v47  ;;  %v1991_v27 = vrot.slane %v1989_v45, 4 }
 0x157   : > { %v9682_v13 = vpop.f32.mrf.mxu1 }
 0x158   : > { %v746_v19 = vpop.f32.mrf.mxu0  ;;  %9783 = vmatmul.mubr.msk.bf16.gmra.mxu0 %vm524_vm3, %v1340_v32  ;;  %v1349_v32 = vsel %vm1256_vm5, %v1339_v12, %v1348_v35 }
 0x159   : > { %v1199_v36 = vpop.f32.mrf.mxu1  ;;  %9786 = vmatprep.mubr.msk.bf16.mxu0 %vm11313_vm1, %v15329_v57 }
 0x15a   : > { %v12355_v22 = vadd.f32 %v1199_v36, %v741_v21  ;;  %v9600_v14 = vpop.f32.mrf.mxu0  ;;  %v1992_v21 = vor.u32 %v1991_v27, %v1988_v1 }
 0x15b   : > { %v9683_v56 = vpop.f32.mrf.mxu1 }
 0x15c   : > { %v749_v37 = vpop.f32.mrf.mxu0  ;;  %v1993_v48 = vsel %vm1256_vm5, %v1983_v24, %v1992_v21 }
 0x15d   : > { %v1204_v39 = vpop.f32.mrf.mxu1  ;;  %9869 = vmatmul.mubr.msk.bf16.gmra.mxu1 %vm524_vm3, %v1984_v9 }
 0x15e   : > { %v12360_v5 = vadd.f32 %v1204_v39, %v746_v19  ;;  %9872 = vmatprep.mubr.msk.bf16.mxu1 %vm11313_vm1, %v15329_v57  ;;  %v9601_v34 = vpop.f32.mrf.mxu0 }
 0x15f   : > { %v9686_v63 = vpop.f32.mrf.mxu1 }
 0x160   : > { %v754_v13 = vpop.f32.mrf.mxu0  ;;  %9787 = vmatmul.mubr.msk.bf16.gmra.mxu0 %vm524_vm3, %v1349_v32 }
 0x161   : > { %v1207_v47 = vpop.f32.mrf.mxu1  ;;  %9790 = vmatprep.mubr.msk.bf16.mxu0 %vm11313_vm1, %v15329_v57 }
 0x162   : > { %v12366_v0 = vadd.f32 %v1207_v47, %v749_v37  ;;  %v9604_v45 = vpop.f32.mrf.mxu0 }
 0x163   : > { %v9687_v19 = vpop.f32.mrf.mxu1 }
 0x164   : > { %v757_v12 = vpop.f32.mrf.mxu0 }
 0x165   : > { %v1212_v36 = vpop.f32.mrf.mxu1  ;;  %9873 = vmatmul.mubr.msk.bf16.gmra.mxu1 %vm524_vm3, %v1993_v48 }
 0x166   : > { %v12372_v9 = vadd.f32 %v1212_v36, %v754_v13  ;;  %9876 = vmatprep.mubr.msk.bf16.mxu1 %vm11313_vm1, %v15329_v57  ;;  %v9605_v1 = vpop.f32.mrf.mxu0 }
 0x167   : > { %v9690_v27 = vpop.f32.mrf.mxu1 }
 0x168   : > { %v762_v14 = vpop.f32.mrf.mxu0  ;;  %9791 = vmatmul.mubr.msk.bf16.gmra.mxu0 %vm524_vm3, %v1348_v35 }
 0x169   : > { %v1215_v56 = vpop.f32.mrf.mxu1  ;;  %9882 = vmatprep.mubr.msk.bf16.mxu0 %vm11313_vm1, %v15329_v57 }
 0x16a   : > { %v12377_v24 = vadd.f32 %v1215_v56, %v757_v12  ;;  %v9608_v37 = vpop.f32.mrf.mxu0 }
 0x16b   : > { %v9691_v39 = vpop.f32.mrf.mxu1 }
 0x16c   : > { %v765_v32 = vpop.f32.mrf.mxu0 }
 0x16d   : > { %v1220_v34 = vpop.f32.mrf.mxu1  ;;  %9877 = vmatmul.mubr.msk.bf16.gmra.mxu1 %vm524_vm3, %v1992_v21 }
 0x16e   : > { %v12382_v63 = vadd.f32 %v1220_v34, %v762_v14  ;;  %9968 = vmatprep.mubr.msk.bf16.mxu1 %vm11313_vm1, %v15329_v57  ;;  %v9609_v13 = vpop.f32.mrf.mxu0 }
 0x16f   : > { %v9694_v47 = vpop.f32.mrf.mxu1 }
 0x170   : > { %v770_v48 = vpop.f32.mrf.mxu0  ;;  %9883 = vmatmul.mubr.msk.bf16.vlgmr.msra.gmra.mxu0 %vm524_vm3, %v11594_v38 }
 0x171   : > { %v1223_v35 = vpop.f32.mrf.mxu1  ;;  %9886 = vmatprep.mubr.msk.bf16.mxu0 %vm11313_vm1, %v15329_v57 }
 0x172   : > { %v12388_v45 = vadd.f32 %v1223_v35, %v765_v32  ;;  %v9612_v19 = vpop.f32.mrf.mxu0 }
 0x173   : > { %v9695_v12 = vpop.f32.mrf.mxu1 }
 0x174   : > { %v773_v21 = vpop.f32.mrf.mxu0 }
 0x175   : > { %v1228_v36 = vpop.f32.mrf.mxu1  ;;  %9969 = vmatmul.mubr.msk.bf16.vlgmr.msra.gmra.mxu1 %vm524_vm3, %v12028_v11 }
 0x176   : > { %v12394_v1 = vadd.f32 %v1228_v36, %v770_v48  ;;  %9972 = vmatprep.mubr.msk.bf16.mxu1 %vm11313_vm1, %v15329_v57  ;;  %v9613_v27 = vpop.f32.mrf.mxu0 }
 0x177   : > { %v9698_v14 = vpop.f32.mrf.mxu1 }
 0x178   : > { %v778_v38 = vpop.f32.mrf.mxu0  ;;  %9887 = vmatmul.mubr.msk.bf16.gmra.mxu0 %vm524_vm3, %v11629_v58 }
 0x179   : > { %v1231_v56 = vpop.f32.mrf.mxu1  ;;  %9890 = vmatprep.mubr.msk.bf16.mxu0 %vm11313_vm1, %v15329_v57 }
 0x17a   : > { %v12400_v37 = vadd.f32 %v1231_v56, %v773_v21  ;;  %v9616_v39 = vpop.f32.mrf.mxu0 }
 0x17b   : > { %v9699_v32 = vpop.f32.mrf.mxu1 }
 0x17c   : > { %v781_v11 = vpop.f32.mrf.mxu0 }
 0x17d   : > { %v1236_v34 = vpop.f32.mrf.mxu1  ;;  %9973 = vmatmul.mubr.msk.bf16.gmra.mxu1 %vm524_vm3, %v12054_v29 }
 0x17e   : > { %v12406_v13 = vadd.f32 %v1236_v34, %v778_v38  ;;  %9976 = vmatprep.mubr.msk.bf16.mxu1 %vm11313_vm1, %v15329_v57  ;;  %v9617_v47 = vpop.f32.mrf.mxu0 }
 0x17f   : > { %v9702_v48 = vpop.f32.mrf.mxu1 }
 0x180   : > { %v786_v58 = vpop.f32.mrf.mxu0  ;;  %9891 = vmatmul.mubr.msk.bf16.gmra.mxu0 %vm524_vm3, %v11664_v18  ;;  %v8798_v18 = vld [vmem:[%s15220_s1 + $0xc] sm:$0x3] }
 0x181   : > { %v1239_v35 = vpop.f32.mrf.mxu1  ;;  %9894 = vmatprep.mubr.msk.bf16.mxu0 %vm11313_vm1, %v15329_v57  ;;  %v3469_v56 = vsel %vm588_vm0, %v8798_v18, 0 }
 0x182   : > { %v12412_v19 = vadd.f32 %v1239_v35, %v781_v11  ;;  %v9620_v12 = vpop.f32.mrf.mxu0  ;;  %10053 = vmatpush3.bf16.msra.mxu0 %v3469_v56 }
 0x183   : > { %v9703_v21 = vpop.f32.mrf.mxu1  ;;  %10224 = vmatprep.subr.bf16.mxu0 %v15329_v57 }
 0x184   : > { %v789_v29 = vpop.f32.mrf.mxu0 }
 0x185   : > { %v1244_v36 = vpop.f32.mrf.mxu1  ;;  %9977 = vmatmul.mubr.msk.bf16.gmra.mxu1 %vm524_vm3, %v12080_v43 }
 0x186   : > { %v12418_v27 = vadd.f32 %v1244_v36, %v786_v58  ;;  %9980 = vmatprep.mubr.msk.bf16.mxu1 %vm11313_vm1, %v15329_v57  ;;  %v9621_v14 = vpop.f32.mrf.mxu0 }
 0x187   : > { %v9706_v38 = vpop.f32.mrf.mxu1 }
 0x188   : > { %v1450_v32 = vpop.f32.mrf.mxu0  ;;  %9895 = vmatmul.mubr.msk.bf16.gmra.mxu0 %vm524_vm3, %v11703_v53 }
 0x189   : > { %v1247_v39 = vpop.f32.mrf.mxu1  ;;  %v1616_v43 = vadd.f32 %v1450_v32, %v11987_v51  ;;  %9898 = vmatprep.mubr.msk.bf16.mxu0 %vm11313_vm1, %v15329_v57 }
 0x18a   : > { %v9712_v34 = vpop.f32.mrf.mxu0  ;;  %v8841_v39 = vld [vmem:[%s15220_s1 + $0xe] sm:$0x3] }
 0x18b   : > { %v9707_v11 = vpop.f32.mrf.mxu1 }
 0x18c   : > { %v1453_v47 = vpop.f32.mrf.mxu0 }
 0x18d   : > { %v2094_v48 = vpop.f32.mrf.mxu1  ;;  %9981 = vmatmul.mubr.msk.bf16.gmra.mxu1 %vm524_vm3, %v12109_v28  ;;  %v1617_v58 = vadd.f32 %v1453_v47, %v11995_v59 }
 0x18e   : > { %v12435_v35 = vadd.f32 %v2094_v48, %v1616_v43  ;;  %9984 = vmatprep.mubr.msk.bf16.mxu1 %vm11313_vm1, %v15329_v57  ;;  %v9713_v53 = vpop.f32.mrf.mxu0 }
 0x18f   : > { %v9798_v51 = vpop.f32.mrf.mxu1 }
 0x190   : > { %v1458_v12 = vpop.f32.mrf.mxu0  ;;  %9899 = vmatmul.mubr.msk.bf16.gmra.mxu0 %vm524_vm3, %v11737_v2 }
 0x191   : > { %v2097_v21 = vpop.f32.mrf.mxu1  ;;  %v1618_v29 = vadd.f32 %v1458_v12, %v12003_v60  ;;  %9902 = vmatprep.mubr.msk.bf16.mxu0 %vm11313_vm1, %v15329_v57 }
 0x192   : > { %v12442_v36 = vadd.f32 %v2097_v21, %v1617_v58  ;;  %v9716_v59 = vpop.f32.mrf.mxu0 }
 0x193   : > { %v9799_v28 = vpop.f32.mrf.mxu1 }
 0x194   : > { %v1461_v14 = vpop.f32.mrf.mxu0 }
 0x195   : > { %v2102_v38 = vpop.f32.mrf.mxu1  ;;  %9985 = vmatmul.mubr.msk.bf16.gmra.mxu1 %vm524_vm3, %v12138_v7  ;;  %v1619_v18 = vadd.f32 %v1461_v14, %v12022_v44  ;;  %v3824_v7 = vsel %vm588_vm0, %v8841_v39, 0 }
 0x196   : > { %v12449_v56 = vadd.f32 %v2102_v38, %v1618_v29  ;;  %9988 = vmatprep.mubr.msk.bf16.mxu1 %vm11313_vm1, %v15329_v57  ;;  %v9717_v2 = vpop.f32.mrf.mxu0  ;;  %10139 = vmatpush3.bf16.msra.mxu1 %v3824_v7 }
 0x197   : > { %v9802_v60 = vpop.f32.mrf.mxu1  ;;  %10310 = vmatprep.subr.bf16.mxu1 %v15329_v57 }
 0x198   : > { %v1466_v32 = vpop.f32.mrf.mxu0  ;;  %9903 = vmatmul.mubr.msk.bf16.gmra.mxu0 %vm524_vm3, %v11765_v26  ;;  %v11247_v60 = vld [vmem:[%s11435_s29 + $0x58] sm:$0xf] }
 0x199   : > { %v2105_v43 = vpop.f32.mrf.mxu1  ;;  %v1620_v44 = vadd.f32 %v1466_v32, %v12031_v46  ;;  %9906 = vmatprep.mubr.msk.bf16.mxu0 %vm11313_vm1, %v15329_v57  ;;  %v11246_v46 = vld [vmem:[%s11435_s29 + $0x50] sm:$0xf] }
 0x19a   : > { %v12460_v11 = vadd.f32 %v2105_v43, %v1619_v18  ;;  %v9720_v34 = vpop.f32.mrf.mxu0  ;;  %v8741_v51 = vcombine.low %v11246_v46, %v12041_v4 }
 0x19b   : > { %v9803_v47 = vpop.f32.mrf.mxu1 }
 0x19c   : > { %v1469_v48 = vpop.f32.mrf.mxu0  ;;  %v2693_v14 = vshll.u32 %v8741_v51, 16 }
 0x19d   : > { %v2110_v58 = vpop.f32.mrf.mxu1  ;;  %9989 = vmatmul.mubr.msk.bf16.gmra.mxu1 %vm524_vm3, %v12167_v55  ;;  %v1621_v26 = vadd.f32 %v1469_v48, %v12049_v40  ;;  %v2690_v40 = vshrl.u32 %v11803_v52, 16 }
 0x19e   : > { %v12468_v53 = vadd.f32 %v2110_v58, %v1620_v44  ;;  %9992 = vmatprep.mubr.msk.bf16.mxu1 %vm11313_vm1, %v15329_v57  ;;  %v9721_v12 = vpop.f32.mrf.mxu0  ;;  %v2695_v43 = vrot.slane %v2693_v14, 1 }
 0x19f   : > { %v9806_v21 = vpop.f32.mrf.mxu1  ;;  %v2692_v32 = vor.u32 %v2690_v40, %v12195_v15 }
 0x1a0   : > { %v1474_v29 = vpop.f32.mrf.mxu0  ;;  %9907 = vmatmul.mubr.msk.bf16.gmra.mxu0 %vm524_vm3, %v11799_v23  ;;  %v8742_v23 = vcombine.low %v11247_v60, %v12067_v49 }
 0x1a1   : > { %v2113_v59 = vpop.f32.mrf.mxu1  ;;  %v1622_v55 = vadd.f32 %v1474_v29, %v12057_v30  ;;  %9910 = vmatprep.mubr.msk.bf16.mxu0 %vm11313_vm1, %v15329_v57  ;;  %v2696_v58 = vsel %vm2637_vm6, %v2692_v32, %v2695_v43 }
 0x1a2   : > { %v12477_v28 = vadd.f32 %v2113_v59, %v1621_v26  ;;  %v9724_v38 = vpop.f32.mrf.mxu0  ;;  %v2700_v49 = vshll.u32 %v8742_v23, 16 }
 0x1a3   : > { %v9807_v4 = vpop.f32.mrf.mxu1 }
 0x1a4   : > { %v1477_v18 = vpop.f32.mrf.mxu0 }
 0x1a5   : > { %v2118_v2 = vpop.f32.mrf.mxu1  ;;  %9993 = vmatmul.mubr.msk.bf16.gmra.mxu1 %vm524_vm3, %v12199_v41  ;;  %v1623_v30 = vadd.f32 %v1477_v18, %v12075_v50  ;;  %v2697_v41 = vshrl.u32 %v8741_v51, 16 }
 0x1a6   : > { %v12487_v39 = vadd.f32 %v2118_v2, %v1622_v55  ;;  %9996 = vmatprep.mubr.msk.bf16.mxu1 %vm11313_vm1, %v15329_v57  ;;  %v9725_v7 = vpop.f32.mrf.mxu0 }
 0x1a7   : > { %v9810_v44 = vpop.f32.mrf.mxu1  ;;  %v2699_v21 = vor.u32 %v2697_v41, %v2695_v43 }
 0x1a8   : > { %v1482_v34 = vpop.f32.mrf.mxu0  ;;  %9911 = vmatmul.mubr.msk.bf16.gmra.mxu0 %vm524_vm3, %v11803_v52  ;;  %v2702_v52 = vrot.slane %v2700_v49, 1  ;;  %v15362_v44 = vld [vmem:[#allocation7_spill] sm:$0xff] }
 0x1a9   : > { %v2121_v47 = vpop.f32.mrf.mxu1  ;;  %v1624_v50 = vadd.f32 %v1482_v34, %v12083_v8  ;;  %9914 = vmatprep.mubr.msk.bf16.mxu0 %vm11313_vm1, %v15329_v57  ;;  %v11248_v8 = vld [vmem:[%s11435_s29 + $0x60] sm:$0xf] }
 0x1aa   : > { %v12495_v48 = vadd.f32 %v2121_v47, %v1623_v30  ;;  %v9728_v15 = vpop.f32.mrf.mxu0  ;;  %v8743_v55 = vcombine.low %v11248_v8, %v12093_v54  ;;  %v2703_v18 = vsel %vm2637_vm6, %v2699_v21, %v2702_v52 }
 0x1ab   : > { %v9811_v26 = vpop.f32.mrf.mxu1 }
 0x1ac   : > { %v1485_v46 = vpop.f32.mrf.mxu0  ;;  %v2707_v30 = vshll.u32 %v8743_v55, 16  ;;  %v2711_v26 = vshrl.u32 %v8743_v55, 16 }
 0x1ad   : > { %v2126_v12 = vpop.f32.mrf.mxu1  ;;  %9997 = vmatmul.mubr.msk.bf16.gmra.mxu1 %vm524_vm3, %v2696_v58  ;;  %v1625_v29 = vadd.f32 %v1485_v46, %v12104_v61  ;;  %v2704_v61 = vshrl.u32 %v8742_v23, 16 }
 0x1ae   : > { %v12502_v59 = vadd.f32 %v2126_v12, %v1624_v50  ;;  %10000 = vmatprep.mubr.msk.bf16.mxu1 %vm11313_vm1, %v15329_v57  ;;  %v9729_v40 = vpop.f32.mrf.mxu0  ;;  %v2709_v41 = vrot.slane %v2707_v30, 1  ;;  %v15363_v12 = vld [vmem:[#allocation8_spill] sm:$0xff] }
 0x1af   : > { %v9814_v14 = vpop.f32.mrf.mxu1 }
 0x1b0   : > { %v1490_v38 = vpop.f32.mrf.mxu0  ;;  %9915 = vmatmul.mubr.msk.bf16.gmra.mxu0 %vm524_vm3, %v8741_v51  ;;  %v8744_v51 = vcombine.low %v12096_v62, %v12122_v25  ;;  %v2713_v14 = vor.u32 %v2711_v26, %v2709_v41 }
 0x1b1   : > { %v2129_v4 = vpop.f32.mrf.mxu1  ;;  %v1626_v2 = vadd.f32 %v1490_v38, %v12112_v6  ;;  %9918 = vmatprep.mubr.msk.bf16.mxu0 %vm11313_vm1, %v15329_v57  ;;  %v2706_v6 = vor.u32 %v2704_v61, %v2702_v52  ;;  %v15366_v61 = vld [vmem:[#allocation6_spill] sm:$0xff] }
 0x1b2   : > { %v12511_v60 = vadd.f32 %v2129_v4, %v1625_v29  ;;  %v9732_v32 = vpop.f32.mrf.mxu0  ;;  %v2714_v46 = vshll.u32 %v8744_v51, 16 }
 0x1b3   : > { %v9815_v43 = vpop.f32.mrf.mxu1  ;;  %v2710_v25 = vsel %vm2637_vm6, %v2706_v6, %v2709_v41 }
 0x1b4   : > { %v1493_v54 = vpop.f32.mrf.mxu0  ;;  %v2716_v38 = vrot.slane %v2714_v46, 1 }
 0x1b5   : > { %v2134_v7 = vpop.f32.mrf.mxu1  ;;  %10001 = vmatmul.mubr.msk.bf16.gmra.mxu1 %vm524_vm3, %v2703_v18  ;;  %v1627_v34 = vadd.f32 %v1493_v54, %v15362_v44 }
 0x1b6   : > { %v12519_v47 = vadd.f32 %v2134_v7, %v1626_v2  ;;  %10004 = vmatprep.mubr.msk.bf16.mxu1 %vm11313_vm1, %v15329_v57  ;;  %v9733_v49 = vpop.f32.mrf.mxu0  ;;  %v15365_v2 = vld [vmem:[#allocation9_spill] sm:$0xff]  ;;  %v2717_v44 = vsel %vm2637_vm6, %v2713_v14, %v2716_v38 }
 0x1b7   : > { %v9818_v50 = vpop.f32.mrf.mxu1  ;;  %v8745_v30 = vcombine.low %v15366_v61, %v15365_v2  ;;  %v2718_v49 = vshrl.u32 %v8744_v51, 16  ;;  %v15369_v61 = vld [vmem:[#allocation14_spill] sm:$0xff] }
 0x1b8   : > { %v1498_v58 = vpop.f32.mrf.mxu0  ;;  %9919 = vmatmul.mubr.msk.bf16.gmra.mxu0 %vm524_vm3, %v8742_v23  ;;  %v15364_v23 = vld [vmem:[#allocation11_spill] sm:$0xff] }
 0x1b9   : > { %v2137_v15 = vpop.f32.mrf.mxu1  ;;  %v1628_v21 = vadd.f32 %v1498_v58, %v15363_v12  ;;  %9922 = vmatprep.mubr.msk.bf16.mxu0 %vm11313_vm1, %v15329_v57  ;;  %v2721_v50 = vshll.u32 %v8745_v30, 16  ;;  %v15368_v12 = vld [vmem:[#allocation10_spill] sm:$0xff] }
 0x1ba   : > { %v12525_v62 = vadd.f32 %v2137_v15, %v1627_v34  ;;  %v9736_v29 = vpop.f32.mrf.mxu0  ;;  %v15367_v34 = vld [vmem:[#allocation12_spill] sm:$0xff] }
 0x1bb   : > { %v9819_v52 = vpop.f32.mrf.mxu1  ;;  %v2720_v29 = vor.u32 %v2718_v49, %v2716_v38  ;;  %v15370_v49 = vld [vmem:[#allocation15_spill] sm:$0xff] }
 0x1bc   : > { %v1501_v8 = vpop.f32.mrf.mxu0  ;;  %v2723_v52 = vrot.slane %v2721_v50, 1  ;;  %v15371_v50 = vld [vmem:[#allocation13_spill] sm:$0xff] }
 0x1bd   : > { %v2142_v40 = vpop.f32.mrf.mxu1  ;;  %10005 = vmatmul.mubr.msk.bf16.gmra.mxu1 %vm524_vm3, %v2710_v25  ;;  %v1629_v4 = vadd.f32 %v1501_v8, %v15364_v23 }
 0x1be   : > { %v12532_v18 = vadd.f32 %v2142_v40, %v1628_v21  ;;  %10008 = vmatprep.mubr.msk.bf16.mxu1 %vm11313_vm1, %v15329_v57  ;;  %v9737_v32 = vpop.f32.mrf.mxu0 }
 0x1bf   : > { %v9822_v43 = vpop.f32.mrf.mxu1 }
 0x1c0   : > { %v1506_v54 = vpop.f32.mrf.mxu0  ;;  %9923 = vmatmul.mubr.msk.bf16.gmra.mxu0 %vm524_vm3, %v8743_v55  ;;  %v8746_v55 = vcombine.low %v15368_v12, %v12180_v42 }
 0x1c1   : > { %v2145_v7 = vpop.f32.mrf.mxu1  ;;  %v1630_v6 = vadd.f32 %v1506_v54, %v15367_v34  ;;  %9926 = vmatprep.mubr.msk.bf16.mxu0 %vm11313_vm1, %v15329_v57 }
 0x1c2   : > { %v12541_v41 = vadd.f32 %v2145_v7, %v1629_v4  ;;  %v9740_v58 = vpop.f32.mrf.mxu0  ;;  %v2725_v4 = vshrl.u32 %v8745_v30, 16  ;;  %v2728_v2 = vshll.u32 %v8746_v55, 16 }
 0x1c3   : > { %v9823_v15 = vpop.f32.mrf.mxu1  ;;  %v8747_v58 = vcombine.low %v15371_v50, %v15370_v49 }
 0x1c4   : > { %v1509_v26 = vpop.f32.mrf.mxu0  ;;  %v2730_v34 = vrot.slane %v2728_v2, 1 }
 0x1c5   : > { %v2150_v46 = vpop.f32.mrf.mxu1  ;;  %10009 = vmatmul.mubr.msk.bf16.gmra.mxu1 %vm524_vm3, %v2717_v44  ;;  %v1631_v21 = vadd.f32 %v1509_v26, %v12191_v17  ;;  %v2724_v17 = vsel %vm2637_vm6, %v2720_v29, %v2723_v52  ;;  %v2727_v44 = vor.u32 %v2725_v4, %v2723_v52  ;;  %v15372_v29 = vld [vmem:[#allocation17_spill] sm:$0xff] }
 0x1c6   : > { %v12549_v25 = vadd.f32 %v2150_v46, %v1630_v6  ;;  %10012 = vmatprep.mubr.msk.bf16.mxu1 %vm11313_vm1, %v15329_v57  ;;  %v9741_v8 = vpop.f32.mrf.mxu0 }
 0x1c7   : > { %v9826_v40 = vpop.f32.mrf.mxu1 }
 0x1c8   : > { %v1514_v14 = vpop.f32.mrf.mxu0  ;;  %9927 = vmatmul.mubr.msk.bf16.gmra.mxu0 %vm524_vm3, %v8744_v51  ;;  %v2735_v40 = vshll.u32 %v8747_v58, 16 }
 0x1c9   : > { %v2153_v23 = vpop.f32.mrf.mxu1  ;;  %v1632_v32 = vadd.f32 %v1514_v14, %v15369_v61  ;;  %9930 = vmatprep.mubr.msk.bf16.mxu0 %vm11313_vm1, %v15329_v57  ;;  %v15373_v61 = vld [vmem:[#allocation18_spill] sm:$0xff] }
 0x1ca   : > { %v12555_v42 = vadd.f32 %v2153_v23, %v1631_v21  ;;  %v9744_v43 = vpop.f32.mrf.mxu0  ;;  %v2731_v21 = vsel %vm2637_vm6, %v2727_v44, %v2730_v34 }
 0x1cb   : > { %v9827_v38 = vpop.f32.mrf.mxu1 }
 0x1cc   : > { %v1517_v54 = vpop.f32.mrf.mxu0 }
 0x1cd   : > { %v2158_v7 = vpop.f32.mrf.mxu1  ;;  %10013 = vmatmul.mubr.msk.bf16.gmra.mxu1 %vm524_vm3, %v2724_v17  ;;  %v1633_v51 = vadd.f32 %v1517_v54, %v12218_v33  ;;  %v2732_v33 = vshrl.u32 %v8746_v55, 16  ;;  %v15375_v17 = vld [vmem:[#allocation20_spill] sm:$0xff] }
 0x1ce   : > { %v12562_v6 = vadd.f32 %v2158_v7, %v1632_v32  ;;  %10016 = vmatprep.mubr.msk.bf16.mxu1 %vm11313_vm1, %v15329_v57  ;;  %v9745_v15 = vpop.f32.mrf.mxu0  ;;  %v15374_v32 = vld [vmem:[#allocation16_spill] sm:$0xff]  ;;  %v2737_v7 = vrot.slane %v2735_v40, 1 }
 0x1cf   : > { %v9830_v26 = vpop.f32.mrf.mxu1  ;;  %v2734_v54 = vor.u32 %v2732_v33, %v2730_v34  ;;  %v2739_v15 = vshrl.u32 %v8747_v58, 16 }
 0x1d0   : > { %v1522_v46 = vpop.f32.mrf.mxu0  ;;  %9931 = vmatmul.mubr.msk.bf16.gmra.mxu0 %vm524_vm3, %v8745_v30  ;;  %v8748_v30 = vcombine.low %v15374_v32, %v15373_v61 }
 0x1d1   : > { %v2161_v12 = vpop.f32.mrf.mxu1  ;;  %v1634_v52 = vadd.f32 %v1522_v46, %v15372_v29  ;;  %9934 = vmatprep.mubr.msk.bf16.mxu0 %vm11313_vm1, %v15329_v57  ;;  %v2741_v40 = vor.u32 %v2739_v15, %v2737_v7 }
 0x1d2   : > { %v12571_v8 = vadd.f32 %v2161_v12, %v1633_v51  ;;  %v9748_v14 = vpop.f32.mrf.mxu0  ;;  %v2742_v26 = vshll.u32 %v8748_v30, 16 }
 0x1d3   : > { %v9831_v23 = vpop.f32.mrf.mxu1 }
 0x1d4   : > { %v1525_v4 = vpop.f32.mrf.mxu0  ;;  %v2744_v14 = vrot.slane %v2742_v26, 1 }
 0x1d5   : > { %v2166_v2 = vpop.f32.mrf.mxu1  ;;  %10017 = vmatmul.mubr.msk.bf16.gmra.mxu1 %vm524_vm3, %v2731_v21  ;;  %v1635_v43 = vadd.f32 %v1525_v4, %v15375_v17  ;;  %v2738_v21 = vsel %vm2637_vm6, %v2734_v54, %v2737_v7  ;;  %v15377_v4 = vld [vmem:[#allocation19_spill] sm:$0xff] }
 0x1d6   : > { %v12579_v38 = vadd.f32 %v2166_v2, %v1634_v52  ;;  %10020 = vmatprep.mubr.msk.bf16.mxu1 %vm11313_vm1, %v15329_v57  ;;  %v9749_v44 = vpop.f32.mrf.mxu0  ;;  %v2745_v54 = vsel %vm2637_vm6, %v2741_v40, %v2744_v14  ;;  %v15378_v7 = vld [vmem:[#allocation23_spill] sm:$0xff] }
 0x1d7   : > { %v9834_v51 = vpop.f32.mrf.mxu1 }
 0x1d8   : > { %v1530_v49 = vpop.f32.mrf.mxu0  ;;  %9935 = vmatmul.mubr.msk.bf16.gmra.mxu0 %vm524_vm3, %v8746_v55 }
 0x1d9   : > { %v2169_v50 = vpop.f32.mrf.mxu1  ;;  %v1636_v46 = vadd.f32 %v1530_v49, %v12255_v16  ;;  %9938 = vmatprep.mubr.msk.bf16.mxu0 %vm11313_vm1, %v15329_v57  ;;  %v15376_v16 = vld [vmem:[#allocation21_spill] sm:$0xff] }
 0x1da   : > { %v12585_v12 = vadd.f32 %v2169_v50, %v1635_v43  ;;  %v9752_v29 = vpop.f32.mrf.mxu0  ;;  %v8749_v2 = vcombine.low %v15377_v4, %v15376_v16 }
 0x1db   : > { %v9835_v34 = vpop.f32.mrf.mxu1  ;;  %v15380_v29 = vld [vmem:[#allocation22_spill] sm:$0xff] }
 0x1dc   : > { %v1533_v52 = vpop.f32.mrf.mxu0  ;;  %v2749_v49 = vshll.u32 %v8749_v2, 16  ;;  %v15381_v34 = vld [vmem:[#allocation26_spill] sm:$0xff] }
 0x1dd   : > { %v2174_v33 = vpop.f32.mrf.mxu1  ;;  %10021 = vmatmul.mubr.msk.bf16.gmra.mxu1 %vm524_vm3, %v2738_v21  ;;  %v1637_v55 = vadd.f32 %v1533_v52, %v12268_v31  ;;  %v2746_v31 = vshrl.u32 %v8748_v30, 16  ;;  %v15379_v21 = vld [vmem:[#allocation24_spill] sm:$0xff] }
 0x1de   : > { %v12592_v23 = vadd.f32 %v2174_v33, %v1636_v46  ;;  %10024 = vmatprep.mubr.msk.bf16.mxu1 %vm11313_vm1, %v15329_v57  ;;  %v9753_v61 = vpop.f32.mrf.mxu0 }
 0x1df   : > { %v9838_v32 = vpop.f32.mrf.mxu1  ;;  %v2748_v40 = vor.u32 %v2746_v31, %v2744_v14 }
 0x1e0   : > { %v1538_v17 = vpop.f32.mrf.mxu0  ;;  %9939 = vmatmul.mubr.msk.bf16.gmra.mxu0 %vm524_vm3, %v8747_v58  ;;  %v8750_v58 = vcombine.low %v15380_v29, %v15379_v21 }
 0x1e1   : > { %v2177_v43 = vpop.f32.mrf.mxu1  ;;  %v1638_v44 = vadd.f32 %v1538_v17, %v15378_v7  ;;  %9942 = vmatprep.mubr.msk.bf16.mxu0 %vm11313_vm1, %v15329_v57  ;;  %v2753_v17 = vshrl.u32 %v8749_v2, 16 }
 0x1e2   : > { %v12601_v51 = vadd.f32 %v2177_v43, %v1637_v55  ;;  %v9756_v50 = vpop.f32.mrf.mxu0  ;;  %v2751_v55 = vrot.slane %v2749_v49, 1  ;;  %v2756_v43 = vshll.u32 %v8750_v58, 16 }
 0x1e3   : > { %v9839_v15 = vpop.f32.mrf.mxu1 }
 0x1e4   : > { %v1541_v26 = vpop.f32.mrf.mxu0 }
 0x1e5   : > { %v2182_v46 = vpop.f32.mrf.mxu1  ;;  %10025 = vmatmul.mubr.msk.bf16.gmra.mxu1 %vm524_vm3, %v2745_v54  ;;  %v1639_v52 = vadd.f32 %v1541_v26, %v15381_v34  ;;  %v15382_v54 = vld [vmem:[#allocation27_spill] sm:$0xff]  ;;  %v2755_v26 = vor.u32 %v2753_v17, %v2751_v55  ;;  %v15384_v34 = vld [vmem:[#allocation28_spill] sm:$0xff] }
 0x1e6   : > { %v12609_v33 = vadd.f32 %v2182_v46, %v1638_v44  ;;  %10028 = vmatprep.mubr.msk.bf16.mxu1 %vm11313_vm1, %v15329_v57  ;;  %v9757_v16 = vpop.f32.mrf.mxu0  ;;  %v2752_v44 = vsel %vm2637_vm6, %v2748_v40, %v2751_v55  ;;  %v2758_v46 = vrot.slane %v2756_v43, 1  ;;  %v15386_v55 = vld [vmem:[#allocation31_spill] sm:$0xff] }
 0x1e7   : > { %v9842_v4 = vpop.f32.mrf.mxu1 }
 0x1e8   : > { %v1546_v61 = vpop.f32.mrf.mxu0  ;;  %9943 = vmatmul.mubr.msk.bf16.gmra.mxu0 %vm524_vm3, %v8748_v30  ;;  %v15383_v30 = vld [vmem:[#allocation30_spill] sm:$0xff] }
 0x1e9   : > { %v2185_v32 = vpop.f32.mrf.mxu1  ;;  %v1640_v7 = vadd.f32 %v1546_v61, %v15382_v54  ;;  %9946 = vmatprep.mubr.msk.bf16.mxu0 %vm11313_vm1, %v15329_v57  ;;  %v2759_v54 = vsel %vm2637_vm6, %v2755_v26, %v2758_v46 }
 0x1ea   : > { %v12615_v50 = vadd.f32 %v2185_v32, %v1639_v52  ;;  %v9760_v15 = vpop.f32.mrf.mxu0  ;;  %v15385_v52 = vld [vmem:[#allocation25_spill] sm:$0xff] }
 0x1eb   : > { %v9843_v14 = vpop.f32.mrf.mxu1  ;;  %v8751_v40 = vcombine.low %v15385_v52, %v15384_v34 }
 0x1ec   : > { %v1549_v31 = vpop.f32.mrf.mxu0 }
 0x1ed   : > { %v2190_v49 = vpop.f32.mrf.mxu1  ;;  %10029 = vmatmul.mubr.msk.bf16.gmra.mxu1 %vm524_vm3, %v2752_v44  ;;  %v1641_v21 = vadd.f32 %v1549_v31, %v15383_v30  ;;  %v2763_v44 = vshll.u32 %v8751_v40, 16  ;;  %v15387_v30 = vld [vmem:[#allocation29_spill] sm:$0xff] }
 0x1ee   : > { %v12622_v29 = vadd.f32 %v2190_v49, %v1640_v7  ;;  %10032 = vmatprep.mubr.msk.bf16.mxu1 %vm11313_vm1, %v15329_v57  ;;  %v9761_v16 = vpop.f32.mrf.mxu0  ;;  %v2760_v7 = vshrl.u32 %v8750_v58, 16 }
 0x1ef   : > { %v9846_v4 = vpop.f32.mrf.mxu1  ;;  %v2765_v52 = vrot.slane %v2763_v44, 1 }
 0x1f0   : > { %v1554_v61 = vpop.f32.mrf.mxu0  ;;  %9947 = vmatmul.mubr.msk.bf16.gmra.mxu0 %vm524_vm3, %v8749_v2  ;;  %v8752_v2 = vcombine.low %v15387_v30, %v12334_v10 }
 0x1f1   : > { %v2193_v32 = vpop.f32.mrf.mxu1  ;;  %v1642_v17 = vadd.f32 %v1554_v61, %v15386_v55  ;;  %9950 = vmatprep.mubr.msk.bf16.mxu0 %vm11313_vm1, %v15329_v57  ;;  %v2767_v55 = vshrl.u32 %v8751_v40, 16 }
 0x1f2   : > { %v12631_v43 = vadd.f32 %v2193_v32, %v1641_v21  ;;  %v9764_v15 = vpop.f32.mrf.mxu0  ;;  %v2762_v21 = vor.u32 %v2760_v7, %v2758_v46 }
 0x1f3   : > { %v9847_v14 = vpop.f32.mrf.mxu1 }
 0x1f4   : > { %v1557_v31 = vpop.f32.mrf.mxu0  ;;  %v2769_v14 = vor.u32 %v2767_v55, %v2765_v52  ;;  %v3092_v55 = vld [vmem:[%s11435_s29 + $0x18] sm:$0xf] }
 0x1f5   : > { %v2198_v49 = vpop.f32.mrf.mxu1  ;;  %10033 = vmatmul.mubr.msk.bf16.gmra.mxu1 %vm524_vm3, %v2759_v54  ;;  %v1643_v26 = vadd.f32 %v1557_v31, %v12340_v20  ;;  %v2770_v54 = vshll.u32 %v8752_v2, 16  ;;  %v2766_v20 = vsel %vm2637_vm6, %v2762_v21, %v2765_v52 }
 0x1f6   : > { %v12639_v34 = vadd.f32 %v2198_v49, %v1642_v17  ;;  %10036 = vmatprep.mubr.msk.bf16.mxu1 %vm11313_vm1, %v15329_v57  ;;  %v9765_v16 = vpop.f32.mrf.mxu0  ;;  %v11221_v49 = vld [vmem:[%s11435_s29 + $0xb0] ss:$0 sps:$4 sm:$0x77]  }
 0x1f7   : > { %v9850_v4 = vpop.f32.mrf.mxu1 }
 0x1f8   : > { %v1562_v61 = vpop.f32.mrf.mxu0  ;;  %9951 = vmatmul.mubr.msk.bf16.gmra.mxu0 %vm524_vm3, %v8750_v58  ;;  %v2772_v58 = vrot.slane %v2770_v54, 1  ;;  %v3093_v54 = vld [vmem:[%s11435_s29 + $0x1c] sm:$0xf] }
 0x1f9   : > { %v2201_v32 = vpop.f32.mrf.mxu1  ;;  %v1644_v10 = vadd.f32 %v1562_v61, %v12349_v3  ;;  %9954 = vmatprep.mubr.msk.bf16.mxu0 %vm11313_vm1, %v15329_v57 }
 0x1fa   : > { %v12645_v15 = vadd.f32 %v2201_v32, %v1643_v26  ;;  %v9768_v46 = vpop.f32.mrf.mxu0  ;;  %v2773_v4 = vsel %vm2637_vm6, %v2769_v14, %v2772_v58  ;;  %v2778_v32 = vshll.u32 %v11221_v49, 16 }
 0x1fb   : > { %v9851_v17 = vpop.f32.mrf.mxu1 }
 0x1fc   : > { %v1565_v7 = vpop.f32.mrf.mxu0  ;;  %v2780_v14 = vrot.slane %v2778_v32, 1 }
 0x1fd   : > { %v2206_v44 = vpop.f32.mrf.mxu1  ;;  %10037 = vmatmul.mubr.msk.bf16.gmra.mxu1 %vm524_vm3, %v2766_v20  ;;  %v1645_v31 = vadd.f32 %v1565_v7, %v12355_v22  ;;  %v2774_v22 = vshrl.u32 %v8752_v2, 16 }
 0x1fe   : > { %v12652_v3 = vadd.f32 %v2206_v44, %v1644_v10  ;;  %10040 = vmatprep.mubr.msk.bf16.mxu1 %vm11313_vm1, %v15329_v57  ;;  %v9769_v30 = vpop.f32.mrf.mxu0 }
 0x1ff   : > { %v9854_v26 = vpop.f32.mrf.mxu1  ;;  %v2776_v44 = vor.u32 %v2774_v22, %v2772_v58  ;;  %v15388_v22 = vld [vmem:[#allocation32_spill] sm:$0xff] }
 0x200   : > { %v1570_v21 = vpop.f32.mrf.mxu0  ;;  %9955 = vmatmul.mubr.msk.bf16.gmra.mxu0 %vm524_vm3, %v8751_v40  ;;  %v8799_v40 = vcombine.low %v3092_v55, %v3093_v54  ;;  %v8753_v32 = vcombine.low %v15388_v22, %v15388_v22 }
 0x201   : > { %v2209_v16 = vpop.f32.mrf.mxu1  ;;  %v1646_v52 = vadd.f32 %v1570_v21, %v12360_v5  ;;  %9958 = vmatprep.mubr.msk.bf16.mxu0 %vm11313_vm1, %v15329_v57 }
 0x202   : > { %v12660_v61 = vadd.f32 %v2209_v16, %v1645_v31  ;;  %v9772_v10 = vpop.f32.mrf.mxu0  ;;  %v12674_v16 = vld [vmem:[%s11435_s29 + $0x20] sm:$0xff]  }
 0x203   : > { %v9855_v20 = vpop.f32.mrf.mxu1  ;;  %v3241_v10 = vshll.u32 %v8799_v40, 16 }
 0x204   : > { %v1573_v46 = vpop.f32.mrf.mxu0 }
 0x205   : > { %v2214_v17 = vpop.f32.mrf.mxu1  ;;  %10041 = vmatmul.mubr.msk.bf16.gmra.mxu1 %vm524_vm3, %v2773_v4  ;;  %v1647_v7 = vadd.f32 %v1573_v46, %v12366_v0  ;;  %v2781_v0 = vsel %vm2637_vm6, %v2776_v44, %v2780_v14  ;;  %v2782_v46 = vshrl.u32 %v11221_v49, 16 }
 0x206   : > { %v12668_v5 = vadd.f32 %v2214_v17, %v1646_v52  ;;  %10044 = vmatprep.mubr.msk.bf16.mxu1 %vm11313_vm1, %v15329_v57  ;;  %v9773_v31 = vpop.f32.mrf.mxu0  ;;  %v3243_v17 = vrot.slane %v3241_v10, 1  ;;  %v12696_v10 = vld [vmem:[%s11435_s29 + $0x28] sm:$0xff]  }
 0x207   : > { %v9858_v30 = vpop.f32.mrf.mxu1  ;;  %v2784_v49 = vor.u32 %v2782_v46, %v2780_v14  ;;  %v15275_v46 = vshrl.u32 %v12674_v16, 16 }
 0x208   : > { %v1578_v26 = vpop.f32.mrf.mxu0  ;;  %9959 = vmatmul.mubr.msk.bf16.gmra.mxu0 %vm524_vm3, %v8752_v2 }
 0x209   : > { %v2217_v21 = vpop.f32.mrf.mxu1  ;;  %v1648_v4 = vadd.f32 %v1578_v26, %v12372_v9  ;;  %9962 = vmatprep.mubr.msk.bf16.mxu0 %vm11313_vm1, %v15329_v57  ;;  %v3239_v9 = vshrl.u32 %v8799_v40, 16 }
 0x20a   : > { %v12677_v55 = vadd.f32 %v2217_v21, %v1647_v7  ;;  %v9776_v58 = vpop.f32.mrf.mxu0  ;;  %v15272_v7 = vshll.u32 %v12674_v16, 16  ;;  %v3712_v21 = vld [vmem:[%s11435_s29 + $0x18] sm:$0xe] }
 0x20b   : > { %v9859_v52 = vpop.f32.mrf.mxu1  ;;  %v12703_v22 = vcombine.low %v3712_v21, %v3093_v54 }
 0x20c   : > { %v1581_v20 = vpop.f32.mrf.mxu0  ;;  %v3248_v40 = vrot.slane %v15272_v7, 1 }
 0x20d   : > { %v2222_v2 = vpop.f32.mrf.mxu1  ;;  %10045 = vmatmul.mubr.msk.bf16.gmra.mxu1 %vm524_vm3, %v2781_v0  ;;  %v1649_v44 = vadd.f32 %v1581_v20, %v12377_v24  ;;  %v3244_v0 = vor.u32 %v3243_v17, %v3239_v9  ;;  %v15271_v9 = vshll.u32 %v12696_v10, 16  ;;  %v3719_v54 = vrot.slane %v12703_v22, 1 }
 0x20e   : > { %v12687_v31 = vadd.f32 %v2222_v2, %v1648_v4  ;;  %10048 = vmatprep.mubr.msk.bf16.mxu1 %vm11313_vm1, %v15329_v57  ;;  %v9777_v30 = vpop.f32.mrf.mxu0 }
 0x20f   : > { %v9862_v26 = vpop.f32.mrf.mxu1  ;;  %v3249_v14 = vsel %vm2637_vm6, %v3244_v0, %v3248_v40 }
 0x210   : > { %v1586_v58 = vpop.f32.mrf.mxu0  ;;  %9963 = vmatmul.mubr.msk.bf16.gmra.mxu0 %vm524_vm3, %v8753_v32 }
 0x211   : > { %v2225_v52 = vpop.f32.mrf.mxu1  ;;  %v1650_v24 = vadd.f32 %v1586_v58, %v12382_v63  ;;  %10054 = vmatprep.mubr.msk.bf16.mxu0 %vm11313_vm1, %v15329_v57 }
 0x212   : > { %v12699_v4 = vadd.f32 %v2225_v52, %v1649_v44  ;;  %v9780_v20 = vpop.f32.mrf.mxu0  ;;  %v3720_v44 = vrot.slane %v12674_v16, 1 }
 0x213   : > { %v9863_v2 = vpop.f32.mrf.mxu1 }
 0x214   : > { %v1589_v30 = vpop.f32.mrf.mxu0  ;;  %v3721_v20 = vsel %vm3718_vm7, %v3719_v54, %v3720_v44  ;;  %v12728_v2 = vld [vmem:[%s11435_s29 + $0x30] sm:$0xff]   ;;  %v15274_v54 = vshrl.u32 %v12696_v10, 16 }
 0x215   : > { %v2230_v32 = vpop.f32.mrf.mxu1  ;;  %10049 = vmatmul.mubr.msk.bf16.gmra.mxu1 %vm524_vm3, %v2784_v49  ;;  %v1651_v63 = vadd.f32 %v1589_v30, %v12388_v45  ;;  %v3252_v45 = vor.u32 %v15275_v46, %v3248_v40  ;;  %v3256_v49 = vrot.slane %v15271_v9, 1 }
 0x216   : > { %v12710_v17 = vadd.f32 %v2230_v32, %v1650_v24  ;;  %10140 = vmatprep.mubr.msk.bf16.mxu1 %vm11313_vm1, %v15329_v57  ;;  %v9781_v26 = vpop.f32.mrf.mxu0 }
 0x217   : > { %v9866_v21 = vpop.f32.mrf.mxu1  ;;  %v3257_v40 = vsel %vm2637_vm6, %v3252_v45, %v3256_v49 }
 0x218   : > { %v1594_v58 = vpop.f32.mrf.mxu0  ;;  %10055 = vmatmul.mubr.msk.bf16.vlgmr.msra.gmra.mxu0 %vm524_vm3, %v3249_v14 }
 0x219   : > { %v2233_v52 = vpop.f32.mrf.mxu1  ;;  %v1652_v0 = vadd.f32 %v1594_v58, %v12394_v1  ;;  %10058 = vmatprep.mubr.msk.bf16.mxu0 %vm11313_vm1, %v15329_v57  ;;  %v3722_v1 = vrot.slane %v12696_v10, 1  ;;  %v15273_v58 = vshll.u32 %v12728_v2, 16 }
 0x21a   : > { %v12722_v24 = vadd.f32 %v2233_v52, %v1651_v63  ;;  %v9784_v30 = vpop.f32.mrf.mxu0 }
 0x21b   : > { %v9867_v32 = vpop.f32.mrf.mxu1  ;;  %v3723_v45 = vsel %vm3718_vm7, %v3720_v44, %v3722_v1  ;;  %v15279_v44 = vshrl.u32 %v12728_v2, 16 }
 0x21c   : > { %v1597_v14 = vpop.f32.mrf.mxu0 }
 0x21d   : > { %v2238_v26 = vpop.f32.mrf.mxu1  ;;  %10141 = vmatmul.mubr.msk.bf16.vlgmr.msra.gmra.mxu1 %vm524_vm3, %v3721_v20  ;;  %v1653_v63 = vadd.f32 %v1597_v14, %v12400_v37  ;;  %v12743_v20 = vld [vmem:[%s11435_s29 + $0x38] sm:$0xff]   ;;  %v3260_v14 = vor.u32 %v15274_v54, %v3256_v49 }
 0x21e   : > { %v12734_v21 = vadd.f32 %v2238_v26, %v1652_v0  ;;  %10144 = vmatprep.mubr.msk.bf16.mxu1 %vm11313_vm1, %v15329_v57  ;;  %v9785_v52 = vpop.f32.mrf.mxu0  ;;  %v3264_v26 = vrot.slane %v15273_v58, 1 }
 0x21f   : > { %v9870_v30 = vpop.f32.mrf.mxu1 }
 0x220   : > { %v1602_v32 = vpop.f32.mrf.mxu0  ;;  %10059 = vmatmul.mubr.msk.bf16.gmra.mxu0 %vm524_vm3, %v3257_v40  ;;  %v3265_v49 = vsel %vm2637_vm6, %v3260_v14, %v3264_v26  ;;  %v3268_v54 = vor.u32 %v15279_v44, %v3264_v26 }
 0x221   : > { %v2241_v9 = vpop.f32.mrf.mxu1  ;;  %v1654_v37 = vadd.f32 %v1602_v32, %v12406_v13  ;;  %10062 = vmatprep.mubr.msk.bf16.mxu0 %vm11313_vm1, %v15329_v57  ;;  %v15276_v13 = vshll.u32 %v12743_v20, 16  ;;  %v3724_v32 = vrot.slane %v12728_v2, 1 }
 0x222   : > { %v12746_v0 = vadd.f32 %v2241_v9, %v1653_v63  ;;  %v9788_v52 = vpop.f32.mrf.mxu0 }
 0x223   : > { %v9871_v30 = vpop.f32.mrf.mxu1  ;;  %v3725_v14 = vsel %vm3718_vm7, %v3722_v1, %v3724_v32  ;;  %v15277_v1 = vshrl.u32 %v12743_v20, 16 }
 0x224   : > { %v1605_v40 = vpop.f32.mrf.mxu0 }
 0x225   : > { %v2246_v7 = vpop.f32.mrf.mxu1  ;;  %10145 = vmatmul.mubr.msk.bf16.gmra.mxu1 %vm524_vm3, %v3723_v45  ;;  %v1655_v9 = vadd.f32 %v1605_v40, %v12412_v19  ;;  %v3272_v19 = vrot.slane %v15276_v13, 1  ;;  %v12776_v40 = vld [vmem:[%s11435_s29 + $0x40] sm:$0xff]  }
 0x226   : > { %v12758_v63 = vadd.f32 %v2246_v7, %v1654_v37  ;;  %10148 = vmatprep.mubr.msk.bf16.mxu1 %vm11313_vm1, %v15329_v57  ;;  %v9789_v52 = vpop.f32.mrf.mxu0 }
 0x227   : > { %v9874_v30 = vpop.f32.mrf.mxu1  ;;  %v3273_v26 = vsel %vm2637_vm6, %v3268_v54, %v3272_v19 }
 0x228   : > { %v1610_v58 = vpop.f32.mrf.mxu0  ;;  %10063 = vmatmul.mubr.msk.bf16.gmra.mxu0 %vm524_vm3, %v3265_v49 }
 0x229   : > { %v2249_v45 = vpop.f32.mrf.mxu1  ;;  %v1656_v7 = vadd.f32 %v1610_v58, %v12418_v27  ;;  %10066 = vmatprep.mubr.msk.bf16.mxu0 %vm11313_vm1, %v15329_v57  ;;  %v3726_v27 = vrot.slane %v12743_v20, 1  ;;  %v15278_v58 = vshll.u32 %v12776_v40, 16 }
 0x22a   : > { %v12770_v37 = vadd.f32 %v2249_v45, %v1655_v9  ;;  %v9792_v52 = vpop.f32.mrf.mxu0 }
 0x22b   : > { %v9875_v30 = vpop.f32.mrf.mxu1 }
 0x22c   : > { %v1613_v49 = vpop.f32.mrf.mxu0  ;;  %v3727_v30 = vsel %vm3718_vm7, %v3724_v32, %v3726_v27  ;;  %v3728_v32 = vrot.slane %v12776_v40, 1 }
 0x22d   : > { %v2254_v46 = vpop.f32.mrf.mxu1  ;;  %10149 = vmatmul.mubr.msk.bf16.gmra.mxu1 %vm524_vm3, %v3725_v14  ;;  %v8864_v14 = vld [vmem:[%s15220_s1 + $0x10] sm:$0x3]  ;;  %v3276_v49 = vor.u32 %v15277_v1, %v3272_v19 }
 0x22e   : > { %v12780_v13 = vadd.f32 %v2254_v46, %v1656_v7  ;;  %10152 = vmatprep.mubr.msk.bf16.mxu1 %vm11313_vm1, %v15329_v57  ;;  %v9793_v9 = vpop.f32.mrf.mxu0  ;;  %v4231_v54 = vsel %vm588_vm0, %v8864_v14, 0 }
 0x22f   : > { %v9878_v45 = vpop.f32.mrf.mxu1  ;;  %v3280_v9 = vrot.slane %v15278_v58, 1  ;;  %10225 = vmatpush3.bf16.msra.mxu0 %v4231_v54 }
 0x230   : > { %15389 = vst [vmem:[#allocation7_spill] sm:$0xff] %v12780_v13  ;;  %v2424_v7 = vpop.f32.mrf.mxu0  ;;  %10067 = vmatmul.mubr.msk.bf16.gmra.mxu0 %vm524_vm3, %v3273_v26  ;;  %v12801_v45 = vld [vmem:[%s11435_s29 + $0x48] sm:$0xff]   ;;  %10396 = vmatprep.subr.bf16.mxu0 %v15329_v57 }
 0x231   : > { %v2257_v46 = vpop.f32.mrf.mxu1  ;;  %v2590_v52 = vadd.f32 %v2424_v7, %v12435_v35  ;;  %10070 = vmatprep.mubr.msk.bf16.mxu0 %vm11313_vm1, %v15329_v57  ;;  %v15281_v7 = vshrl.u32 %v12776_v40, 16  ;;  %v3281_v58 = vsel %vm2637_vm6, %v3276_v49, %v3280_v9  ;;  %v15280_v54 = vshll.u32 %v12801_v45, 16 }
 0x232   : > { %v9884_v46 = vpop.f32.mrf.mxu0 }
 0x233   : > { %v9879_v14 = vpop.f32.mrf.mxu1 }
 0x234   : > { %v2427_v26 = vpop.f32.mrf.mxu0 }
 0x235   : > { %v2885_v35 = vpop.f32.mrf.mxu1  ;;  %10153 = vmatmul.mubr.msk.bf16.gmra.mxu1 %vm524_vm3, %v3727_v30  ;;  %v2591_v19 = vadd.f32 %v2427_v26, %v12442_v36  ;;  %v3729_v30 = vsel %vm3718_vm7, %v3726_v27, %v3728_v32  ;;  %v3284_v36 = vor.u32 %v15281_v7, %v3280_v9  ;;  %v4563_v27 = vld [vmem:[%s15224_s5] sm:$0xff] }
 0x236   : > { %v12808_v1 = vadd.f32 %v2885_v35, %v2590_v52  ;;  %10156 = vmatprep.mubr.msk.bf16.mxu1 %vm11313_vm1, %v15329_v57  ;;  %v9885_v14 = vpop.f32.mrf.mxu0  ;;  %v12819_v52 = vld [vmem:[%s11435_s29 + $0x50] sm:$0xff]   ;;  %v3288_v35 = vrot.slane %v15280_v54, 1 }
 0x237   : > { %v9970_v46 = vpop.f32.mrf.mxu1 }
 0x238   : > { %v2432_v44 = vpop.f32.mrf.mxu0  ;;  %10071 = vmatmul.mubr.msk.bf16.gmra.mxu0 %vm524_vm3, %v3281_v58  ;;  %v11314_v58 = vmov 0  }
 0x239   : > { %v2888_v13 = vpop.f32.mrf.mxu1  ;;  %v2592_v49 = vadd.f32 %v2432_v44, %v12449_v56  ;;  %10074 = vmatprep.mubr.msk.bf16.mxu0 %vm11313_vm1, %v15329_v57  ;;  %11155 = vset.pattern.permute.xlu0 %v11314_v58  ;;  %v15282_v44 = vshrl.u32 %v12801_v45, 16 }
 0x23a   : > { %v12822_v26 = vadd.f32 %v2888_v13, %v2591_v19  ;;  %v9888_v14 = vpop.f32.mrf.mxu0  ;;  %11156 = vset.pattern.permute.xlu1 %v11314_v58  ;;  %4606 = vperm.xlu0 %11155, %v4563_v27   ;;  %v3730_v58 = vrot.slane %v12801_v45, 1 }
 0x23b   : > { %v9971_v46 = vpop.f32.mrf.mxu1 }
 0x23c   : > { %v2435_v9 = vpop.f32.mrf.mxu0  ;;  %v3289_v46 = vsel %vm2637_vm6, %v3284_v36, %v3288_v35  ;;  %v15391_v36 = vshll.u32 %v12819_v52, 16 }
 0x23d   : > { %v2893_v56 = vpop.f32.mrf.mxu1  ;;  %10157 = vmatmul.mubr.msk.bf16.gmra.mxu1 %vm524_vm3, %v3729_v30  ;;  %v2593_v19 = vadd.f32 %v2435_v9, %v12460_v11  ;;  %v4564_v30 = vld [vmem:[%s15224_s5 + $0x8] sm:$0xff]  ;;  %v3292_v11 = vor.u32 %v15282_v44, %v3288_v35  ;;  %v4567_v35 = vld [vmem:[%s15224_s5 + $0x20] sm:$0xff] }
 0x23e   : > { %v12835_v14 = vadd.f32 %v2893_v56, %v2592_v49  ;;  %10160 = vmatprep.mubr.msk.bf16.mxu1 %vm11313_vm1, %v15329_v57  ;;  %v9889_v27 = vpop.f32.mrf.mxu0  ;;  %4611 = vperm.xlu0 %11155, %v4564_v30   ;;  %v3296_v49 = vrot.slane %v15391_v36, 1 }
 0x23f   : > { %v9974_v54 = vpop.f32.mrf.mxu1  ;;  %v12856_v27 = vld [vmem:[%s11435_s29 + $0x58] sm:$0xff]  }
 0x240   : > { %15390 = vst [vmem:[#allocation8_spill] sm:$0xff] %v12835_v14  ;;  %v2440_v7 = vpop.f32.mrf.mxu0  ;;  %10075 = vmatmul.mubr.msk.bf16.gmra.mxu0 %vm524_vm3, %v3289_v46  ;;  %v3731_v54 = vsel %vm3718_vm7, %v3728_v32, %v3730_v58  ;;  %v3732_v32 = vrot.slane %v12819_v52, 1 }
 0x241   : > { %v2896_v13 = vpop.f32.mrf.mxu1  ;;  %v2594_v9 = vadd.f32 %v2440_v7, %v12468_v53  ;;  %10078 = vmatprep.mubr.msk.bf16.mxu0 %vm11313_vm1, %v15329_v57  ;;  %v3297_v53 = vsel %vm2637_vm6, %v3292_v11, %v3296_v49  ;;  %v4565_v11 = vld [vmem:[%s15224_s5 + $0x10] sm:$0xff] }
 0x242   : > { %v12850_v56 = vadd.f32 %v2896_v13, %v2593_v19  ;;  %v9892_v30 = vpop.f32.mrf.mxu0  ;;  %4626 = vperm.xlu0 %11155, %v4567_v35   ;;  %v15284_v19 = vshrl.u32 %v12819_v52, 16  ;;  %4616 = vperm.xlu1 %11156, %v4565_v11  }
 0x243   : > { %v9975_v14 = vpop.f32.mrf.mxu1 }
 0x244   : > { %v2443_v46 = vpop.f32.mrf.mxu0  ;;  %v15283_v14 = vshll.u32 %v12856_v27, 16  ;;  %v3300_v44 = vor.u32 %v15284_v19, %v3296_v49  ;;  %v15286_v49 = vshrl.u32 %v12856_v27, 16 }
 0x245   : > { %v2901_v36 = vpop.f32.mrf.mxu1  ;;  %10161 = vmatmul.mubr.msk.bf16.gmra.mxu1 %vm524_vm3, %v3731_v54  ;;  %v2595_v7 = vadd.f32 %v2443_v46, %v12477_v28  ;;  %v4569_v54 = vld [vmem:[%s15224_s5 + $0x30] sm:$0xff]  ;;  %v3733_v46 = vsel %vm3718_vm7, %v3730_v58, %v3732_v32  ;;  %v4566_v58 = vld [vmem:[%s15224_s5 + $0x18] sm:$0xff] }
 0x246   : > { %v12865_v13 = vadd.f32 %v2901_v36, %v2594_v9  ;;  %10164 = vmatprep.mubr.msk.bf16.mxu1 %vm11313_vm1, %v15329_v57  ;;  %v9893_v30 = vpop.f32.mrf.mxu0  ;;  %4636 = vperm.xlu0 %11155, %v4569_v54   ;;  %v12880_v36 = vld [vmem:[%s11435_s29 + $0x60] sm:$0xff]   ;;  %v3304_v11 = vrot.slane %v15283_v14, 1 }
 0x247   : > { %v9978_v35 = vpop.f32.mrf.mxu1  ;;  %4621 = vperm.xlu1 %11156, %v4566_v58   ;;  %v3734_v58 = vrot.slane %v12856_v27, 1 }
 0x248   : > { %15392 = vst [vmem:[#allocation11_spill] sm:$0xff] %v12865_v13  ;;  %v2448_v28 = vpop.f32.mrf.mxu0  ;;  %10079 = vmatmul.mubr.msk.bf16.gmra.mxu0 %vm524_vm3, %v3297_v53 }
 0x249   : > { %v2904_v9 = vpop.f32.mrf.mxu1  ;;  %v2596_v30 = vadd.f32 %v2448_v28, %v12487_v39  ;;  %10082 = vmatprep.mubr.msk.bf16.mxu0 %vm11313_vm1, %v15329_v57  ;;  %v4571_v39 = vld [vmem:[%s15224_s5 + $0x40] sm:$0xff]  ;;  %v15285_v28 = vshll.u32 %v12880_v36, 16  ;;  %v3735_v19 = vsel %vm3718_vm7, %v3732_v32, %v3734_v58 }
 0x24a   : > { %v12883_v35 = vadd.f32 %v2904_v9, %v2595_v7  ;;  %v9896_v54 = vpop.f32.mrf.mxu0  ;;  %4646 = vperm.xlu0 %11155, %v4571_v39  }
 0x24b   : > { %v9979_v13 = vpop.f32.mrf.mxu1  ;;  %v3305_v54 = vsel %vm2637_vm6, %v3300_v44, %v3304_v11 }
 0x24c   : > { %v2451_v53 = vpop.f32.mrf.mxu0 }
 0x24d   : > { %v2909_v7 = vpop.f32.mrf.mxu1  ;;  %10165 = vmatmul.mubr.msk.bf16.gmra.mxu1 %vm524_vm3, %v3733_v46  ;;  %v2597_v13 = vadd.f32 %v2451_v53, %v12495_v48  ;;  %v4568_v46 = vld [vmem:[%s15224_s5 + $0x28] sm:$0xff]  ;;  %v4573_v48 = vld [vmem:[%s15224_s5 + $0x50] sm:$0xff]  ;;  %v3308_v53 = vor.u32 %v15286_v49, %v3304_v11  ;;  %v4570_v11 = vld [vmem:[%s15224_s5 + $0x38] sm:$0xff] }
 0x24e   : > { %v12901_v9 = vadd.f32 %v2909_v7, %v2596_v30  ;;  %10168 = vmatprep.mubr.msk.bf16.mxu1 %vm11313_vm1, %v15329_v57  ;;  %v9897_v39 = vpop.f32.mrf.mxu0  ;;  %4631 = vperm.xlu1 %11156, %v4568_v46   ;;  %v12925_v46 = vld [vmem:[%s11435_s29 + $0x68] sm:$0xff]  }
 0x24f   : > { %v9982_v14 = vpop.f32.mrf.mxu1  ;;  %4656 = vperm.xlu0 %11155, %v4573_v48  }
 0x250   : > { %15393 = vst [vmem:[#allocation9_spill] sm:$0xff] %v12901_v9  ;;  %v2456_v30 = vpop.f32.mrf.mxu0  ;;  %10083 = vmatmul.mubr.msk.bf16.gmra.mxu0 %vm524_vm3, %v3305_v54  ;;  %v3312_v14 = vrot.slane %v15285_v28, 1  ;;  %v4575_v54 = vld [vmem:[%s15224_s5 + $0x60] sm:$0xff] }
 0x251   : > { %v2912_v44 = vpop.f32.mrf.mxu1  ;;  %v2598_v7 = vadd.f32 %v2456_v30, %v12502_v59  ;;  %10086 = vmatprep.mubr.msk.bf16.mxu0 %vm11313_vm1, %v15329_v57  ;;  %v3736_v30 = vrot.slane %v12880_v36, 1 }
 0x252   : > { %v12919_v39 = vadd.f32 %v2912_v44, %v2597_v13  ;;  %v9900_v48 = vpop.f32.mrf.mxu0  ;;  %4641 = vperm.xlu1 %11156, %v4570_v11   ;;  %v3313_v32 = vsel %vm2637_vm6, %v3308_v53, %v3312_v14  ;;  %v15287_v11 = vshll.u32 %v12925_v46, 16  ;;  %v4577_v53 = vld [vmem:[%s15224_s5 + $0x70] sm:$0xff] }
 0x253   : > { %v9983_v9 = vpop.f32.mrf.mxu1  ;;  %4666 = vperm.xlu0 %11155, %v4575_v54   ;;  %v15288_v48 = vshrl.u32 %v12880_v36, 16 }
 0x254   : > { %v2459_v59 = vpop.f32.mrf.mxu0 }
 0x255   : > { %v2917_v13 = vpop.f32.mrf.mxu1  ;;  %10169 = vmatmul.mubr.msk.bf16.gmra.mxu1 %vm524_vm3, %v3735_v19  ;;  %v2599_v9 = vadd.f32 %v2459_v59, %v12511_v60  ;;  %v4572_v19 = vld [vmem:[%s15224_s5 + $0x48] sm:$0xff]  ;;  %v3737_v59 = vsel %vm3718_vm7, %v3734_v58, %v3736_v30  ;;  %v3316_v49 = vor.u32 %v15288_v48, %v3312_v14  ;;  %v4574_v58 = vld [vmem:[%s15224_s5 + $0x58] sm:$0xff]  ;;  %v15290_v14 = vshrl.u32 %v12925_v46, 16 }
 0x256   : > { %v12937_v44 = vadd.f32 %v2917_v13, %v2598_v7  ;;  %10172 = vmatprep.mubr.msk.bf16.mxu1 %vm11313_vm1, %v15329_v57  ;;  %v9901_v54 = vpop.f32.mrf.mxu0  ;;  %4651 = vperm.xlu1 %11156, %v4572_v19   ;;  %v12952_v13 = vld [vmem:[%s11435_s29 + $0x70] sm:$0xff]   ;;  %v3320_v19 = vrot.slane %v15287_v11, 1 }
 0x257   : > { %v9986_v28 = vpop.f32.mrf.mxu1  ;;  %4676 = vperm.xlu0 %11155, %v4577_v53  }
 0x258   : > { %15394 = vst [vmem:[#allocation6_spill] sm:$0xff] %v12937_v44  ;;  %v2464_v60 = vpop.f32.mrf.mxu0  ;;  %10087 = vmatmul.mubr.msk.bf16.gmra.mxu0 %vm524_vm3, %v3313_v32 }
 0x259   : > { %v2920_v7 = vpop.f32.mrf.mxu1  ;;  %v2600_v28 = vadd.f32 %v2464_v60, %v12519_v47  ;;  %10090 = vmatprep.mubr.msk.bf16.mxu0 %vm11313_vm1, %v15329_v57  ;;  %v4579_v47 = vld [vmem:[%s15224_s5 + $0x80] sm:$0xff]  ;;  %v15289_v60 = vshll.u32 %v12952_v13, 16 }
 0x25a   : > { %v12955_v54 = vadd.f32 %v2920_v7, %v2599_v9  ;;  %v9904_v53 = vpop.f32.mrf.mxu0  ;;  %4661 = vperm.xlu1 %11156, %v4574_v58   ;;  %v3738_v58 = vrot.slane %v12925_v46, 1 }
 0x25b   : > { %v9987_v44 = vpop.f32.mrf.mxu1  ;;  %4686 = vperm.xlu0 %11155, %v4579_v47   ;;  %v3321_v53 = vsel %vm2637_vm6, %v3316_v49, %v3320_v19 }
 0x25c   : > { %v2467_v32 = vpop.f32.mrf.mxu0  ;;  %v3739_v48 = vsel %vm3718_vm7, %v3736_v30, %v3738_v58 }
 0x25d   : > { %v2925_v9 = vpop.f32.mrf.mxu1  ;;  %10173 = vmatmul.mubr.msk.bf16.gmra.mxu1 %vm524_vm3, %v3737_v59  ;;  %v2601_v44 = vadd.f32 %v2467_v32, %v12525_v62  ;;  %v4576_v59 = vld [vmem:[%s15224_s5 + $0x68] sm:$0xff]  ;;  %v4581_v62 = vld [vmem:[%s15224_s5 + $0x90] sm:$0xff]  ;;  %v3324_v32 = vor.u32 %v15290_v14, %v3320_v19  ;;  %v4578_v19 = vld [vmem:[%s15224_s5 + $0x78] sm:$0xff] }
 0x25e   : > { %v12973_v7 = vadd.f32 %v2925_v9, %v2600_v28  ;;  %10176 = vmatprep.mubr.msk.bf16.mxu1 %vm11313_vm1, %v15329_v57  ;;  %v9905_v47 = vpop.f32.mrf.mxu0  ;;  %4671 = vperm.xlu1 %11156, %v4576_v59   ;;  %v12997_v59 = vld [vmem:[%s11435_s29 + $0x78] sm:$0xff]  }
 0x25f   : > { %v9990_v11 = vpop.f32.mrf.mxu1  ;;  %4696 = vperm.xlu0 %11155, %v4581_v62  }
 0x260   : > { %15395 = vst [vmem:[#allocation12_spill] sm:$0xff] %v12973_v7  ;;  %v2472_v28 = vpop.f32.mrf.mxu0  ;;  %10091 = vmatmul.mubr.msk.bf16.gmra.mxu0 %vm524_vm3, %v3321_v53  ;;  %v3328_v11 = vrot.slane %v15289_v60, 1  ;;  %v4583_v53 = vld [vmem:[%s15224_s5 + $0xa0] sm:$0xff] }
 0x261   : > { %v2928_v49 = vpop.f32.mrf.mxu1  ;;  %v2602_v9 = vadd.f32 %v2472_v28, %v12532_v18  ;;  %10094 = vmatprep.mubr.msk.bf16.mxu0 %vm11313_vm1, %v15329_v57  ;;  %v3740_v28 = vrot.slane %v12952_v13, 1 }
 0x262   : > { %v12991_v47 = vadd.f32 %v2928_v49, %v2601_v44  ;;  %v9908_v62 = vpop.f32.mrf.mxu0  ;;  %4681 = vperm.xlu1 %11156, %v4578_v19   ;;  %v3329_v30 = vsel %vm2637_vm6, %v3324_v32, %v3328_v11  ;;  %v15291_v19 = vshll.u32 %v12997_v59, 16  ;;  %v4585_v32 = vld [vmem:[%s15224_s5 + $0xb0] sm:$0xff] }
 0x263   : > { %v9991_v7 = vpop.f32.mrf.mxu1  ;;  %4706 = vperm.xlu0 %11155, %v4583_v53   ;;  %v15292_v62 = vshrl.u32 %v12952_v13, 16 }
 0x264   : > { %v2475_v18 = vpop.f32.mrf.mxu0 }
 0x265   : > { %v2933_v44 = vpop.f32.mrf.mxu1  ;;  %10177 = vmatmul.mubr.msk.bf16.gmra.mxu1 %vm524_vm3, %v3739_v48  ;;  %v2603_v7 = vadd.f32 %v2475_v18, %v12541_v41  ;;  %v4580_v48 = vld [vmem:[%s15224_s5 + $0x88] sm:$0xff]  ;;  %v3741_v18 = vsel %vm3718_vm7, %v3738_v58, %v3740_v28  ;;  %v3332_v14 = vor.u32 %v15292_v62, %v3328_v11  ;;  %v4582_v58 = vld [vmem:[%s15224_s5 + $0x98] sm:$0xff]  ;;  %v15294_v11 = vshrl.u32 %v12997_v59, 16 }
 0x266   : > { %v13009_v49 = vadd.f32 %v2933_v44, %v2602_v9  ;;  %10180 = vmatprep.mubr.msk.bf16.mxu1 %vm11313_vm1, %v15329_v57  ;;  %v9909_v53 = vpop.f32.mrf.mxu0  ;;  %4691 = vperm.xlu1 %11156, %v4580_v48   ;;  %v13024_v44 = vld [vmem:[%s11435_s29 + $0x80] sm:$0xff]   ;;  %v3336_v48 = vrot.slane %v15291_v19, 1 }
 0x267   : > { %v9994_v60 = vpop.f32.mrf.mxu1  ;;  %4716 = vperm.xlu0 %11155, %v4585_v32  }
 0x268   : > { %15396 = vst [vmem:[#allocation10_spill] sm:$0xff] %v13009_v49  ;;  %v2480_v41 = vpop.f32.mrf.mxu0  ;;  %10095 = vmatmul.mubr.msk.bf16.gmra.mxu0 %vm524_vm3, %v3329_v30 }
 0x269   : > { %v2936_v9 = vpop.f32.mrf.mxu1  ;;  %v2604_v60 = vadd.f32 %v2480_v41, %v12549_v25  ;;  %10098 = vmatprep.mubr.msk.bf16.mxu0 %vm11313_vm1, %v15329_v57  ;;  %v4587_v25 = vld [vmem:[%s15224_s5 + $0xc0] sm:$0xff]  ;;  %v15293_v41 = vshll.u32 %v13024_v44, 16 }
 0x26a   : > { %v13027_v53 = vadd.f32 %v2936_v9, %v2603_v7  ;;  %v9912_v32 = vpop.f32.mrf.mxu0  ;;  %4701 = vperm.xlu1 %11156, %v4582_v58   ;;  %v3742_v58 = vrot.slane %v12997_v59, 1 }
 0x26b   : > { %v9995_v49 = vpop.f32.mrf.mxu1  ;;  %4726 = vperm.xlu0 %11155, %v4587_v25   ;;  %v3337_v32 = vsel %vm2637_vm6, %v3332_v14, %v3336_v48 }
 0x26c   : > { %v2483_v30 = vpop.f32.mrf.mxu0  ;;  %v3743_v62 = vsel %vm3718_vm7, %v3740_v28, %v3742_v58 }
 0x26d   : > { %v2941_v7 = vpop.f32.mrf.mxu1  ;;  %10181 = vmatmul.mubr.msk.bf16.gmra.mxu1 %vm524_vm3, %v3741_v18  ;;  %v2605_v49 = vadd.f32 %v2483_v30, %v12555_v42  ;;  %v4584_v18 = vld [vmem:[%s15224_s5 + $0xa8] sm:$0xff]  ;;  %v4589_v42 = vld [vmem:[%s15224_s5 + $0xd0] sm:$0xff]  ;;  %v3340_v30 = vor.u32 %v15294_v11, %v3336_v48  ;;  %v4586_v48 = vld [vmem:[%s15224_s5 + $0xb8] sm:$0xff] }
 0x26e   : > { %v13045_v9 = vadd.f32 %v2941_v7, %v2604_v60  ;;  %10184 = vmatprep.mubr.msk.bf16.mxu1 %vm11313_vm1, %v15329_v57  ;;  %v9913_v25 = vpop.f32.mrf.mxu0  ;;  %4711 = vperm.xlu1 %11156, %v4584_v18   ;;  %v13069_v18 = vld [vmem:[%s11435_s29 + $0x88] sm:$0xff]  }
 0x26f   : > { %v9998_v19 = vpop.f32.mrf.mxu1  ;;  %4736 = vperm.xlu0 %11155, %v4589_v42  }
 0x270   : > { %15397 = vst [vmem:[#allocation14_spill] sm:$0xff] %v13045_v9  ;;  %v2488_v60 = vpop.f32.mrf.mxu0  ;;  %10099 = vmatmul.mubr.msk.bf16.gmra.mxu0 %vm524_vm3, %v3337_v32  ;;  %v3344_v19 = vrot.slane %v15293_v41, 1  ;;  %v4591_v32 = vld [vmem:[%s15224_s5 + $0xe0] sm:$0xff] }
 0x271   : > { %v2944_v14 = vpop.f32.mrf.mxu1  ;;  %v2606_v7 = vadd.f32 %v2488_v60, %v12562_v6  ;;  %10102 = vmatprep.mubr.msk.bf16.mxu0 %vm11313_vm1, %v15329_v57  ;;  %v3744_v60 = vrot.slane %v13024_v44, 1 }
 0x272   : > { %v13063_v25 = vadd.f32 %v2944_v14, %v2605_v49  ;;  %v9916_v42 = vpop.f32.mrf.mxu0  ;;  %4721 = vperm.xlu1 %11156, %v4586_v48   ;;  %v3345_v28 = vsel %vm2637_vm6, %v3340_v30, %v3344_v19  ;;  %v15295_v48 = vshll.u32 %v13069_v18, 16  ;;  %v4593_v30 = vld [vmem:[%s15224_s5 + $0xf0] sm:$0xff] }
 0x273   : > { %v9999_v9 = vpop.f32.mrf.mxu1  ;;  %4746 = vperm.xlu0 %11155, %v4591_v32   ;;  %v15296_v42 = vshrl.u32 %v13024_v44, 16 }
 0x274   : > { %v2491_v6 = vpop.f32.mrf.mxu0 }
 0x275   : > { %v2949_v49 = vpop.f32.mrf.mxu1  ;;  %10185 = vmatmul.mubr.msk.bf16.gmra.mxu1 %vm524_vm3, %v3743_v62  ;;  %v2607_v9 = vadd.f32 %v2491_v6, %v12571_v8  ;;  %v4588_v62 = vld [vmem:[%s15224_s5 + $0xc8] sm:$0xff]  ;;  %v3745_v6 = vsel %vm3718_vm7, %v3742_v58, %v3744_v60  ;;  %v3348_v11 = vor.u32 %v15296_v42, %v3344_v19  ;;  %v4590_v58 = vld [vmem:[%s15224_s5 + $0xd8] sm:$0xff]  ;;  %v15298_v19 = vshrl.u32 %v13069_v18, 16 }
 0x276   : > { %v13081_v14 = vadd.f32 %v2949_v49, %v2606_v7  ;;  %10188 = vmatprep.mubr.msk.bf16.mxu1 %vm11313_vm1, %v15329_v57  ;;  %v9917_v32 = vpop.f32.mrf.mxu0  ;;  %4731 = vperm.xlu1 %11156, %v4588_v62   ;;  %v13096_v49 = vld [vmem:[%s11435_s29 + $0x90] sm:$0xff]   ;;  %v3352_v62 = vrot.slane %v15295_v48, 1 }
 0x277   : > { %v10002_v41 = vpop.f32.mrf.mxu1  ;;  %4756 = vperm.xlu0 %11155, %v4593_v30  }
 0x278   : > { %15398 = vst [vmem:[#allocation15_spill] sm:$0xff] %v13081_v14  ;;  %v2496_v8 = vpop.f32.mrf.mxu0  ;;  %10103 = vmatmul.mubr.msk.bf16.gmra.mxu0 %vm524_vm3, %v3345_v28 }
 0x279   : > { %v2952_v7 = vpop.f32.mrf.mxu1  ;;  %v2608_v41 = vadd.f32 %v2496_v8, %v12579_v38  ;;  %10106 = vmatprep.mubr.msk.bf16.mxu0 %vm11313_vm1, %v15329_v57  ;;  %v4595_v38 = vld [vmem:[%s15224_s5 + $0x100] sm:$0xff]  ;;  %v15297_v8 = vshll.u32 %v13096_v49, 16 }
 0x27a   : > { %v13099_v32 = vadd.f32 %v2952_v7, %v2607_v9  ;;  %v9920_v30 = vpop.f32.mrf.mxu0  ;;  %4741 = vperm.xlu1 %11156, %v4590_v58   ;;  %v3746_v58 = vrot.slane %v13069_v18, 1 }
 0x27b   : > { %v10003_v14 = vpop.f32.mrf.mxu1  ;;  %4766 = vperm.xlu0 %11155, %v4595_v38   ;;  %v3353_v30 = vsel %vm2637_vm6, %v3348_v11, %v3352_v62 }
 0x27c   : > { %v2499_v28 = vpop.f32.mrf.mxu0  ;;  %v3747_v42 = vsel %vm3718_vm7, %v3744_v60, %v3746_v58 }
 0x27d   : > { %v2957_v9 = vpop.f32.mrf.mxu1  ;;  %10189 = vmatmul.mubr.msk.bf16.gmra.mxu1 %vm524_vm3, %v3745_v6  ;;  %v2609_v14 = vadd.f32 %v2499_v28, %v12585_v12  ;;  %v4592_v6 = vld [vmem:[%s15224_s5 + $0xe8] sm:$0xff]  ;;  %v4597_v12 = vld [vmem:[%s15224_s5 + $0x110] sm:$0xff]  ;;  %v3356_v28 = vor.u32 %v15298_v19, %v3352_v62  ;;  %v4594_v62 = vld [vmem:[%s15224_s5 + $0xf8] sm:$0xff] }
 0x27e   : > { %v13117_v7 = vadd.f32 %v2957_v9, %v2608_v41  ;;  %10192 = vmatprep.mubr.msk.bf16.mxu1 %vm11313_vm1, %v15329_v57  ;;  %v9921_v38 = vpop.f32.mrf.mxu0  ;;  %4751 = vperm.xlu1 %11156, %v4592_v6   ;;  %v13141_v6 = vld [vmem:[%s11435_s29 + $0x98] sm:$0xff]  }
 0x27f   : > { %v10006_v48 = vpop.f32.mrf.mxu1  ;;  %4776 = vperm.xlu0 %11155, %v4597_v12  }
 0x280   : > { %15399 = vst [vmem:[#allocation13_spill] sm:$0xff] %v13117_v7  ;;  %v2504_v41 = vpop.f32.mrf.mxu0  ;;  %10107 = vmatmul.mubr.msk.bf16.gmra.mxu0 %vm524_vm3, %v3353_v30  ;;  %v3360_v48 = vrot.slane %v15297_v8, 1  ;;  %v4599_v30 = vld [vmem:[%s15224_s5 + $0x120] sm:$0xff] }
 0x281   : > { %v2960_v11 = vpop.f32.mrf.mxu1  ;;  %v2610_v9 = vadd.f32 %v2504_v41, %v12592_v23  ;;  %10110 = vmatprep.mubr.msk.bf16.mxu0 %vm11313_vm1, %v15329_v57  ;;  %v3748_v41 = vrot.slane %v13096_v49, 1 }
 0x282   : > { %v13135_v38 = vadd.f32 %v2960_v11, %v2609_v14  ;;  %v9924_v12 = vpop.f32.mrf.mxu0  ;;  %4761 = vperm.xlu1 %11156, %v4594_v62   ;;  %v3361_v60 = vsel %vm2637_vm6, %v3356_v28, %v3360_v48  ;;  %v15299_v62 = vshll.u32 %v13141_v6, 16  ;;  %v4601_v28 = vld [vmem:[%s15224_s5 + $0x130] sm:$0xff] }
 0x283   : > { %v10007_v7 = vpop.f32.mrf.mxu1  ;;  %4786 = vperm.xlu0 %11155, %v4599_v30   ;;  %v15300_v12 = vshrl.u32 %v13096_v49, 16 }
 0x284   : > { %v2507_v23 = vpop.f32.mrf.mxu0 }
 0x285   : > { %v2965_v14 = vpop.f32.mrf.mxu1  ;;  %10193 = vmatmul.mubr.msk.bf16.gmra.mxu1 %vm524_vm3, %v3747_v42  ;;  %v2611_v7 = vadd.f32 %v2507_v23, %v12601_v51  ;;  %v4596_v42 = vld [vmem:[%s15224_s5 + $0x108] sm:$0xff]  ;;  %v3749_v23 = vsel %vm3718_vm7, %v3746_v58, %v3748_v41  ;;  %v3364_v19 = vor.u32 %v15300_v12, %v3360_v48  ;;  %v4598_v58 = vld [vmem:[%s15224_s5 + $0x118] sm:$0xff]  ;;  %v15301_v48 = vshrl.u32 %v13141_v6, 16 }
 0x286   : > { %v13153_v11 = vadd.f32 %v2965_v14, %v2610_v9  ;;  %10196 = vmatprep.mubr.msk.bf16.mxu1 %vm11313_vm1, %v15329_v57  ;;  %v9925_v30 = vpop.f32.mrf.mxu0  ;;  %4771 = vperm.xlu1 %11156, %v4596_v42   ;;  %v13168_v14 = vld [vmem:[%s11435_s29 + $0xa0] sm:$0xff]   ;;  %v3368_v42 = vrot.slane %v15299_v62, 1 }
 0x287   : > { %v10010_v8 = vpop.f32.mrf.mxu1  ;;  %4796 = vperm.xlu0 %11155, %v4601_v28  }
 0x288   : > { %15400 = vst [vmem:[#allocation17_spill] sm:$0xff] %v13153_v11  ;;  %v2512_v51 = vpop.f32.mrf.mxu0  ;;  %10111 = vmatmul.mubr.msk.bf16.gmra.mxu0 %vm524_vm3, %v3361_v60 }
 0x289   : > { %v2968_v9 = vpop.f32.mrf.mxu1  ;;  %v2612_v8 = vadd.f32 %v2512_v51, %v12609_v33  ;;  %10114 = vmatprep.mubr.msk.bf16.mxu0 %vm11313_vm1, %v15329_v57  ;;  %v4603_v33 = vld [vmem:[%s15224_s5 + $0x140] sm:$0xf] }
 0x28a   : > { %v13171_v30 = vadd.f32 %v2968_v9, %v2611_v7  ;;  %v9928_v28 = vpop.f32.mrf.mxu0  ;;  %4781 = vperm.xlu1 %11156, %v4598_v58   ;;  %v3750_v58 = vrot.slane %v13141_v6, 1 }
 0x28b   : > { %v10011_v11 = vpop.f32.mrf.mxu1  ;;  %4806 = vperm.xlu0 %11155, %v4603_v33   ;;  %v3369_v28 = vsel %vm2637_vm6, %v3364_v19, %v3368_v42  ;;  %v15402_v19 = vshll.u32 %v13168_v14, 16 }
 0x28c   : > { %v2515_v60 = vpop.f32.mrf.mxu0 }
 0x28d   : > { %v2973_v7 = vpop.f32.mrf.mxu1  ;;  %10197 = vmatmul.mubr.msk.bf16.gmra.mxu1 %vm524_vm3, %v3749_v23  ;;  %v2613_v11 = vadd.f32 %v2515_v60, %v12615_v50  ;;  %v4600_v23 = vld [vmem:[%s15224_s5 + $0x128] sm:$0xff]  ;;  %v3372_v50 = vor.u32 %v15301_v48, %v3368_v42  ;;  %v4602_v42 = vld [vmem:[%s15224_s5 + $0x138] sm:$0xff] }
 0x28e   : > { %v13189_v9 = vadd.f32 %v2973_v7, %v2612_v8  ;;  %10200 = vmatprep.mubr.msk.bf16.mxu1 %vm11313_vm1, %v15329_v57  ;;  %v9929_v33 = vpop.f32.mrf.mxu0  ;;  %4791 = vperm.xlu1 %11156, %v4600_v23   ;;  %v3376_v8 = vrot.slane %v15402_v19, 1 }
 0x28f   : > { %v10014_v62 = vpop.f32.mrf.mxu1  ;;  %v13210_v33 = vld [vmem:[%s11435_s29 + $0xa8] sm:$0xff]  }
 0x290   : > { %15401 = vst [vmem:[#allocation18_spill] sm:$0xff] %v13189_v9  ;;  %v2520_v12 = vpop.f32.mrf.mxu0  ;;  %10115 = vmatmul.mubr.msk.bf16.gmra.mxu0 %vm524_vm3, %v3369_v28  ;;  %v3751_v62 = vsel %vm3718_vm7, %v3748_v41, %v3750_v58  ;;  %v3752_v41 = vrot.slane %v13168_v14, 1 }
 0x291   : > { %v2976_v51 = vpop.f32.mrf.mxu1  ;;  %v2614_v60 = vadd.f32 %v2520_v12, %v12622_v29  ;;  %10118 = vmatprep.mubr.msk.bf16.mxu0 %vm11313_vm1, %v15329_v57  ;;  %v3377_v29 = vsel %vm2637_vm6, %v3372_v50, %v3376_v8 }
 0x292   : > { %v13204_v7 = vadd.f32 %v2976_v51, %v2613_v11  ;;  %v9932_v23 = vpop.f32.mrf.mxu0  ;;  %4801 = vperm.xlu1 %11156, %v4602_v42   ;;  %v15303_v11 = vshrl.u32 %v13168_v14, 16  ;;  %v3753_v50 = vsel %vm3718_vm7, %v3750_v58, %v3752_v41  ;;  %v15305_v58 = vshrl.u32 %v13210_v33, 16 }
 0x293   : > { %v10015_v9 = vpop.f32.mrf.mxu1 }
 0x294   : > { %15403 = vst [vmem:[#allocation16_spill] sm:$0xff] %v13204_v7  ;;  %v2523_v28 = vpop.f32.mrf.mxu0  ;;  %v15302_v9 = vshll.u32 %v13210_v33, 16 }
 0x295   : > { %v2981_v19 = vpop.f32.mrf.mxu1  ;;  %10201 = vmatmul.mubr.msk.bf16.gmra.mxu1 %vm524_vm3, %v3751_v62  ;;  %v2615_v12 = vadd.f32 %v2523_v28, %v12631_v43  ;;  %v13228_v62 = vld [vmem:[%s11435_s29 + $0xb0] sm:$0xff]   ;;  %v3380_v28 = vor.u32 %v15303_v11, %v3376_v8 }
 0x296   : > { %v13219_v51 = vadd.f32 %v2981_v19, %v2614_v60  ;;  %10204 = vmatprep.mubr.msk.bf16.mxu1 %vm11313_vm1, %v15329_v57  ;;  %v9933_v23 = vpop.f32.mrf.mxu0  ;;  %v3384_v19 = vrot.slane %v15302_v9, 1 }
 0x297   : > { %v10018_v42 = vpop.f32.mrf.mxu1 }
 0x298   : > { %15404 = vst [vmem:[#allocation20_spill] sm:$0xff] %v13219_v51  ;;  %v2528_v48 = vpop.f32.mrf.mxu0  ;;  %10119 = vmatmul.mubr.msk.bf16.gmra.mxu0 %vm524_vm3, %v3377_v29  ;;  %v3385_v8 = vsel %vm2637_vm6, %v3380_v28, %v3384_v19  ;;  %v3388_v11 = vor.u32 %v15305_v58, %v3384_v19 }
 0x299   : > { %v2984_v7 = vpop.f32.mrf.mxu1  ;;  %v2616_v43 = vadd.f32 %v2528_v48, %v12639_v34  ;;  %10122 = vmatprep.mubr.msk.bf16.mxu0 %vm11313_vm1, %v15329_v57  ;;  %v15304_v34 = vshll.u32 %v13228_v62, 16 }
 0x29a   : > { %v13231_v60 = vadd.f32 %v2984_v7, %v2615_v12  ;;  %v9936_v23 = vpop.f32.mrf.mxu0  ;;  %v3754_v12 = vrot.slane %v13210_v33, 1 }
 0x29b   : > { %v10019_v42 = vpop.f32.mrf.mxu1 }
 0x29c   : > { %v2531_v29 = vpop.f32.mrf.mxu0  ;;  %v3755_v28 = vsel %vm3718_vm7, %v3752_v41, %v3754_v12  ;;  %v15306_v41 = vshrl.u32 %v13228_v62, 16 }
 0x29d   : > { %v2989_v51 = vpop.f32.mrf.mxu1  ;;  %10205 = vmatmul.mubr.msk.bf16.gmra.mxu1 %vm524_vm3, %v3753_v50  ;;  %v2617_v48 = vadd.f32 %v2531_v29, %v12645_v15  ;;  %v3392_v15 = vrot.slane %v15304_v34, 1  ;;  %v13261_v29 = vld [vmem:[%s11435_s29 + $0xb8] ss:$0 sps:$4 sm:$0x77]   ;;  %v3756_v34 = vrot.slane %v13228_v62, 1 }
 0x29e   : > { %v13243_v7 = vadd.f32 %v2989_v51, %v2616_v43  ;;  %10208 = vmatprep.mubr.msk.bf16.mxu1 %vm11313_vm1, %v15329_v57  ;;  %v9937_v23 = vpop.f32.mrf.mxu0 }
 0x29f   : > { %v10022_v42 = vpop.f32.mrf.mxu1  ;;  %v3393_v19 = vsel %vm2637_vm6, %v3388_v11, %v3392_v15  ;;  %v3757_v11 = vsel %vm3718_vm7, %v3754_v12, %v3756_v34 }
 0x2a0   : > { %15405 = vst [vmem:[#allocation21_spill] sm:$0xff] %v13243_v7  ;;  %v2536_v9 = vpop.f32.mrf.mxu0  ;;  %10123 = vmatmul.mubr.msk.bf16.gmra.mxu0 %vm524_vm3, %v3385_v8 }
 0x2a1   : > { %v2992_v50 = vpop.f32.mrf.mxu1  ;;  %v2618_v51 = vadd.f32 %v2536_v9, %v12652_v3  ;;  %10126 = vmatprep.mubr.msk.bf16.mxu0 %vm11313_vm1, %v15329_v57 }
 0x2a2   : > { %v13255_v43 = vadd.f32 %v2992_v50, %v2617_v48  ;;  %v9940_v23 = vpop.f32.mrf.mxu0  ;;  %v3398_v48 = vshll.u32 %v13261_v29, 16 }
 0x2a3   : > { %v10023_v42 = vpop.f32.mrf.mxu1 }
 0x2a4   : > { %v2539_v8 = vpop.f32.mrf.mxu0 }
 0x2a5   : > { %v2997_v7 = vpop.f32.mrf.mxu1  ;;  %10209 = vmatmul.mubr.msk.bf16.gmra.mxu1 %vm524_vm3, %v3755_v28  ;;  %v2619_v3 = vadd.f32 %v2539_v8, %v12660_v61 }
 0x2a6   : > { %v13267_v9 = vadd.f32 %v2997_v7, %v2618_v51  ;;  %10212 = vmatprep.mubr.msk.bf16.mxu1 %vm11313_vm1, %v15329_v57  ;;  %v9941_v50 = vpop.f32.mrf.mxu0  ;;  %v3396_v7 = vor.u32 %v15306_v41, %v3392_v15  ;;  %v3400_v51 = vrot.slane %v3398_v48, 1 }
 0x2a7   : > { %v10026_v23 = vpop.f32.mrf.mxu1 }
 0x2a8   : > { %15406 = vst [vmem:[#allocation19_spill] sm:$0xff] %v13267_v9  ;;  %v2544_v42 = vpop.f32.mrf.mxu0  ;;  %10127 = vmatmul.mubr.msk.bf16.gmra.mxu0 %vm524_vm3, %v3393_v19 }
 0x2a9   : > { %v3000_v58 = vpop.f32.mrf.mxu1  ;;  %v2620_v28 = vadd.f32 %v2544_v42, %v12668_v5  ;;  %10130 = vmatprep.mubr.msk.bf16.mxu0 %vm11313_vm1, %v15329_v57  ;;  %v3401_v5 = vsel %vm2637_vm6, %v3396_v7, %v3400_v51 }
 0x2aa   : > { %v13276_v61 = vadd.f32 %v3000_v58, %v2619_v3  ;;  %v9944_v8 = vpop.f32.mrf.mxu0  ;;  %v3758_v58 = vrot.slane %v13261_v29, 1 }
 0x2ab   : > { %v10027_v50 = vpop.f32.mrf.mxu1  ;;  %v3402_v8 = vshrl.u32 %v13261_v29, 16 }
 0x2ac   : > { %v2547_v23 = vpop.f32.mrf.mxu0  ;;  %v3759_v7 = vsel %vm3718_vm7, %v3756_v34, %v3758_v58 }
 0x2ad   : > { %v3005_v9 = vpop.f32.mrf.mxu1  ;;  %10213 = vmatmul.mubr.msk.bf16.gmra.mxu1 %vm524_vm3, %v3757_v11  ;;  %v2621_v19 = vadd.f32 %v2547_v23, %v12677_v55  ;;  %v4075_v11 = vshrl.u32 %v12703_v22, 16  ;;  %v4078_v55 = vshll.u32 %v12703_v22, 16  ;;  %v3404_v41 = vor.u32 %v3402_v8, %v3400_v51 }
 0x2ae   : > { %v13284_v12 = vadd.f32 %v3005_v9, %v2620_v28  ;;  %10216 = vmatprep.mubr.msk.bf16.mxu1 %vm11313_vm1, %v15329_v57  ;;  %v9945_v3 = vpop.f32.mrf.mxu0 }
 0x2af   : > { %v10030_v15 = vpop.f32.mrf.mxu1  ;;  %v15408_v3 = vshrl.u32 %v12674_v16, 16  ;;  %v4077_v22 = vrot.slane %v4075_v11, 1 }
 0x2b0   : > { %15407 = vst [vmem:[#allocation23_spill] sm:$0xff] %v13284_v12  ;;  %v2552_v48 = vpop.f32.mrf.mxu0  ;;  %10131 = vmatmul.mubr.msk.bf16.gmra.mxu0 %vm524_vm3, %v3401_v5  ;;  %v4080_v12 = vrot.slane %v4078_v55, 2 }
 0x2b1   : > { %v3008_v42 = vpop.f32.mrf.mxu1  ;;  %v2622_v9 = vadd.f32 %v2552_v48, %v12687_v31  ;;  %10134 = vmatprep.mubr.msk.bf16.mxu0 %vm11313_vm1, %v15329_v57  ;;  %v4082_v5 = vrot.slane %v15408_v3, 1  ;;  %v15409_v31 = vshll.u32 %v12674_v16, 16 }
 0x2b2   : > { %v13295_v28 = vadd.f32 %v3008_v42, %v2621_v19  ;;  %v9948_v50 = vpop.f32.mrf.mxu0 }
 0x2b3   : > { %v10031_v23 = vpop.f32.mrf.mxu1  ;;  %v4083_v19 = vrot.slane %v15409_v31, 2 }
 0x2b4   : > { %v2555_v15 = vpop.f32.mrf.mxu0 }
 0x2b5   : > { %v3013_v29 = vpop.f32.mrf.mxu1  ;;  %10217 = vmatmul.mubr.msk.bf16.gmra.mxu1 %vm524_vm3, %v3759_v7  ;;  %v2623_v34 = vadd.f32 %v2555_v15, %v12699_v4  ;;  %v4081_v7 = vor.u32 %v4080_v12, %v4077_v22  ;;  %v4084_v51 = vor.u32 %v4083_v19, %v4082_v5 }
 0x2b6   : > { %v13306_v48 = vadd.f32 %v3013_v29, %v2622_v9  ;;  %10220 = vmatprep.mubr.msk.bf16.mxu1 %vm11313_vm1, %v15329_v57  ;;  %v9949_v42 = vpop.f32.mrf.mxu0  ;;  %v15411_v29 = vshll.u32 %v12696_v10, 16 }
 0x2b7   : > { %v10034_v50 = vpop.f32.mrf.mxu1  ;;  %v4085_v15 = vsel %vm4073_vm8, %v4081_v7, %v4084_v51 }
 0x2b8   : > { %v2560_v23 = vpop.f32.mrf.mxu0  ;;  %10135 = vmatmul.mubr.msk.bf16.gmra.mxu0 %vm524_vm3, %v3404_v41  ;;  %v4087_v22 = vrot.slane %v15411_v29, 2 }
 0x2b9   : > { %v3016_v3 = vpop.f32.mrf.mxu1  ;;  %v2624_v8 = vadd.f32 %v2560_v23, %v12710_v17  ;;  %10226 = vmatprep.mubr.msk.bf16.mxu0 %vm11313_vm1, %v15329_v57  ;;  %v15410_v17 = vshrl.u32 %v12696_v10, 16 }
 0x2ba   : > { %v13312_v11 = vadd.f32 %v3016_v3, %v2623_v34  ;;  %v9952_v16 = vpop.f32.mrf.mxu0 }
 0x2bb   : > { %v10035_v4 = vpop.f32.mrf.mxu1  ;;  %v4086_v5 = vrot.slane %v15410_v17, 1 }
 0x2bc   : > { %v2563_v55 = vpop.f32.mrf.mxu0  ;;  %v15413_v4 = vshll.u32 %v12728_v2, 16 }
 0x2bd   : > { %v3021_v9 = vpop.f32.mrf.mxu1  ;;  %10221 = vmatmul.mubr.msk.bf16.gmra.mxu1 %vm524_vm3, %v3758_v58  ;;  %v2625_v41 = vadd.f32 %v2563_v55, %v12722_v24  ;;  %v4088_v50 = vor.u32 %v4087_v22, %v4086_v5 }
 0x2be   : > { %v13319_v12 = vadd.f32 %v3021_v9, %v2624_v8  ;;  %10312 = vmatprep.mubr.msk.bf16.mxu1 %vm11313_vm1, %v15329_v57  ;;  %v9953_v31 = vpop.f32.mrf.mxu0  ;;  %v15412_v8 = vshrl.u32 %v12728_v2, 16  ;;  %v4091_v55 = vrot.slane %v15413_v4, 2 }
 0x2bf   : > { %v10038_v19 = vpop.f32.mrf.mxu1 }
 0x2c0   : > { %v2568_v34 = vpop.f32.mrf.mxu0  ;;  %10227 = vmatmul.mubr.msk.bf16.vlgmr.msra.gmra.mxu0 %vm524_vm3, %v4085_v15  ;;  %v4090_v16 = vrot.slane %v15412_v8, 1 }
 0x2c1   : > { %v3024_v42 = vpop.f32.mrf.mxu1  ;;  %v2626_v58 = vadd.f32 %v2568_v34, %v12734_v21  ;;  %10230 = vmatprep.mubr.msk.bf16.mxu0 %vm11313_vm1, %v15329_v57  ;;  %v4089_v21 = vsel %vm4073_vm8, %v4084_v51, %v4088_v50 }
 0x2c2   : > { %v13329_v24 = vadd.f32 %v3024_v42, %v2625_v41  ;;  %v9956_v23 = vpop.f32.mrf.mxu0  ;;  %v4092_v22 = vor.u32 %v4091_v55, %v4090_v16 }
 0x2c3   : > { %v10039_v10 = vpop.f32.mrf.mxu1 }
 0x2c4   : > { %v2571_v3 = vpop.f32.mrf.mxu0  ;;  %v4093_v51 = vsel %vm4073_vm8, %v4088_v50, %v4092_v22  ;;  %v15414_v10 = vshrl.u32 %v12743_v20, 16 }
 0x2c5   : > { %v3029_v7 = vpop.f32.mrf.mxu1  ;;  %v2627_v9 = vadd.f32 %v2571_v3, %v12746_v0 }
 0x2c6   : > { %v13338_v15 = vadd.f32 %v3029_v7, %v2626_v58  ;;  %v9957_v41 = vpop.f32.mrf.mxu0  ;;  %v4094_v3 = vrot.slane %v15414_v10, 1 }
 0x2c7   : > { %v10042_v17 = vpop.f32.mrf.mxu1 }
 0x2c8   : > { %v2576_v29 = vpop.f32.mrf.mxu0  ;;  %10231 = vmatmul.mubr.msk.bf16.gmra.mxu0 %vm524_vm3, %v4089_v21 }
 0x2c9   : > { %v3032_v5 = vpop.f32.mrf.mxu1  ;;  %v2628_v31 = vadd.f32 %v2576_v29, %v12758_v63  ;;  %10234 = vmatprep.mubr.msk.bf16.mxu0 %vm11313_vm1, %v15329_v57  ;;  %v15415_v63 = vshll.u32 %v12743_v20, 16  ;;  %v15417_v20 = vshrl.u32 %v12776_v40, 16 }
 0x2ca   : > { %v13343_v19 = vadd.f32 %v3032_v5, %v2627_v9  ;;  %v9960_v2 = vpop.f32.mrf.mxu0  ;;  %v15416_v9 = vld [vmem:[#allocation7_spill] sm:$0xff] }
 0x2cb   : > { %v10043_v0 = vpop.f32.mrf.mxu1  ;;  %v4095_v7 = vrot.slane %v15415_v63, 2  ;;  %v15418_v2 = vshll.u32 %v12776_v40, 16 }
 0x2cc   : > { %v2579_v34 = vpop.f32.mrf.mxu0 }
 0x2cd   : > { %v3037_v42 = vpop.f32.mrf.mxu1  ;;  %v2629_v58 = vadd.f32 %v2579_v34, %v12770_v37  ;;  %v4096_v37 = vor.u32 %v4095_v7, %v4094_v3  ;;  %v4099_v0 = vrot.slane %v15418_v2, 2  ;;  %v15421_v2 = vld [vmem:[#allocation8_spill] sm:$0xff] }
 0x2ce   : > { %v13349_v23 = vadd.f32 %v3037_v42, %v2628_v31  ;;  %v9961_v8 = vpop.f32.mrf.mxu0  ;;  %v4098_v31 = vrot.slane %v15417_v20, 1 }
 0x2cf   : > { %v10046_v16 = vpop.f32.mrf.mxu1  ;;  %v4097_v42 = vsel %vm4073_vm8, %v4092_v22, %v4096_v37 }
 0x2d0   : > { %v2584_v4 = vpop.f32.mrf.mxu0  ;;  %10235 = vmatmul.mubr.msk.bf16.gmra.mxu0 %vm524_vm3, %v4093_v51  ;;  %v4100_v3 = vor.u32 %v4099_v0, %v4098_v31 }
 0x2d1   : > { %v3040_v55 = vpop.f32.mrf.mxu1  ;;  %v2630_v21 = vadd.f32 %v2584_v4, %v15416_v9  ;;  %10238 = vmatprep.mubr.msk.bf16.mxu0 %vm11313_vm1, %v15329_v57 }
 0x2d2   : > { %v13357_v41 = vadd.f32 %v3040_v55, %v2629_v58  ;;  %v9964_v50 = vpop.f32.mrf.mxu0  ;;  %v4101_v55 = vsel %vm4073_vm8, %v4096_v37, %v4100_v3 }
 0x2d3   : > { %v10047_v17 = vpop.f32.mrf.mxu1 }
 0x2d4   : > { %v2587_v29 = vpop.f32.mrf.mxu0  ;;  %v15420_v17 = vshll.u32 %v12801_v45, 16 }
 0x2d5   : > { %v3045_v5 = vpop.f32.mrf.mxu1 }
 0x2d6   : > { %v13365_v34 = vadd.f32 %v3045_v5, %v2630_v21  ;;  %v9965_v51 = vpop.f32.mrf.mxu0  ;;  %v15419_v21 = vshrl.u32 %v12801_v45, 16  ;;  %v4103_v29 = vrot.slane %v15420_v17, 2  ;;  %v15422_v45 = vshrl.u32 %v12819_v52, 16 }
 0x2d7   : > { %v10050_v58 = vpop.f32.mrf.mxu1 }
 0x2d8   : > { %v3505_v63 = vpop.f32.mrf.mxu0  ;;  %10239 = vmatmul.mubr.msk.bf16.gmra.mxu0 %vm524_vm3, %v4097_v42  ;;  %v4102_v50 = vrot.slane %v15419_v21, 1 }
 0x2d9   : > { %v3048_v10 = vpop.f32.mrf.mxu1  ;;  %v3671_v7 = vadd.f32 %v3505_v63, %v12808_v1  ;;  %10242 = vmatprep.mubr.msk.bf16.mxu0 %vm11313_vm1, %v15329_v57  ;;  %v4106_v63 = vrot.slane %v15422_v45, 1 }
 0x2da   : > { %v10056_v16 = vpop.f32.mrf.mxu0 }
 0x2db   : > { %v10051_v8 = vpop.f32.mrf.mxu1 }
 0x2dc   : > { %v3508_v40 = vpop.f32.mrf.mxu0 }
 0x2dd   : > { %v3860_v4 = vpop.f32.mrf.mxu1  ;;  %v3672_v22 = vadd.f32 %v3508_v40, %v12822_v26  ;;  %v4104_v26 = vor.u32 %v4103_v29, %v4102_v50  ;;  %v15424_v29 = vld [vmem:[#allocation11_spill] sm:$0xff] }
 0x2de   : > { %v13374_v9 = vadd.f32 %v3860_v4, %v3671_v7  ;;  %v10057_v1 = vpop.f32.mrf.mxu0  ;;  %v15423_v7 = vshll.u32 %v12819_v52, 16 }
 0x2df   : > { %v10142_v5 = vpop.f32.mrf.mxu1  ;;  %v4105_v4 = vsel %vm4073_vm8, %v4100_v3, %v4104_v26 }
 0x2e0   : > { %v3513_v20 = vpop.f32.mrf.mxu0  ;;  %10243 = vmatmul.mubr.msk.bf16.gmra.mxu0 %vm524_vm3, %v4101_v55  ;;  %v4107_v8 = vrot.slane %v15423_v7, 2 }
 0x2e1   : > { %v3863_v31 = vpop.f32.mrf.mxu1  ;;  %v3673_v0 = vadd.f32 %v3513_v20, %v15421_v2  ;;  %10246 = vmatprep.mubr.msk.bf16.mxu0 %vm11313_vm1, %v15329_v57 }
 0x2e2   : > { %v13382_v42 = vadd.f32 %v3863_v31, %v3672_v22  ;;  %v10060_v37 = vpop.f32.mrf.mxu0  ;;  %v4108_v17 = vor.u32 %v4107_v8, %v4106_v63 }
 0x2e3   : > { %v10143_v51 = vpop.f32.mrf.mxu1  ;;  %v15425_v37 = vshrl.u32 %v12856_v27, 16 }
 0x2e4   : > { %v3516_v58 = vpop.f32.mrf.mxu0  ;;  %v4109_v3 = vsel %vm4073_vm8, %v4104_v26, %v4108_v17 }
 0x2e5   : > { %v3868_v10 = vpop.f32.mrf.mxu1  ;;  %v3674_v16 = vadd.f32 %v3516_v58, %v12850_v56  ;;  %v4110_v51 = vrot.slane %v15425_v37, 1  ;;  %v15426_v58 = vshll.u32 %v12856_v27, 16  ;;  %v15428_v27 = vshrl.u32 %v12880_v36, 16 }
 0x2e6   : > { %v13391_v40 = vadd.f32 %v3868_v10, %v3673_v0  ;;  %v10061_v55 = vpop.f32.mrf.mxu0 }
 0x2e7   : > { %v10146_v22 = vpop.f32.mrf.mxu1  ;;  %v4111_v10 = vrot.slane %v15426_v58, 2 }
 0x2e8   : > { %v3521_v21 = vpop.f32.mrf.mxu0  ;;  %10247 = vmatmul.mubr.msk.bf16.gmra.mxu0 %vm524_vm3, %v4105_v4 }
 0x2e9   : > { %v3871_v50 = vpop.f32.mrf.mxu1  ;;  %v3675_v1 = vadd.f32 %v3521_v21, %v15424_v29  ;;  %10250 = vmatprep.mubr.msk.bf16.mxu0 %vm11313_vm1, %v15329_v57  ;;  %v4114_v29 = vrot.slane %v15428_v27, 1 }
 0x2ea   : > { %v13396_v5 = vadd.f32 %v3871_v50, %v3674_v16  ;;  %v10064_v52 = vpop.f32.mrf.mxu0  ;;  %v15427_v16 = vld [vmem:[#allocation9_spill] sm:$0xff] }
 0x2eb   : > { %v10147_v56 = vpop.f32.mrf.mxu1 }
 0x2ec   : > { %v3524_v20 = vpop.f32.mrf.mxu0 }
 0x2ed   : > { %v3876_v31 = vpop.f32.mrf.mxu1  ;;  %v3676_v2 = vadd.f32 %v3524_v20, %v12883_v35  ;;  %v4112_v35 = vor.u32 %v4111_v10, %v4110_v51  ;;  %v15430_v10 = vld [vmem:[#allocation6_spill] sm:$0xff] }
 0x2ee   : > { %v13402_v0 = vadd.f32 %v3876_v31, %v3675_v1  ;;  %v10065_v45 = vpop.f32.mrf.mxu0  ;;  %v15429_v1 = vshll.u32 %v12880_v36, 16 }
 0x2ef   : > { %v10150_v63 = vpop.f32.mrf.mxu1  ;;  %v4113_v31 = vsel %vm4073_vm8, %v4108_v17, %v4112_v35 }
 0x2f0   : > { %v3529_v7 = vpop.f32.mrf.mxu0  ;;  %10251 = vmatmul.mubr.msk.bf16.gmra.mxu0 %vm524_vm3, %v4109_v3  ;;  %v4115_v52 = vrot.slane %v15429_v1, 2  ;;  %v8888_v1 = vld [vmem:[%s15222_s3 + $0x4] sm:$0xf] }
 0x2f1   : > { %v3879_v8 = vpop.f32.mrf.mxu1  ;;  %v3677_v4 = vadd.f32 %v3529_v7, %v15427_v16  ;;  %10254 = vmatprep.mubr.msk.bf16.mxu0 %vm11313_vm1, %v15329_v57 }
 0x2f2   : > { %v13410_v55 = vadd.f32 %v3879_v8, %v3676_v2  ;;  %v10068_v26 = vpop.f32.mrf.mxu0  ;;  %v13423_v58 = vor.u32 %v4115_v52, %v4114_v29  ;;  %v15433_v52 = vld [vmem:[#allocation12_spill] sm:$0xff] }
 0x2f3   : > { %v10151_v22 = vpop.f32.mrf.mxu1  ;;  %v15431_v26 = vshrl.u32 %v12925_v46, 16 }
 0x2f4   : > { %v3532_v21 = vpop.f32.mrf.mxu0  ;;  %v4117_v17 = vsel %vm4073_vm8, %v4112_v35, %v13423_v58  ;;  %v5134_v35 = vsel %vm5132_vm9, %v8888_v1, 0 }
 0x2f5   : > { %v3884_v50 = vpop.f32.mrf.mxu1  ;;  %v3678_v56 = vadd.f32 %v3532_v21, %v12919_v39  ;;  %v4118_v22 = vrot.slane %v15431_v26, 1  ;;  %v15432_v21 = vshll.u32 %v12925_v46, 16  ;;  %10311 = vmatpush3.bf16.msra.mxu1 %v5134_v35 }
 0x2f6   : > { %v13419_v20 = vadd.f32 %v3884_v50, %v3677_v4  ;;  %v10069_v3 = vpop.f32.mrf.mxu0  ;;  %10482 = vmatprep.subr.bf16.mxu1 %v15329_v57 }
 0x2f7   : > { %v10154_v2 = vpop.f32.mrf.mxu1  ;;  %v4119_v50 = vrot.slane %v15432_v21, 2  ;;  %v5004_v21 = vld [vmem:[%s15222_s3] sm:$0xf] }
 0x2f8   : > { %v3537_v37 = vpop.f32.mrf.mxu0  ;;  %10255 = vmatmul.mubr.msk.bf16.gmra.mxu0 %vm524_vm3, %v4113_v31 }
 0x2f9   : > { %v3887_v51 = vpop.f32.mrf.mxu1  ;;  %v3679_v45 = vadd.f32 %v3537_v37, %v15430_v10  ;;  %10258 = vmatprep.mubr.msk.bf16.mxu0 %vm11313_vm1, %v15329_v57  ;;  %v4120_v3 = vor.u32 %v4119_v50, %v4118_v22  ;;  %v5005_v50 = vld [vmem:[#allocation2 + $0xe] sm:$0xff] }
 0x2fa   : > { %v13426_v63 = vadd.f32 %v3887_v51, %v3678_v56  ;;  %v10072_v36 = vpop.f32.mrf.mxu0 }
 0x2fb   : > { %v10155_v39 = vpop.f32.mrf.mxu1 }
 0x2fc   : > { %v3540_v7 = vpop.f32.mrf.mxu0  ;;  %v15435_v39 = vshll.u32 %v12952_v13, 16 }
 0x2fd   : > { %v3892_v8 = vpop.f32.mrf.mxu1  ;;  %v3680_v16 = vadd.f32 %v3540_v7, %v12955_v54 }
 0x2fe   : > { %v13433_v4 = vadd.f32 %v3892_v8, %v3679_v45  ;;  %v10073_v27 = vpop.f32.mrf.mxu0  ;;  %v15434_v45 = vshrl.u32 %v12952_v13, 16  ;;  %v4123_v7 = vrot.slane %v15435_v39, 2 }
 0x2ff   : > { %v10158_v29 = vpop.f32.mrf.mxu1  ;;  %v5006_v27 = vld [vmem:[#allocation2 + $0x16] sm:$0xff] }
 0x300   : > { %v3545_v46 = vpop.f32.mrf.mxu0  ;;  %10259 = vmatmul.mubr.msk.bf16.gmra.mxu0 %vm524_vm3, %v4117_v17  ;;  %v4122_v36 = vrot.slane %v15434_v45, 1  ;;  %v5400_v29 = vsel %vm5132_vm9, %v5004_v21, 0  ;;  %v5046_v1 = vpack.c.bf16 %v5006_v27, %v5005_v50  ;;  %v15439_v50 = vld [vmem:[#allocation14_spill] sm:$0xff] }
 0x301   : > { %v3895_v54 = vpop.f32.mrf.mxu1  ;;  %v3681_v56 = vadd.f32 %v3545_v46, %v15433_v52  ;;  %10262 = vmatprep.mubr.msk.bf16.mxu0 %vm11313_vm1, %v15329_v57  ;;  %v15436_v46 = vld [vmem:[#allocation10_spill] sm:$0xff]  ;;  %10397 = vmatpush3.bf16.msra.mxu0 %v5400_v29 }
 0x302   : > { %v13537_v31 = vadd.f32 %v3895_v54, %v3680_v16  ;;  %v10076_v2 = vpop.f32.mrf.mxu0  ;;  %v4121_v16 = vsel %vm4073_vm8, %v13423_v58, %v4120_v3  ;;  %10313 = vmatmul.mubr.msk.bf16.vlgmr.msra.gmra.mxu1 %vm4850_vm10, %v5046_v1  ;;  %10568 = vmatprep.subr.bf16.mxu0 %v15329_v57 }
 0x303   : > { %v10159_v37 = vpop.f32.mrf.mxu1  ;;  %10316 = vmatprep.mubr.msk.bf16.mxu1 %vm11313_vm1, %v15329_v57 }
 0x304   : > { %v3548_v51 = vpop.f32.mrf.mxu0 }
 0x305   : > { %v3900_v10 = vpop.f32.mrf.mxu1  ;;  %v3682_v8 = vadd.f32 %v3548_v51, %v12991_v47  ;;  %v4124_v47 = vor.u32 %v4123_v7, %v4122_v36  ;;  %v15437_v36 = vshrl.u32 %v12997_v59, 16  ;;  %v15438_v7 = vshll.u32 %v12997_v59, 16 }
 0x306   : > { %v13547_v17 = vadd.f32 %v3900_v10, %v3681_v56  ;;  %v10077_v26 = vpop.f32.mrf.mxu0  ;;  %v15440_v59 = vshrl.u32 %v13024_v44, 16 }
 0x307   : > { %v10162_v22 = vpop.f32.mrf.mxu1  ;;  %v4125_v51 = vsel %vm4073_vm8, %v4120_v3, %v4124_v47  ;;  %v4126_v39 = vrot.slane %v15437_v36, 1 }
 0x308   : > { %v3553_v13 = vpop.f32.mrf.mxu0  ;;  %10263 = vmatmul.mubr.msk.bf16.gmra.mxu0 %vm524_vm3, %v4121_v16 }
 0x309   : > { %v3903_v35 = vpop.f32.mrf.mxu1  ;;  %v3683_v54 = vadd.f32 %v3553_v13, %v15436_v46  ;;  %10266 = vmatprep.mubr.msk.bf16.mxu0 %vm11313_vm1, %v15329_v57  ;;  %v4130_v46 = vrot.slane %v15440_v59, 1 }
 0x30a   : > { %v13557_v52 = vadd.f32 %v3903_v35, %v3682_v8  ;;  %v10080_v58 = vpop.f32.mrf.mxu0  ;;  %v4127_v8 = vrot.slane %v15438_v7, 2 }
 0x30b   : > { %v10163_v56 = vpop.f32.mrf.mxu1 }
 0x30c   : > { %v3556_v2 = vpop.f32.mrf.mxu0 }
 0x30d   : > { %v3908_v37 = vpop.f32.mrf.mxu1  ;;  %v3684_v10 = vadd.f32 %v3556_v2, %v13027_v53  ;;  %v4128_v53 = vor.u32 %v4127_v8, %v4126_v39  ;;  %v15442_v8 = vld [vmem:[#allocation15_spill] sm:$0xff] }
 0x30e   : > { %v13567_v45 = vadd.f32 %v3908_v37, %v3683_v54  ;;  %v10081_v16 = vpop.f32.mrf.mxu0  ;;  %v15441_v54 = vshll.u32 %v13024_v44, 16 }
 0x30f   : > { %v10166_v26 = vpop.f32.mrf.mxu1  ;;  %v4129_v37 = vsel %vm4073_vm8, %v4124_v47, %v4128_v53 }
 0x310   : > { %v3561_v22 = vpop.f32.mrf.mxu0  ;;  %10267 = vmatmul.mubr.msk.bf16.gmra.mxu0 %vm524_vm3, %v4125_v51  ;;  %v4131_v58 = vrot.slane %v15441_v54, 2 }
 0x311   : > { %v3911_v21 = vpop.f32.mrf.mxu1  ;;  %v3685_v27 = vadd.f32 %v3561_v22, %v15439_v50  ;;  %10270 = vmatprep.mubr.msk.bf16.mxu0 %vm11313_vm1, %v15329_v57 }
 0x312   : > { %v13575_v29 = vadd.f32 %v3911_v21, %v3684_v10  ;;  %v10084_v3 = vpop.f32.mrf.mxu0  ;;  %v4132_v7 = vor.u32 %v4131_v58, %v4130_v46 }
 0x313   : > { %v10167_v1 = vpop.f32.mrf.mxu1  ;;  %v15443_v3 = vshrl.u32 %v13069_v18, 16 }
 0x314   : > { %v3564_v13 = vpop.f32.mrf.mxu0  ;;  %v4133_v47 = vsel %vm4073_vm8, %v4128_v53, %v4132_v7 }
 0x315   : > { %v3916_v35 = vpop.f32.mrf.mxu1  ;;  %v3686_v56 = vadd.f32 %v3564_v13, %v13063_v25  ;;  %v4134_v1 = vrot.slane %v15443_v3, 1  ;;  %v15444_v13 = vshll.u32 %v13069_v18, 16  ;;  %v15446_v18 = vshrl.u32 %v13096_v49, 16 }
 0x316   : > { %v13584_v2 = vadd.f32 %v3916_v35, %v3685_v27  ;;  %v10085_v51 = vpop.f32.mrf.mxu0 }
 0x317   : > { %v10170_v10 = vpop.f32.mrf.mxu1  ;;  %v4135_v35 = vrot.slane %v15444_v13, 2 }
 0x318   : > { %v3569_v36 = vpop.f32.mrf.mxu0  ;;  %10271 = vmatmul.mubr.msk.bf16.gmra.mxu0 %vm524_vm3, %v4129_v37 }
 0x319   : > { %v3919_v39 = vpop.f32.mrf.mxu1  ;;  %v3687_v16 = vadd.f32 %v3569_v36, %v15442_v8  ;;  %10274 = vmatprep.mubr.msk.bf16.mxu0 %vm11313_vm1, %v15329_v57  ;;  %v4138_v8 = vrot.slane %v15446_v18, 1 }
 0x31a   : > { %v13589_v26 = vadd.f32 %v3919_v39, %v3686_v56  ;;  %v10088_v44 = vpop.f32.mrf.mxu0  ;;  %v15445_v56 = vld [vmem:[#allocation13_spill] sm:$0xff] }
 0x31b   : > { %v10171_v25 = vpop.f32.mrf.mxu1 }
 0x31c   : > { %v3572_v22 = vpop.f32.mrf.mxu0 }
 0x31d   : > { %v3924_v21 = vpop.f32.mrf.mxu1  ;;  %v3688_v50 = vadd.f32 %v3572_v22, %v13099_v32  ;;  %v4136_v32 = vor.u32 %v4135_v35, %v4134_v1  ;;  %v15448_v35 = vld [vmem:[#allocation17_spill] sm:$0xff] }
 0x31e   : > { %v13595_v27 = vadd.f32 %v3924_v21, %v3687_v16  ;;  %v10089_v59 = vpop.f32.mrf.mxu0  ;;  %v15447_v16 = vshll.u32 %v13096_v49, 16 }
 0x31f   : > { %v10174_v46 = vpop.f32.mrf.mxu1  ;;  %v4137_v21 = vsel %vm4073_vm8, %v4132_v7, %v4136_v32 }
 0x320   : > { %v3577_v54 = vpop.f32.mrf.mxu0  ;;  %10275 = vmatmul.mubr.msk.bf16.gmra.mxu0 %vm524_vm3, %v4133_v47  ;;  %v4139_v44 = vrot.slane %v15447_v16, 2 }
 0x321   : > { %v3927_v58 = vpop.f32.mrf.mxu1  ;;  %v3689_v37 = vadd.f32 %v3577_v54, %v15445_v56  ;;  %10278 = vmatprep.mubr.msk.bf16.mxu0 %vm11313_vm1, %v15329_v57 }
 0x322   : > { %v13603_v51 = vadd.f32 %v3927_v58, %v3688_v50  ;;  %v10092_v53 = vpop.f32.mrf.mxu0  ;;  %v4140_v13 = vor.u32 %v4139_v44, %v4138_v8 }
 0x323   : > { %v10175_v10 = vpop.f32.mrf.mxu1  ;;  %v15449_v53 = vshrl.u32 %v13141_v6, 16 }
 0x324   : > { %v3580_v36 = vpop.f32.mrf.mxu0  ;;  %v4141_v7 = vsel %vm4073_vm8, %v4136_v32, %v4140_v13 }
 0x325   : > { %v3932_v39 = vpop.f32.mrf.mxu1  ;;  %v3690_v25 = vadd.f32 %v3580_v36, %v13135_v38  ;;  %v4142_v10 = vrot.slane %v15449_v53, 1  ;;  %v15450_v36 = vshll.u32 %v13141_v6, 16  ;;  %v15452_v6 = vshrl.u32 %v13168_v14, 16 }
 0x326   : > { %v13612_v22 = vadd.f32 %v3932_v39, %v3689_v37  ;;  %v10093_v47 = vpop.f32.mrf.mxu0 }
 0x327   : > { %v10178_v50 = vpop.f32.mrf.mxu1  ;;  %v4143_v39 = vrot.slane %v15450_v36, 2 }
 0x328   : > { %v3585_v3 = vpop.f32.mrf.mxu0  ;;  %10279 = vmatmul.mubr.msk.bf16.gmra.mxu0 %vm524_vm3, %v4137_v21 }
 0x329   : > { %v3935_v1 = vpop.f32.mrf.mxu1  ;;  %v3691_v59 = vadd.f32 %v3585_v3, %v15448_v35  ;;  %10282 = vmatprep.mubr.msk.bf16.mxu0 %vm11313_vm1, %v15329_v57  ;;  %v4146_v35 = vrot.slane %v15452_v6, 1  ;;  %v15457_v6 = vshll.u32 %v13210_v33, 16 }
 0x32a   : > { %v13617_v46 = vadd.f32 %v3935_v1, %v3690_v25  ;;  %v10096_v49 = vpop.f32.mrf.mxu0  ;;  %v15451_v25 = vld [vmem:[#allocation18_spill] sm:$0xff] }
 0x32b   : > { %v10179_v38 = vpop.f32.mrf.mxu1 }
 0x32c   : > { %v3588_v54 = vpop.f32.mrf.mxu0  ;;  %v15454_v38 = vld [vmem:[#allocation16_spill] sm:$0xff] }
 0x32d   : > { %v3940_v58 = vpop.f32.mrf.mxu1  ;;  %v3692_v56 = vadd.f32 %v3588_v54, %v13171_v30  ;;  %v4144_v30 = vor.u32 %v4143_v39, %v4142_v10 }
 0x32e   : > { %v13623_v37 = vadd.f32 %v3940_v58, %v3691_v59  ;;  %v10097_v18 = vpop.f32.mrf.mxu0  ;;  %v15453_v59 = vshll.u32 %v13168_v14, 16 }
 0x32f   : > { %v10182_v8 = vpop.f32.mrf.mxu1  ;;  %v15455_v18 = vld [vmem:[#allocation20_spill] sm:$0xff] }
 0x330   : > { %v3593_v16 = vpop.f32.mrf.mxu0  ;;  %10283 = vmatmul.mubr.msk.bf16.gmra.mxu0 %vm524_vm3, %v4141_v7  ;;  %v4147_v49 = vrot.slane %v15453_v59, 2  ;;  %v4145_v7 = vsel %vm4073_vm8, %v4140_v13, %v4144_v30 }
 0x331   : > { %v3943_v44 = vpop.f32.mrf.mxu1  ;;  %v3693_v21 = vadd.f32 %v3593_v16, %v15451_v25  ;;  %10286 = vmatprep.mubr.msk.bf16.mxu0 %vm11313_vm1, %v15329_v57 }
 0x332   : > { %v13631_v47 = vadd.f32 %v3943_v44, %v3692_v56  ;;  %v10100_v32 = vpop.f32.mrf.mxu0  ;;  %v4148_v39 = vor.u32 %v4147_v49, %v4146_v35  ;;  %v4151_v35 = vrot.slane %v15457_v6, 2 }
 0x333   : > { %v10183_v50 = vpop.f32.mrf.mxu1 }
 0x334   : > { %v3596_v3 = vpop.f32.mrf.mxu0  ;;  %v4149_v13 = vsel %vm4073_vm8, %v4144_v30, %v4148_v39 }
 0x335   : > { %v3948_v1 = vpop.f32.mrf.mxu1  ;;  %v3694_v54 = vadd.f32 %v3596_v3, %v15454_v38  ;;  %v15456_v3 = vshrl.u32 %v13210_v33, 16 }
 0x336   : > { %v13640_v58 = vadd.f32 %v3948_v1, %v3693_v21  ;;  %v10101_v56 = vpop.f32.mrf.mxu0 }
 0x337   : > { %v10186_v53 = vpop.f32.mrf.mxu1  ;;  %v4150_v1 = vrot.slane %v15456_v3, 1 }
 0x338   : > { %v3601_v36 = vpop.f32.mrf.mxu0  ;;  %10287 = vmatmul.mubr.msk.bf16.gmra.mxu0 %vm524_vm3, %v4145_v7  ;;  %v15458_v7 = vld [vmem:[#allocation21_spill] sm:$0xff] }
 0x339   : > { %v3951_v10 = vpop.f32.mrf.mxu1  ;;  %v3695_v8 = vadd.f32 %v3601_v36, %v15455_v18  ;;  %10290 = vmatprep.mubr.msk.bf16.mxu0 %vm11313_vm1, %v15329_v57  ;;  %v15459_v18 = vshrl.u32 %v13228_v62, 16 }
 0x33a   : > { %v13645_v16 = vadd.f32 %v3951_v10, %v3694_v54  ;;  %v10104_v14 = vpop.f32.mrf.mxu0 }
 0x33b   : > { %v10187_v44 = vpop.f32.mrf.mxu1  ;;  %v15460_v14 = vshll.u32 %v13228_v62, 16 }
 0x33c   : > { %v3604_v25 = vpop.f32.mrf.mxu0 }
 0x33d   : > { %v3956_v21 = vpop.f32.mrf.mxu1  ;;  %v3696_v32 = vadd.f32 %v3604_v25, %v13231_v60  ;;  %v4152_v60 = vor.u32 %v4151_v35, %v4150_v1  ;;  %v4155_v44 = vrot.slane %v15460_v14, 2 }
 0x33e   : > { %v13651_v50 = vadd.f32 %v3956_v21, %v3695_v8  ;;  %v10105_v59 = vpop.f32.mrf.mxu0  ;;  %v4154_v8 = vrot.slane %v15459_v18, 1 }
 0x33f   : > { %v10190_v49 = vpop.f32.mrf.mxu1 }
 0x340   : > { %v3609_v38 = vpop.f32.mrf.mxu0  ;;  %10291 = vmatmul.mubr.msk.bf16.gmra.mxu0 %vm524_vm3, %v4149_v13  ;;  %v4153_v13 = vsel %vm4073_vm8, %v4148_v39, %v4152_v60  ;;  %v4156_v59 = vor.u32 %v4155_v44, %v4154_v8  ;;  %v15461_v49 = vld [vmem:[#allocation19_spill] sm:$0xff] }
 0x341   : > { %v3959_v54 = vpop.f32.mrf.mxu1  ;;  %v3697_v56 = vadd.f32 %v3609_v38, %v15458_v7  ;;  %10294 = vmatprep.mubr.msk.bf16.mxu0 %vm11313_vm1, %v15329_v57 }
 0x342   : > { %v13659_v30 = vadd.f32 %v3959_v54, %v3696_v32  ;;  %v10108_v53 = vpop.f32.mrf.mxu0  ;;  %v11245_v32 = vld [vmem:[%s11435_s29 + $0xb8] ss:$0 sps:$4 sm:$0xff]   ;;  %s11250_s29 = scalar_lea.vmem %s8542_s25, 16 }
 0x343   : > { %v10191_v36 = vpop.f32.mrf.mxu1  ;;  %v4159_v62 = vshrl.u32 %v11245_v32, 16  ;;  %p11251_p11 = scmp.ne.s32.totalorder %s8542_s25, %s11250_s29  ;;  %p11258_p1 = scmp.lt.s32.totalorder %s11256_s21, %s11250_s29 }
 0x344   : > { %v3612_v10 = vpop.f32.mrf.mxu0  ;;  %v4157_v36 = vsel %vm4073_vm8, %v4152_v60, %v4156_v59 }
 0x345   : > { %v3964_v33 = vpop.f32.mrf.mxu1  ;;  %v3698_v25 = vadd.f32 %v3612_v10, %v13255_v43  ;;  %v4162_v43 = vshll.u32 %v11245_v32, 16  ;;  %v4161_v18 = vrot.slane %v4159_v62, 1  ;;  %p11252_p12 = pnand %p11251_p11, %p11404_p5  ;;  %p11259_p2 = por %p11258_p1, %p11257_p0 }
 0x346   : > { %v13668_v21 = vadd.f32 %v3964_v33, %v3697_v56  ;;  %v10109_v3 = vpop.f32.mrf.mxu0 }
 0x347   : > { %v10194_v6 = vpop.f32.mrf.mxu1  ;;  %v4164_v8 = vrot.slane %v4162_v43, 2  ;;  %v15462_v3 = vld [vmem:[#allocation23_spill] sm:$0xff]  ;;  %p11253_p13 = pneg %p11252_p12 }
 0x348   : > { %v3617_v1 = vpop.f32.mrf.mxu0  ;;  %10295 = vmatmul.mubr.msk.bf16.gmra.mxu0 %vm524_vm3, %v4153_v13 }
 0x349   : > { %v3967_v35 = vpop.f32.mrf.mxu1  ;;  %v3699_v38 = vadd.f32 %v3617_v1, %v15461_v49  ;;  %10298 = vmatprep.mubr.msk.bf16.mxu0 %vm11313_vm1, %v15329_v57  ;;  %v4165_v60 = vor.u32 %v4164_v8, %v4161_v18  ;;  %p11260_p3 = pnand %p11259_p2, %p11253_p13 }
 0x34a   : > { %v13674_v54 = vadd.f32 %v3967_v35, %v3698_v25  ;;  %v10112_v7 = vpop.f32.mrf.mxu0 }
 0x34b   : > { %v10195_v56 = vpop.f32.mrf.mxu1  ;;  %v4166_v43 = vsel %vm4073_vm8, %v4156_v59, %v4165_v60 }
 0x34c   : > { %v3620_v39 = vpop.f32.mrf.mxu0 }
 0x34d   : > { %v3972_v53 = vpop.f32.mrf.mxu1  ;;  %v3700_v10 = vadd.f32 %v3620_v39, %v13276_v61 }
 0x34e   : > { %v13680_v33 = vadd.f32 %v3972_v53, %v3699_v38  ;;  %v10113_v14 = vpop.f32.mrf.mxu0 }
 0x34f   : > { %v10198_v44 = vpop.f32.mrf.mxu1 }
 0x350   : > { %v3625_v25 = vpop.f32.mrf.mxu0  ;;  %10299 = vmatmul.mubr.msk.bf16.gmra.mxu0 %vm524_vm3, %v4157_v36 }
 0x351   : > { %v3975_v13 = vpop.f32.mrf.mxu1  ;;  %v3701_v32 = vadd.f32 %v3625_v25, %v15462_v3  ;;  %10302 = vmatprep.mubr.msk.bf16.mxu0 %vm11313_vm1, %v15329_v57 }
 0x352   : > { %v13684_v6 = vadd.f32 %v3975_v13, %v3700_v10  ;;  %v10116_v1 = vpop.f32.mrf.mxu0 }
 0x353   : > { %v10199_v61 = vpop.f32.mrf.mxu1 }
 0x354   : > { %v3628_v35 = vpop.f32.mrf.mxu0  ;;  %v4942_v61 = vld [vmem:[#allocation2 + $0xd] sm:$0xff] }
 0x355   : > { %v3980_v49 = vpop.f32.mrf.mxu1  ;;  %v3702_v38 = vadd.f32 %v3628_v35, %v13295_v28  ;;  %v4943_v35 = vld [vmem:[#allocation2 + $0x15] sm:$0xff] }
 0x356   : > { %v13689_v62 = vadd.f32 %v3980_v49, %v3701_v32  ;;  %v10117_v7 = vpop.f32.mrf.mxu0 }
 0x357   : > { %v10202_v56 = vpop.f32.mrf.mxu1  ;;  %v4983_v7 = vpack.c.bf16 %v4943_v35, %v4942_v61 }
 0x358   : > { %v3633_v39 = vpop.f32.mrf.mxu0  ;;  %10303 = vmatmul.mubr.msk.bf16.gmra.mxu0 %vm524_vm3, %v4166_v43 }
 0x359   : > { %v3983_v53 = vpop.f32.mrf.mxu1  ;;  %v3703_v36 = vadd.f32 %v3633_v39, %v13306_v48  ;;  %10306 = vmatprep.mubr.msk.bf16.mxu0 %vm11313_vm1, %v15329_v57 }
 0x35a   : > { %v13694_v10 = vadd.f32 %v3983_v53, %v3702_v38  ;;  %v10120_v18 = vpop.f32.mrf.mxu0 }
 0x35b   : > { %v10203_v8 = vpop.f32.mrf.mxu1 }
 0x35c   : > { %v3636_v28 = vpop.f32.mrf.mxu0 }
 0x35d   : > { %v3988_v14 = vpop.f32.mrf.mxu1  ;;  %v3704_v44 = vadd.f32 %v3636_v28, %v13312_v11 }
 0x35e   : > { %v13699_v59 = vadd.f32 %v3988_v14, %v3703_v36  ;;  %v10121_v25 = vpop.f32.mrf.mxu0 }
 0x35f   : > { %v10206_v13 = vpop.f32.mrf.mxu1 }
 0x360   : > { %v3641_v3 = vpop.f32.mrf.mxu0  ;;  %10307 = vmatmul.mubr.msk.bf16.gmra.mxu0 %vm524_vm3, %v4165_v60 }
 0x361   : > { %v3991_v32 = vpop.f32.mrf.mxu1  ;;  %v3705_v48 = vadd.f32 %v3641_v3, %v13319_v12  ;;  %10398 = vmatprep.mubr.msk.bf16.mxu0 %vm11313_vm1, %v15329_v57 }
 0x362   : > { %v13703_v1 = vadd.f32 %v3991_v32, %v3704_v44  ;;  %v10124_v49 = vpop.f32.mrf.mxu0 }
 0x363   : > { %v10207_v38 = vpop.f32.mrf.mxu1 }
 0x364   : > { %v3644_v11 = vpop.f32.mrf.mxu0 }
 0x365   : > { %v3996_v43 = vpop.f32.mrf.mxu1  ;;  %v3706_v56 = vadd.f32 %v3644_v11, %v13329_v24 }
 0x366   : > { %v13708_v39 = vadd.f32 %v3996_v43, %v3705_v48  ;;  %v10125_v53 = vpop.f32.mrf.mxu0 }
 0x367   : > { %v10210_v60 = vpop.f32.mrf.mxu1 }
 0x368   : > { %v3649_v36 = vpop.f32.mrf.mxu0  ;;  %10399 = vmatmul.mubr.msk.bf16.vlgmr.msra.gmra.mxu0 %vm4850_vm10, %v4983_v7 }
 0x369   : > { %v3999_v12 = vpop.f32.mrf.mxu1  ;;  %v3707_v18 = vadd.f32 %v3649_v36, %v13338_v15  ;;  %10402 = vmatprep.mubr.msk.bf16.mxu0 %vm11313_vm1, %v15329_v57 }
 0x36a   : > { %v13712_v8 = vadd.f32 %v3999_v12, %v3706_v56  ;;  %v10128_v28 = vpop.f32.mrf.mxu0 }
 0x36b   : > { %v10211_v14 = vpop.f32.mrf.mxu1 }
 0x36c   : > { %v3652_v44 = vpop.f32.mrf.mxu0 }
 0x36d   : > { %v4004_v25 = vpop.f32.mrf.mxu1  ;;  %v3708_v24 = vadd.f32 %v3652_v44, %v13343_v19 }
 0x36e   : > { %v13717_v13 = vadd.f32 %v4004_v25, %v3707_v18  ;;  %v10129_v3 = vpop.f32.mrf.mxu0 }
 0x36f   : > { %v10214_v32 = vpop.f32.mrf.mxu1 }
 0x370   : > { %v3657_v48 = vpop.f32.mrf.mxu0 }
 0x371   : > { %v4007_v61 = vpop.f32.mrf.mxu1  ;;  %v3709_v35 = vadd.f32 %v3657_v48, %v13349_v23 }
 0x372   : > { %v13720_v15 = vadd.f32 %v4007_v61, %v3708_v24  ;;  %v10132_v49 = vpop.f32.mrf.mxu0 }
 0x373   : > { %v10215_v38 = vpop.f32.mrf.mxu1 }
 0x374   : > { %v3660_v11 = vpop.f32.mrf.mxu0  ;;  %v4607_v38 = vpop.permute.xlu0 %4606 }
 0x375   : > { %v4012_v43 = vpop.f32.mrf.mxu1  ;;  %v3710_v7 = vadd.f32 %v3660_v11, %v13357_v41  ;;  %v13733_v41 = vld [vmem:[%s15221_s2] ss:$0 sm:$0xff] }
 0x376   : > { %v13723_v56 = vadd.f32 %v4012_v43, %v3709_v35  ;;  %v10133_v53 = vpop.f32.mrf.mxu0 }
 0x377   : > { %v10218_v19 = vpop.f32.mrf.mxu1 }
 0x378   : > { %v3665_v60 = vpop.f32.mrf.mxu0 }
 0x379   : > { %v4015_v36 = vpop.f32.mrf.mxu1  ;;  %v3711_v12 = vadd.f32 %v3665_v60, %v13365_v34 }
 0x37a   : > { %v13726_v18 = vadd.f32 %v4015_v36, %v3710_v7  ;;  %v10136_v28 = vpop.f32.mrf.mxu0 }
 0x37b   : > { %v10219_v23 = vpop.f32.mrf.mxu1 }
 0x37c   : > { %v3668_v14 = vpop.f32.mrf.mxu0 }
 0x37d   : > { %v4020_v44 = vpop.f32.mrf.mxu1 }
 0x37e   : > { %v13728_v25 = vadd.f32 %v4020_v44, %v3711_v12  ;;  %v10137_v24 = vpop.f32.mrf.mxu0 }
 0x37f   : > { %v10222_v3 = vpop.f32.mrf.mxu1  ;;  %v4617_v24 = vpop.permute.xlu1 %4616 }
 0x380   : > { %v4267_v32 = vpop.f32.mrf.mxu0 }
 0x381   : > { %v4023_v48 = vpop.f32.mrf.mxu1  ;;  %v4433_v61 = vadd.f32 %v4267_v32, %v13374_v9  ;;  %v4612_v9 = vpop.permute.xlu0 %4611 }
 0x382   : > { %v10228_v34 = vpop.f32.mrf.mxu0 }
 0x383   : > { %v10223_v35 = vpop.f32.mrf.mxu1  ;;  %v4481_v49 = vadd.f32 %v13733_v41, %v4433_v61 }
 0x384   : > { %v4270_v11 = vpop.f32.mrf.mxu0 }
 0x385   : > { %v4522_v43 = vmax.f32 %v4481_v49, 0.0  ;;  %v4434_v7 = vadd.f32 %v4270_v11, %v13382_v42 }
 0x386   : > { %v10229_v53 = vpop.f32.mrf.mxu0 }
 0x387   : > { %v4809_v19 = vmul.f32 %v4607_v38, %v4522_v43  ;;  %v4482_v60 = vadd.f32 %v13733_v41, %v4434_v7  ;;  %v4622_v38 = vpop.permute.xlu1 %4621 }
 0x388   : > { %v4275_v36 = vpop.f32.mrf.mxu0 }
 0x389   : > { %4901 = vst.msk [vmem:[#allocation2 + $0x20] sm:$0xff] %vm4850_vm10, %v4809_v19  ;;  %v4523_v12 = vmax.f32 %v4482_v60, 0.0  ;;  %v4435_v28 = vadd.f32 %v4275_v36, %v13391_v40 }
 0x38a   : > { %v10232_v23 = vpop.f32.mrf.mxu0 }
 0x38b   : > { %v4810_v14 = vmul.f32 %v4612_v9, %v4523_v12  ;;  %v4483_v44 = vadd.f32 %v13733_v41, %v4435_v28 }
 0x38c   : > { %v4278_v3 = vpop.f32.mrf.mxu0 }
 0x38d   : > { %4902 = vst.msk [vmem:[#allocation2 + $0x28] sm:$0xff] %vm4850_vm10, %v4810_v14  ;;  %v4524_v42 = vmax.f32 %v4483_v44, 0.0  ;;  %v4436_v32 = vadd.f32 %v4278_v3, %v13396_v5  ;;  %v4627_v14 = vpop.permute.xlu0 %4626 }
 0x38e   : > { %v10233_v48 = vpop.f32.mrf.mxu0 }
 0x38f   : > { %v4811_v61 = vmul.f32 %v4617_v24, %v4524_v42  ;;  %v4484_v34 = vadd.f32 %v13733_v41, %v4436_v32  ;;  %v4632_v32 = vpop.permute.xlu1 %4631 }
 0x390   : > { %v4283_v35 = vpop.f32.mrf.mxu0  ;;  %v5007_v53 = vld [vmem:[#allocation2 + $0x1e] sm:$0xff] }
 0x391   : > { %4903 = vst.msk [vmem:[#allocation2 + $0x30] sm:$0xff] %vm4850_vm10, %v4811_v61  ;;  %v4525_v40 = vmax.f32 %v4484_v34, 0.0  ;;  %v4437_v49 = vadd.f32 %v4283_v35, %v13402_v0  ;;  %v4944_v36 = vld [vmem:[#allocation2 + $0x1d] sm:$0xff] }
 0x392   : > { %v10236_v11 = vpop.f32.mrf.mxu0 }
 0x393   : > { %v4812_v43 = vmul.f32 %v4622_v38, %v4525_v40  ;;  %v4485_v7 = vadd.f32 %v13733_v41, %v4437_v49 }
 0x394   : > { %v4286_v19 = vpop.f32.mrf.mxu0  ;;  %v5008_v60 = vld [vmem:[#allocation2 + $0x26] sm:$0xff] }
 0x395   : > { %v4945_v5 = vld [vmem:[#allocation2 + $0x25] sm:$0xff]  ;;  %4904 = vst.msk [vmem:[#allocation2 + $0x38] sm:$0xff] %vm4850_vm10, %v4812_v43  ;;  %v4526_v12 = vmax.f32 %v4485_v7, 0.0  ;;  %v4438_v28 = vadd.f32 %v4286_v19, %v13410_v55  ;;  %v5047_v9 = vpack.c.bf16 %v5008_v60, %v5007_v53  ;;  %v4637_v60 = vpop.permute.xlu0 %4636 }
 0x396   : > { %v4984_v23 = vpack.c.bf16 %v4945_v5, %v4944_v36  ;;  %v10237_v44 = vpop.f32.mrf.mxu0 }
 0x397   : > { %v4813_v0 = vmul.f32 %v4627_v14, %v4526_v12  ;;  %v4486_v24 = vadd.f32 %v13733_v41, %v4438_v28  ;;  %10317 = vmatmul.mubr.msk.bf16.gmra.mxu1 %vm4850_vm10, %v5047_v9  ;;  %v4642_v9 = vpop.permute.xlu1 %4641 }
 0x398   : > { %10403 = vmatmul.mubr.msk.bf16.gmra.mxu0 %vm4850_vm10, %v4984_v23  ;;  %v4291_v3 = vpop.f32.mrf.mxu0  ;;  %10320 = vmatprep.mubr.msk.bf16.mxu1 %vm11313_vm1, %v15329_v57  ;;  %v5009_v35 = vld [vmem:[#allocation2 + $0x2e] sm:$0xff] }
 0x399   : > { %10406 = vmatprep.mubr.msk.bf16.mxu0 %vm11313_vm1, %v15329_v57  ;;  %4905 = vst.msk [vmem:[#allocation2 + $0x40] sm:$0xff] %vm4850_vm10, %v4813_v0  ;;  %v4527_v55 = vmax.f32 %v4486_v24, 0.0  ;;  %v4439_v42 = vadd.f32 %v4291_v3, %v13419_v20  ;;  %v4946_v38 = vld [vmem:[#allocation2 + $0x2d] sm:$0xff] }
 0x39a   : > { %v10240_v48 = vpop.f32.mrf.mxu0 }
 0x39b   : > { %v4814_v61 = vmul.f32 %v4632_v32, %v4527_v55  ;;  %v4487_v34 = vadd.f32 %v13733_v41, %v4439_v42 }
 0x39c   : > { %v4294_v40 = vpop.f32.mrf.mxu0  ;;  %v5010_v49 = vld [vmem:[#allocation2 + $0x36] sm:$0xff] }
 0x39d   : > { %v4947_v11 = vld [vmem:[#allocation2 + $0x35] sm:$0xff]  ;;  %4906 = vst.msk [vmem:[#allocation2 + $0x48] sm:$0xff] %vm4850_vm10, %v4814_v61  ;;  %v4528_v43 = vmax.f32 %v4487_v34, 0.0  ;;  %v4440_v7 = vadd.f32 %v4294_v40, %v13426_v63  ;;  %v5048_v53 = vpack.c.bf16 %v5010_v49, %v5009_v35  ;;  %v4647_v35 = vpop.permute.xlu0 %4646 }
 0x39e   : > { %v4985_v19 = vpack.c.bf16 %v4947_v11, %v4946_v38  ;;  %v10241_v36 = vpop.f32.mrf.mxu0 }
 0x39f   : > { %v4815_v20 = vmul.f32 %v4637_v60, %v4528_v43  ;;  %v4488_v5 = vadd.f32 %v13733_v41, %v4440_v7  ;;  %10321 = vmatmul.mubr.msk.bf16.gmra.mxu1 %vm4850_vm10, %v5048_v53  ;;  %v8931_v43 = vld [vmem:[%s15222_s3 + $0x8] sm:$0xf]  ;;  %v4652_v7 = vpop.permute.xlu1 %4651 }
 0x3a0   : > { %10407 = vmatmul.mubr.msk.bf16.gmra.mxu0 %vm4850_vm10, %v4985_v19  ;;  %v4299_v12 = vpop.f32.mrf.mxu0  ;;  %10324 = vmatprep.mubr.msk.bf16.mxu1 %vm11313_vm1, %v15329_v57  ;;  %v5011_v0 = vld [vmem:[#allocation2 + $0x3e] sm:$0xff]  ;;  %v5730_v19 = vsel %vm5132_vm9, %v8931_v43, 0 }
 0x3a1   : > { %10410 = vmatprep.mubr.msk.bf16.mxu0 %vm11313_vm1, %v15329_v57  ;;  %4907 = vst.msk [vmem:[#allocation2 + $0x50] sm:$0xff] %vm4850_vm10, %v4815_v20  ;;  %v4529_v63 = vmax.f32 %v4488_v5, 0.0  ;;  %v4441_v28 = vadd.f32 %v4299_v12, %v13433_v4  ;;  %v4948_v55 = vld [vmem:[#allocation2 + $0x3d] sm:$0xff]  ;;  %10483 = vmatpush3.bf16.msra.mxu1 %v5730_v19 }
 0x3a2   : > { %v10244_v23 = vpop.f32.mrf.mxu0  ;;  %10654 = vmatprep.subr.bf16.mxu1 %v15329_v57 }
 0x3a3   : > { %v4816_v14 = vmul.f32 %v4642_v9, %v4529_v63  ;;  %v4489_v44 = vadd.f32 %v13733_v41, %v4441_v28 }
 0x3a4   : > { %v4302_v24 = vpop.f32.mrf.mxu0  ;;  %v5012_v3 = vld [vmem:[#allocation2 + $0x46] sm:$0xff] }
 0x3a5   : > { %v4949_v42 = vld [vmem:[#allocation2 + $0x45] sm:$0xff]  ;;  %4908 = vst.msk [vmem:[#allocation2 + $0x58] sm:$0xff] %vm4850_vm10, %v4816_v14  ;;  %v4530_v32 = vmax.f32 %v4489_v44, 0.0  ;;  %v4442_v48 = vadd.f32 %v4302_v24, %v13537_v31  ;;  %v5049_v61 = vpack.c.bf16 %v5012_v3, %v5011_v0  ;;  %v4657_v44 = vpop.permute.xlu0 %4656 }
 0x3a6   : > { %v4986_v34 = vpack.c.bf16 %v4949_v42, %v4948_v55  ;;  %v10245_v40 = vpop.f32.mrf.mxu0  ;;  %v8953_v55 = vld [vmem:[%s15222_s3 + $0xc] sm:$0xf] }
 0x3a7   : > { %v4817_v4 = vmul.f32 %v4647_v35, %v4530_v32  ;;  %v4490_v49 = vadd.f32 %v13733_v41, %v4442_v48  ;;  %10325 = vmatmul.mubr.msk.bf16.gmra.mxu1 %vm4850_vm10, %v5049_v61  ;;  %v4662_v61 = vpop.permute.xlu1 %4661 }
 0x3a8   : > { %10411 = vmatmul.mubr.msk.bf16.gmra.mxu0 %vm4850_vm10, %v4986_v34  ;;  %v4307_v38 = vpop.f32.mrf.mxu0  ;;  %10328 = vmatprep.mubr.msk.bf16.mxu1 %vm11313_vm1, %v15329_v57  ;;  %v5013_v20 = vld [vmem:[#allocation2 + $0x4e] sm:$0xff] }
 0x3a9   : > { %10414 = vmatprep.mubr.msk.bf16.mxu0 %vm11313_vm1, %v15329_v57  ;;  %4909 = vst.msk [vmem:[#allocation2 + $0x60] sm:$0xff] %vm4850_vm10, %v4817_v4  ;;  %v4531_v31 = vmax.f32 %v4490_v49, 0.0  ;;  %v4443_v11 = vadd.f32 %v4307_v38, %v13547_v17  ;;  %v4950_v63 = vld [vmem:[#allocation2 + $0x4d] sm:$0xff]  ;;  %v4667_v19 = vpop.permute.xlu0 %4666 }
 0x3aa   : > { %v10248_v53 = vpop.f32.mrf.mxu0 }
 0x3ab   : > { %v4818_v60 = vmul.f32 %v4652_v7, %v4531_v31  ;;  %v4491_v36 = vadd.f32 %v13733_v41, %v4443_v11 }
 0x3ac   : > { %v4310_v5 = vpop.f32.mrf.mxu0  ;;  %v5014_v12 = vld [vmem:[#allocation2 + $0x56] sm:$0xff] }
 0x3ad   : > { %v4951_v28 = vld [vmem:[#allocation2 + $0x55] sm:$0xff]  ;;  %4910 = vst.msk [vmem:[#allocation2 + $0x68] sm:$0xff] %vm4850_vm10, %v4818_v60  ;;  %v4532_v17 = vmax.f32 %v4491_v36, 0.0  ;;  %v4444_v9 = vadd.f32 %v4310_v5, %v13557_v52  ;;  %v5050_v23 = vpack.c.bf16 %v5014_v12, %v5013_v20  ;;  %v6101_v52 = vsel %vm5132_vm9, %v8953_v55, 0 }
 0x3ae   : > { %v4987_v14 = vpack.c.bf16 %v4951_v28, %v4950_v63  ;;  %v10249_v0 = vpop.f32.mrf.mxu0  ;;  %10569 = vmatpush3.bf16.msra.mxu0 %v6101_v52  ;;  %v4672_v63 = vpop.permute.xlu1 %4671 }
 0x3af   : > { %v4819_v24 = vmul.f32 %v4657_v44, %v4532_v17  ;;  %v4492_v3 = vadd.f32 %v13733_v41, %v4444_v9  ;;  %10329 = vmatmul.mubr.msk.bf16.gmra.mxu1 %vm4850_vm10, %v5050_v23  ;;  %10740 = vmatprep.subr.bf16.mxu0 %v15329_v57 }
 0x3b0   : > { %10415 = vmatmul.mubr.msk.bf16.gmra.mxu0 %vm4850_vm10, %v4987_v14  ;;  %v4315_v42 = vpop.f32.mrf.mxu0  ;;  %10332 = vmatprep.mubr.msk.bf16.mxu1 %vm11313_vm1, %v15329_v57  ;;  %v5015_v4 = vld [vmem:[#allocation2 + $0x5e] sm:$0xff] }
 0x3b1   : > { %10418 = vmatprep.mubr.msk.bf16.mxu0 %vm11313_vm1, %v15329_v57  ;;  %4911 = vst.msk [vmem:[#allocation2 + $0x70] sm:$0xff] %vm4850_vm10, %v4819_v24  ;;  %v4533_v32 = vmax.f32 %v4492_v3, 0.0  ;;  %v4445_v48 = vadd.f32 %v4315_v42, %v13567_v45  ;;  %v4952_v31 = vld [vmem:[#allocation2 + $0x5d] sm:$0xff] }
 0x3b2   : > { %v10252_v34 = vpop.f32.mrf.mxu0 }
 0x3b3   : > { %v4820_v35 = vmul.f32 %v4662_v61, %v4533_v32  ;;  %v4493_v40 = vadd.f32 %v13733_v41, %v4445_v48  ;;  %v4677_v32 = vpop.permute.xlu0 %4676 }
 0x3b4   : > { %v4318_v49 = vpop.f32.mrf.mxu0  ;;  %v5016_v38 = vld [vmem:[#allocation2 + $0x66] sm:$0xff] }
 0x3b5   : > { %v4953_v11 = vld [vmem:[#allocation2 + $0x65] sm:$0xff]  ;;  %4912 = vst.msk [vmem:[#allocation2 + $0x78] sm:$0xff] %vm4850_vm10, %v4820_v35  ;;  %v4534_v43 = vmax.f32 %v4493_v40, 0.0  ;;  %v4446_v7 = vadd.f32 %v4318_v49, %v13575_v29  ;;  %v5051_v53 = vpack.c.bf16 %v5016_v38, %v5015_v4  ;;  %v4682_v40 = vpop.permute.xlu1 %4681 }
 0x3b6   : > { %v4988_v45 = vpack.c.bf16 %v4953_v11, %v4952_v31  ;;  %v10253_v60 = vpop.f32.mrf.mxu0 }
 0x3b7   : > { %v4821_v36 = vmul.f32 %v4667_v19, %v4534_v43  ;;  %v4494_v20 = vadd.f32 %v13733_v41, %v4446_v7  ;;  %10333 = vmatmul.mubr.msk.bf16.gmra.mxu1 %vm4850_vm10, %v5051_v53 }
 0x3b8   : > { %10419 = vmatmul.mubr.msk.bf16.gmra.mxu0 %vm4850_vm10, %v4988_v45  ;;  %v4323_v5 = vpop.f32.mrf.mxu0  ;;  %10336 = vmatprep.mubr.msk.bf16.mxu1 %vm11313_vm1, %v15329_v57  ;;  %v5017_v23 = vld [vmem:[#allocation2 + $0x6e] sm:$0xff] }
 0x3b9   : > { %10422 = vmatprep.mubr.msk.bf16.mxu0 %vm11313_vm1, %v15329_v57  ;;  %4913 = vst.msk [vmem:[#allocation2 + $0x80] sm:$0xff] %vm4850_vm10, %v4821_v36  ;;  %v4535_v29 = vmax.f32 %v4494_v20, 0.0  ;;  %v4447_v12 = vadd.f32 %v4323_v5, %v13584_v2  ;;  %v4954_v0 = vld [vmem:[#allocation2 + $0x6d] sm:$0xff]  ;;  %v4687_v20 = vpop.permute.xlu0 %4686 }
 0x3ba   : > { %v10256_v28 = vpop.f32.mrf.mxu0 }
 0x3bb   : > { %v4822_v17 = vmul.f32 %v4672_v63, %v4535_v29  ;;  %v4495_v9 = vadd.f32 %v13733_v41, %v4447_v12  ;;  %v4692_v63 = vpop.permute.xlu1 %4691 }
 0x3bc   : > { %v4326_v14 = vpop.f32.mrf.mxu0  ;;  %v5018_v44 = vld [vmem:[#allocation2 + $0x76] sm:$0xff] }
 0x3bd   : > { %v4955_v24 = vld [vmem:[#allocation2 + $0x75] sm:$0xff]  ;;  %4914 = vst.msk [vmem:[#allocation2 + $0x88] sm:$0xff] %vm4850_vm10, %v4822_v17  ;;  %v4536_v3 = vmax.f32 %v4495_v9, 0.0  ;;  %v4448_v55 = vadd.f32 %v4326_v14, %v13589_v26  ;;  %v5052_v42 = vpack.c.bf16 %v5018_v44, %v5017_v23 }
 0x3be   : > { %v4989_v52 = vpack.c.bf16 %v4955_v24, %v4954_v0  ;;  %v10257_v48 = vpop.f32.mrf.mxu0 }
 0x3bf   : > { %v4823_v2 = vmul.f32 %v4677_v32, %v4536_v3  ;;  %v4496_v61 = vadd.f32 %v13733_v41, %v4448_v55  ;;  %10337 = vmatmul.mubr.msk.bf16.gmra.mxu1 %vm4850_vm10, %v5052_v42 }
 0x3c0   : > { %10423 = vmatmul.mubr.msk.bf16.gmra.mxu0 %vm4850_vm10, %v4989_v52  ;;  %v4331_v34 = vpop.f32.mrf.mxu0  ;;  %10340 = vmatprep.mubr.msk.bf16.mxu1 %vm11313_vm1, %v15329_v57  ;;  %v5019_v31 = vld [vmem:[#allocation2 + $0x7e] sm:$0xff]  ;;  %v4697_v52 = vpop.permute.xlu0 %4696 }
 0x3c1   : > { %10426 = vmatprep.mubr.msk.bf16.mxu0 %vm11313_vm1, %v15329_v57  ;;  %4915 = vst.msk [vmem:[#allocation2 + $0x90] sm:$0xff] %vm4850_vm10, %v4823_v2  ;;  %v4537_v26 = vmax.f32 %v4496_v61, 0.0  ;;  %v4449_v35 = vadd.f32 %v4331_v34, %v13595_v27  ;;  %v4956_v7 = vld [vmem:[#allocation2 + $0x7d] sm:$0xff] }
 0x3c2   : > { %v10260_v4 = vpop.f32.mrf.mxu0  ;;  %v13841_v9 = vpop.f32.mrf.mxu1 }
 0x3c3   : > { %v4824_v49 = vmul.f32 %v4682_v40, %v4537_v26  ;;  %v4497_v38 = vadd.f32 %v13733_v41, %v4449_v35 }
 0x3c4   : > { %v4334_v11 = vpop.f32.mrf.mxu0  ;;  %v5020_v43 = vld [vmem:[#allocation2 + $0x86] sm:$0xff]  ;;  %v10314_v42 = vpop.f32.mrf.mxu1 }
 0x3c5   : > { %v4957_v53 = vld [vmem:[#allocation2 + $0x85] sm:$0xff]  ;;  %4916 = vst.msk [vmem:[#allocation2 + $0x98] sm:$0xff] %vm4850_vm10, %v4824_v49  ;;  %v4538_v45 = vmax.f32 %v4497_v38, 0.0  ;;  %v4450_v19 = vadd.f32 %v4334_v11, %v13603_v51  ;;  %v5053_v60 = vpack.c.bf16 %v5020_v43, %v5019_v31  ;;  %v4702_v38 = vpop.permute.xlu1 %4701 }
 0x3c6   : > { %v4990_v36 = vpack.c.bf16 %v4957_v53, %v4956_v7  ;;  %v10261_v5 = vpop.f32.mrf.mxu0  ;;  %v13846_v34 = vpop.f32.mrf.mxu1 }
 0x3c7   : > { %v4825_v27 = vmul.f32 %v4687_v20, %v4538_v45  ;;  %v4498_v29 = vadd.f32 %v13733_v41, %v4450_v19  ;;  %10341 = vmatmul.mubr.msk.bf16.gmra.mxu1 %vm4850_vm10, %v5053_v60 }
 0x3c8   : > { %10427 = vmatmul.mubr.msk.bf16.gmra.mxu0 %vm4850_vm10, %v4990_v36  ;;  %v4339_v12 = vpop.f32.mrf.mxu0  ;;  %10344 = vmatprep.mubr.msk.bf16.mxu1 %vm11313_vm1, %v15329_v57  ;;  %v5021_v44 = vld [vmem:[#allocation2 + $0x8e] sm:$0xff] }
 0x3c9   : > { %10430 = vmatprep.mubr.msk.bf16.mxu0 %vm11313_vm1, %v15329_v57  ;;  %4917 = vst.msk [vmem:[#allocation2 + $0xa0] sm:$0xff] %vm4850_vm10, %v4825_v27  ;;  %v4539_v51 = vmax.f32 %v4498_v29, 0.0  ;;  %v4451_v28 = vadd.f32 %v4339_v12, %v13612_v22  ;;  %v4958_v3 = vld [vmem:[#allocation2 + $0x8d] sm:$0xff]  ;;  %v4707_v29 = vpop.permute.xlu0 %4706 }
 0x3ca   : > { %v10264_v17 = vpop.f32.mrf.mxu0 }
 0x3cb   : > { %v4826_v23 = vmul.f32 %v4692_v63, %v4539_v51  ;;  %v4499_v14 = vadd.f32 %v13733_v41, %v4451_v28  ;;  %v4712_v17 = vpop.permute.xlu1 %4711 }
 0x3cc   : > { %v4342_v0 = vpop.f32.mrf.mxu0  ;;  %v5022_v24 = vld [vmem:[#allocation2 + $0x96] sm:$0xff] }
 0x3cd   : > { %v4959_v55 = vld [vmem:[#allocation2 + $0x95] sm:$0xff]  ;;  %4918 = vst.msk [vmem:[#allocation2 + $0xa8] sm:$0xff] %vm4850_vm10, %v4826_v23  ;;  %v4540_v32 = vmax.f32 %v4499_v14, 0.0  ;;  %v4452_v48 = vadd.f32 %v4342_v0, %v13617_v46  ;;  %v5054_v2 = vpack.c.bf16 %v5022_v24, %v5021_v44  ;;  %v10315_v46 = vpop.f32.mrf.mxu1 }
 0x3ce   : > { %v4991_v22 = vpack.c.bf16 %v4959_v55, %v4958_v3  ;;  %v10265_v61 = vpop.f32.mrf.mxu0 }
 0x3cf   : > { %v4827_v26 = vmul.f32 %v4697_v52, %v4540_v32  ;;  %v4500_v35 = vadd.f32 %v13733_v41, %v4452_v48  ;;  %10345 = vmatmul.mubr.msk.bf16.gmra.mxu1 %vm4850_vm10, %v5054_v2  ;;  %v4722_v46 = vpop.permute.xlu1 %4721 }
 0x3d0   : > { %10431 = vmatmul.mubr.msk.bf16.gmra.mxu0 %vm4850_vm10, %v4991_v22  ;;  %v4347_v40 = vpop.f32.mrf.mxu0  ;;  %10348 = vmatprep.mubr.msk.bf16.mxu1 %vm11313_vm1, %v15329_v57  ;;  %v5023_v7 = vld [vmem:[#allocation2 + $0x9e] sm:$0xff]  ;;  %v4717_v22 = vpop.permute.xlu0 %4716 }
 0x3d1   : > { %10434 = vmatprep.mubr.msk.bf16.mxu0 %vm11313_vm1, %v15329_v57  ;;  %4919 = vst.msk [vmem:[#allocation2 + $0xb0] sm:$0xff] %vm4850_vm10, %v4827_v26  ;;  %v4541_v4 = vmax.f32 %v4500_v35, 0.0  ;;  %v4453_v49 = vadd.f32 %v4347_v40, %v13623_v37  ;;  %v4960_v19 = vld [vmem:[#allocation2 + $0x9d] sm:$0xff] }
 0x3d2   : > { %v10268_v31 = vpop.f32.mrf.mxu0 }
 0x3d3   : > { %v4828_v11 = vmul.f32 %v4702_v38, %v4541_v4  ;;  %v4501_v43 = vadd.f32 %v13733_v41, %v4453_v49 }
 0x3d4   : > { %v4350_v53 = vpop.f32.mrf.mxu0  ;;  %v5024_v45 = vld [vmem:[#allocation2 + $0xa6] sm:$0xff] }
 0x3d5   : > { %v4961_v60 = vld [vmem:[#allocation2 + $0xa5] sm:$0xff]  ;;  %4920 = vst.msk [vmem:[#allocation2 + $0xb8] sm:$0xff] %vm4850_vm10, %v4828_v11  ;;  %v4542_v36 = vmax.f32 %v4501_v43, 0.0  ;;  %v4454_v20 = vadd.f32 %v4350_v53, %v13631_v47  ;;  %v5055_v5 = vpack.c.bf16 %v5024_v45, %v5023_v7 }
 0x3d6   : > { %v4992_v27 = vpack.c.bf16 %v4961_v60, %v4960_v19  ;;  %v10269_v12 = vpop.f32.mrf.mxu0 }
 0x3d7   : > { %v4829_v37 = vmul.f32 %v4707_v29, %v4542_v36  ;;  %v4502_v63 = vadd.f32 %v13733_v41, %v4454_v20  ;;  %10349 = vmatmul.mubr.msk.bf16.gmra.mxu1 %vm4850_vm10, %v5055_v5  ;;  %v4727_v20 = vpop.permute.xlu0 %4726 }
 0x3d8   : > { %10435 = vmatmul.mubr.msk.bf16.gmra.mxu0 %vm4850_vm10, %v4992_v27  ;;  %v4355_v51 = vpop.f32.mrf.mxu0  ;;  %10352 = vmatprep.mubr.msk.bf16.mxu1 %vm11313_vm1, %v15329_v57  ;;  %v5025_v0 = vld [vmem:[#allocation2 + $0xae] sm:$0xff] }
 0x3d9   : > { %10438 = vmatprep.mubr.msk.bf16.mxu0 %vm11313_vm1, %v15329_v57  ;;  %4921 = vst.msk [vmem:[#allocation2 + $0xc0] sm:$0xff] %vm4850_vm10, %v4829_v37  ;;  %v4543_v47 = vmax.f32 %v4502_v63, 0.0  ;;  %v4455_v28 = vadd.f32 %v4355_v51, %v13640_v58  ;;  %v4962_v55 = vld [vmem:[#allocation2 + $0xad] sm:$0xff]  ;;  %v4732_v37 = vpop.permute.xlu1 %4731 }
 0x3da   : > { %v10272_v23 = vpop.f32.mrf.mxu0 }
 0x3db   : > { %v4830_v14 = vmul.f32 %v4712_v17, %v4543_v47  ;;  %v4503_v44 = vadd.f32 %v13733_v41, %v4455_v28 }
 0x3dc   : > { %v4358_v24 = vpop.f32.mrf.mxu0  ;;  %v5026_v3 = vld [vmem:[#allocation2 + $0xb6] sm:$0xff] }
 0x3dd   : > { %v4963_v42 = vld [vmem:[#allocation2 + $0xb5] sm:$0xff]  ;;  %4922 = vst.msk [vmem:[#allocation2 + $0xc8] sm:$0xff] %vm4850_vm10, %v4830_v14  ;;  %v4544_v52 = vmax.f32 %v4503_v44, 0.0  ;;  %v4456_v32 = vadd.f32 %v4358_v24, %v13645_v16  ;;  %v5056_v48 = vpack.c.bf16 %v5026_v3, %v5025_v0 }
 0x3de   : > { %v4993_v2 = vpack.c.bf16 %v4963_v42, %v4962_v55  ;;  %v10273_v61 = vpop.f32.mrf.mxu0  ;;  %v4737_v42 = vpop.permute.xlu0 %4736 }
 0x3df   : > { %v4831_v58 = vmul.f32 %v4717_v22, %v4544_v52  ;;  %v4504_v26 = vadd.f32 %v13733_v41, %v4456_v32  ;;  %10353 = vmatmul.mubr.msk.bf16.gmra.mxu1 %vm4850_vm10, %v5056_v48  ;;  %v4742_v22 = vpop.permute.xlu1 %4741 }
 0x3e0   : > { %10439 = vmatmul.mubr.msk.bf16.gmra.mxu0 %vm4850_vm10, %v4993_v2  ;;  %v4363_v35 = vpop.f32.mrf.mxu0  ;;  %10356 = vmatprep.mubr.msk.bf16.mxu1 %vm11313_vm1, %v15329_v57  ;;  %v5027_v31 = vld [vmem:[#allocation2 + $0xbe] sm:$0xff] }
 0x3e1   : > { %10442 = vmatprep.mubr.msk.bf16.mxu0 %vm11313_vm1, %v15329_v57  ;;  %4923 = vst.msk [vmem:[#allocation2 + $0xd0] sm:$0xff] %vm4850_vm10, %v4831_v58  ;;  %v4545_v16 = vmax.f32 %v4504_v26, 0.0  ;;  %v4457_v40 = vadd.f32 %v4363_v35, %v13651_v50  ;;  %v4964_v7 = vld [vmem:[#allocation2 + $0xbd] sm:$0xff] }
 0x3e2   : > { %v10276_v4 = vpop.f32.mrf.mxu0 }
 0x3e3   : > { %v4832_v49 = vmul.f32 %v4722_v46, %v4545_v16  ;;  %v4505_v38 = vadd.f32 %v13733_v41, %v4457_v40 }
 0x3e4   : > { %v4366_v11 = vpop.f32.mrf.mxu0  ;;  %v5028_v43 = vld [vmem:[#allocation2 + $0xc6] sm:$0xff] }
 0x3e5   : > { %v4965_v53 = vld [vmem:[#allocation2 + $0xc5] sm:$0xff]  ;;  %4924 = vst.msk [vmem:[#allocation2 + $0xd8] sm:$0xff] %vm4850_vm10, %v4832_v49  ;;  %v4546_v45 = vmax.f32 %v4505_v38, 0.0  ;;  %v4458_v19 = vadd.f32 %v4366_v11, %v13659_v30  ;;  %v5057_v60 = vpack.c.bf16 %v5028_v43, %v5027_v31  ;;  %v4747_v43 = vpop.permute.xlu0 %4746 }
 0x3e6   : > { %v4994_v36 = vpack.c.bf16 %v4965_v53, %v4964_v7  ;;  %v10277_v5 = vpop.f32.mrf.mxu0 }
 0x3e7   : > { %v4833_v50 = vmul.f32 %v4727_v20, %v4546_v45  ;;  %v4506_v27 = vadd.f32 %v13733_v41, %v4458_v19  ;;  %10357 = vmatmul.mubr.msk.bf16.gmra.mxu1 %vm4850_vm10, %v5057_v60  ;;  %v4752_v60 = vpop.permute.xlu1 %4751 }
 0x3e8   : > { %10443 = vmatmul.mubr.msk.bf16.gmra.mxu0 %vm4850_vm10, %v4994_v36  ;;  %v4371_v29 = vpop.f32.mrf.mxu0  ;;  %10360 = vmatprep.mubr.msk.bf16.mxu1 %vm11313_vm1, %v15329_v57  ;;  %v5029_v28 = vld [vmem:[#allocation2 + $0xce] sm:$0xff] }
 0x3e9   : > { %10446 = vmatprep.mubr.msk.bf16.mxu0 %vm11313_vm1, %v15329_v57  ;;  %4925 = vst.msk [vmem:[#allocation2 + $0xe0] sm:$0xff] %vm4850_vm10, %v4833_v50  ;;  %v4547_v30 = vmax.f32 %v4506_v27, 0.0  ;;  %v4459_v12 = vadd.f32 %v4371_v29, %v13668_v21  ;;  %v4966_v14 = vld [vmem:[#allocation2 + $0xcd] sm:$0xff] }
 0x3ea   : > { %v10280_v63 = vpop.f32.mrf.mxu0 }
 0x3eb   : > { %v4834_v51 = vmul.f32 %v4732_v37, %v4547_v30  ;;  %v4507_v47 = vadd.f32 %v13733_v41, %v4459_v12 }
 0x3ec   : > { %v4374_v17 = vpop.f32.mrf.mxu0  ;;  %v5030_v23 = vld [vmem:[#allocation2 + $0xd6] sm:$0xff] }
 0x3ed   : > { %v4967_v44 = vld [vmem:[#allocation2 + $0xd5] sm:$0xff]  ;;  %4926 = vst.msk [vmem:[#allocation2 + $0xe8] sm:$0xff] %vm4850_vm10, %v4834_v51  ;;  %v4548_v0 = vmax.f32 %v4507_v47, 0.0  ;;  %v4460_v24 = vadd.f32 %v4374_v17, %v13674_v54  ;;  %v5058_v3 = vpack.c.bf16 %v5030_v23, %v5029_v28  ;;  %v4757_v28 = vpop.permute.xlu0 %4756 }
 0x3ee   : > { %v4995_v55 = vpack.c.bf16 %v4967_v44, %v4966_v14  ;;  %v10281_v52 = vpop.f32.mrf.mxu0 }
 0x3ef   : > { %v4835_v21 = vmul.f32 %v4737_v42, %v4548_v0  ;;  %v4508_v32 = vadd.f32 %v13733_v41, %v4460_v24  ;;  %10361 = vmatmul.mubr.msk.bf16.gmra.mxu1 %vm4850_vm10, %v5058_v3  ;;  %v4762_v0 = vpop.permute.xlu1 %4761 }
 0x3f0   : > { %10447 = vmatmul.mubr.msk.bf16.gmra.mxu0 %vm4850_vm10, %v4995_v55  ;;  %v4379_v48 = vpop.f32.mrf.mxu0  ;;  %10364 = vmatprep.mubr.msk.bf16.mxu1 %vm11313_vm1, %v15329_v57  ;;  %v5031_v35 = vld [vmem:[#allocation2 + $0xde] sm:$0xff] }
 0x3f1   : > { %10450 = vmatprep.mubr.msk.bf16.mxu0 %vm11313_vm1, %v15329_v57  ;;  %4927 = vst.msk [vmem:[#allocation2 + $0xf0] sm:$0xff] %vm4850_vm10, %v4835_v21  ;;  %v4549_v54 = vmax.f32 %v4508_v32, 0.0  ;;  %v4461_v2 = vadd.f32 %v4379_v48, %v13680_v33  ;;  %v4968_v46 = vld [vmem:[#allocation2 + $0xdd] sm:$0xff] }
 0x3f2   : > { %v10284_v61 = vpop.f32.mrf.mxu0 }
 0x3f3   : > { %v4836_v58 = vmul.f32 %v4742_v22, %v4549_v54  ;;  %v4509_v26 = vadd.f32 %v13733_v41, %v4461_v2 }
 0x3f4   : > { %v4382_v16 = vpop.f32.mrf.mxu0  ;;  %v5032_v40 = vld [vmem:[#allocation2 + $0xe6] sm:$0xff] }
 0x3f5   : > { %v4969_v4 = vld [vmem:[#allocation2 + $0xe5] sm:$0xff]  ;;  %4928 = vst.msk [vmem:[#allocation2 + $0xf8] sm:$0xff] %vm4850_vm10, %v4836_v58  ;;  %v4550_v49 = vmax.f32 %v4509_v26, 0.0  ;;  %v4462_v38 = vadd.f32 %v4382_v16, %v13684_v6  ;;  %v5059_v31 = vpack.c.bf16 %v5032_v40, %v5031_v35  ;;  %v4767_v58 = vpop.permute.xlu0 %4766 }
 0x3f6   : > { %v4996_v11 = vpack.c.bf16 %v4969_v4, %v4968_v46  ;;  %v10285_v7 = vpop.f32.mrf.mxu0  ;;  %v4772_v46 = vpop.permute.xlu1 %4771 }
 0x3f7   : > { %v4837_v33 = vmul.f32 %v4747_v43, %v4550_v49  ;;  %v4510_v53 = vadd.f32 %v13733_v41, %v4462_v38  ;;  %10365 = vmatmul.mubr.msk.bf16.gmra.mxu1 %vm4850_vm10, %v5059_v31 }
 0x3f8   : > { %10451 = vmatmul.mubr.msk.bf16.gmra.mxu0 %vm4850_vm10, %v4996_v11  ;;  %v4387_v45 = vpop.f32.mrf.mxu0  ;;  %10368 = vmatprep.mubr.msk.bf16.mxu1 %vm11313_vm1, %v15329_v57  ;;  %v5033_v50 = vld [vmem:[#allocation2 + $0xee] sm:$0xff] }
 0x3f9   : > { %10454 = vmatprep.mubr.msk.bf16.mxu0 %vm11313_vm1, %v15329_v57  ;;  %4929 = vst.msk [vmem:[#allocation2 + $0x100] sm:$0xff] %vm4850_vm10, %v4837_v33  ;;  %v4551_v6 = vmax.f32 %v4510_v53, 0.0  ;;  %v4463_v19 = vadd.f32 %v4387_v45, %v13689_v62  ;;  %v4970_v30 = vld [vmem:[#allocation2 + $0xed] sm:$0xff] }
 0x3fa   : > { %v10288_v36 = vpop.f32.mrf.mxu0 }
 0x3fb   : > { %v4838_v20 = vmul.f32 %v4752_v60, %v4551_v6  ;;  %v4511_v5 = vadd.f32 %v13733_v41, %v4463_v19  ;;  %v4777_v60 = vpop.permute.xlu0 %4776 }
 0x3fc   : > { %v4390_v27 = vpop.f32.mrf.mxu0  ;;  %v5034_v29 = vld [vmem:[#allocation2 + $0xf6] sm:$0xff] }
 0x3fd   : > { %v4971_v12 = vld [vmem:[#allocation2 + $0xf5] sm:$0xff]  ;;  %4930 = vst.msk [vmem:[#allocation2 + $0x108] sm:$0xff] %vm4850_vm10, %v4838_v20  ;;  %v4552_v37 = vmax.f32 %v4511_v5, 0.0  ;;  %v4464_v63 = vadd.f32 %v4390_v27, %v13694_v10  ;;  %v5060_v51 = vpack.c.bf16 %v5034_v29, %v5033_v50  ;;  %v4782_v27 = vpop.permute.xlu1 %4781 }
 0x3fe   : > { %v4997_v47 = vpack.c.bf16 %v4971_v12, %v4970_v30  ;;  %v10289_v17 = vpop.f32.mrf.mxu0 }
 0x3ff   : > { %v4839_v62 = vmul.f32 %v4757_v28, %v4552_v37  ;;  %v4512_v23 = vadd.f32 %v13733_v41, %v4464_v63  ;;  %10369 = vmatmul.mubr.msk.bf16.gmra.mxu1 %vm4850_vm10, %v5060_v51 }
 0x400   : > { %10455 = vmatmul.mubr.msk.bf16.gmra.mxu0 %vm4850_vm10, %v4997_v47  ;;  %v4395_v14 = vpop.f32.mrf.mxu0  ;;  %10372 = vmatprep.mubr.msk.bf16.mxu1 %vm11313_vm1, %v15329_v57  ;;  %v5035_v42 = vld [vmem:[#allocation2 + $0xfe] sm:$0xff] }
 0x401   : > { %10458 = vmatprep.mubr.msk.bf16.mxu0 %vm11313_vm1, %v15329_v57  ;;  %4931 = vst.msk [vmem:[#allocation2 + $0x110] sm:$0xff] %vm4850_vm10, %v4839_v62  ;;  %v4553_v10 = vmax.f32 %v4512_v23, 0.0  ;;  %v4465_v44 = vadd.f32 %v4395_v14, %v13699_v59  ;;  %v4972_v32 = vld [vmem:[#allocation2 + $0xfd] sm:$0xff] }
 0x402   : > { %v10292_v24 = vpop.f32.mrf.mxu0 }
 0x403   : > { %v4840_v3 = vmul.f32 %v4762_v0, %v4553_v10  ;;  %v4513_v55 = vadd.f32 %v13733_v41, %v4465_v44  ;;  %v4787_v10 = vpop.permute.xlu0 %4786 }
 0x404   : > { %v4398_v52 = vpop.f32.mrf.mxu0  ;;  %v5036_v21 = vld [vmem:[#allocation2 + $0x106] sm:$0xff] }
 0x405   : > { %v4973_v48 = vld [vmem:[#allocation2 + $0x105] sm:$0xff]  ;;  %4932 = vst.msk [vmem:[#allocation2 + $0x118] sm:$0xff] %vm4850_vm10, %v4840_v3  ;;  %v4554_v54 = vmax.f32 %v4513_v55, 0.0  ;;  %v4466_v2 = vadd.f32 %v4398_v52, %v13703_v1  ;;  %v5061_v22 = vpack.c.bf16 %v5036_v21, %v5035_v42  ;;  %v4792_v55 = vpop.permute.xlu1 %4791 }
 0x406   : > { %v4998_v61 = vpack.c.bf16 %v4973_v48, %v4972_v32  ;;  %v10293_v26 = vpop.f32.mrf.mxu0 }
 0x407   : > { %v4841_v59 = vmul.f32 %v4767_v58, %v4554_v54  ;;  %v4514_v35 = vadd.f32 %v13733_v41, %v4466_v2  ;;  %10373 = vmatmul.mubr.msk.bf16.gmra.mxu1 %vm4850_vm10, %v5061_v22 }
 0x408   : > { %10459 = vmatmul.mubr.msk.bf16.gmra.mxu0 %vm4850_vm10, %v4998_v61  ;;  %v4403_v16 = vpop.f32.mrf.mxu0  ;;  %10376 = vmatprep.mubr.msk.bf16.mxu1 %vm11313_vm1, %v15329_v57  ;;  %v5037_v31 = vld [vmem:[#allocation2 + $0x10e] sm:$0xff] }
 0x409   : > { %10462 = vmatprep.mubr.msk.bf16.mxu0 %vm11313_vm1, %v15329_v57  ;;  %4933 = vst.msk [vmem:[#allocation2 + $0x120] sm:$0xff] %vm4850_vm10, %v4841_v59  ;;  %v4555_v1 = vmax.f32 %v4514_v35, 0.0  ;;  %v4467_v40 = vadd.f32 %v4403_v16, %v13708_v39  ;;  %v4974_v7 = vld [vmem:[#allocation2 + $0x10d] sm:$0xff]  ;;  %v4797_v35 = vpop.permute.xlu0 %4796 }
 0x40a   : > { %v10296_v4 = vpop.f32.mrf.mxu0 }
 0x40b   : > { %v4842_v49 = vmul.f32 %v4772_v46, %v4555_v1  ;;  %v4515_v38 = vadd.f32 %v13733_v41, %v4467_v40  ;;  %v4802_v4 = vpop.permute.xlu1 %4801 }
 0x40c   : > { %v4406_v11 = vpop.f32.mrf.mxu0  ;;  %v5038_v43 = vld [vmem:[#allocation2 + $0x116] sm:$0xff] }
 0x40d   : > { %v4975_v33 = vld [vmem:[#allocation2 + $0x115] sm:$0xff]  ;;  %4934 = vst.msk [vmem:[#allocation2 + $0x128] sm:$0xff] %vm4850_vm10, %v4842_v49  ;;  %v4556_v53 = vmax.f32 %v4515_v38, 0.0  ;;  %v4468_v45 = vadd.f32 %v4406_v11, %v13712_v8  ;;  %v5062_v6 = vpack.c.bf16 %v5038_v43, %v5037_v31 }
 0x40e   : > { %v4999_v19 = vpack.c.bf16 %v4975_v33, %v4974_v7  ;;  %v10297_v36 = vpop.f32.mrf.mxu0 }
 0x40f   : > { %v4843_v39 = vmul.f32 %v4777_v60, %v4556_v53  ;;  %v4516_v20 = vadd.f32 %v13733_v41, %v4468_v45  ;;  %10377 = vmatmul.mubr.msk.bf16.gmra.mxu1 %vm4850_vm10, %v5062_v6  ;;  %v4807_v60 = vpop.permute.xlu0 %4806 }
 0x410   : > { %10463 = vmatmul.mubr.msk.bf16.gmra.mxu0 %vm4850_vm10, %v4999_v19  ;;  %v4411_v5 = vpop.f32.mrf.mxu0  ;;  %10380 = vmatprep.mubr.msk.bf16.mxu1 %vm11313_vm1, %v15329_v57  ;;  %v5039_v37 = vld [vmem:[#allocation2 + $0x11e] sm:$0xff] }
 0x411   : > { %10466 = vmatprep.mubr.msk.bf16.mxu0 %vm11313_vm1, %v15329_v57  ;;  %4935 = vst.msk [vmem:[#allocation2 + $0x130] sm:$0xff] %vm4850_vm10, %v4843_v39  ;;  %v4557_v8 = vmax.f32 %v4516_v20, 0.0  ;;  %v4469_v50 = vadd.f32 %v4411_v5, %v13717_v13  ;;  %v4976_v47 = vld [vmem:[#allocation2 + $0x11d] sm:$0xff] }
 0x412   : > { %v10300_v29 = vpop.f32.mrf.mxu0 }
 0x413   : > { %v4844_v30 = vmul.f32 %v4782_v27, %v4557_v8  ;;  %v4517_v12 = vadd.f32 %v13733_v41, %v4469_v50 }
 0x414   : > { %v4414_v63 = vpop.f32.mrf.mxu0  ;;  %v5040_v51 = vld [vmem:[#allocation2 + $0x126] sm:$0xff] }
 0x415   : > { %v4977_v28 = vld [vmem:[#allocation2 + $0x125] sm:$0xff]  ;;  %4936 = vst.msk [vmem:[#allocation2 + $0x138] sm:$0xff] %vm4850_vm10, %v4844_v30  ;;  %v4558_v17 = vmax.f32 %v4517_v12, 0.0  ;;  %v4470_v62 = vadd.f32 %v4414_v63, %v13720_v15  ;;  %v5063_v23 = vpack.c.bf16 %v5040_v51, %v5039_v37  ;;  %v5602_v12 = vld [vmem:[#allocation2 + $0xf] sm:$0xff]  ;;  %v5603_v37 = vld [vmem:[#allocation2 + $0x17] sm:$0xff] }
 0x416   : > { %v5000_v14 = vpack.c.bf16 %v4977_v28, %v4976_v47  ;;  %v10301_v44 = vpop.f32.mrf.mxu0  ;;  %v5974_v63 = vld [vmem:[#allocation2 + $0x27] sm:$0xff]  ;;  %v5643_v51 = vpack.c.bf16 %v5603_v37, %v5602_v12  ;;  %v5973_v47 = vld [vmem:[#allocation2 + $0x1f] sm:$0xff] }
 0x417   : > { %v4845_v13 = vmul.f32 %v4787_v10, %v4558_v17  ;;  %v4518_v0 = vadd.f32 %v13733_v41, %v4470_v62  ;;  %10381 = vmatmul.mubr.msk.bf16.gmra.mxu1 %vm4850_vm10, %v5063_v23  ;;  %v6014_v28 = vpack.c.bf16 %v5974_v63, %v5973_v47  ;;  %v5976_v17 = vld [vmem:[#allocation2 + $0x37] sm:$0xff]  ;;  %v5975_v62 = vld [vmem:[#allocation2 + $0x2f] sm:$0xff]  ;;  %v5977_v10 = vld [vmem:[#allocation2 + $0x3f] sm:$0xff] }
 0x418   : > { %10467 = vmatmul.mubr.msk.bf16.gmra.mxu0 %vm4850_vm10, %v5000_v14  ;;  %v4419_v24 = vpop.f32.mrf.mxu0  ;;  %10384 = vmatprep.mubr.msk.bf16.mxu1 %vm11313_vm1, %v15329_v57  ;;  %v5041_v32 = vld [vmem:[#allocation2 + $0x12e] sm:$0xff]  ;;  %v6015_v23 = vpack.c.bf16 %v5976_v17, %v5975_v62 }
 0x419   : > { %10470 = vmatprep.mubr.msk.bf16.mxu0 %vm11313_vm1, %v15329_v57  ;;  %4937 = vst.msk [vmem:[#allocation2 + $0x140] sm:$0xff] %vm4850_vm10, %v4845_v13  ;;  %v4559_v15 = vmax.f32 %v4518_v0, 0.0  ;;  %v4471_v3 = vadd.f32 %v4419_v24, %v13723_v56  ;;  %v4978_v2 = vld [vmem:[#allocation2 + $0x12d] sm:$0xff]  ;;  %v5980_v13 = vld [vmem:[#allocation2 + $0x57] sm:$0xff] }
 0x41a   : > { %v10304_v42 = vpop.f32.mrf.mxu0  ;;  %v5978_v14 = vld [vmem:[#allocation2 + $0x47] sm:$0xff]  ;;  %v5979_v0 = vld [vmem:[#allocation2 + $0x4f] sm:$0xff] }
 0x41b   : > { %v4846_v52 = vmul.f32 %v4792_v55, %v4559_v15  ;;  %v4519_v21 = vadd.f32 %v13733_v41, %v4471_v3  ;;  %v6016_v44 = vpack.c.bf16 %v5978_v14, %v5977_v10  ;;  %v6017_v24 = vpack.c.bf16 %v5980_v13, %v5979_v0  ;;  %v8975_v15 = vld [vmem:[%s15222_s3 + $0x10] sm:$0xf]  ;;  %v5982_v55 = vld [vmem:[#allocation2 + $0x67] sm:$0xff]  ;;  %v5981_v42 = vld [vmem:[#allocation2 + $0x5f] sm:$0xff] }
 0x41c   : > { %v4422_v48 = vpop.f32.mrf.mxu0  ;;  %v5042_v54 = vld [vmem:[#allocation2 + $0x136] sm:$0xff]  ;;  %v6472_v3 = vsel %vm5132_vm9, %v8975_v15, 0  ;;  %v5990_v62 = vld [vmem:[#allocation2 + $0xa7] sm:$0xff] }
 0x41d   : > { %v4979_v22 = vld [vmem:[#allocation2 + $0x135] sm:$0xff]  ;;  %4938 = vst.msk [vmem:[#allocation2 + $0x148] sm:$0xff] %vm4850_vm10, %v4846_v52  ;;  %v4560_v61 = vmax.f32 %v4519_v21, 0.0  ;;  %v4472_v58 = vadd.f32 %v4422_v48, %v13726_v18  ;;  %v5064_v26 = vpack.c.bf16 %v5042_v54, %v5041_v32  ;;  %v6018_v52 = vpack.c.bf16 %v5982_v55, %v5981_v42 }
 0x41e   : > { %v5001_v59 = vpack.c.bf16 %v4979_v22, %v4978_v2  ;;  %v10305_v16 = vpop.f32.mrf.mxu0  ;;  %v5984_v22 = vld [vmem:[#allocation2 + $0x77] sm:$0xff] }
 0x41f   : > { %v4847_v56 = vmul.f32 %v4797_v35, %v4560_v61  ;;  %v4520_v1 = vadd.f32 %v13733_v41, %v4472_v58  ;;  %10385 = vmatmul.mubr.msk.bf16.gmra.mxu1 %vm4850_vm10, %v5064_v26  ;;  %v11249_v41 = vld [vmem:[%s15221_s2] ss:$0 sm:$0xff]  ;;  %v8997_v26 = vld [vmem:[%s15222_s3 + $0x14] sm:$0xf] }
 0x420   : > { %10471 = vmatmul.mubr.msk.bf16.gmra.mxu0 %vm4850_vm10, %v5001_v59  ;;  %v4427_v40 = vpop.f32.mrf.mxu0  ;;  %10388 = vmatprep.mubr.msk.bf16.mxu1 %vm11313_vm1, %v15329_v57  ;;  %v5043_v11 = vld [vmem:[#allocation2 + $0x13e] sm:$0xff]  ;;  %v5983_v35 = vld [vmem:[#allocation2 + $0x6f] sm:$0xff]  ;;  %v6843_v16 = vsel %vm5132_vm9, %v8997_v26, 0 }
 0x421   : > { %10474 = vmatprep.mubr.msk.bf16.mxu0 %vm11313_vm1, %v15329_v57  ;;  %4939 = vst.msk [vmem:[#allocation2 + $0x150] sm:$0xff] %vm4850_vm10, %v4847_v56  ;;  %v4561_v18 = vmax.f32 %v4520_v1, 0.0  ;;  %v4473_v46 = vadd.f32 %v4427_v40, %v13728_v25  ;;  %v4980_v7 = vld [vmem:[#allocation2 + $0x13d] sm:$0xff]  ;;  %v6019_v40 = vpack.c.bf16 %v5984_v22, %v5983_v35  ;;  %v5991_v22 = vld [vmem:[#allocation2 + $0xaf] sm:$0xff] }
 0x422   : > { %v10308_v49 = vpop.f32.mrf.mxu0 }
 0x423   : > { %v4848_v38 = vmul.f32 %v4802_v4, %v4561_v18  ;;  %v4521_v31 = vadd.f32 %v11249_v41, %v4473_v46  ;;  %v5986_v41 = vld [vmem:[#allocation2 + $0x87] sm:$0xff] }
 0x424   : > { %v5044_v43 = vld [vmem:[#allocation2 + $0x146] sm:$0xff]  ;;  %v4430_v53 = vpop.f32.mrf.mxu0 }
 0x425   : > { %v4981_v33 = vld [vmem:[#allocation2 + $0x145] sm:$0xff]  ;;  %4940 = vst.msk [vmem:[#allocation2 + $0x158] sm:$0xff] %vm4850_vm10, %v4848_v38  ;;  %v4562_v45 = vmax.f32 %v4521_v31, 0.0  ;;  %v5065_v6 = vpack.c.bf16 %v5044_v43, %v5043_v11 }
 0x426   : > { %v5002_v19 = vpack.c.bf16 %v4981_v33, %v4980_v7  ;;  %v10309_v25 = vpop.f32.mrf.mxu0  ;;  %v5985_v7 = vld [vmem:[#allocation2 + $0x7f] sm:$0xff] }
 0x427   : > { %v4849_v36 = vmul.f32 %v4807_v60, %v4562_v45  ;;  %10389 = vmatmul.mubr.msk.bf16.gmra.mxu1 %vm4850_vm10, %v5065_v6  ;;  %v6020_v45 = vpack.c.bf16 %v5986_v41, %v5985_v7  ;;  %v5993_v41 = vld [vmem:[#allocation2 + $0xbf] sm:$0xff] }
 0x428   : > { %10475 = vmatmul.mubr.msk.bf16.gmra.mxu0 %vm4850_vm10, %v5002_v19  ;;  %10392 = vmatprep.mubr.msk.bf16.mxu1 %vm11313_vm1, %v15329_v57  ;;  %v13987_v39 = vpop.f32.mrf.mxu0  ;;  %v5045_v20 = vld [vmem:[#allocation2 + $0x14e] sm:$0xf] }
 0x429   : > { %10478 = vmatprep.mubr.msk.bf16.mxu0 %vm11313_vm1, %v15329_v57  ;;  %4941 = vst.msk [vmem:[#allocation2 + $0x160] sm:$0xf] %vm4899_vm11, %v4849_v36  ;;  %v4982_v5 = vld [vmem:[#allocation2 + $0x14d] sm:$0xf]  ;;  %v5066_v27 = vpack.c.bf16 %v5045_v20, %v5045_v20  ;;  %v5988_v20 = vld [vmem:[#allocation2 + $0x97] sm:$0xff] }
 0x42a   : > { %v10400_v8 = vpop.f32.mrf.mxu0  ;;  %v5003_v29 = vpack.c.bf16 %v4982_v5, %v4982_v5 }
 0x42c   : > { %v13990_v50 = vpop.f32.mrf.mxu0 }
 0x42e   : > { %v10401_v30 = vpop.f32.mrf.mxu0 }
 0x42f   : > { %10393 = vmatmul.mubr.msk.bf16.gmra.mxu1 %vm4850_vm10, %v5066_v27 }
 0x430   : > { %10479 = vmatmul.mubr.msk.bf16.gmra.mxu0 %vm4850_vm10, %v5003_v29  ;;  %10484 = vmatprep.mubr.msk.bf16.mxu1 %vm11313_vm1, %v15329_v57  ;;  %v5987_v29 = vld [vmem:[#allocation2 + $0x8f] sm:$0xff] }
 0x431   : > { %10570 = vmatprep.mubr.msk.bf16.mxu0 %vm11313_vm1, %v15329_v57  ;;  %v6021_v37 = vpack.c.bf16 %v5988_v20, %v5987_v29 }
 0x437   : > { %10485 = vmatmul.mubr.msk.bf16.vlgmr.msra.gmra.mxu1 %vm4850_vm10, %v5643_v51 }
 0x438   : > { %10571 = vmatmul.mubr.msk.bf16.vlgmr.msra.gmra.mxu0 %vm4850_vm10, %v6014_v28  ;;  %10488 = vmatprep.mubr.msk.bf16.mxu1 %vm11313_vm1, %v15329_v57 }
 0x439   : > { %10574 = vmatprep.mubr.msk.bf16.mxu0 %vm11313_vm1, %v15329_v57  ;;  %10655 = vmatpush3.bf16.msra.mxu1 %v6472_v3 }
 0x43a   : > { %10826 = vmatprep.subr.bf16.mxu1 %v15329_v57  ;;  %10741 = vmatpush3.bf16.msra.mxu0 %v6843_v16 }
 0x43b   : > { %10912 = vmatprep.subr.bf16.mxu0 %v15329_v57 }
 0x43f   : > { %10489 = vmatmul.mubr.msk.bf16.gmra.mxu1 %vm4850_vm10, %v6014_v28 }
 0x440   : > { %10575 = vmatmul.mubr.msk.bf16.gmra.mxu0 %vm4850_vm10, %v6015_v23  ;;  %10492 = vmatprep.mubr.msk.bf16.mxu1 %vm11313_vm1, %v15329_v57 }
 0x441   : > { %10578 = vmatprep.mubr.msk.bf16.mxu0 %vm11313_vm1, %v15329_v57 }
 0x447   : > { %10493 = vmatmul.mubr.msk.bf16.gmra.mxu1 %vm4850_vm10, %v6015_v23 }
 0x448   : > { %10579 = vmatmul.mubr.msk.bf16.gmra.mxu0 %vm4850_vm10, %v6016_v44  ;;  %10496 = vmatprep.mubr.msk.bf16.mxu1 %vm11313_vm1, %v15329_v57 }
 0x449   : > { %10582 = vmatprep.mubr.msk.bf16.mxu0 %vm11313_vm1, %v15329_v57 }
 0x44f   : > { %10497 = vmatmul.mubr.msk.bf16.gmra.mxu1 %vm4850_vm10, %v6016_v44  ;;  %v5989_v44 = vld [vmem:[#allocation2 + $0x9f] sm:$0xff] }
 0x450   : > { %10583 = vmatmul.mubr.msk.bf16.gmra.mxu0 %vm4850_vm10, %v6017_v24  ;;  %10500 = vmatprep.mubr.msk.bf16.mxu1 %vm11313_vm1, %v15329_v57 }
 0x451   : > { %10586 = vmatprep.mubr.msk.bf16.mxu0 %vm11313_vm1, %v15329_v57 }
 0x457   : > { %v5178_v21 = vpop.f32.mrf.mxu1  ;;  %10501 = vmatmul.mubr.msk.bf16.gmra.mxu1 %vm4850_vm10, %v6017_v24  ;;  %v6022_v24 = vpack.c.bf16 %v5990_v62, %v5989_v44  ;;  %v5998_v62 = vld [vmem:[#allocation2 + $0xe7] sm:$0xff] }
 0x458   : > { %v5444_v32 = vpop.f32.mrf.mxu0  ;;  %10587 = vmatmul.mubr.msk.bf16.gmra.mxu0 %vm4850_vm10, %v6018_v52  ;;  %10504 = vmatprep.mubr.msk.bf16.mxu1 %vm11313_vm1, %v15329_v57 }
 0x459   : > { %v14029_v48 = vadd.f32 %v5444_v32, %v5178_v21  ;;  %10590 = vmatprep.mubr.msk.bf16.mxu0 %vm11313_vm1, %v15329_v57  ;;  %v10318_v54 = vpop.f32.mrf.mxu1  ;;  %v5992_v21 = vld [vmem:[#allocation2 + $0xb7] sm:$0xff] }
 0x45a   : > { %v10404_v2 = vpop.f32.mrf.mxu0  ;;  %v6023_v26 = vpack.c.bf16 %v5992_v21, %v5991_v22 }
 0x45b   : > { %v5181_v61 = vpop.f32.mrf.mxu1 }
 0x45c   : > { %v5447_v58 = vpop.f32.mrf.mxu0 }
 0x45d   : > { %v14038_v59 = vadd.f32 %v5447_v58, %v5181_v61  ;;  %v10319_v56 = vpop.f32.mrf.mxu1 }
 0x45e   : > { %v10405_v1 = vpop.f32.mrf.mxu0 }
 0x45f   : > { %v5186_v18 = vpop.f32.mrf.mxu1  ;;  %10505 = vmatmul.mubr.msk.bf16.gmra.mxu1 %vm4850_vm10, %v6018_v52 }
 0x460   : > { %v5452_v46 = vpop.f32.mrf.mxu0  ;;  %10591 = vmatmul.mubr.msk.bf16.gmra.mxu0 %vm4850_vm10, %v6019_v40  ;;  %10508 = vmatprep.mubr.msk.bf16.mxu1 %vm11313_vm1, %v15329_v57 }
 0x461   : > { %v14044_v4 = vadd.f32 %v5452_v46, %v5186_v18  ;;  %10594 = vmatprep.mubr.msk.bf16.mxu0 %vm11313_vm1, %v15329_v57  ;;  %v10322_v49 = vpop.f32.mrf.mxu1  ;;  %v5994_v18 = vld [vmem:[#allocation2 + $0xc7] sm:$0xff] }
 0x462   : > { %v10408_v38 = vpop.f32.mrf.mxu0  ;;  %v6024_v7 = vpack.c.bf16 %v5994_v18, %v5993_v41 }
 0x463   : > { %v5189_v31 = vpop.f32.mrf.mxu1 }
 0x464   : > { %v5455_v11 = vpop.f32.mrf.mxu0 }
 0x465   : > { %v14050_v43 = vadd.f32 %v5455_v11, %v5189_v31  ;;  %v10323_v33 = vpop.f32.mrf.mxu1 }
 0x466   : > { %v10409_v53 = vpop.f32.mrf.mxu0 }
 0x467   : > { %v5194_v6 = vpop.f32.mrf.mxu1  ;;  %10509 = vmatmul.mubr.msk.bf16.gmra.mxu1 %vm4850_vm10, %v6019_v40 }
 0x468   : > { %v5460_v19 = vpop.f32.mrf.mxu0  ;;  %10595 = vmatmul.mubr.msk.bf16.gmra.mxu0 %vm4850_vm10, %v6020_v45  ;;  %10512 = vmatprep.mubr.msk.bf16.mxu1 %vm11313_vm1, %v15329_v57 }
 0x469   : > { %v14054_v60 = vadd.f32 %v5460_v19, %v5194_v6  ;;  %10598 = vmatprep.mubr.msk.bf16.mxu0 %vm11313_vm1, %v15329_v57  ;;  %v10326_v25 = vpop.f32.mrf.mxu1 }
 0x46a   : > { %v10412_v36 = vpop.f32.mrf.mxu0  ;;  %v5996_v25 = vld [vmem:[#allocation2 + $0xd7] sm:$0xff] }
 0x46b   : > { %v5197_v5 = vpop.f32.mrf.mxu1 }
 0x46c   : > { %v5463_v8 = vpop.f32.mrf.mxu0 }
 0x46d   : > { %v14060_v27 = vadd.f32 %v5463_v8, %v5197_v5  ;;  %v10327_v30 = vpop.f32.mrf.mxu1  ;;  %v5995_v8 = vld [vmem:[#allocation2 + $0xcf] sm:$0xff] }
 0x46e   : > { %v10413_v12 = vpop.f32.mrf.mxu0 }
 0x46f   : > { %v5202_v63 = vpop.f32.mrf.mxu1  ;;  %10513 = vmatmul.mubr.msk.bf16.gmra.mxu1 %vm4850_vm10, %v6020_v45  ;;  %v6025_v12 = vpack.c.bf16 %v5996_v25, %v5995_v8 }
 0x470   : > { %v5468_v51 = vpop.f32.mrf.mxu0  ;;  %10599 = vmatmul.mubr.msk.bf16.gmra.mxu0 %vm4850_vm10, %v6021_v37  ;;  %10516 = vmatprep.mubr.msk.bf16.mxu1 %vm11313_vm1, %v15329_v57 }
 0x471   : > { %v14064_v47 = vadd.f32 %v5468_v51, %v5202_v63  ;;  %10602 = vmatprep.mubr.msk.bf16.mxu0 %vm11313_vm1, %v15329_v57  ;;  %v10330_v28 = vpop.f32.mrf.mxu1 }
 0x472   : > { %v10416_v17 = vpop.f32.mrf.mxu0 }
 0x473   : > { %v5205_v23 = vpop.f32.mrf.mxu1 }
 0x474   : > { %v5471_v14 = vpop.f32.mrf.mxu0 }
 0x475   : > { %v14070_v10 = vadd.f32 %v5471_v14, %v5205_v23  ;;  %v10331_v13 = vpop.f32.mrf.mxu1 }
 0x476   : > { %v10417_v0 = vpop.f32.mrf.mxu0  ;;  %v5997_v13 = vld [vmem:[#allocation2 + $0xdf] sm:$0xff] }
 0x477   : > { %v5210_v15 = vpop.f32.mrf.mxu1  ;;  %10517 = vmatmul.mubr.msk.bf16.gmra.mxu1 %vm4850_vm10, %v6021_v37 }
 0x478   : > { %v5476_v3 = vpop.f32.mrf.mxu0  ;;  %10603 = vmatmul.mubr.msk.bf16.gmra.mxu0 %vm4850_vm10, %v6022_v24  ;;  %10520 = vmatprep.mubr.msk.bf16.mxu1 %vm11313_vm1, %v15329_v57 }
 0x479   : > { %v14074_v55 = vadd.f32 %v5476_v3, %v5210_v15  ;;  %10606 = vmatprep.mubr.msk.bf16.mxu0 %vm11313_vm1, %v15329_v57  ;;  %v10334_v42 = vpop.f32.mrf.mxu1  ;;  %v6026_v15 = vpack.c.bf16 %v5998_v62, %v5997_v13 }
 0x47a   : > { %v10420_v52 = vpop.f32.mrf.mxu0 }
 0x47b   : > { %v5213_v32 = vpop.f32.mrf.mxu1 }
 0x47c   : > { %v5479_v54 = vpop.f32.mrf.mxu0 }
 0x47d   : > { %v14080_v2 = vadd.f32 %v5479_v54, %v5213_v32  ;;  %v10335_v61 = vpop.f32.mrf.mxu1  ;;  %v6000_v54 = vld [vmem:[#allocation2 + $0xf7] sm:$0xff] }
 0x47e   : > { %v10421_v58 = vpop.f32.mrf.mxu0 }
 0x47f   : > { %v5218_v35 = vpop.f32.mrf.mxu1  ;;  %10521 = vmatmul.mubr.msk.bf16.gmra.mxu1 %vm4850_vm10, %v6022_v24 }
 0x480   : > { %v5484_v16 = vpop.f32.mrf.mxu0  ;;  %10607 = vmatmul.mubr.msk.bf16.gmra.mxu0 %vm4850_vm10, %v6023_v26  ;;  %10524 = vmatprep.mubr.msk.bf16.mxu1 %vm11313_vm1, %v15329_v57 }
 0x481   : > { %v14084_v56 = vadd.f32 %v5484_v16, %v5218_v35  ;;  %10610 = vmatprep.mubr.msk.bf16.mxu0 %vm11313_vm1, %v15329_v57  ;;  %v10338_v1 = vpop.f32.mrf.mxu1 }
 0x482   : > { %v10424_v40 = vpop.f32.mrf.mxu0 }
 0x483   : > { %v5221_v46 = vpop.f32.mrf.mxu1 }
 0x484   : > { %v5487_v49 = vpop.f32.mrf.mxu0 }
 0x485   : > { %v14090_v38 = vadd.f32 %v5487_v49, %v5221_v46  ;;  %v10339_v31 = vpop.f32.mrf.mxu1 }
 0x486   : > { %v10425_v11 = vpop.f32.mrf.mxu0  ;;  %v6002_v31 = vld [vmem:[#allocation2 + $0x107] sm:$0xff] }
 0x487   : > { %v5226_v33 = vpop.f32.mrf.mxu1  ;;  %10525 = vmatmul.mubr.msk.bf16.gmra.mxu1 %vm4850_vm10, %v6023_v26  ;;  %v5999_v26 = vld [vmem:[#allocation2 + $0xef] sm:$0xff] }
 0x488   : > { %v5492_v53 = vpop.f32.mrf.mxu0  ;;  %10611 = vmatmul.mubr.msk.bf16.gmra.mxu0 %vm4850_vm10, %v6024_v7  ;;  %10528 = vmatprep.mubr.msk.bf16.mxu1 %vm11313_vm1, %v15329_v57  ;;  %v6027_v1 = vpack.c.bf16 %v6000_v54, %v5999_v26 }
 0x489   : > { %v14094_v45 = vadd.f32 %v5492_v53, %v5226_v33  ;;  %10614 = vmatprep.mubr.msk.bf16.mxu0 %vm11313_vm1, %v15329_v57  ;;  %v10342_v6 = vpop.f32.mrf.mxu1  ;;  %v6001_v53 = vld [vmem:[#allocation2 + $0xff] sm:$0xff] }
 0x48a   : > { %v10428_v19 = vpop.f32.mrf.mxu0  ;;  %v6028_v25 = vpack.c.bf16 %v6002_v31, %v6001_v53  ;;  %v6007_v53 = vld [vmem:[#allocation2 + $0x12f] sm:$0xff] }
 0x48b   : > { %v5229_v36 = vpop.f32.mrf.mxu1 }
 0x48c   : > { %v5495_v20 = vpop.f32.mrf.mxu0 }
 0x48d   : > { %v14100_v5 = vadd.f32 %v5495_v20, %v5229_v36  ;;  %v10343_v29 = vpop.f32.mrf.mxu1 }
 0x48e   : > { %v10429_v30 = vpop.f32.mrf.mxu0 }
 0x48f   : > { %v5234_v37 = vpop.f32.mrf.mxu1  ;;  %10529 = vmatmul.mubr.msk.bf16.gmra.mxu1 %vm4850_vm10, %v6024_v7 }
 0x490   : > { %v5500_v63 = vpop.f32.mrf.mxu0  ;;  %10615 = vmatmul.mubr.msk.bf16.gmra.mxu0 %vm4850_vm10, %v6025_v12  ;;  %10532 = vmatprep.mubr.msk.bf16.mxu1 %vm11313_vm1, %v15329_v57 }
 0x491   : > { %v14104_v51 = vadd.f32 %v5500_v63, %v5234_v37  ;;  %10618 = vmatprep.mubr.msk.bf16.mxu0 %vm11313_vm1, %v15329_v57  ;;  %v10346_v28 = vpop.f32.mrf.mxu1 }
 0x492   : > { %v10432_v17 = vpop.f32.mrf.mxu0 }
 0x493   : > { %v5237_v23 = vpop.f32.mrf.mxu1  ;;  %v6003_v17 = vld [vmem:[#allocation2 + $0x10f] sm:$0xff] }
 0x494   : > { %v5503_v14 = vpop.f32.mrf.mxu0 }
 0x495   : > { %v14110_v44 = vadd.f32 %v5503_v14, %v5237_v23  ;;  %v10347_v0 = vpop.f32.mrf.mxu1 }
 0x496   : > { %v10433_v24 = vpop.f32.mrf.mxu0 }
 0x497   : > { %v5242_v3 = vpop.f32.mrf.mxu1  ;;  %10533 = vmatmul.mubr.msk.bf16.gmra.mxu1 %vm4850_vm10, %v6025_v12  ;;  %v6004_v12 = vld [vmem:[#allocation2 + $0x117] sm:$0xff] }
 0x498   : > { %v5508_v42 = vpop.f32.mrf.mxu0  ;;  %10619 = vmatmul.mubr.msk.bf16.gmra.mxu0 %vm4850_vm10, %v6026_v15  ;;  %10536 = vmatprep.mubr.msk.bf16.mxu1 %vm11313_vm1, %v15329_v57  ;;  %v6029_v14 = vpack.c.bf16 %v6004_v12, %v6003_v17 }
 0x499   : > { %v14114_v52 = vadd.f32 %v5508_v42, %v5242_v3  ;;  %10622 = vmatprep.mubr.msk.bf16.mxu0 %vm11313_vm1, %v15329_v57  ;;  %v10350_v21 = vpop.f32.mrf.mxu1  ;;  %v6006_v42 = vld [vmem:[#allocation2 + $0x127] sm:$0xff] }
 0x49a   : > { %v10436_v32 = vpop.f32.mrf.mxu0 }
 0x49b   : > { %v5245_v22 = vpop.f32.mrf.mxu1 }
 0x49c   : > { %v5511_v61 = vpop.f32.mrf.mxu0 }
 0x49d   : > { %v14120_v58 = vadd.f32 %v5511_v61, %v5245_v22  ;;  %v10351_v35 = vpop.f32.mrf.mxu1  ;;  %v6005_v22 = vld [vmem:[#allocation2 + $0x11f] sm:$0xff] }
 0x49e   : > { %v10437_v16 = vpop.f32.mrf.mxu0  ;;  %v6030_v35 = vpack.c.bf16 %v6006_v42, %v6005_v22  ;;  %v6012_v22 = vld [vmem:[#allocation2 + $0x157] sm:$0xff] }
 0x49f   : > { %v5250_v40 = vpop.f32.mrf.mxu1  ;;  %10537 = vmatmul.mubr.msk.bf16.gmra.mxu1 %vm4850_vm10, %v6026_v15 }
 0x4a0   : > { %v5516_v18 = vpop.f32.mrf.mxu0  ;;  %10623 = vmatmul.mubr.msk.bf16.gmra.mxu0 %vm4850_vm10, %v6027_v1  ;;  %10540 = vmatprep.mubr.msk.bf16.mxu1 %vm11313_vm1, %v15329_v57 }
 0x4a1   : > { %v14124_v46 = vadd.f32 %v5516_v18, %v5250_v40  ;;  %10626 = vmatprep.mubr.msk.bf16.mxu0 %vm11313_vm1, %v15329_v57  ;;  %v10354_v49 = vpop.f32.mrf.mxu1 }
 0x4a2   : > { %v10440_v41 = vpop.f32.mrf.mxu0 }
 0x4a3   : > { %v5253_v11 = vpop.f32.mrf.mxu1  ;;  %v6008_v41 = vld [vmem:[#allocation2 + $0x137] sm:$0xff] }
 0x4a4   : > { %v5519_v7 = vpop.f32.mrf.mxu0 }
 0x4a5   : > { %v14130_v33 = vadd.f32 %v5519_v7, %v5253_v11  ;;  %v10355_v6 = vpop.f32.mrf.mxu1 }
 0x4a6   : > { %v10441_v19 = vpop.f32.mrf.mxu0 }
 0x4a7   : > { %v5258_v36 = vpop.f32.mrf.mxu1  ;;  %10541 = vmatmul.mubr.msk.bf16.gmra.mxu1 %vm4850_vm10, %v6027_v1 }
 0x4a8   : > { %v5524_v20 = vpop.f32.mrf.mxu0  ;;  %10627 = vmatmul.mubr.msk.bf16.gmra.mxu0 %vm4850_vm10, %v6028_v25  ;;  %10544 = vmatprep.mubr.msk.bf16.mxu1 %vm11313_vm1, %v15329_v57 }
 0x4a9   : > { %v14134_v8 = vadd.f32 %v5524_v20, %v5258_v36  ;;  %10630 = vmatprep.mubr.msk.bf16.mxu0 %vm11313_vm1, %v15329_v57  ;;  %v10358_v29 = vpop.f32.mrf.mxu1 }
 0x4aa   : > { %v10444_v30 = vpop.f32.mrf.mxu0 }
 0x4ab   : > { %v5261_v37 = vpop.f32.mrf.mxu1 }
 0x4ac   : > { %v5527_v63 = vpop.f32.mrf.mxu0 }
 0x4ad   : > { %v14140_v28 = vadd.f32 %v5527_v63, %v5261_v37  ;;  %v10359_v62 = vpop.f32.mrf.mxu1  ;;  %v6010_v37 = vld [vmem:[#allocation2 + $0x147] sm:$0xff] }
 0x4ae   : > { %v10445_v23 = vpop.f32.mrf.mxu0 }
 0x4af   : > { %v5266_v13 = vpop.f32.mrf.mxu1  ;;  %10545 = vmatmul.mubr.msk.bf16.gmra.mxu1 %vm4850_vm10, %v6028_v25  ;;  %v6031_v25 = vpack.c.bf16 %v6008_v41, %v6007_v53  ;;  %v6009_v23 = vld [vmem:[#allocation2 + $0x13f] sm:$0xff] }
 0x4b0   : > { %v5532_v0 = vpop.f32.mrf.mxu0  ;;  %10631 = vmatmul.mubr.msk.bf16.gmra.mxu0 %vm4850_vm10, %v6029_v14  ;;  %10548 = vmatprep.mubr.msk.bf16.mxu1 %vm11313_vm1, %v15329_v57 }
 0x4b1   : > { %v14144_v24 = vadd.f32 %v5532_v0, %v5266_v13  ;;  %10634 = vmatprep.mubr.msk.bf16.mxu0 %vm11313_vm1, %v15329_v57  ;;  %v10362_v15 = vpop.f32.mrf.mxu1  ;;  %v6032_v0 = vpack.c.bf16 %v6010_v37, %v6009_v23 }
 0x4b2   : > { %v10448_v3 = vpop.f32.mrf.mxu0 }
 0x4b3   : > { %v5269_v21 = vpop.f32.mrf.mxu1 }
 0x4b4   : > { %v5535_v32 = vpop.f32.mrf.mxu0 }
 0x4b5   : > { %v14150_v54 = vadd.f32 %v5535_v32, %v5269_v21  ;;  %v10363_v61 = vpop.f32.mrf.mxu1 }
 0x4b6   : > { %v10449_v26 = vpop.f32.mrf.mxu0 }
 0x4b7   : > { %v5274_v16 = vpop.f32.mrf.mxu1  ;;  %10549 = vmatmul.mubr.msk.bf16.gmra.mxu1 %vm4850_vm10, %v6029_v14 }
 0x4b8   : > { %v5540_v1 = vpop.f32.mrf.mxu0  ;;  %10635 = vmatmul.mubr.msk.bf16.gmra.mxu0 %vm4850_vm10, %v6030_v35  ;;  %10552 = vmatprep.mubr.msk.bf16.mxu1 %vm11313_vm1, %v15329_v57 }
 0x4b9   : > { %v14154_v40 = vadd.f32 %v5540_v1, %v5274_v16  ;;  %10638 = vmatprep.mubr.msk.bf16.mxu0 %vm11313_vm1, %v15329_v57  ;;  %v10366_v18 = vpop.f32.mrf.mxu1  ;;  %v6011_v16 = vld [vmem:[#allocation2 + $0x14f] sm:$0xff] }
 0x4ba   : > { %v10452_v49 = vpop.f32.mrf.mxu0 }
 0x4bb   : > { %v5277_v31 = vpop.f32.mrf.mxu1  ;;  %v6033_v49 = vpack.c.bf16 %v6012_v22, %v6011_v16  ;;  %v6715_v16 = vld [vmem:[#allocation2 + $0x21] sm:$0xff] }
 0x4bc   : > { %v5543_v11 = vpop.f32.mrf.mxu0 }
 0x4bd   : > { %v14160_v7 = vadd.f32 %v5543_v11, %v5277_v31  ;;  %v10367_v6 = vpop.f32.mrf.mxu1 }
 0x4be   : > { %v10453_v19 = vpop.f32.mrf.mxu0 }
 0x4bf   : > { %v5282_v36 = vpop.f32.mrf.mxu1  ;;  %10553 = vmatmul.mubr.msk.bf16.gmra.mxu1 %vm4850_vm10, %v6030_v35  ;;  %v5642_v19 = vld [vmem:[#allocation2 + $0x14f] sm:$0xf] }
 0x4c0   : > { %v5548_v20 = vpop.f32.mrf.mxu0  ;;  %10639 = vmatmul.mubr.msk.bf16.gmra.mxu0 %vm4850_vm10, %v6031_v25  ;;  %10556 = vmatprep.mubr.msk.bf16.mxu1 %vm11313_vm1, %v15329_v57 }
 0x4c1   : > { %v14164_v29 = vadd.f32 %v5548_v20, %v5282_v36  ;;  %10642 = vmatprep.mubr.msk.bf16.mxu0 %vm11313_vm1, %v15329_v57  ;;  %v10370_v30 = vpop.f32.mrf.mxu1 }
 0x4c2   : > { %v10456_v12 = vpop.f32.mrf.mxu0 }
 0x4c3   : > { %v5285_v63 = vpop.f32.mrf.mxu1 }
 0x4c4   : > { %v5551_v17 = vpop.f32.mrf.mxu0 }
 0x4c5   : > { %v14170_v62 = vadd.f32 %v5551_v17, %v5285_v63  ;;  %v10371_v14 = vpop.f32.mrf.mxu1  ;;  %v5663_v63 = vpack.c.bf16 %v5642_v19, %v5642_v19 }
 0x4c6   : > { %v10457_v13 = vpop.f32.mrf.mxu0 }
 0x4c7   : > { %v5290_v15 = vpop.f32.mrf.mxu1  ;;  %10557 = vmatmul.mubr.msk.bf16.gmra.mxu1 %vm4850_vm10, %v6031_v25  ;;  %v6013_v25 = vld [vmem:[#allocation2 + $0x15f] sm:$0xf] }
 0x4c8   : > { %v5556_v3 = vpop.f32.mrf.mxu0  ;;  %10643 = vmatmul.mubr.msk.bf16.gmra.mxu0 %vm4850_vm10, %v6032_v0  ;;  %10560 = vmatprep.mubr.msk.bf16.mxu1 %vm11313_vm1, %v15329_v57  ;;  %v6034_v17 = vpack.c.bf16 %v6013_v25, %v6013_v25 }
 0x4c9   : > { %v14174_v42 = vadd.f32 %v5556_v3, %v5290_v15  ;;  %10646 = vmatprep.mubr.msk.bf16.mxu0 %vm11313_vm1, %v15329_v57  ;;  %v10374_v21 = vpop.f32.mrf.mxu1  ;;  %v6345_v3 = vld [vmem:[#allocation2 + $0x28] sm:$0xff] }
 0x4ca   : > { %v10460_v32 = vpop.f32.mrf.mxu0  ;;  %v6716_v21 = vld [vmem:[#allocation2 + $0x29] sm:$0xff] }
 0x4cb   : > { %v5293_v61 = vpop.f32.mrf.mxu1 }
 0x4cc   : > { %v5559_v26 = vpop.f32.mrf.mxu0 }
 0x4cd   : > { %v14180_v35 = vadd.f32 %v5559_v26, %v5293_v61  ;;  %v10375_v1 = vpop.f32.mrf.mxu1  ;;  %v6344_v26 = vld [vmem:[#allocation2 + $0x20] sm:$0xff] }
 0x4ce   : > { %v10461_v18 = vpop.f32.mrf.mxu0 }
 0x4cf   : > { %v5298_v41 = vpop.f32.mrf.mxu1  ;;  %10561 = vmatmul.mubr.msk.bf16.gmra.mxu1 %vm4850_vm10, %v6032_v0 }
 0x4d0   : > { %v5564_v31 = vpop.f32.mrf.mxu0  ;;  %10647 = vmatmul.mubr.msk.bf16.gmra.mxu0 %vm4850_vm10, %v6033_v49  ;;  %10564 = vmatprep.mubr.msk.bf16.mxu1 %vm11313_vm1, %v15329_v57  ;;  %v6385_v49 = vpack.c.bf16 %v6345_v3, %v6344_v26 }
 0x4d1   : > { %v14184_v11 = vadd.f32 %v5564_v31, %v5298_v41  ;;  %10650 = vmatprep.mubr.msk.bf16.mxu0 %vm11313_vm1, %v15329_v57  ;;  %v10378_v53 = vpop.f32.mrf.mxu1  ;;  %v6756_v41 = vpack.c.bf16 %v6716_v21, %v6715_v16 }
 0x4d2   : > { %v10464_v6 = vpop.f32.mrf.mxu0 }
 0x4d3   : > { %v5301_v36 = vpop.f32.mrf.mxu1 }
 0x4d4   : > { %v5567_v20 = vpop.f32.mrf.mxu0 }
 0x4d5   : > { %v14190_v30 = vadd.f32 %v5567_v20, %v5301_v36  ;;  %v10379_v12 = vpop.f32.mrf.mxu1  ;;  %v6347_v36 = vld [vmem:[#allocation2 + $0x38] sm:$0xff] }
 0x4d6   : > { %v10465_v37 = vpop.f32.mrf.mxu0  ;;  %v6718_v20 = vld [vmem:[#allocation2 + $0x39] sm:$0xff] }
 0x4d7   : > { %v5306_v23 = vpop.f32.mrf.mxu1  ;;  %10565 = vmatmul.mubr.msk.bf16.gmra.mxu1 %vm4850_vm10, %v5663_v63 }
 0x4d8   : > { %v5572_v14 = vpop.f32.mrf.mxu0  ;;  %10651 = vmatmul.mubr.msk.bf16.gmra.mxu0 %vm4850_vm10, %v6034_v17  ;;  %10656 = vmatprep.mubr.msk.bf16.mxu1 %vm11313_vm1, %v15329_v57  ;;  %v6346_v17 = vld [vmem:[#allocation2 + $0x30] sm:$0xff] }
 0x4d9   : > { %v14194_v13 = vadd.f32 %v5572_v14, %v5306_v23  ;;  %10742 = vmatprep.mubr.msk.bf16.mxu0 %vm11313_vm1, %v15329_v57  ;;  %v10382_v0 = vpop.f32.mrf.mxu1  ;;  %v6717_v23 = vld [vmem:[#allocation2 + $0x31] sm:$0xff] }
 0x4da   : > { %v10468_v15 = vpop.f32.mrf.mxu0  ;;  %v14212_v3 = vpack.c.bf16 %v6718_v20, %v6717_v23 }
 0x4db   : > { %v5309_v32 = vpop.f32.mrf.mxu1  ;;  %v6386_v15 = vpack.c.bf16 %v6347_v36, %v6346_v17 }
 0x4dc   : > { %v5575_v22 = vpop.f32.mrf.mxu0 }
 0x4dd   : > { %v14200_v61 = vadd.f32 %v5575_v22, %v5309_v32  ;;  %v10383_v1 = vpop.f32.mrf.mxu1 }
 0x4de   : > { %v10469_v18 = vpop.f32.mrf.mxu0  ;;  %v6349_v1 = vld [vmem:[#allocation2 + $0x48] sm:$0xff] }
 0x4df   : > { %v5314_v31 = vpop.f32.mrf.mxu1  ;;  %10657 = vmatmul.mubr.msk.bf16.vlgmr.msra.gmra.mxu1 %vm4850_vm10, %v6385_v49  ;;  %v6720_v18 = vld [vmem:[#allocation2 + $0x49] sm:$0xff] }
 0x4e0   : > { %v5580_v53 = vpop.f32.mrf.mxu0  ;;  %10743 = vmatmul.mubr.msk.bf16.vlgmr.msra.gmra.mxu0 %vm4850_vm10, %v6756_v41  ;;  %10660 = vmatprep.mubr.msk.bf16.mxu1 %vm11313_vm1, %v15329_v57 }
 0x4e1   : > { %v14204_v6 = vadd.f32 %v5580_v53, %v5314_v31  ;;  %10746 = vmatprep.mubr.msk.bf16.mxu0 %vm11313_vm1, %v15329_v57  ;;  %v10386_v19 = vpop.f32.mrf.mxu1  ;;  %v6348_v53 = vld [vmem:[#allocation2 + $0x40] sm:$0xff] }
 0x4e2   : > { %v10472_v25 = vpop.f32.mrf.mxu0  ;;  %v6719_v19 = vld [vmem:[#allocation2 + $0x41] sm:$0xff]  ;;  %v6387_v20 = vpack.c.bf16 %v6349_v1, %v6348_v53  ;;  %v6721_v1 = vld [vmem:[#allocation2 + $0x51] sm:$0xff] }
 0x4e3   : > { %v5317_v12 = vpop.f32.mrf.mxu1 }
 0x4e4   : > { %v5583_v37 = vpop.f32.mrf.mxu0 }
 0x4e5   : > { %v14210_v63 = vadd.f32 %v5583_v37, %v5317_v12  ;;  %v10387_v14 = vpop.f32.mrf.mxu1  ;;  %v14225_v12 = vpack.c.bf16 %v6720_v18, %v6719_v19  ;;  %v5437_v19 = vadd.f32 %v13987_v39, %v13841_v9 }
 0x4e6   : > { %v10473_v0 = vpop.f32.mrf.mxu0 }
 0x4e7   : > { %v5322_v21 = vpop.f32.mrf.mxu1  ;;  %10661 = vmatmul.mubr.msk.bf16.gmra.mxu1 %vm4850_vm10, %v6386_v15  ;;  %v6351_v15 = vld [vmem:[#allocation2 + $0x58] sm:$0xff] }
 0x4e8   : > { %v5588_v32 = vpop.f32.mrf.mxu0  ;;  %10747 = vmatmul.mubr.msk.bf16.gmra.mxu0 %vm4850_vm10, %v14212_v3  ;;  %10664 = vmatprep.mubr.msk.bf16.mxu1 %vm11313_vm1, %v15329_v57 }
 0x4e9   : > { %v14217_v22 = vadd.f32 %v5588_v32, %v5322_v21  ;;  %10750 = vmatprep.mubr.msk.bf16.mxu0 %vm11313_vm1, %v15329_v57  ;;  %v10390_v26 = vpop.f32.mrf.mxu1  ;;  %v6722_v21 = vld [vmem:[#allocation2 + $0x59] sm:$0xff] }
 0x4ea   : > { %v10476_v16 = vpop.f32.mrf.mxu0  ;;  %v14236_v53 = vpack.c.bf16 %v6722_v21, %v6721_v1  ;;  %v6724_v21 = vld [vmem:[#allocation2 + $0x69] sm:$0xff]  ;;  %v6352_v1 = vld [vmem:[#allocation2 + $0x60] sm:$0xff] }
 0x4eb   : > { %v5325_v49 = vpop.f32.mrf.mxu1  ;;  %v6350_v16 = vld [vmem:[#allocation2 + $0x50] sm:$0xff] }
 0x4ec   : > { %v5591_v41 = vpop.f32.mrf.mxu0 }
 0x4ed   : > { %v14223_v31 = vadd.f32 %v5591_v41, %v5325_v49  ;;  %v10391_v25 = vpop.f32.mrf.mxu1  ;;  %v6388_v41 = vpack.c.bf16 %v6351_v15, %v6350_v16  ;;  %v6353_v15 = vld [vmem:[#allocation2 + $0x68] sm:$0xff] }
 0x4ee   : > { %v10477_v36 = vpop.f32.mrf.mxu0  ;;  %v9019_v25 = vld [vmem:[%s15222_s3 + $0x18] sm:$0xf] }
 0x4ef   : > { %v5330_v37 = vpop.f32.mrf.mxu1  ;;  %10665 = vmatmul.mubr.msk.bf16.gmra.mxu1 %vm4850_vm10, %v6387_v20 }
 0x4f0   : > { %v5596_v17 = vpop.f32.mrf.mxu0  ;;  %10751 = vmatmul.mubr.msk.bf16.gmra.mxu0 %vm4850_vm10, %v14225_v12  ;;  %10668 = vmatprep.mubr.msk.bf16.mxu1 %vm11313_vm1, %v15329_v57 }
 0x4f1   : > { %v14230_v23 = vadd.f32 %v5596_v17, %v5330_v37  ;;  %10754 = vmatprep.mubr.msk.bf16.mxu0 %vm11313_vm1, %v15329_v57  ;;  %v10394_v14 = vpop.f32.mrf.mxu1  ;;  %v7214_v37 = vsel %vm5132_vm9, %v9019_v25, 0 }
 0x4f2   : > { %v10480_v0 = vpop.f32.mrf.mxu0  ;;  %10827 = vmatpush3.bf16.msra.mxu1 %v7214_v37  ;;  %v5440_v14 = vadd.f32 %v13990_v50, %v13846_v34 }
 0x4f3   : > { %v5333_v32 = vpop.f32.mrf.mxu1  ;;  %10998 = vmatprep.subr.bf16.mxu1 %v15329_v57 }
 0x4f4   : > { %v5599_v26 = vpop.f32.mrf.mxu0 }
 0x4f5   : > { %v10395_v18 = vpop.f32.mrf.mxu1 }
 0x4f6   : > { %v10481_v49 = vpop.f32.mrf.mxu0  ;;  %v6723_v18 = vld [vmem:[#allocation2 + $0x61] sm:$0xff] }
 0x4f7   : > { %v5766_v36 = vpop.f32.mrf.mxu1  ;;  %10669 = vmatmul.mubr.msk.bf16.gmra.mxu1 %vm4850_vm10, %v6388_v41  ;;  %v14256_v25 = vpack.c.bf16 %v6724_v21, %v6723_v18 }
 0x4f8   : > { %v6137_v20 = vpop.f32.mrf.mxu0  ;;  %10755 = vmatmul.mubr.msk.bf16.gmra.mxu0 %vm4850_vm10, %v14236_v53  ;;  %v5932_v17 = vadd.f32 %v5766_v36, %v5437_v19  ;;  %10672 = vmatprep.mubr.msk.bf16.mxu1 %vm11313_vm1, %v15329_v57  ;;  %v6389_v19 = vpack.c.bf16 %v6353_v15, %v6352_v1 }
 0x4f9   : > { %10758 = vmatprep.mubr.msk.bf16.mxu0 %vm11313_vm1, %v15329_v57  ;;  %v10486_v9 = vpop.f32.mrf.mxu1 }
 0x4fa   : > { %v10572_v39 = vpop.f32.mrf.mxu0  ;;  %v14253_v0 = vadd.f32 %v6137_v20, %v5932_v17 }
 0x4fb   : > { %v5769_v32 = vpop.f32.mrf.mxu1  ;;  %v6355_v39 = vld [vmem:[#allocation2 + $0x78] sm:$0xff] }
 0x4fc   : > { %v6140_v26 = vpop.f32.mrf.mxu0  ;;  %v5933_v16 = vadd.f32 %v5769_v32, %v5440_v14  ;;  %v6726_v14 = vld [vmem:[#allocation2 + $0x79] sm:$0xff] }
 0x4fd   : > { %v10487_v49 = vpop.f32.mrf.mxu1 }
 0x4fe   : > { %v10573_v41 = vpop.f32.mrf.mxu0  ;;  %v14258_v36 = vadd.f32 %v6140_v26, %v5933_v16  ;;  %v6354_v26 = vld [vmem:[#allocation2 + $0x70] sm:$0xff] }
 0x4ff   : > { %v5774_v37 = vpop.f32.mrf.mxu1  ;;  %10673 = vmatmul.mubr.msk.bf16.gmra.mxu1 %vm4850_vm10, %v6389_v19  ;;  %v6725_v16 = vld [vmem:[#allocation2 + $0x71] sm:$0xff]  ;;  %v6390_v49 = vpack.c.bf16 %v6355_v39, %v6354_v26 }
 0x500   : > { %v6145_v34 = vpop.f32.mrf.mxu0  ;;  %10759 = vmatmul.mubr.msk.bf16.gmra.mxu0 %vm4850_vm10, %v14256_v25  ;;  %v5934_v50 = vadd.f32 %v5774_v37, %v14029_v48  ;;  %10676 = vmatprep.mubr.msk.bf16.mxu1 %vm11313_vm1, %v15329_v57  ;;  %v9041_v48 = vld [vmem:[%s15222_s3 + $0x1c] sm:$0xf]  ;;  %v14274_v41 = vpack.c.bf16 %v6726_v14, %v6725_v16  ;;  %v6357_v14 = vld [vmem:[#allocation2 + $0x88] sm:$0xff]  ;;  %v6356_v16 = vld [vmem:[#allocation2 + $0x80] sm:$0xff] }
 0x501   : > { %10762 = vmatprep.mubr.msk.bf16.mxu0 %vm11313_vm1, %v15329_v57  ;;  %v10490_v20 = vpop.f32.mrf.mxu1  ;;  %v7585_v19 = vsel %vm5132_vm9, %v9041_v48, 0  ;;  %v6727_v48 = vld [vmem:[#allocation2 + $0x81] sm:$0xff] }
 0x502   : > { %v10576_v17 = vpop.f32.mrf.mxu0  ;;  %v14268_v9 = vadd.f32 %v6145_v34, %v5934_v50  ;;  %10913 = vmatpush3.bf16.msra.mxu0 %v7585_v19 }
 0x503   : > { %v5777_v15 = vpop.f32.mrf.mxu1 }
 0x504   : > { %v6148_v21 = vpop.f32.mrf.mxu0  ;;  %v5935_v32 = vadd.f32 %v5777_v15, %v14038_v59  ;;  %v6728_v15 = vld [vmem:[#allocation2 + $0x89] sm:$0xff] }
 0x505   : > { %v10491_v1 = vpop.f32.mrf.mxu1 }
 0x506   : > { %v10577_v18 = vpop.f32.mrf.mxu0  ;;  %v14277_v37 = vadd.f32 %v6148_v21, %v5935_v32 }
 0x507   : > { %v5782_v34 = vpop.f32.mrf.mxu1  ;;  %10677 = vmatmul.mubr.msk.bf16.gmra.mxu1 %vm4850_vm10, %v6390_v49  ;;  %v6391_v18 = vpack.c.bf16 %v6357_v14, %v6356_v16  ;;  %v14290_v49 = vpack.c.bf16 %v6728_v15, %v6727_v48  ;;  %v6359_v14 = vld [vmem:[#allocation2 + $0x98] sm:$0xff]  ;;  %v6358_v16 = vld [vmem:[#allocation2 + $0x90] sm:$0xff] }
 0x508   : > { %v6153_v50 = vpop.f32.mrf.mxu0  ;;  %10763 = vmatmul.mubr.msk.bf16.gmra.mxu0 %vm4850_vm10, %v14274_v41  ;;  %v5936_v59 = vadd.f32 %v5782_v34, %v14044_v4  ;;  %10680 = vmatprep.mubr.msk.bf16.mxu1 %vm11313_vm1, %v15329_v57  ;;  %v6730_v15 = vld [vmem:[#allocation2 + $0x99] sm:$0xff]  ;;  %v6729_v48 = vld [vmem:[#allocation2 + $0x91] sm:$0xff] }
 0x509   : > { %10766 = vmatprep.mubr.msk.bf16.mxu0 %vm11313_vm1, %v15329_v57  ;;  %v10494_v20 = vpop.f32.mrf.mxu1 }
 0x50a   : > { %v10580_v17 = vpop.f32.mrf.mxu0  ;;  %v14287_v39 = vadd.f32 %v6153_v50, %v5936_v59 }
 0x50b   : > { %v5785_v21 = vpop.f32.mrf.mxu1 }
 0x50c   : > { %v6156_v32 = vpop.f32.mrf.mxu0  ;;  %v5937_v26 = vadd.f32 %v5785_v21, %v14050_v43 }
 0x50d   : > { %v10495_v1 = vpop.f32.mrf.mxu1 }
 0x50e   : > { %v10581_v4 = vpop.f32.mrf.mxu0  ;;  %v14292_v19 = vadd.f32 %v6156_v32, %v5937_v26 }
 0x50f   : > { %v5790_v34 = vpop.f32.mrf.mxu1  ;;  %10681 = vmatmul.mubr.msk.bf16.gmra.mxu1 %vm4850_vm10, %v6391_v18  ;;  %v6392_v4 = vpack.c.bf16 %v6359_v14, %v6358_v16  ;;  %v14305_v18 = vpack.c.bf16 %v6730_v15, %v6729_v48  ;;  %v6361_v14 = vld [vmem:[#allocation2 + $0xa8] sm:$0xff]  ;;  %v6360_v16 = vld [vmem:[#allocation2 + $0xa0] sm:$0xff] }
 0x510   : > { %15463 = vst [vmem:[#allocation24_spill] sm:$0xff] %v14292_v19  ;;  %v6161_v20 = vpop.f32.mrf.mxu0  ;;  %10767 = vmatmul.mubr.msk.bf16.gmra.mxu0 %vm4850_vm10, %v14290_v49  ;;  %v5938_v50 = vadd.f32 %v5790_v34, %v14054_v60  ;;  %10684 = vmatprep.mubr.msk.bf16.mxu1 %vm11313_vm1, %v15329_v57  ;;  %v6732_v15 = vld [vmem:[#allocation2 + $0xa9] sm:$0xff]  ;;  %v6731_v48 = vld [vmem:[#allocation2 + $0xa1] sm:$0xff] }
 0x511   : > { %10770 = vmatprep.mubr.msk.bf16.mxu0 %vm11313_vm1, %v15329_v57  ;;  %v10498_v43 = vpop.f32.mrf.mxu1 }
 0x512   : > { %v10584_v59 = vpop.f32.mrf.mxu0  ;;  %v14302_v17 = vadd.f32 %v6161_v20, %v5938_v50 }
 0x513   : > { %v5793_v21 = vpop.f32.mrf.mxu1 }
 0x514   : > { %v6164_v32 = vpop.f32.mrf.mxu0  ;;  %v5939_v26 = vadd.f32 %v5793_v21, %v14060_v27 }
 0x515   : > { %v10499_v1 = vpop.f32.mrf.mxu1 }
 0x516   : > { %v10585_v60 = vpop.f32.mrf.mxu0  ;;  %v14307_v34 = vadd.f32 %v6164_v32, %v5939_v26 }
 0x517   : > { %v5798_v19 = vpop.f32.mrf.mxu1  ;;  %10685 = vmatmul.mubr.msk.bf16.gmra.mxu1 %vm4850_vm10, %v6392_v4  ;;  %v14320_v60 = vpack.c.bf16 %v6732_v15, %v6731_v48  ;;  %v6734_v15 = vld [vmem:[#allocation2 + $0xb9] sm:$0xff]  ;;  %v6733_v48 = vld [vmem:[#allocation2 + $0xb1] sm:$0xff] }
 0x518   : > { %15464 = vst [vmem:[#allocation22_spill] sm:$0xff] %v14307_v34  ;;  %v6169_v43 = vpop.f32.mrf.mxu0  ;;  %10771 = vmatmul.mubr.msk.bf16.gmra.mxu0 %vm4850_vm10, %v14305_v18  ;;  %v5940_v20 = vadd.f32 %v5798_v19, %v14064_v47  ;;  %10688 = vmatprep.mubr.msk.bf16.mxu1 %vm11313_vm1, %v15329_v57  ;;  %v6393_v19 = vpack.c.bf16 %v6361_v14, %v6360_v16  ;;  %v6363_v14 = vld [vmem:[#allocation2 + $0xb8] sm:$0xff]  ;;  %v6362_v16 = vld [vmem:[#allocation2 + $0xb0] sm:$0xff] }
 0x519   : > { %10774 = vmatprep.mubr.msk.bf16.mxu0 %vm11313_vm1, %v15329_v57  ;;  %v10502_v27 = vpop.f32.mrf.mxu1 }
 0x51a   : > { %v10588_v50 = vpop.f32.mrf.mxu0  ;;  %v14317_v59 = vadd.f32 %v6169_v43, %v5940_v20 }
 0x51b   : > { %v5801_v21 = vpop.f32.mrf.mxu1 }
 0x51c   : > { %v6172_v32 = vpop.f32.mrf.mxu0  ;;  %v5941_v26 = vadd.f32 %v5801_v21, %v14070_v10 }
 0x51d   : > { %v10503_v1 = vpop.f32.mrf.mxu1 }
 0x51e   : > { %v10589_v47 = vpop.f32.mrf.mxu0  ;;  %v14322_v4 = vadd.f32 %v6172_v32, %v5941_v26 }
 0x51f   : > { %v5806_v34 = vpop.f32.mrf.mxu1  ;;  %10689 = vmatmul.mubr.msk.bf16.gmra.mxu1 %vm4850_vm10, %v6393_v19  ;;  %v14335_v47 = vpack.c.bf16 %v6734_v15, %v6733_v48  ;;  %v6736_v15 = vld [vmem:[#allocation2 + $0xc9] sm:$0xff]  ;;  %v6735_v48 = vld [vmem:[#allocation2 + $0xc1] sm:$0xff] }
 0x520   : > { %15465 = vst [vmem:[#allocation26_spill] sm:$0xff] %v14322_v4  ;;  %v6177_v27 = vpop.f32.mrf.mxu0  ;;  %10775 = vmatmul.mubr.msk.bf16.gmra.mxu0 %vm4850_vm10, %v14320_v60  ;;  %v5942_v43 = vadd.f32 %v5806_v34, %v14074_v55  ;;  %10692 = vmatprep.mubr.msk.bf16.mxu1 %vm11313_vm1, %v15329_v57  ;;  %v6394_v34 = vpack.c.bf16 %v6363_v14, %v6362_v16  ;;  %v6365_v14 = vld [vmem:[#allocation2 + $0xc8] sm:$0xff]  ;;  %v6364_v16 = vld [vmem:[#allocation2 + $0xc0] sm:$0xff] }
 0x521   : > { %10778 = vmatprep.mubr.msk.bf16.mxu0 %vm11313_vm1, %v15329_v57  ;;  %v10506_v10 = vpop.f32.mrf.mxu1 }
 0x522   : > { %v10592_v20 = vpop.f32.mrf.mxu0  ;;  %v14332_v50 = vadd.f32 %v6177_v27, %v5942_v43 }
 0x523   : > { %v5809_v21 = vpop.f32.mrf.mxu1 }
 0x524   : > { %v6180_v32 = vpop.f32.mrf.mxu0  ;;  %v5943_v26 = vadd.f32 %v5809_v21, %v14080_v2 }
 0x525   : > { %v10507_v1 = vpop.f32.mrf.mxu1 }
 0x526   : > { %v10593_v55 = vpop.f32.mrf.mxu0  ;;  %v14337_v19 = vadd.f32 %v6180_v32, %v5943_v26 }
 0x527   : > { %v5814_v4 = vpop.f32.mrf.mxu1  ;;  %10693 = vmatmul.mubr.msk.bf16.gmra.mxu1 %vm4850_vm10, %v6394_v34  ;;  %v14350_v55 = vpack.c.bf16 %v6736_v15, %v6735_v48  ;;  %v6738_v15 = vld [vmem:[#allocation2 + $0xd9] sm:$0xff]  ;;  %v6737_v48 = vld [vmem:[#allocation2 + $0xd1] sm:$0xff] }
 0x528   : > { %15466 = vst [vmem:[#allocation27_spill] sm:$0xff] %v14337_v19  ;;  %v6185_v10 = vpop.f32.mrf.mxu0  ;;  %10779 = vmatmul.mubr.msk.bf16.gmra.mxu0 %vm4850_vm10, %v14335_v47  ;;  %v5944_v27 = vadd.f32 %v5814_v4, %v14084_v56  ;;  %10696 = vmatprep.mubr.msk.bf16.mxu1 %vm11313_vm1, %v15329_v57  ;;  %v6395_v4 = vpack.c.bf16 %v6365_v14, %v6364_v16  ;;  %v6367_v14 = vld [vmem:[#allocation2 + $0xd8] sm:$0xff]  ;;  %v6366_v16 = vld [vmem:[#allocation2 + $0xd0] sm:$0xff] }
 0x529   : > { %10782 = vmatprep.mubr.msk.bf16.mxu0 %vm11313_vm1, %v15329_v57  ;;  %v10510_v2 = vpop.f32.mrf.mxu1 }
 0x52a   : > { %v10596_v43 = vpop.f32.mrf.mxu0  ;;  %v14347_v20 = vadd.f32 %v6185_v10, %v5944_v27 }
 0x52b   : > { %v5817_v21 = vpop.f32.mrf.mxu1 }
 0x52c   : > { %v6188_v32 = vpop.f32.mrf.mxu0  ;;  %v5945_v26 = vadd.f32 %v5817_v21, %v14090_v38 }
 0x52d   : > { %v10511_v1 = vpop.f32.mrf.mxu1 }
 0x52e   : > { %v10597_v56 = vpop.f32.mrf.mxu0  ;;  %v14352_v34 = vadd.f32 %v6188_v32, %v5945_v26 }
 0x52f   : > { %v5822_v19 = vpop.f32.mrf.mxu1  ;;  %10697 = vmatmul.mubr.msk.bf16.gmra.mxu1 %vm4850_vm10, %v6395_v4  ;;  %v14365_v56 = vpack.c.bf16 %v6738_v15, %v6737_v48  ;;  %v6740_v15 = vld [vmem:[#allocation2 + $0xe9] sm:$0xff]  ;;  %v6739_v48 = vld [vmem:[#allocation2 + $0xe1] sm:$0xff] }
 0x530   : > { %15467 = vst [vmem:[#allocation30_spill] sm:$0xff] %v14352_v34  ;;  %v6193_v2 = vpop.f32.mrf.mxu0  ;;  %10783 = vmatmul.mubr.msk.bf16.gmra.mxu0 %vm4850_vm10, %v14350_v55  ;;  %v5946_v10 = vadd.f32 %v5822_v19, %v14094_v45  ;;  %10700 = vmatprep.mubr.msk.bf16.mxu1 %vm11313_vm1, %v15329_v57  ;;  %v6396_v19 = vpack.c.bf16 %v6367_v14, %v6366_v16  ;;  %v6369_v14 = vld [vmem:[#allocation2 + $0xe8] sm:$0xff]  ;;  %v6368_v16 = vld [vmem:[#allocation2 + $0xe0] sm:$0xff] }
 0x531   : > { %10786 = vmatprep.mubr.msk.bf16.mxu0 %vm11313_vm1, %v15329_v57  ;;  %v10514_v38 = vpop.f32.mrf.mxu1 }
 0x532   : > { %v10600_v27 = vpop.f32.mrf.mxu0  ;;  %v14362_v43 = vadd.f32 %v6193_v2, %v5946_v10 }
 0x533   : > { %v5825_v21 = vpop.f32.mrf.mxu1 }
 0x534   : > { %v6196_v32 = vpop.f32.mrf.mxu0  ;;  %v5947_v26 = vadd.f32 %v5825_v21, %v14100_v5 }
 0x535   : > { %v10515_v1 = vpop.f32.mrf.mxu1 }
 0x536   : > { %v10601_v45 = vpop.f32.mrf.mxu0  ;;  %v14367_v4 = vadd.f32 %v6196_v32, %v5947_v26 }
 0x537   : > { %v5830_v34 = vpop.f32.mrf.mxu1  ;;  %10701 = vmatmul.mubr.msk.bf16.gmra.mxu1 %vm4850_vm10, %v6396_v19  ;;  %v14380_v45 = vpack.c.bf16 %v6740_v15, %v6739_v48  ;;  %v6742_v15 = vld [vmem:[#allocation2 + $0xf9] sm:$0xff]  ;;  %v6741_v48 = vld [vmem:[#allocation2 + $0xf1] sm:$0xff] }
 0x538   : > { %15468 = vst [vmem:[#allocation28_spill] sm:$0xff] %v14367_v4  ;;  %v6201_v38 = vpop.f32.mrf.mxu0  ;;  %10787 = vmatmul.mubr.msk.bf16.gmra.mxu0 %vm4850_vm10, %v14365_v56  ;;  %v5948_v2 = vadd.f32 %v5830_v34, %v14104_v51  ;;  %10704 = vmatprep.mubr.msk.bf16.mxu1 %vm11313_vm1, %v15329_v57  ;;  %v6397_v34 = vpack.c.bf16 %v6369_v14, %v6368_v16  ;;  %v6371_v14 = vld [vmem:[#allocation2 + $0xf8] sm:$0xff]  ;;  %v6370_v16 = vld [vmem:[#allocation2 + $0xf0] sm:$0xff] }
 0x539   : > { %10790 = vmatprep.mubr.msk.bf16.mxu0 %vm11313_vm1, %v15329_v57  ;;  %v10518_v5 = vpop.f32.mrf.mxu1 }
 0x53a   : > { %v10604_v10 = vpop.f32.mrf.mxu0  ;;  %v14377_v27 = vadd.f32 %v6201_v38, %v5948_v2 }
 0x53b   : > { %v5833_v21 = vpop.f32.mrf.mxu1 }
 0x53c   : > { %v6204_v32 = vpop.f32.mrf.mxu0  ;;  %v5949_v26 = vadd.f32 %v5833_v21, %v14110_v44 }
 0x53d   : > { %v10519_v1 = vpop.f32.mrf.mxu1 }
 0x53e   : > { %v10605_v51 = vpop.f32.mrf.mxu0  ;;  %v14382_v19 = vadd.f32 %v6204_v32, %v5949_v26 }
 0x53f   : > { %v5838_v4 = vpop.f32.mrf.mxu1  ;;  %10705 = vmatmul.mubr.msk.bf16.gmra.mxu1 %vm4850_vm10, %v6397_v34  ;;  %v14395_v51 = vpack.c.bf16 %v6742_v15, %v6741_v48  ;;  %v6744_v15 = vld [vmem:[#allocation2 + $0x109] sm:$0xff]  ;;  %v6743_v48 = vld [vmem:[#allocation2 + $0x101] sm:$0xff] }
 0x540   : > { %15469 = vst [vmem:[#allocation25_spill] sm:$0xff] %v14382_v19  ;;  %v6209_v5 = vpop.f32.mrf.mxu0  ;;  %10791 = vmatmul.mubr.msk.bf16.gmra.mxu0 %vm4850_vm10, %v14380_v45  ;;  %v5950_v38 = vadd.f32 %v5838_v4, %v14114_v52  ;;  %10708 = vmatprep.mubr.msk.bf16.mxu1 %vm11313_vm1, %v15329_v57  ;;  %v6398_v4 = vpack.c.bf16 %v6371_v14, %v6370_v16  ;;  %v6373_v14 = vld [vmem:[#allocation2 + $0x108] sm:$0xff]  ;;  %v6372_v16 = vld [vmem:[#allocation2 + $0x100] sm:$0xff] }
 0x541   : > { %10794 = vmatprep.mubr.msk.bf16.mxu0 %vm11313_vm1, %v15329_v57  ;;  %v10522_v44 = vpop.f32.mrf.mxu1 }
 0x542   : > { %v10608_v2 = vpop.f32.mrf.mxu0  ;;  %v14392_v10 = vadd.f32 %v6209_v5, %v5950_v38 }
 0x543   : > { %v5841_v21 = vpop.f32.mrf.mxu1 }
 0x544   : > { %v6212_v32 = vpop.f32.mrf.mxu0  ;;  %v5951_v26 = vadd.f32 %v5841_v21, %v14120_v58 }
 0x545   : > { %v10523_v1 = vpop.f32.mrf.mxu1 }
 0x546   : > { %v10609_v52 = vpop.f32.mrf.mxu0  ;;  %v14397_v34 = vadd.f32 %v6212_v32, %v5951_v26 }
 0x547   : > { %v5846_v19 = vpop.f32.mrf.mxu1  ;;  %10709 = vmatmul.mubr.msk.bf16.gmra.mxu1 %vm4850_vm10, %v6398_v4  ;;  %v14410_v52 = vpack.c.bf16 %v6744_v15, %v6743_v48  ;;  %v6746_v15 = vld [vmem:[#allocation2 + $0x119] sm:$0xff]  ;;  %v6745_v48 = vld [vmem:[#allocation2 + $0x111] sm:$0xff] }
 0x548   : > { %15470 = vst [vmem:[#allocation31_spill] sm:$0xff] %v14397_v34  ;;  %v6217_v44 = vpop.f32.mrf.mxu0  ;;  %10795 = vmatmul.mubr.msk.bf16.gmra.mxu0 %vm4850_vm10, %v14395_v51  ;;  %v5952_v5 = vadd.f32 %v5846_v19, %v14124_v46  ;;  %10712 = vmatprep.mubr.msk.bf16.mxu1 %vm11313_vm1, %v15329_v57  ;;  %v6399_v19 = vpack.c.bf16 %v6373_v14, %v6372_v16  ;;  %v6375_v14 = vld [vmem:[#allocation2 + $0x118] sm:$0xff]  ;;  %v6374_v16 = vld [vmem:[#allocation2 + $0x110] sm:$0xff] }
 0x549   : > { %10798 = vmatprep.mubr.msk.bf16.mxu0 %vm11313_vm1, %v15329_v57  ;;  %v10526_v58 = vpop.f32.mrf.mxu1 }
 0x54a   : > { %v10612_v38 = vpop.f32.mrf.mxu0  ;;  %v14407_v2 = vadd.f32 %v6217_v44, %v5952_v5 }
 0x54b   : > { %v5849_v21 = vpop.f32.mrf.mxu1 }
 0x54c   : > { %v6220_v32 = vpop.f32.mrf.mxu0  ;;  %v5953_v26 = vadd.f32 %v5849_v21, %v14130_v33 }
 0x54d   : > { %v10527_v1 = vpop.f32.mrf.mxu1 }
 0x54e   : > { %v10613_v46 = vpop.f32.mrf.mxu0  ;;  %v14412_v4 = vadd.f32 %v6220_v32, %v5953_v26 }
 0x54f   : > { %v5854_v34 = vpop.f32.mrf.mxu1  ;;  %10713 = vmatmul.mubr.msk.bf16.gmra.mxu1 %vm4850_vm10, %v6399_v19  ;;  %v14425_v46 = vpack.c.bf16 %v6746_v15, %v6745_v48  ;;  %v6748_v15 = vld [vmem:[#allocation2 + $0x129] sm:$0xff]  ;;  %v6747_v48 = vld [vmem:[#allocation2 + $0x121] sm:$0xff] }
 0x550   : > { %15471 = vst [vmem:[#allocation29_spill] sm:$0xff] %v14412_v4  ;;  %v6225_v58 = vpop.f32.mrf.mxu0  ;;  %10799 = vmatmul.mubr.msk.bf16.gmra.mxu0 %vm4850_vm10, %v14410_v52  ;;  %v5954_v44 = vadd.f32 %v5854_v34, %v14134_v8  ;;  %10716 = vmatprep.mubr.msk.bf16.mxu1 %vm11313_vm1, %v15329_v57  ;;  %v6400_v34 = vpack.c.bf16 %v6375_v14, %v6374_v16  ;;  %v6377_v14 = vld [vmem:[#allocation2 + $0x128] sm:$0xff]  ;;  %v6376_v16 = vld [vmem:[#allocation2 + $0x120] sm:$0xff] }
 0x551   : > { %10802 = vmatprep.mubr.msk.bf16.mxu0 %vm11313_vm1, %v15329_v57  ;;  %v10530_v33 = vpop.f32.mrf.mxu1 }
 0x552   : > { %v10616_v5 = vpop.f32.mrf.mxu0  ;;  %v14422_v38 = vadd.f32 %v6225_v58, %v5954_v44 }
 0x553   : > { %v5857_v21 = vpop.f32.mrf.mxu1 }
 0x554   : > { %v6228_v32 = vpop.f32.mrf.mxu0  ;;  %v5955_v26 = vadd.f32 %v5857_v21, %v14140_v28 }
 0x555   : > { %v10531_v1 = vpop.f32.mrf.mxu1 }
 0x556   : > { %v10617_v8 = vpop.f32.mrf.mxu0  ;;  %v14427_v19 = vadd.f32 %v6228_v32, %v5955_v26 }
 0x557   : > { %v5862_v4 = vpop.f32.mrf.mxu1  ;;  %10717 = vmatmul.mubr.msk.bf16.gmra.mxu1 %vm4850_vm10, %v6400_v34  ;;  %v14440_v8 = vpack.c.bf16 %v6748_v15, %v6747_v48  ;;  %v6750_v15 = vld [vmem:[#allocation2 + $0x139] sm:$0xff]  ;;  %v6749_v48 = vld [vmem:[#allocation2 + $0x131] sm:$0xff] }
 0x558   : > { %15472 = vst [vmem:[#allocation32_spill] sm:$0xff] %v14427_v19  ;;  %v6233_v33 = vpop.f32.mrf.mxu0  ;;  %10803 = vmatmul.mubr.msk.bf16.gmra.mxu0 %vm4850_vm10, %v14425_v46  ;;  %v5956_v58 = vadd.f32 %v5862_v4, %v14144_v24  ;;  %10720 = vmatprep.mubr.msk.bf16.mxu1 %vm11313_vm1, %v15329_v57  ;;  %v6401_v4 = vpack.c.bf16 %v6377_v14, %v6376_v16  ;;  %v6379_v14 = vld [vmem:[#allocation2 + $0x138] sm:$0xff]  ;;  %v6378_v16 = vld [vmem:[#allocation2 + $0x130] sm:$0xff] }
 0x559   : > { %10806 = vmatprep.mubr.msk.bf16.mxu0 %vm11313_vm1, %v15329_v57  ;;  %v10534_v28 = vpop.f32.mrf.mxu1 }
 0x55a   : > { %v10620_v44 = vpop.f32.mrf.mxu0  ;;  %v14437_v5 = vadd.f32 %v6233_v33, %v5956_v58 }
 0x55b   : > { %v5865_v21 = vpop.f32.mrf.mxu1 }
 0x55c   : > { %v6236_v32 = vpop.f32.mrf.mxu0  ;;  %v5957_v26 = vadd.f32 %v5865_v21, %v14150_v54 }
 0x55d   : > { %v10535_v1 = vpop.f32.mrf.mxu1 }
 0x55e   : > { %v10621_v24 = vpop.f32.mrf.mxu0  ;;  %v14442_v34 = vadd.f32 %v6236_v32, %v5957_v26 }
 0x55f   : > { %v5870_v19 = vpop.f32.mrf.mxu1  ;;  %10721 = vmatmul.mubr.msk.bf16.gmra.mxu1 %vm4850_vm10, %v6401_v4  ;;  %v14455_v24 = vpack.c.bf16 %v6750_v15, %v6749_v48  ;;  %v6752_v15 = vld [vmem:[#allocation2 + $0x149] sm:$0xff]  ;;  %v6751_v48 = vld [vmem:[#allocation2 + $0x141] sm:$0xff] }
 0x560   : > { %15473 = vst [vmem:[#allocation7_spill] sm:$0xff] %v14442_v34  ;;  %v6241_v28 = vpop.f32.mrf.mxu0  ;;  %10807 = vmatmul.mubr.msk.bf16.gmra.mxu0 %vm4850_vm10, %v14440_v8  ;;  %v5958_v33 = vadd.f32 %v5870_v19, %v14154_v40  ;;  %10724 = vmatprep.mubr.msk.bf16.mxu1 %vm11313_vm1, %v15329_v57  ;;  %v6402_v19 = vpack.c.bf16 %v6379_v14, %v6378_v16  ;;  %v6381_v14 = vld [vmem:[#allocation2 + $0x148] sm:$0xff]  ;;  %v6380_v16 = vld [vmem:[#allocation2 + $0x140] sm:$0xff] }
 0x561   : > { %10810 = vmatprep.mubr.msk.bf16.mxu0 %vm11313_vm1, %v15329_v57  ;;  %v10538_v54 = vpop.f32.mrf.mxu1 }
 0x562   : > { %v10624_v58 = vpop.f32.mrf.mxu0  ;;  %v14452_v44 = vadd.f32 %v6241_v28, %v5958_v33 }
 0x563   : > { %v5873_v21 = vpop.f32.mrf.mxu1 }
 0x564   : > { %v6244_v32 = vpop.f32.mrf.mxu0  ;;  %v5959_v26 = vadd.f32 %v5873_v21, %v14160_v7 }
 0x565   : > { %v10539_v1 = vpop.f32.mrf.mxu1 }
 0x566   : > { %v10625_v40 = vpop.f32.mrf.mxu0  ;;  %v14457_v4 = vadd.f32 %v6244_v32, %v5959_v26 }
 0x567   : > { %v5878_v34 = vpop.f32.mrf.mxu1  ;;  %10725 = vmatmul.mubr.msk.bf16.gmra.mxu1 %vm4850_vm10, %v6402_v19  ;;  %v14470_v40 = vpack.c.bf16 %v6752_v15, %v6751_v48  ;;  %v6754_v15 = vld [vmem:[#allocation2 + $0x159] sm:$0xff]  ;;  %v6753_v48 = vld [vmem:[#allocation2 + $0x151] sm:$0xff] }
 0x568   : > { %15474 = vst [vmem:[#allocation8_spill] sm:$0xff] %v14457_v4  ;;  %v6249_v54 = vpop.f32.mrf.mxu0  ;;  %10811 = vmatmul.mubr.msk.bf16.gmra.mxu0 %vm4850_vm10, %v14455_v24  ;;  %v5960_v28 = vadd.f32 %v5878_v34, %v14164_v29  ;;  %10728 = vmatprep.mubr.msk.bf16.mxu1 %vm11313_vm1, %v15329_v57  ;;  %v6403_v34 = vpack.c.bf16 %v6381_v14, %v6380_v16  ;;  %v6383_v14 = vld [vmem:[#allocation2 + $0x158] sm:$0xff]  ;;  %v6382_v16 = vld [vmem:[#allocation2 + $0x150] sm:$0xff] }
 0x569   : > { %10814 = vmatprep.mubr.msk.bf16.mxu0 %vm11313_vm1, %v15329_v57  ;;  %v10542_v7 = vpop.f32.mrf.mxu1 }
 0x56a   : > { %v10628_v33 = vpop.f32.mrf.mxu0  ;;  %v14467_v58 = vadd.f32 %v6249_v54, %v5960_v28 }
 0x56b   : > { %v5881_v21 = vpop.f32.mrf.mxu1 }
 0x56c   : > { %v6252_v32 = vpop.f32.mrf.mxu0  ;;  %v5961_v26 = vadd.f32 %v5881_v21, %v14170_v62 }
 0x56d   : > { %v10543_v1 = vpop.f32.mrf.mxu1 }
 0x56e   : > { %v10629_v29 = vpop.f32.mrf.mxu0  ;;  %v14472_v19 = vadd.f32 %v6252_v32, %v5961_v26 }
 0x56f   : > { %v5886_v4 = vpop.f32.mrf.mxu1  ;;  %10729 = vmatmul.mubr.msk.bf16.gmra.mxu1 %vm4850_vm10, %v6403_v34  ;;  %v14485_v29 = vpack.c.bf16 %v6754_v15, %v6753_v48  ;;  %v6755_v15 = vld [vmem:[#allocation2 + $0x161] sm:$0xf] }
 0x570   : > { %15475 = vst [vmem:[#allocation11_spill] sm:$0xff] %v14472_v19  ;;  %v6257_v7 = vpop.f32.mrf.mxu0  ;;  %10815 = vmatmul.mubr.msk.bf16.gmra.mxu0 %vm4850_vm10, %v14470_v40  ;;  %v5962_v54 = vadd.f32 %v5886_v4, %v14174_v42  ;;  %10732 = vmatprep.mubr.msk.bf16.mxu1 %vm11313_vm1, %v15329_v57  ;;  %v6404_v4 = vpack.c.bf16 %v6383_v14, %v6382_v16  ;;  %v6384_v14 = vld [vmem:[#allocation2 + $0x160] sm:$0xf] }
 0x571   : > { %10818 = vmatprep.mubr.msk.bf16.mxu0 %vm11313_vm1, %v15329_v57  ;;  %v10546_v62 = vpop.f32.mrf.mxu1 }
 0x572   : > { %v10632_v28 = vpop.f32.mrf.mxu0  ;;  %v14482_v33 = vadd.f32 %v6257_v7, %v5962_v54 }
 0x573   : > { %v5889_v21 = vpop.f32.mrf.mxu1 }
 0x574   : > { %v6260_v32 = vpop.f32.mrf.mxu0  ;;  %v5963_v26 = vadd.f32 %v5889_v21, %v14180_v35 }
 0x575   : > { %v10547_v1 = vpop.f32.mrf.mxu1 }
 0x576   : > { %v10633_v42 = vpop.f32.mrf.mxu0  ;;  %v14487_v34 = vadd.f32 %v6260_v32, %v5963_v26  ;;  %v6405_v1 = vpack.c.bf16 %v6384_v14, %v6384_v14 }
 0x577   : > { %v5894_v19 = vpop.f32.mrf.mxu1  ;;  %10733 = vmatmul.mubr.msk.bf16.gmra.mxu1 %vm4850_vm10, %v6404_v4 }
 0x578   : > { %v6265_v62 = vpop.f32.mrf.mxu0  ;;  %10819 = vmatmul.mubr.msk.bf16.gmra.mxu0 %vm4850_vm10, %v14485_v29  ;;  %v5964_v7 = vadd.f32 %v5894_v19, %v14184_v11  ;;  %10736 = vmatprep.mubr.msk.bf16.mxu1 %vm11313_vm1, %v15329_v57  ;;  %v6776_v11 = vpack.c.bf16 %v6755_v15, %v6755_v15 }
 0x579   : > { %10822 = vmatprep.mubr.msk.bf16.mxu0 %vm11313_vm1, %v15329_v57  ;;  %v10550_v35 = vpop.f32.mrf.mxu1 }
 0x57a   : > { %v10636_v54 = vpop.f32.mrf.mxu0  ;;  %v14497_v28 = vadd.f32 %v6265_v62, %v5964_v7 }
 0x57b   : > { %v5897_v21 = vpop.f32.mrf.mxu1  ;;  %v7458_v54 = vld [vmem:[#allocation2 + $0x3a] sm:$0xff] }
 0x57c   : > { %v6268_v32 = vpop.f32.mrf.mxu0  ;;  %v5965_v26 = vadd.f32 %v5897_v21, %v14190_v30 }
 0x57d   : > { %v10551_v16 = vpop.f32.mrf.mxu1 }
 0x57e   : > { %v10637_v48 = vpop.f32.mrf.mxu0  ;;  %v14500_v19 = vadd.f32 %v6268_v32, %v5965_v26  ;;  %v7457_v32 = vld [vmem:[#allocation2 + $0x32] sm:$0xff] }
 0x57f   : > { %v5902_v42 = vpop.f32.mrf.mxu1  ;;  %10737 = vmatmul.mubr.msk.bf16.gmra.mxu1 %vm4850_vm10, %v6405_v1  ;;  %v7498_v48 = vpack.c.bf16 %v7458_v54, %v7457_v32 }
 0x580   : > { %v6273_v4 = vpop.f32.mrf.mxu0  ;;  %10823 = vmatmul.mubr.msk.bf16.gmra.mxu0 %vm4850_vm10, %v6776_v11  ;;  %v5966_v62 = vadd.f32 %v5902_v42, %v14194_v13  ;;  %10828 = vmatprep.mubr.msk.bf16.mxu1 %vm11313_vm1, %v15329_v57 }
 0x581   : > { %10914 = vmatprep.mubr.msk.bf16.mxu0 %vm11313_vm1, %v15329_v57  ;;  %v10554_v30 = vpop.f32.mrf.mxu1 }
 0x582   : > { %v10640_v7 = vpop.f32.mrf.mxu0  ;;  %v14509_v35 = vadd.f32 %v6273_v4, %v5966_v62  ;;  %v7460_v30 = vld [vmem:[#allocation2 + $0x4a] sm:$0xff] }
 0x583   : > { %v5905_v14 = vpop.f32.mrf.mxu1 }
 0x584   : > { %v6276_v15 = vpop.f32.mrf.mxu0  ;;  %v5967_v21 = vadd.f32 %v5905_v14, %v14200_v61 }
 0x585   : > { %v10555_v26 = vpop.f32.mrf.mxu1 }
 0x586   : > { %v10641_v16 = vpop.f32.mrf.mxu0  ;;  %v14512_v13 = vadd.f32 %v6276_v15, %v5967_v21 }
 0x587   : > { %v5910_v1 = vpop.f32.mrf.mxu1  ;;  %10829 = vmatmul.mubr.msk.bf16.vlgmr.msra.gmra.mxu1 %vm4850_vm10, %v14212_v3  ;;  %v7459_v3 = vld [vmem:[#allocation2 + $0x42] sm:$0xff] }
 0x588   : > { %v6281_v11 = vpop.f32.mrf.mxu0  ;;  %10915 = vmatmul.mubr.msk.bf16.vlgmr.msra.gmra.mxu0 %vm4850_vm10, %v7498_v48  ;;  %v5968_v42 = vadd.f32 %v5910_v1, %v14204_v6  ;;  %10832 = vmatprep.mubr.msk.bf16.mxu1 %vm11313_vm1, %v15329_v57  ;;  %v7499_v32 = vpack.c.bf16 %v7460_v30, %v7459_v3 }
 0x589   : > { %10918 = vmatprep.mubr.msk.bf16.mxu0 %vm11313_vm1, %v15329_v57  ;;  %v10558_v61 = vpop.f32.mrf.mxu1 }
 0x58a   : > { %v10644_v4 = vpop.f32.mrf.mxu0  ;;  %v14522_v62 = vadd.f32 %v6281_v11, %v5968_v42  ;;  %v7462_v42 = vld [vmem:[#allocation2 + $0x5a] sm:$0xff] }
 0x58b   : > { %v5913_v7 = vpop.f32.mrf.mxu1 }
 0x58c   : > { %v6284_v54 = vpop.f32.mrf.mxu0  ;;  %v5969_v14 = vadd.f32 %v5913_v7, %v14210_v63 }
 0x58d   : > { %v10559_v15 = vpop.f32.mrf.mxu1 }
 0x58e   : > { %v10645_v21 = vpop.f32.mrf.mxu0  ;;  %v14525_v6 = vadd.f32 %v6284_v54, %v5969_v14 }
 0x58f   : > { %v5918_v26 = vpop.f32.mrf.mxu1  ;;  %10833 = vmatmul.mubr.msk.bf16.gmra.mxu1 %vm4850_vm10, %v14225_v12  ;;  %v7461_v12 = vld [vmem:[#allocation2 + $0x52] sm:$0xff] }
 0x590   : > { %v6289_v16 = vpop.f32.mrf.mxu0  ;;  %10919 = vmatmul.mubr.msk.bf16.gmra.mxu0 %vm4850_vm10, %v7499_v32  ;;  %v5970_v48 = vadd.f32 %v5918_v26, %v14217_v22  ;;  %10836 = vmatprep.mubr.msk.bf16.mxu1 %vm11313_vm1, %v15329_v57  ;;  %v7500_v14 = vpack.c.bf16 %v7462_v42, %v7461_v12 }
 0x591   : > { %10922 = vmatprep.mubr.msk.bf16.mxu0 %vm11313_vm1, %v15329_v57  ;;  %v10562_v63 = vpop.f32.mrf.mxu1 }
 0x592   : > { %v10648_v1 = vpop.f32.mrf.mxu0  ;;  %v14535_v11 = vadd.f32 %v6289_v16, %v5970_v48  ;;  %v7464_v16 = vld [vmem:[#allocation2 + $0x6a] sm:$0xff] }
 0x593   : > { %v5921_v61 = vpop.f32.mrf.mxu1  ;;  %v7463_v1 = vld [vmem:[#allocation2 + $0x62] sm:$0xff] }
 0x594   : > { %v6292_v4 = vpop.f32.mrf.mxu0  ;;  %v5971_v30 = vadd.f32 %v5921_v61, %v14223_v31  ;;  %v7501_v61 = vpack.c.bf16 %v7464_v16, %v7463_v1 }
 0x595   : > { %v10563_v7 = vpop.f32.mrf.mxu1 }
 0x596   : > { %v10649_v54 = vpop.f32.mrf.mxu0  ;;  %v14538_v22 = vadd.f32 %v6292_v4, %v5971_v30 }
 0x597   : > { %v5926_v3 = vpop.f32.mrf.mxu1  ;;  %10837 = vmatmul.mubr.msk.bf16.gmra.mxu1 %vm4850_vm10, %v14236_v53 }
 0x598   : > { %v6297_v15 = vpop.f32.mrf.mxu0  ;;  %10923 = vmatmul.mubr.msk.bf16.gmra.mxu0 %vm4850_vm10, %v7500_v14  ;;  %v5972_v21 = vadd.f32 %v5926_v3, %v14230_v23  ;;  %10840 = vmatprep.mubr.msk.bf16.mxu1 %vm11313_vm1, %v15329_v57  ;;  %v9063_v23 = vld [vmem:[%s15222_s3 + $0x20] sm:$0xf] }
 0x599   : > { %10926 = vmatprep.mubr.msk.bf16.mxu0 %vm11313_vm1, %v15329_v57  ;;  %v10566_v31 = vpop.f32.mrf.mxu1  ;;  %v7956_v12 = vsel %vm5132_vm9, %v9063_v23, 0 }
 0x59a   : > { %v10652_v32 = vpop.f32.mrf.mxu0  ;;  %v14548_v26 = vadd.f32 %v6297_v15, %v5972_v21  ;;  %10999 = vmatpush3.bf16.msra.mxu1 %v7956_v12  ;;  %v7466_v15 = vld [vmem:[#allocation2 + $0x7a] sm:$0xff] }
 0x59b   : > { %v5929_v48 = vpop.f32.mrf.mxu1  ;;  %11084 = vmatprep.subr.mxu1 %v15329_v57  ;;  %v7465_v32 = vld [vmem:[#allocation2 + $0x72] sm:$0xff] }
 0x59c   : > { %v6300_v63 = vpop.f32.mrf.mxu0  ;;  %v7502_v48 = vpack.c.bf16 %v7466_v15, %v7465_v32 }
 0x59d   : > { %v10567_v42 = vpop.f32.mrf.mxu1 }
 0x59e   : > { %v10653_v53 = vpop.f32.mrf.mxu0 }
 0x59f   : > { %v6508_v4 = vpop.f32.mrf.mxu1  ;;  %10841 = vmatmul.mubr.msk.bf16.gmra.mxu1 %vm4850_vm10, %v14256_v25 }
 0x5a0   : > { %v6879_v30 = vpop.f32.mrf.mxu0  ;;  %10927 = vmatmul.mubr.msk.bf16.gmra.mxu0 %vm4850_vm10, %v7501_v61  ;;  %v6674_v7 = vadd.f32 %v6508_v4, %v14253_v0  ;;  %10844 = vmatprep.mubr.msk.bf16.mxu1 %vm11313_vm1, %v15329_v57  ;;  %v7468_v4 = vld [vmem:[#allocation2 + $0x8a] sm:$0xff] }
 0x5a1   : > { %10930 = vmatprep.mubr.msk.bf16.mxu0 %vm11313_vm1, %v15329_v57  ;;  %v10658_v54 = vpop.f32.mrf.mxu1 }
 0x5a2   : > { %v10744_v14 = vpop.f32.mrf.mxu0  ;;  %v14562_v3 = vadd.f32 %v6879_v30, %v6674_v7 }
 0x5a3   : > { %v6511_v25 = vpop.f32.mrf.mxu1 }
 0x5a4   : > { %v6882_v21 = vpop.f32.mrf.mxu0  ;;  %v6675_v31 = vadd.f32 %v6511_v25, %v14258_v36 }
 0x5a5   : > { %v10659_v0 = vpop.f32.mrf.mxu1 }
 0x5a6   : > { %v10745_v16 = vpop.f32.mrf.mxu0  ;;  %v14566_v63 = vadd.f32 %v6882_v21, %v6675_v31 }
 0x5a7   : > { %v6516_v1 = vpop.f32.mrf.mxu1  ;;  %10845 = vmatmul.mubr.msk.bf16.gmra.mxu1 %vm4850_vm10, %v14274_v41  ;;  %v7467_v41 = vld [vmem:[#allocation2 + $0x82] sm:$0xff]  ;;  %v7470_v16 = vld [vmem:[#allocation2 + $0x9a] sm:$0xff] }
 0x5a8   : > { %v6887_v42 = vpop.f32.mrf.mxu0  ;;  %10931 = vmatmul.mubr.msk.bf16.gmra.mxu0 %vm4850_vm10, %v7502_v48  ;;  %v6676_v53 = vadd.f32 %v6516_v1, %v14268_v9  ;;  %10848 = vmatprep.mubr.msk.bf16.mxu1 %vm11313_vm1, %v15329_v57  ;;  %v7503_v15 = vpack.c.bf16 %v7468_v4, %v7467_v41 }
 0x5a9   : > { %10934 = vmatprep.mubr.msk.bf16.mxu0 %vm11313_vm1, %v15329_v57  ;;  %v10662_v36 = vpop.f32.mrf.mxu1 }
 0x5aa   : > { %v10748_v61 = vpop.f32.mrf.mxu0  ;;  %v14576_v23 = vadd.f32 %v6887_v42, %v6676_v53  ;;  %v15476_v42 = vld [vmem:[#allocation24_spill] sm:$0xff] }
 0x5ab   : > { %v6519_v30 = vpop.f32.mrf.mxu1 }
 0x5ac   : > { %v6890_v12 = vpop.f32.mrf.mxu0  ;;  %v6677_v7 = vadd.f32 %v6519_v30, %v14277_v37 }
 0x5ad   : > { %v10663_v54 = vpop.f32.mrf.mxu1 }
 0x5ae   : > { %v10749_v14 = vpop.f32.mrf.mxu0  ;;  %v14579_v9 = vadd.f32 %v6890_v12, %v6677_v7 }
 0x5af   : > { %v6524_v25 = vpop.f32.mrf.mxu1  ;;  %10849 = vmatmul.mubr.msk.bf16.gmra.mxu1 %vm4850_vm10, %v14290_v49  ;;  %v7469_v49 = vld [vmem:[#allocation2 + $0x92] sm:$0xff] }
 0x5b0   : > { %v6895_v21 = vpop.f32.mrf.mxu0  ;;  %10935 = vmatmul.mubr.msk.bf16.gmra.mxu0 %vm4850_vm10, %v7503_v15  ;;  %v6678_v31 = vadd.f32 %v6524_v25, %v14287_v39  ;;  %10852 = vmatprep.mubr.msk.bf16.mxu1 %vm11313_vm1, %v15329_v57  ;;  %v7504_v4 = vpack.c.bf16 %v7470_v16, %v7469_v49  ;;  %v7472_v15 = vld [vmem:[#allocation2 + $0xaa] sm:$0xff] }
 0x5b1   : > { %10938 = vmatprep.mubr.msk.bf16.mxu0 %vm11313_vm1, %v15329_v57  ;;  %v10666_v37 = vpop.f32.mrf.mxu1 }
 0x5b2   : > { %v10752_v32 = vpop.f32.mrf.mxu0  ;;  %v14589_v0 = vadd.f32 %v6895_v21, %v6678_v31  ;;  %v15477_v31 = vld [vmem:[#allocation22_spill] sm:$0xff] }
 0x5b3   : > { %v6527_v48 = vpop.f32.mrf.mxu1 }
 0x5b4   : > { %v6898_v1 = vpop.f32.mrf.mxu0  ;;  %v6679_v53 = vadd.f32 %v6527_v48, %v15476_v42 }
 0x5b5   : > { %v10667_v36 = vpop.f32.mrf.mxu1 }
 0x5b6   : > { %v10753_v61 = vpop.f32.mrf.mxu0  ;;  %v14592_v39 = vadd.f32 %v6898_v1, %v6679_v53 }
 0x5b7   : > { %v6532_v30 = vpop.f32.mrf.mxu1  ;;  %10853 = vmatmul.mubr.msk.bf16.gmra.mxu1 %vm4850_vm10, %v14305_v18  ;;  %v7471_v18 = vld [vmem:[#allocation2 + $0xa2] sm:$0xff] }
 0x5b8   : > { %v6903_v12 = vpop.f32.mrf.mxu0  ;;  %10939 = vmatmul.mubr.msk.bf16.gmra.mxu0 %vm4850_vm10, %v7504_v4  ;;  %v6680_v7 = vadd.f32 %v6532_v30, %v14302_v17  ;;  %10856 = vmatprep.mubr.msk.bf16.mxu1 %vm11313_vm1, %v15329_v57  ;;  %v7505_v48 = vpack.c.bf16 %v7472_v15, %v7471_v18  ;;  %v7474_v4 = vld [vmem:[#allocation2 + $0xba] sm:$0xff] }
 0x5b9   : > { %10942 = vmatprep.mubr.msk.bf16.mxu0 %vm11313_vm1, %v15329_v57  ;;  %v10670_v41 = vpop.f32.mrf.mxu1 }
 0x5ba   : > { %v10756_v54 = vpop.f32.mrf.mxu0  ;;  %v14602_v14 = vadd.f32 %v6903_v12, %v6680_v7  ;;  %v15478_v7 = vld [vmem:[#allocation26_spill] sm:$0xff] }
 0x5bb   : > { %v6535_v25 = vpop.f32.mrf.mxu1 }
 0x5bc   : > { %v6906_v21 = vpop.f32.mrf.mxu0  ;;  %v6681_v37 = vadd.f32 %v6535_v25, %v15477_v31 }
 0x5bd   : > { %v10671_v32 = vpop.f32.mrf.mxu1 }
 0x5be   : > { %v10757_v16 = vpop.f32.mrf.mxu0  ;;  %v14605_v17 = vadd.f32 %v6906_v21, %v6681_v37 }
 0x5bf   : > { %v6540_v1 = vpop.f32.mrf.mxu1  ;;  %10857 = vmatmul.mubr.msk.bf16.gmra.mxu1 %vm4850_vm10, %v14320_v60  ;;  %v7473_v60 = vld [vmem:[#allocation2 + $0xb2] sm:$0xff] }
 0x5c0   : > { %v6911_v42 = vpop.f32.mrf.mxu0  ;;  %10943 = vmatmul.mubr.msk.bf16.gmra.mxu0 %vm4850_vm10, %v7505_v48  ;;  %v6682_v53 = vadd.f32 %v6540_v1, %v14317_v59  ;;  %10860 = vmatprep.mubr.msk.bf16.mxu1 %vm11313_vm1, %v15329_v57  ;;  %v7506_v25 = vpack.c.bf16 %v7474_v4, %v7473_v60  ;;  %v7476_v48 = vld [vmem:[#allocation2 + $0xca] sm:$0xff] }
 0x5c1   : > { %10946 = vmatprep.mubr.msk.bf16.mxu0 %vm11313_vm1, %v15329_v57  ;;  %v10674_v49 = vpop.f32.mrf.mxu1 }
 0x5c2   : > { %v10760_v36 = vpop.f32.mrf.mxu0  ;;  %v14615_v61 = vadd.f32 %v6911_v42, %v6682_v53  ;;  %v15479_v53 = vld [vmem:[#allocation27_spill] sm:$0xff] }
 0x5c3   : > { %v6543_v30 = vpop.f32.mrf.mxu1 }
 0x5c4   : > { %v6914_v12 = vpop.f32.mrf.mxu0  ;;  %v6683_v41 = vadd.f32 %v6543_v30, %v15478_v7 }
 0x5c5   : > { %v10675_v54 = vpop.f32.mrf.mxu1 }
 0x5c6   : > { %v10761_v15 = vpop.f32.mrf.mxu0  ;;  %v14618_v59 = vadd.f32 %v6914_v12, %v6683_v41 }
 0x5c7   : > { %v6548_v21 = vpop.f32.mrf.mxu1  ;;  %10861 = vmatmul.mubr.msk.bf16.gmra.mxu1 %vm4850_vm10, %v14335_v47  ;;  %v7475_v47 = vld [vmem:[#allocation2 + $0xc2] sm:$0xff] }
 0x5c8   : > { %v6919_v31 = vpop.f32.mrf.mxu0  ;;  %10947 = vmatmul.mubr.msk.bf16.gmra.mxu0 %vm4850_vm10, %v7506_v25  ;;  %v6684_v37 = vadd.f32 %v6548_v21, %v14332_v50  ;;  %10864 = vmatprep.mubr.msk.bf16.mxu1 %vm11313_vm1, %v15329_v57  ;;  %v7507_v30 = vpack.c.bf16 %v7476_v48, %v7475_v47  ;;  %v7478_v25 = vld [vmem:[#allocation2 + $0xda] sm:$0xff] }
 0x5c9   : > { %10950 = vmatprep.mubr.msk.bf16.mxu0 %vm11313_vm1, %v15329_v57  ;;  %v10678_v18 = vpop.f32.mrf.mxu1 }
 0x5ca   : > { %v10764_v32 = vpop.f32.mrf.mxu0  ;;  %v14628_v16 = vadd.f32 %v6919_v31, %v6684_v37  ;;  %v15480_v37 = vld [vmem:[#allocation30_spill] sm:$0xff] }
 0x5cb   : > { %v6551_v1 = vpop.f32.mrf.mxu1 }
 0x5cc   : > { %v6922_v42 = vpop.f32.mrf.mxu0  ;;  %v6685_v49 = vadd.f32 %v6551_v1, %v15479_v53 }
 0x5cd   : > { %v10679_v36 = vpop.f32.mrf.mxu1 }
 0x5ce   : > { %v10765_v4 = vpop.f32.mrf.mxu0  ;;  %v14631_v50 = vadd.f32 %v6922_v42, %v6685_v49 }
 0x5cf   : > { %v6556_v12 = vpop.f32.mrf.mxu1  ;;  %10865 = vmatmul.mubr.msk.bf16.gmra.mxu1 %vm4850_vm10, %v14350_v55  ;;  %v7477_v55 = vld [vmem:[#allocation2 + $0xd2] sm:$0xff] }
 0x5d0   : > { %v6927_v7 = vpop.f32.mrf.mxu0  ;;  %10951 = vmatmul.mubr.msk.bf16.gmra.mxu0 %vm4850_vm10, %v7507_v30  ;;  %v6686_v41 = vadd.f32 %v6556_v12, %v14347_v20  ;;  %10868 = vmatprep.mubr.msk.bf16.mxu1 %vm11313_vm1, %v15329_v57  ;;  %v7508_v1 = vpack.c.bf16 %v7478_v25, %v7477_v55  ;;  %v7480_v30 = vld [vmem:[#allocation2 + $0xea] sm:$0xff] }
 0x5d1   : > { %10954 = vmatprep.mubr.msk.bf16.mxu0 %vm11313_vm1, %v15329_v57  ;;  %v10682_v60 = vpop.f32.mrf.mxu1 }
 0x5d2   : > { %v10768_v54 = vpop.f32.mrf.mxu0  ;;  %v14641_v15 = vadd.f32 %v6927_v7, %v6686_v41  ;;  %v15481_v41 = vld [vmem:[#allocation28_spill] sm:$0xff] }
 0x5d3   : > { %v6559_v21 = vpop.f32.mrf.mxu1 }
 0x5d4   : > { %v6930_v31 = vpop.f32.mrf.mxu0  ;;  %v6687_v18 = vadd.f32 %v6559_v21, %v15480_v37 }
 0x5d5   : > { %v10683_v32 = vpop.f32.mrf.mxu1 }
 0x5d6   : > { %v10769_v48 = vpop.f32.mrf.mxu0  ;;  %v14644_v20 = vadd.f32 %v6930_v31, %v6687_v18 }
 0x5d7   : > { %v6564_v42 = vpop.f32.mrf.mxu1  ;;  %10869 = vmatmul.mubr.msk.bf16.gmra.mxu1 %vm4850_vm10, %v14365_v56  ;;  %v7479_v56 = vld [vmem:[#allocation2 + $0xe2] sm:$0xff] }
 0x5d8   : > { %v6935_v53 = vpop.f32.mrf.mxu0  ;;  %10955 = vmatmul.mubr.msk.bf16.gmra.mxu0 %vm4850_vm10, %v7508_v1  ;;  %v6688_v49 = vadd.f32 %v6564_v42, %v14362_v43  ;;  %10872 = vmatprep.mubr.msk.bf16.mxu1 %vm11313_vm1, %v15329_v57  ;;  %v7509_v21 = vpack.c.bf16 %v7480_v30, %v7479_v56  ;;  %v7482_v1 = vld [vmem:[#allocation2 + $0xfa] sm:$0xff] }
 0x5d9   : > { %10958 = vmatprep.mubr.msk.bf16.mxu0 %vm11313_vm1, %v15329_v57  ;;  %v10686_v47 = vpop.f32.mrf.mxu1 }
 0x5da   : > { %v10772_v36 = vpop.f32.mrf.mxu0  ;;  %v14654_v4 = vadd.f32 %v6935_v53, %v6688_v49  ;;  %v15482_v49 = vld [vmem:[#allocation25_spill] sm:$0xff] }
 0x5db   : > { %v6567_v12 = vpop.f32.mrf.mxu1 }
 0x5dc   : > { %v6938_v7 = vpop.f32.mrf.mxu0  ;;  %v6689_v60 = vadd.f32 %v6567_v12, %v15481_v41 }
 0x5dd   : > { %v10687_v54 = vpop.f32.mrf.mxu1 }
 0x5de   : > { %v10773_v25 = vpop.f32.mrf.mxu0  ;;  %v14657_v43 = vadd.f32 %v6938_v7, %v6689_v60 }
 0x5df   : > { %v6572_v31 = vpop.f32.mrf.mxu1  ;;  %10873 = vmatmul.mubr.msk.bf16.gmra.mxu1 %vm4850_vm10, %v14380_v45  ;;  %v7481_v45 = vld [vmem:[#allocation2 + $0xf2] sm:$0xff] }
 0x5e0   : > { %v6943_v37 = vpop.f32.mrf.mxu0  ;;  %10959 = vmatmul.mubr.msk.bf16.gmra.mxu0 %vm4850_vm10, %v7509_v21  ;;  %v6690_v18 = vadd.f32 %v6572_v31, %v14377_v27  ;;  %10876 = vmatprep.mubr.msk.bf16.mxu1 %vm11313_vm1, %v15329_v57  ;;  %v7510_v12 = vpack.c.bf16 %v7482_v1, %v7481_v45  ;;  %v7484_v21 = vld [vmem:[#allocation2 + $0x10a] sm:$0xff] }
 0x5e1   : > { %10962 = vmatprep.mubr.msk.bf16.mxu0 %vm11313_vm1, %v15329_v57  ;;  %v10690_v55 = vpop.f32.mrf.mxu1 }
 0x5e2   : > { %v10776_v32 = vpop.f32.mrf.mxu0  ;;  %v14667_v48 = vadd.f32 %v6943_v37, %v6690_v18  ;;  %v15483_v18 = vld [vmem:[#allocation31_spill] sm:$0xff] }
 0x5e3   : > { %v6575_v42 = vpop.f32.mrf.mxu1 }
 0x5e4   : > { %v6946_v53 = vpop.f32.mrf.mxu0  ;;  %v6691_v47 = vadd.f32 %v6575_v42, %v15482_v49 }
 0x5e5   : > { %v10691_v36 = vpop.f32.mrf.mxu1 }
 0x5e6   : > { %v10777_v30 = vpop.f32.mrf.mxu0  ;;  %v14670_v27 = vadd.f32 %v6946_v53, %v6691_v47 }
 0x5e7   : > { %v6580_v7 = vpop.f32.mrf.mxu1  ;;  %10877 = vmatmul.mubr.msk.bf16.gmra.mxu1 %vm4850_vm10, %v14395_v51  ;;  %v7483_v51 = vld [vmem:[#allocation2 + $0x102] sm:$0xff] }
 0x5e8   : > { %v6951_v41 = vpop.f32.mrf.mxu0  ;;  %10963 = vmatmul.mubr.msk.bf16.gmra.mxu0 %vm4850_vm10, %v7510_v12  ;;  %v6692_v60 = vadd.f32 %v6580_v7, %v14392_v10  ;;  %10880 = vmatprep.mubr.msk.bf16.mxu1 %vm11313_vm1, %v15329_v57  ;;  %v7511_v42 = vpack.c.bf16 %v7484_v21, %v7483_v51  ;;  %v7486_v12 = vld [vmem:[#allocation2 + $0x11a] sm:$0xff] }
 0x5e9   : > { %10966 = vmatprep.mubr.msk.bf16.mxu0 %vm11313_vm1, %v15329_v57  ;;  %v10694_v56 = vpop.f32.mrf.mxu1 }
 0x5ea   : > { %v10780_v54 = vpop.f32.mrf.mxu0  ;;  %v14680_v25 = vadd.f32 %v6951_v41, %v6692_v60  ;;  %v15484_v60 = vld [vmem:[#allocation29_spill] sm:$0xff] }
 0x5eb   : > { %v6583_v31 = vpop.f32.mrf.mxu1 }
 0x5ec   : > { %v6954_v37 = vpop.f32.mrf.mxu0  ;;  %v6693_v55 = vadd.f32 %v6583_v31, %v15483_v18 }
 0x5ed   : > { %v10695_v32 = vpop.f32.mrf.mxu1 }
 0x5ee   : > { %v10781_v1 = vpop.f32.mrf.mxu0  ;;  %v14683_v10 = vadd.f32 %v6954_v37, %v6693_v55 }
 0x5ef   : > { %v6588_v53 = vpop.f32.mrf.mxu1  ;;  %10881 = vmatmul.mubr.msk.bf16.gmra.mxu1 %vm4850_vm10, %v14410_v52  ;;  %v7485_v52 = vld [vmem:[#allocation2 + $0x112] sm:$0xff] }
 0x5f0   : > { %v6959_v49 = vpop.f32.mrf.mxu0  ;;  %10967 = vmatmul.mubr.msk.bf16.gmra.mxu0 %vm4850_vm10, %v7511_v42  ;;  %v6694_v47 = vadd.f32 %v6588_v53, %v14407_v2  ;;  %10884 = vmatprep.mubr.msk.bf16.mxu1 %vm11313_vm1, %v15329_v57  ;;  %v7512_v31 = vpack.c.bf16 %v7486_v12, %v7485_v52  ;;  %v7488_v42 = vld [vmem:[#allocation2 + $0x12a] sm:$0xff] }
 0x5f1   : > { %10970 = vmatprep.mubr.msk.bf16.mxu0 %vm11313_vm1, %v15329_v57  ;;  %v10698_v45 = vpop.f32.mrf.mxu1 }
 0x5f2   : > { %v10784_v36 = vpop.f32.mrf.mxu0  ;;  %v14693_v30 = vadd.f32 %v6959_v49, %v6694_v47  ;;  %v15485_v47 = vld [vmem:[#allocation32_spill] sm:$0xff] }
 0x5f3   : > { %v6591_v7 = vpop.f32.mrf.mxu1 }
 0x5f4   : > { %v6962_v41 = vpop.f32.mrf.mxu0  ;;  %v6695_v56 = vadd.f32 %v6591_v7, %v15484_v60 }
 0x5f5   : > { %v10699_v54 = vpop.f32.mrf.mxu1 }
 0x5f6   : > { %v10785_v21 = vpop.f32.mrf.mxu0  ;;  %v14696_v2 = vadd.f32 %v6962_v41, %v6695_v56 }
 0x5f7   : > { %v6596_v37 = vpop.f32.mrf.mxu1  ;;  %10885 = vmatmul.mubr.msk.bf16.gmra.mxu1 %vm4850_vm10, %v14425_v46  ;;  %v7487_v46 = vld [vmem:[#allocation2 + $0x122] sm:$0xff] }
 0x5f8   : > { %v6967_v18 = vpop.f32.mrf.mxu0  ;;  %10971 = vmatmul.mubr.msk.bf16.gmra.mxu0 %vm4850_vm10, %v7512_v31  ;;  %v6696_v55 = vadd.f32 %v6596_v37, %v14422_v38  ;;  %10888 = vmatprep.mubr.msk.bf16.mxu1 %vm11313_vm1, %v15329_v57  ;;  %v7513_v7 = vpack.c.bf16 %v7488_v42, %v7487_v46  ;;  %v7490_v31 = vld [vmem:[#allocation2 + $0x13a] sm:$0xff] }
 0x5f9   : > { %10974 = vmatprep.mubr.msk.bf16.mxu0 %vm11313_vm1, %v15329_v57  ;;  %v10702_v51 = vpop.f32.mrf.mxu1 }
 0x5fa   : > { %v10788_v32 = vpop.f32.mrf.mxu0  ;;  %v14706_v1 = vadd.f32 %v6967_v18, %v6696_v55  ;;  %v15486_v55 = vld [vmem:[#allocation7_spill] sm:$0xff] }
 0x5fb   : > { %v6599_v53 = vpop.f32.mrf.mxu1 }
 0x5fc   : > { %v6970_v49 = vpop.f32.mrf.mxu0  ;;  %v6697_v45 = vadd.f32 %v6599_v53, %v15485_v47 }
 0x5fd   : > { %v10703_v36 = vpop.f32.mrf.mxu1 }
 0x5fe   : > { %v10789_v12 = vpop.f32.mrf.mxu0  ;;  %v14709_v38 = vadd.f32 %v6970_v49, %v6697_v45 }
 0x5ff   : > { %v6604_v41 = vpop.f32.mrf.mxu1  ;;  %10889 = vmatmul.mubr.msk.bf16.gmra.mxu1 %vm4850_vm10, %v14440_v8  ;;  %v7489_v8 = vld [vmem:[#allocation2 + $0x132] sm:$0xff] }
 0x600   : > { %v6975_v60 = vpop.f32.mrf.mxu0  ;;  %10975 = vmatmul.mubr.msk.bf16.gmra.mxu0 %vm4850_vm10, %v7513_v7  ;;  %v6698_v56 = vadd.f32 %v6604_v41, %v14437_v5  ;;  %10892 = vmatprep.mubr.msk.bf16.mxu1 %vm11313_vm1, %v15329_v57  ;;  %v7514_v53 = vpack.c.bf16 %v7490_v31, %v7489_v8  ;;  %v7492_v7 = vld [vmem:[#allocation2 + $0x14a] sm:$0xff] }
 0x601   : > { %10978 = vmatprep.mubr.msk.bf16.mxu0 %vm11313_vm1, %v15329_v57  ;;  %v10706_v52 = vpop.f32.mrf.mxu1 }
 0x602   : > { %v10792_v54 = vpop.f32.mrf.mxu0  ;;  %v14719_v21 = vadd.f32 %v6975_v60, %v6698_v56  ;;  %v15487_v56 = vld [vmem:[#allocation8_spill] sm:$0xff] }
 0x603   : > { %v6607_v37 = vpop.f32.mrf.mxu1 }
 0x604   : > { %v6978_v18 = vpop.f32.mrf.mxu0  ;;  %v6699_v51 = vadd.f32 %v6607_v37, %v15486_v55 }
 0x605   : > { %v10707_v32 = vpop.f32.mrf.mxu1 }
 0x606   : > { %v10793_v42 = vpop.f32.mrf.mxu0  ;;  %v14722_v5 = vadd.f32 %v6978_v18, %v6699_v51 }
 0x607   : > { %v6612_v49 = vpop.f32.mrf.mxu1  ;;  %10893 = vmatmul.mubr.msk.bf16.gmra.mxu1 %vm4850_vm10, %v14455_v24  ;;  %v7491_v24 = vld [vmem:[#allocation2 + $0x142] sm:$0xff] }
 0x608   : > { %v6983_v47 = vpop.f32.mrf.mxu0  ;;  %10979 = vmatmul.mubr.msk.bf16.gmra.mxu0 %vm4850_vm10, %v7514_v53  ;;  %v6700_v45 = vadd.f32 %v6612_v49, %v14452_v44  ;;  %10896 = vmatprep.mubr.msk.bf16.mxu1 %vm11313_vm1, %v15329_v57  ;;  %v7515_v37 = vpack.c.bf16 %v7492_v7, %v7491_v24  ;;  %v7494_v53 = vld [vmem:[#allocation2 + $0x15a] sm:$0xff] }
 0x609   : > { %10982 = vmatprep.mubr.msk.bf16.mxu0 %vm11313_vm1, %v15329_v57  ;;  %v10710_v46 = vpop.f32.mrf.mxu1 }
 0x60a   : > { %v10796_v36 = vpop.f32.mrf.mxu0  ;;  %v14732_v12 = vadd.f32 %v6983_v47, %v6700_v45  ;;  %v15488_v45 = vld [vmem:[#allocation11_spill] sm:$0xff] }
 0x60b   : > { %v6615_v41 = vpop.f32.mrf.mxu1 }
 0x60c   : > { %v6986_v60 = vpop.f32.mrf.mxu0  ;;  %v6701_v52 = vadd.f32 %v6615_v41, %v15487_v56 }
 0x60d   : > { %v10711_v54 = vpop.f32.mrf.mxu1 }
 0x60e   : > { %v10797_v31 = vpop.f32.mrf.mxu0  ;;  %v14735_v44 = vadd.f32 %v6986_v60, %v6701_v52 }
 0x60f   : > { %v6620_v18 = vpop.f32.mrf.mxu1  ;;  %10897 = vmatmul.mubr.msk.bf16.gmra.mxu1 %vm4850_vm10, %v14470_v40  ;;  %v7493_v40 = vld [vmem:[#allocation2 + $0x152] sm:$0xff]  ;;  %v7125_v31 = vld [vmem:[#allocation2 + $0x169] sm:$0xff] }
 0x610   : > { %v6991_v55 = vpop.f32.mrf.mxu0  ;;  %10983 = vmatmul.mubr.msk.bf16.gmra.mxu0 %vm4850_vm10, %v7515_v37  ;;  %v6702_v51 = vadd.f32 %v6620_v18, %v14467_v58  ;;  %10900 = vmatprep.mubr.msk.bf16.mxu1 %vm11313_vm1, %v15329_v57  ;;  %v7516_v41 = vpack.c.bf16 %v7494_v53, %v7493_v40  ;;  %v7124_v18 = vld [vmem:[#allocation2 + $0x161] sm:$0xff] }
 0x611   : > { %10986 = vmatprep.mubr.msk.bf16.mxu0 %vm11313_vm1, %v15329_v57  ;;  %v10714_v8 = vpop.f32.mrf.mxu1 }
 0x612   : > { %v10800_v32 = vpop.f32.mrf.mxu0  ;;  %v14745_v42 = vadd.f32 %v6991_v55, %v6702_v51  ;;  %v7495_v55 = vld [vmem:[#allocation2 + $0x162] sm:$0xff]  ;;  %v7496_v51 = vld [vmem:[#allocation2 + $0x16a] sm:$0xff] }
 0x613   : > { %v6623_v49 = vpop.f32.mrf.mxu1 }
 0x614   : > { %v6994_v47 = vpop.f32.mrf.mxu0  ;;  %v6703_v46 = vadd.f32 %v6623_v49, %v15488_v45  ;;  %v7146_v49 = vpack.c.bf16 %v7125_v31, %v7124_v18 }
 0x615   : > { %v10715_v36 = vpop.f32.mrf.mxu1 }
 0x616   : > { %v10801_v7 = vpop.f32.mrf.mxu0  ;;  %v14748_v58 = vadd.f32 %v6994_v47, %v6703_v46  ;;  %v7517_v47 = vpack.c.bf16 %v7496_v51, %v7495_v55 }
 0x617   : > { %v6628_v60 = vpop.f32.mrf.mxu1  ;;  %10901 = vmatmul.mubr.msk.bf16.gmra.mxu1 %vm4850_vm10, %v14485_v29  ;;  %v7126_v7 = vld [vmem:[#allocation2 + $0x171] sm:$0xf] }
 0x618   : > { %v6999_v56 = vpop.f32.mrf.mxu0  ;;  %10987 = vmatmul.mubr.msk.bf16.gmra.mxu0 %vm4850_vm10, %v7516_v41  ;;  %v6704_v52 = vadd.f32 %v6628_v60, %v14482_v33  ;;  %10904 = vmatprep.mubr.msk.bf16.mxu1 %vm11313_vm1, %v15329_v57 }
 0x619   : > { %10990 = vmatprep.mubr.msk.bf16.mxu0 %vm11313_vm1, %v15329_v57  ;;  %v10718_v24 = vpop.f32.mrf.mxu1 }
 0x61a   : > { %v10804_v54 = vpop.f32.mrf.mxu0  ;;  %v14758_v37 = vadd.f32 %v6999_v56, %v6704_v52 }
 0x61b   : > { %v6631_v8 = vpop.f32.mrf.mxu1  ;;  %v7147_v54 = vpack.c.bf16 %v7126_v7, %v7126_v7 }
 0x61c   : > { %v7002_v29 = vpop.f32.mrf.mxu0  ;;  %v6705_v32 = vadd.f32 %v6631_v8, %v14487_v34  ;;  %v7497_v34 = vld [vmem:[#allocation2 + $0x172] sm:$0xf] }
 0x61d   : > { %v10719_v53 = vpop.f32.mrf.mxu1  ;;  %v7518_v31 = vpack.c.bf16 %v7497_v34, %v7497_v34 }
 0x61e   : > { %v10805_v33 = vpop.f32.mrf.mxu0  ;;  %v14761_v45 = vadd.f32 %v7002_v29, %v6705_v32 }
 0x61f   : > { %v6636_v46 = vpop.f32.mrf.mxu1  ;;  %10905 = vmatmul.mubr.msk.bf16.gmra.mxu1 %vm4850_vm10, %v7146_v49 }
 0x620   : > { %v7007_v40 = vpop.f32.mrf.mxu0  ;;  %10991 = vmatmul.mubr.msk.bf16.gmra.mxu0 %vm4850_vm10, %v7517_v47  ;;  %v6706_v36 = vadd.f32 %v6636_v46, %v14497_v28  ;;  %10908 = vmatprep.mubr.msk.bf16.mxu1 %vm11313_vm1, %v15329_v57 }
 0x621   : > { %10994 = vmatprep.mubr.msk.bf16.mxu0 %vm11313_vm1, %v15329_v57  ;;  %v10722_v41 = vpop.f32.mrf.mxu1 }
 0x622   : > { %v10808_v60 = vpop.f32.mrf.mxu0  ;;  %v14770_v56 = vadd.f32 %v7007_v40, %v6706_v36  ;;  %v7828_v36 = vld [vmem:[#allocation2 + $0x33] sm:$0xff] }
 0x623   : > { %v6639_v52 = vpop.f32.mrf.mxu1 }
 0x624   : > { %v7010_v24 = vpop.f32.mrf.mxu0  ;;  %v6707_v18 = vadd.f32 %v6639_v52, %v14500_v19  ;;  %v7829_v19 = vld [vmem:[#allocation2 + $0x3b] sm:$0xff] }
 0x625   : > { %v10723_v55 = vpop.f32.mrf.mxu1  ;;  %v7869_v41 = vpack.c.bf16 %v7829_v19, %v7828_v36 }
 0x626   : > { %v10809_v28 = vpop.f32.mrf.mxu0  ;;  %v14773_v51 = vadd.f32 %v7010_v24, %v6707_v18 }
 0x627   : > { %v6644_v8 = vpop.f32.mrf.mxu1  ;;  %10909 = vmatmul.mubr.msk.bf16.gmra.mxu1 %vm4850_vm10, %v7147_v54 }
 0x628   : > { %v7015_v29 = vpop.f32.mrf.mxu0  ;;  %10995 = vmatmul.mubr.msk.bf16.gmra.mxu0 %vm4850_vm10, %v7518_v31  ;;  %v6708_v32 = vadd.f32 %v6644_v8, %v14509_v35  ;;  %11000 = vmatprep.mubr.msk.bf16.mxu1 %vm11313_vm1, %v15329_v57 }
 0x629   : > { %v10726_v53 = vpop.f32.mrf.mxu1 }
 0x62a   : > { %v10812_v33 = vpop.f32.mrf.mxu0  ;;  %v14780_v49 = vadd.f32 %v7015_v29, %v6708_v32  ;;  %v7830_v29 = vld [vmem:[#allocation2 + $0x43] sm:$0xff] }
 0x62b   : > { %v6647_v47 = vpop.f32.mrf.mxu1 }
 0x62c   : > { %v7018_v46 = vpop.f32.mrf.mxu0  ;;  %v6709_v40 = vadd.f32 %v6647_v47, %v14512_v13  ;;  %v7831_v13 = vld [vmem:[#allocation2 + $0x4b] sm:$0xff] }
 0x62d   : > { %v10727_v7 = vpop.f32.mrf.mxu1  ;;  %v7870_v33 = vpack.c.bf16 %v7831_v13, %v7830_v29 }
 0x62e   : > { %v10813_v34 = vpop.f32.mrf.mxu0  ;;  %v14783_v60 = vadd.f32 %v7018_v46, %v6709_v40 }
 0x62f   : > { %v6652_v52 = vpop.f32.mrf.mxu1  ;;  %11001 = vmatmul.mubr.msk.bf16.vlgmr.msra.gmra.mxu1 %vm4850_vm10, %v7869_v41 }
 0x630   : > { %v7023_v35 = vpop.f32.mrf.mxu0  ;;  %v6710_v24 = vadd.f32 %v6652_v52, %v14522_v62  ;;  %11004 = vmatprep.mubr.msk.bf16.mxu1 %vm11313_vm1, %v15329_v57 }
 0x631   : > { %v10730_v54 = vpop.f32.mrf.mxu1 }
 0x632   : > { %v10816_v31 = vpop.f32.mrf.mxu0  ;;  %v14789_v18 = vadd.f32 %v7023_v35, %v6710_v24  ;;  %v7832_v35 = vld [vmem:[#allocation2 + $0x53] sm:$0xff] }
 0x633   : > { %v6655_v55 = vpop.f32.mrf.mxu1 }
 0x634   : > { %v7026_v28 = vpop.f32.mrf.mxu0  ;;  %v6711_v8 = vadd.f32 %v6655_v55, %v14525_v6  ;;  %v7833_v6 = vld [vmem:[#allocation2 + $0x5b] sm:$0xff] }
 0x635   : > { %v10731_v32 = vpop.f32.mrf.mxu1  ;;  %v7871_v31 = vpack.c.bf16 %v7833_v6, %v7832_v35  ;;  %v7837_v35 = vld [vmem:[#allocation2 + $0x7b] sm:$0xff] }
 0x636   : > { %v10817_v53 = vpop.f32.mrf.mxu0  ;;  %v14792_v19 = vadd.f32 %v7026_v28, %v6711_v8 }
 0x637   : > { %v6660_v47 = vpop.f32.mrf.mxu1  ;;  %11005 = vmatmul.mubr.msk.bf16.gmra.mxu1 %vm4850_vm10, %v7870_v33 }
 0x638   : > { %v7031_v62 = vpop.f32.mrf.mxu0  ;;  %v6712_v46 = vadd.f32 %v6660_v47, %v14535_v11  ;;  %11008 = vmatprep.mubr.msk.bf16.mxu1 %vm11313_vm1, %v15329_v57  ;;  %v7834_v47 = vld [vmem:[#allocation2 + $0x63] sm:$0xff] }
 0x639   : > { %v10734_v40 = vpop.f32.mrf.mxu1 }
 0x63a   : > { %v10820_v36 = vpop.f32.mrf.mxu0  ;;  %v14798_v7 = vadd.f32 %v7031_v62, %v6712_v46 }
 0x63b   : > { %v6663_v34 = vpop.f32.mrf.mxu1 }
 0x63c   : > { %v7034_v41 = vpop.f32.mrf.mxu0  ;;  %v6713_v52 = vadd.f32 %v6663_v34, %v14538_v22  ;;  %v7835_v22 = vld [vmem:[#allocation2 + $0x6b] sm:$0xff] }
 0x63d   : > { %v10735_v24 = vpop.f32.mrf.mxu1  ;;  %v7872_v40 = vpack.c.bf16 %v7835_v22, %v7834_v47 }
 0x63e   : > { %v10821_v54 = vpop.f32.mrf.mxu0  ;;  %v14801_v13 = vadd.f32 %v7034_v41, %v6713_v52 }
 0x63f   : > { %v6668_v55 = vpop.f32.mrf.mxu1  ;;  %11009 = vmatmul.mubr.msk.bf16.gmra.mxu1 %vm4850_vm10, %v7871_v31 }
 0x640   : > { %v7039_v11 = vpop.f32.mrf.mxu0  ;;  %v6714_v28 = vadd.f32 %v6668_v55, %v14548_v26  ;;  %11012 = vmatprep.mubr.msk.bf16.mxu1 %vm11313_vm1, %v15329_v57  ;;  %v7836_v55 = vld [vmem:[#allocation2 + $0x73] sm:$0xff] }
 0x641   : > { %v10738_v8 = vpop.f32.mrf.mxu1 }
 0x642   : > { %v10824_v29 = vpop.f32.mrf.mxu0  ;;  %v14807_v32 = vadd.f32 %v7039_v11, %v6714_v28  ;;  %v7873_v8 = vpack.c.bf16 %v7837_v35, %v7836_v55 }
 0x643   : > { %v6671_v53 = vpop.f32.mrf.mxu1 }
 0x644   : > { %v7042_v33 = vpop.f32.mrf.mxu0 }
 0x645   : > { %v10739_v62 = vpop.f32.mrf.mxu1 }
 0x646   : > { %v10825_v46 = vpop.f32.mrf.mxu0 }
 0x647   : > { %v7250_v36 = vpop.f32.mrf.mxu1  ;;  %11013 = vmatmul.mubr.msk.bf16.gmra.mxu1 %vm4850_vm10, %v7872_v40 }
 0x648   : > { %v7621_v6 = vpop.f32.mrf.mxu0  ;;  %v7416_v26 = vadd.f32 %v7250_v36, %v14562_v3  ;;  %11016 = vmatprep.mubr.msk.bf16.mxu1 %vm11313_vm1, %v15329_v57 }
 0x649   : > { %v10830_v34 = vpop.f32.mrf.mxu1 }
 0x64a   : > { %v10916_v41 = vpop.f32.mrf.mxu0  ;;  %v14813_v52 = vadd.f32 %v7621_v6, %v7416_v26  ;;  %v7838_v6 = vld [vmem:[#allocation2 + $0x83] sm:$0xff] }
 0x64b   : > { %v7253_v24 = vpop.f32.mrf.mxu1 }
 0x64c   : > { %v7624_v54 = vpop.f32.mrf.mxu0  ;;  %v7417_v31 = vadd.f32 %v7253_v24, %v14566_v63  ;;  %v7839_v63 = vld [vmem:[#allocation2 + $0x8b] sm:$0xff] }
 0x64d   : > { %v10831_v11 = vpop.f32.mrf.mxu1  ;;  %v7874_v41 = vpack.c.bf16 %v7839_v63, %v7838_v6 }
 0x64e   : > { %v10917_v28 = vpop.f32.mrf.mxu0  ;;  %v14816_v29 = vadd.f32 %v7624_v54, %v7417_v31 }
 0x64f   : > { %v7258_v22 = vpop.f32.mrf.mxu1  ;;  %11017 = vmatmul.mubr.msk.bf16.gmra.mxu1 %vm4850_vm10, %v7873_v8 }
 0x650   : > { %v7629_v3 = vpop.f32.mrf.mxu0  ;;  %v7418_v53 = vadd.f32 %v7258_v22, %v14576_v23  ;;  %11020 = vmatprep.mubr.msk.bf16.mxu1 %vm11313_vm1, %v15329_v57 }
 0x651   : > { %v10834_v33 = vpop.f32.mrf.mxu1 }
 0x652   : > { %v10920_v47 = vpop.f32.mrf.mxu0  ;;  %v14822_v62 = vadd.f32 %v7629_v3, %v7418_v53  ;;  %v7840_v3 = vld [vmem:[#allocation2 + $0x93] sm:$0xff] }
 0x653   : > { %v7261_v46 = vpop.f32.mrf.mxu1 }
 0x654   : > { %v7632_v40 = vpop.f32.mrf.mxu0  ;;  %v7419_v36 = vadd.f32 %v7261_v46, %v14579_v9  ;;  %v7841_v9 = vld [vmem:[#allocation2 + $0x9b] sm:$0xff] }
 0x655   : > { %v10835_v26 = vpop.f32.mrf.mxu1  ;;  %v7875_v47 = vpack.c.bf16 %v7841_v9, %v7840_v3 }
 0x656   : > { %v10921_v34 = vpop.f32.mrf.mxu0  ;;  %v14825_v35 = vadd.f32 %v7632_v40, %v7419_v36 }
 0x657   : > { %v7266_v24 = vpop.f32.mrf.mxu1  ;;  %11021 = vmatmul.mubr.msk.bf16.gmra.mxu1 %vm4850_vm10, %v7874_v41 }
 0x658   : > { %v7637_v23 = vpop.f32.mrf.mxu0  ;;  %v7420_v54 = vadd.f32 %v7266_v24, %v14589_v0  ;;  %11024 = vmatprep.mubr.msk.bf16.mxu1 %vm11313_vm1, %v15329_v57 }
 0x659   : > { %v10838_v31 = vpop.f32.mrf.mxu1 }
 0x65a   : > { %v10924_v55 = vpop.f32.mrf.mxu0  ;;  %v14831_v11 = vadd.f32 %v7637_v23, %v7420_v54  ;;  %v7842_v23 = vld [vmem:[#allocation2 + $0xa3] sm:$0xff] }
 0x65b   : > { %v7269_v28 = vpop.f32.mrf.mxu1 }
 0x65c   : > { %v7640_v8 = vpop.f32.mrf.mxu0  ;;  %v7421_v22 = vadd.f32 %v7269_v28, %v14592_v39  ;;  %v7843_v39 = vld [vmem:[#allocation2 + $0xab] sm:$0xff] }
 0x65d   : > { %v10839_v53 = vpop.f32.mrf.mxu1  ;;  %v7876_v55 = vpack.c.bf16 %v7843_v39, %v7842_v23 }
 0x65e   : > { %v10925_v33 = vpop.f32.mrf.mxu0  ;;  %v14834_v63 = vadd.f32 %v7640_v8, %v7421_v22 }
 0x65f   : > { %v7274_v46 = vpop.f32.mrf.mxu1  ;;  %11025 = vmatmul.mubr.msk.bf16.gmra.mxu1 %vm4850_vm10, %v7875_v47 }
 0x660   : > { %v7645_v0 = vpop.f32.mrf.mxu0  ;;  %v7422_v40 = vadd.f32 %v7274_v46, %v14602_v14  ;;  %11028 = vmatprep.mubr.msk.bf16.mxu1 %vm11313_vm1, %v15329_v57 }
 0x661   : > { %v10842_v36 = vpop.f32.mrf.mxu1 }
 0x662   : > { %v10928_v6 = vpop.f32.mrf.mxu0  ;;  %v14840_v26 = vadd.f32 %v7645_v0, %v7422_v40  ;;  %v7844_v0 = vld [vmem:[#allocation2 + $0xb3] sm:$0xff] }
 0x663   : > { %v7277_v34 = vpop.f32.mrf.mxu1 }
 0x664   : > { %v7648_v41 = vpop.f32.mrf.mxu0  ;;  %v7423_v24 = vadd.f32 %v7277_v34, %v14605_v17  ;;  %v7845_v17 = vld [vmem:[#allocation2 + $0xbb] sm:$0xff] }
 0x665   : > { %v10843_v54 = vpop.f32.mrf.mxu1  ;;  %v7877_v6 = vpack.c.bf16 %v7845_v17, %v7844_v0 }
 0x666   : > { %v10929_v31 = vpop.f32.mrf.mxu0  ;;  %v14843_v9 = vadd.f32 %v7648_v41, %v7423_v24 }
 0x667   : > { %v7282_v28 = vpop.f32.mrf.mxu1  ;;  %11029 = vmatmul.mubr.msk.bf16.gmra.mxu1 %vm4850_vm10, %v7876_v55 }
 0x668   : > { %v7653_v14 = vpop.f32.mrf.mxu0  ;;  %v7424_v8 = vadd.f32 %v7282_v28, %v14615_v61  ;;  %11032 = vmatprep.mubr.msk.bf16.mxu1 %vm11313_vm1, %v15329_v57 }
 0x669   : > { %v10846_v22 = vpop.f32.mrf.mxu1 }
 0x66a   : > { %v10932_v3 = vpop.f32.mrf.mxu0  ;;  %v14849_v53 = vadd.f32 %v7653_v14, %v7424_v8  ;;  %v7846_v14 = vld [vmem:[#allocation2 + $0xc3] sm:$0xff] }
 0x66b   : > { %v7285_v33 = vpop.f32.mrf.mxu1 }
 0x66c   : > { %v7656_v47 = vpop.f32.mrf.mxu0  ;;  %v7425_v46 = vadd.f32 %v7285_v33, %v14618_v59  ;;  %v7847_v59 = vld [vmem:[#allocation2 + $0xcb] sm:$0xff] }
 0x66d   : > { %v10847_v40 = vpop.f32.mrf.mxu1  ;;  %v7878_v3 = vpack.c.bf16 %v7847_v59, %v7846_v14 }
 0x66e   : > { %v10933_v36 = vpop.f32.mrf.mxu0  ;;  %v14852_v39 = vadd.f32 %v7656_v47, %v7425_v46 }
 0x66f   : > { %v7290_v34 = vpop.f32.mrf.mxu1  ;;  %11033 = vmatmul.mubr.msk.bf16.gmra.mxu1 %vm4850_vm10, %v7877_v6 }
 0x670   : > { %v7661_v61 = vpop.f32.mrf.mxu0  ;;  %v7426_v41 = vadd.f32 %v7290_v34, %v14628_v16  ;;  %11036 = vmatprep.mubr.msk.bf16.mxu1 %vm11313_vm1, %v15329_v57 }
 0x671   : > { %v10850_v24 = vpop.f32.mrf.mxu1 }
 0x672   : > { %v10936_v23 = vpop.f32.mrf.mxu0  ;;  %v14858_v54 = vadd.f32 %v7661_v61, %v7426_v41  ;;  %v7848_v61 = vld [vmem:[#allocation2 + $0xd3] sm:$0xff] }
 0x673   : > { %v7293_v31 = vpop.f32.mrf.mxu1 }
 0x674   : > { %v7664_v55 = vpop.f32.mrf.mxu0  ;;  %v7427_v28 = vadd.f32 %v7293_v31, %v14631_v50  ;;  %v7849_v50 = vld [vmem:[#allocation2 + $0xdb] sm:$0xff] }
 0x675   : > { %v10851_v8 = vpop.f32.mrf.mxu1  ;;  %v7879_v23 = vpack.c.bf16 %v7849_v50, %v7848_v61 }
 0x676   : > { %v10937_v22 = vpop.f32.mrf.mxu0  ;;  %v14861_v17 = vadd.f32 %v7664_v55, %v7427_v28 }
 0x677   : > { %v7298_v33 = vpop.f32.mrf.mxu1  ;;  %11037 = vmatmul.mubr.msk.bf16.gmra.mxu1 %vm4850_vm10, %v7878_v3 }
 0x678   : > { %v7669_v16 = vpop.f32.mrf.mxu0  ;;  %v7428_v47 = vadd.f32 %v7298_v33, %v14641_v15  ;;  %11040 = vmatprep.mubr.msk.bf16.mxu1 %vm11313_vm1, %v15329_v57 }
 0x679   : > { %v10854_v46 = vpop.f32.mrf.mxu1 }
 0x67a   : > { %v10940_v0 = vpop.f32.mrf.mxu0  ;;  %v14867_v40 = vadd.f32 %v7669_v16, %v7428_v47  ;;  %v7850_v16 = vld [vmem:[#allocation2 + $0xe3] sm:$0xff] }
 0x67b   : > { %v7301_v36 = vpop.f32.mrf.mxu1 }
 0x67c   : > { %v7672_v6 = vpop.f32.mrf.mxu0  ;;  %v7429_v34 = vadd.f32 %v7301_v36, %v14644_v20  ;;  %v7851_v20 = vld [vmem:[#allocation2 + $0xeb] sm:$0xff] }
 0x67d   : > { %v10855_v41 = vpop.f32.mrf.mxu1  ;;  %v7880_v0 = vpack.c.bf16 %v7851_v20, %v7850_v16 }
 0x67e   : > { %v10941_v24 = vpop.f32.mrf.mxu0  ;;  %v14870_v59 = vadd.f32 %v7672_v6, %v7429_v34 }
 0x67f   : > { %v7306_v31 = vpop.f32.mrf.mxu1  ;;  %11041 = vmatmul.mubr.msk.bf16.gmra.mxu1 %vm4850_vm10, %v7879_v23 }
 0x680   : > { %v7677_v15 = vpop.f32.mrf.mxu0  ;;  %v7430_v55 = vadd.f32 %v7306_v31, %v14654_v4  ;;  %11044 = vmatprep.mubr.msk.bf16.mxu1 %vm11313_vm1, %v15329_v57 }
 0x681   : > { %v10858_v28 = vpop.f32.mrf.mxu1 }
 0x682   : > { %v10944_v14 = vpop.f32.mrf.mxu0  ;;  %v14876_v8 = vadd.f32 %v7677_v15, %v7430_v55  ;;  %v7852_v15 = vld [vmem:[#allocation2 + $0xf3] sm:$0xff] }
 0x683   : > { %v7309_v22 = vpop.f32.mrf.mxu1 }
 0x684   : > { %v7680_v3 = vpop.f32.mrf.mxu0  ;;  %v7431_v33 = vadd.f32 %v7309_v22, %v14657_v43  ;;  %v7853_v43 = vld [vmem:[#allocation2 + $0xfb] sm:$0xff] }
 0x685   : > { %v10859_v47 = vpop.f32.mrf.mxu1  ;;  %v7881_v14 = vpack.c.bf16 %v7853_v43, %v7852_v15 }
 0x686   : > { %v10945_v46 = vpop.f32.mrf.mxu0  ;;  %v14879_v50 = vadd.f32 %v7680_v3, %v7431_v33 }
 0x687   : > { %v7314_v36 = vpop.f32.mrf.mxu1  ;;  %11045 = vmatmul.mubr.msk.bf16.gmra.mxu1 %vm4850_vm10, %v7880_v0 }
 0x688   : > { %v7685_v4 = vpop.f32.mrf.mxu0  ;;  %v7432_v6 = vadd.f32 %v7314_v36, %v14667_v48  ;;  %11048 = vmatprep.mubr.msk.bf16.mxu1 %vm11313_vm1, %v15329_v57 }
 0x689   : > { %v10862_v34 = vpop.f32.mrf.mxu1 }
 0x68a   : > { %v10948_v61 = vpop.f32.mrf.mxu0  ;;  %v14885_v41 = vadd.f32 %v7685_v4, %v7432_v6  ;;  %v7854_v4 = vld [vmem:[#allocation2 + $0x103] sm:$0xff] }
 0x68b   : > { %v7317_v24 = vpop.f32.mrf.mxu1 }
 0x68c   : > { %v7688_v23 = vpop.f32.mrf.mxu0  ;;  %v7433_v31 = vadd.f32 %v7317_v24, %v14670_v27  ;;  %v7855_v27 = vld [vmem:[#allocation2 + $0x10b] sm:$0xff] }
 0x68d   : > { %v10863_v55 = vpop.f32.mrf.mxu1  ;;  %v7882_v61 = vpack.c.bf16 %v7855_v27, %v7854_v4 }
 0x68e   : > { %v10949_v28 = vpop.f32.mrf.mxu0  ;;  %v14888_v20 = vadd.f32 %v7688_v23, %v7433_v31 }
 0x68f   : > { %v7322_v22 = vpop.f32.mrf.mxu1  ;;  %11049 = vmatmul.mubr.msk.bf16.gmra.mxu1 %vm4850_vm10, %v7881_v14 }
 0x690   : > { %v7693_v48 = vpop.f32.mrf.mxu0  ;;  %v7434_v3 = vadd.f32 %v7322_v22, %v14680_v25  ;;  %11052 = vmatprep.mubr.msk.bf16.mxu1 %vm11313_vm1, %v15329_v57 }
 0x691   : > { %v10866_v33 = vpop.f32.mrf.mxu1 }
 0x692   : > { %v10952_v16 = vpop.f32.mrf.mxu0  ;;  %v14894_v47 = vadd.f32 %v7693_v48, %v7434_v3  ;;  %v7856_v48 = vld [vmem:[#allocation2 + $0x113] sm:$0xff] }
 0x693   : > { %v7325_v46 = vpop.f32.mrf.mxu1 }
 0x694   : > { %v7696_v0 = vpop.f32.mrf.mxu0  ;;  %v7435_v36 = vadd.f32 %v7325_v46, %v14683_v10  ;;  %v7857_v10 = vld [vmem:[#allocation2 + $0x11b] sm:$0xff] }
 0x695   : > { %v10867_v6 = vpop.f32.mrf.mxu1  ;;  %v7883_v16 = vpack.c.bf16 %v7857_v10, %v7856_v48 }
 0x696   : > { %v10953_v34 = vpop.f32.mrf.mxu0  ;;  %v14897_v43 = vadd.f32 %v7696_v0, %v7435_v36 }
 0x697   : > { %v7330_v24 = vpop.f32.mrf.mxu1  ;;  %11053 = vmatmul.mubr.msk.bf16.gmra.mxu1 %vm4850_vm10, %v7882_v61 }
 0x698   : > { %v7701_v25 = vpop.f32.mrf.mxu0  ;;  %v7436_v23 = vadd.f32 %v7330_v24, %v14693_v30  ;;  %11056 = vmatprep.mubr.msk.bf16.mxu1 %vm11313_vm1, %v15329_v57 }
 0x699   : > { %v10870_v31 = vpop.f32.mrf.mxu1 }
 0x69a   : > { %v10956_v15 = vpop.f32.mrf.mxu0  ;;  %v14903_v55 = vadd.f32 %v7701_v25, %v7436_v23  ;;  %v7858_v25 = vld [vmem:[#allocation2 + $0x123] sm:$0xff] }
 0x69b   : > { %v7333_v28 = vpop.f32.mrf.mxu1 }
 0x69c   : > { %v7704_v14 = vpop.f32.mrf.mxu0  ;;  %v7437_v22 = vadd.f32 %v7333_v28, %v14696_v2  ;;  %v7859_v2 = vld [vmem:[#allocation2 + $0x12b] sm:$0xff] }
 0x69d   : > { %v10871_v3 = vpop.f32.mrf.mxu1  ;;  %v7884_v15 = vpack.c.bf16 %v7859_v2, %v7858_v25 }
 0x69e   : > { %v10957_v33 = vpop.f32.mrf.mxu0  ;;  %v14906_v27 = vadd.f32 %v7704_v14, %v7437_v22 }
 0x69f   : > { %v7338_v46 = vpop.f32.mrf.mxu1  ;;  %11057 = vmatmul.mubr.msk.bf16.gmra.mxu1 %vm4850_vm10, %v7883_v16 }
 0x6a0   : > { %v7709_v30 = vpop.f32.mrf.mxu0  ;;  %v7438_v0 = vadd.f32 %v7338_v46, %v14706_v1  ;;  %11060 = vmatprep.mubr.msk.bf16.mxu1 %vm11313_vm1, %v15329_v57 }
 0x6a1   : > { %v10874_v36 = vpop.f32.mrf.mxu1 }
 0x6a2   : > { %v10960_v4 = vpop.f32.mrf.mxu0  ;;  %v14912_v6 = vadd.f32 %v7709_v30, %v7438_v0  ;;  %v7860_v30 = vld [vmem:[#allocation2 + $0x133] sm:$0xff] }
 0x6a3   : > { %v7341_v34 = vpop.f32.mrf.mxu1 }
 0x6a4   : > { %v7712_v61 = vpop.f32.mrf.mxu0  ;;  %v7439_v24 = vadd.f32 %v7341_v34, %v14709_v38  ;;  %v7861_v38 = vld [vmem:[#allocation2 + $0x13b] sm:$0xff] }
 0x6a5   : > { %v10875_v23 = vpop.f32.mrf.mxu1  ;;  %v7885_v4 = vpack.c.bf16 %v7861_v38, %v7860_v30 }
 0x6a6   : > { %v10961_v31 = vpop.f32.mrf.mxu0  ;;  %v14915_v10 = vadd.f32 %v7712_v61, %v7439_v24 }
 0x6a7   : > { %v7346_v28 = vpop.f32.mrf.mxu1  ;;  %11061 = vmatmul.mubr.msk.bf16.gmra.mxu1 %vm4850_vm10, %v7884_v15 }
 0x6a8   : > { %v7717_v1 = vpop.f32.mrf.mxu0  ;;  %v7440_v14 = vadd.f32 %v7346_v28, %v14719_v21  ;;  %11064 = vmatprep.mubr.msk.bf16.mxu1 %vm11313_vm1, %v15329_v57 }
 0x6a9   : > { %v10878_v22 = vpop.f32.mrf.mxu1 }
 0x6aa   : > { %v10964_v48 = vpop.f32.mrf.mxu0  ;;  %v14921_v3 = vadd.f32 %v7717_v1, %v7440_v14  ;;  %v7862_v1 = vld [vmem:[#allocation2 + $0x143] sm:$0xff] }
 0x6ab   : > { %v7349_v33 = vpop.f32.mrf.mxu1 }
 0x6ac   : > { %v7720_v16 = vpop.f32.mrf.mxu0  ;;  %v7441_v46 = vadd.f32 %v7349_v33, %v14722_v5  ;;  %v7863_v5 = vld [vmem:[#allocation2 + $0x14b] sm:$0xff] }
 0x6ad   : > { %v10879_v0 = vpop.f32.mrf.mxu1  ;;  %v7886_v48 = vpack.c.bf16 %v7863_v5, %v7862_v1 }
 0x6ae   : > { %v10965_v36 = vpop.f32.mrf.mxu0  ;;  %v14924_v2 = vadd.f32 %v7720_v16, %v7441_v46 }
 0x6af   : > { %v7354_v34 = vpop.f32.mrf.mxu1  ;;  %11065 = vmatmul.mubr.msk.bf16.gmra.mxu1 %vm4850_vm10, %v7885_v4 }
 0x6b0   : > { %v7725_v21 = vpop.f32.mrf.mxu0  ;;  %v7442_v61 = vadd.f32 %v7354_v34, %v14732_v12  ;;  %11068 = vmatprep.mubr.msk.bf16.mxu1 %vm11313_vm1, %v15329_v57 }
 0x6b1   : > { %v10882_v24 = vpop.f32.mrf.mxu1 }
 0x6b2   : > { %v10968_v25 = vpop.f32.mrf.mxu0  ;;  %v14930_v23 = vadd.f32 %v7725_v21, %v7442_v61  ;;  %v7864_v21 = vld [vmem:[#allocation2 + $0x153] sm:$0xff] }
 0x6b3   : > { %v7357_v31 = vpop.f32.mrf.mxu1 }
 0x6b4   : > { %v7728_v15 = vpop.f32.mrf.mxu0  ;;  %v7443_v28 = vadd.f32 %v7357_v31, %v14735_v44  ;;  %v7865_v44 = vld [vmem:[#allocation2 + $0x15b] sm:$0xff] }
 0x6b5   : > { %v10883_v14 = vpop.f32.mrf.mxu1  ;;  %v7887_v25 = vpack.c.bf16 %v7865_v44, %v7864_v21 }
 0x6b6   : > { %v10969_v22 = vpop.f32.mrf.mxu0  ;;  %v14933_v38 = vadd.f32 %v7728_v15, %v7443_v28 }
 0x6b7   : > { %v7362_v33 = vpop.f32.mrf.mxu1  ;;  %11069 = vmatmul.mubr.msk.bf16.gmra.mxu1 %vm4850_vm10, %v7886_v48  ;;  %v7867_v22 = vld [vmem:[#allocation2 + $0x16b] sm:$0xff] }
 0x6b8   : > { %v7733_v12 = vpop.f32.mrf.mxu0  ;;  %v7444_v16 = vadd.f32 %v7362_v33, %v14745_v42  ;;  %11072 = vmatprep.mubr.msk.bf16.mxu1 %vm11313_vm1, %v15329_v57 }
 0x6b9   : > { %v10886_v46 = vpop.f32.mrf.mxu1 }
 0x6ba   : > { %v10972_v30 = vpop.f32.mrf.mxu0  ;;  %v14939_v0 = vadd.f32 %v7733_v12, %v7444_v16 }
 0x6bb   : > { %v7365_v36 = vpop.f32.mrf.mxu1 }
 0x6bc   : > { %v7736_v4 = vpop.f32.mrf.mxu0  ;;  %v7445_v34 = vadd.f32 %v7365_v36, %v14748_v58  ;;  %v7866_v58 = vld [vmem:[#allocation2 + $0x163] sm:$0xff] }
 0x6bd   : > { %v10887_v61 = vpop.f32.mrf.mxu1  ;;  %v7888_v30 = vpack.c.bf16 %v7867_v22, %v7866_v58 }
 0x6be   : > { %v10973_v24 = vpop.f32.mrf.mxu0  ;;  %v14942_v5 = vadd.f32 %v7736_v4, %v7445_v34  ;;  %v7868_v34 = vld [vmem:[#allocation2 + $0x173] sm:$0xf] }
 0x6bf   : > { %v7370_v31 = vpop.f32.mrf.mxu1  ;;  %11073 = vmatmul.mubr.msk.bf16.gmra.mxu1 %vm4850_vm10, %v7887_v25 }
 0x6c0   : > { %v7741_v42 = vpop.f32.mrf.mxu0  ;;  %v7446_v15 = vadd.f32 %v7370_v31, %v14758_v37  ;;  %11076 = vmatprep.mubr.msk.bf16.mxu1 %vm11313_vm1, %v15329_v57  ;;  %v7889_v31 = vpack.c.bf16 %v7868_v34, %v7868_v34 }
 0x6c1   : > { %v10890_v28 = vpop.f32.mrf.mxu1 }
 0x6c2   : > { %v10976_v1 = vpop.f32.mrf.mxu0  ;;  %v14948_v14 = vadd.f32 %v7741_v42, %v7446_v15 }
 0x6c3   : > { %v7373_v48 = vpop.f32.mrf.mxu1 }
 0x6c4   : > { %v7744_v33 = vpop.f32.mrf.mxu0  ;;  %v7447_v12 = vadd.f32 %v7373_v48, %v14761_v45 }
 0x6c5   : > { %v10891_v16 = vpop.f32.mrf.mxu1 }
 0x6c6   : > { %v10977_v46 = vpop.f32.mrf.mxu0  ;;  %v14951_v44 = vadd.f32 %v7744_v33, %v7447_v12 }
 0x6c7   : > { %v7378_v36 = vpop.f32.mrf.mxu1  ;;  %11077 = vmatmul.mubr.msk.bf16.gmra.mxu1 %vm4850_vm10, %v7888_v30 }
 0x6c8   : > { %v7749_v37 = vpop.f32.mrf.mxu0  ;;  %v7448_v4 = vadd.f32 %v7378_v36, %v14770_v56  ;;  %11080 = vmatprep.mubr.msk.bf16.mxu1 %vm11313_vm1, %v15329_v57 }
 0x6c9   : > { %v10894_v21 = vpop.f32.mrf.mxu1 }
 0x6ca   : > { %v10980_v61 = vpop.f32.mrf.mxu0  ;;  %v14957_v24 = vadd.f32 %v7749_v37, %v7448_v4 }
 0x6cb   : > { %v7381_v45 = vpop.f32.mrf.mxu1 }
 0x6cc   : > { %15489 = vst [vmem:[#allocation9_spill] sm:$0xff] %v14957_v24  ;;  %v7752_v25 = vpop.f32.mrf.mxu0  ;;  %v7449_v42 = vadd.f32 %v7381_v45, %v14773_v51 }
 0x6cd   : > { %v10895_v15 = vpop.f32.mrf.mxu1 }
 0x6ce   : > { %v10981_v28 = vpop.f32.mrf.mxu0  ;;  %v14960_v1 = vadd.f32 %v7752_v25, %v7449_v42 }
 0x6cf   : > { %v7386_v58 = vpop.f32.mrf.mxu1  ;;  %11081 = vmatmul.mubr.msk.bf16.gmra.mxu1 %vm4850_vm10, %v7889_v31 }
 0x6d0   : > { %v7757_v22 = vpop.f32.mrf.mxu0  ;;  %v7450_v56 = vadd.f32 %v7386_v58, %v14780_v49  ;;  %11102 = vmatprep.mubr.msk.f32.mxu1 %vm11313_vm1, %v15329_v57 }
 0x6d1   : > { %v10898_v48 = vpop.f32.mrf.mxu1 }
 0x6d2   : > { %v10984_v33 = vpop.f32.mrf.mxu0  ;;  %v14966_v12 = vadd.f32 %v7757_v22, %v7450_v56 }
 0x6d3   : > { %v7389_v16 = vpop.f32.mrf.mxu1 }
 0x6d4   : > { %v7760_v46 = vpop.f32.mrf.mxu0  ;;  %v7451_v51 = vadd.f32 %v7389_v16, %v14783_v60 }
 0x6d5   : > { %v10899_v30 = vpop.f32.mrf.mxu1 }
 0x6d6   : > { %v10985_v36 = vpop.f32.mrf.mxu0  ;;  %v14969_v37 = vadd.f32 %v7760_v46, %v7451_v51 }
 0x6d7   : > { %v7394_v4 = vpop.f32.mrf.mxu1 }
 0x6d8   : > { %v7765_v34 = vpop.f32.mrf.mxu0  ;;  %v7452_v21 = vadd.f32 %v7394_v4, %v14789_v18 }
 0x6d9   : > { %v10902_v49 = vpop.f32.mrf.mxu1 }
 0x6da   : > { %v10988_v61 = vpop.f32.mrf.mxu0  ;;  %v14972_v45 = vadd.f32 %v7765_v34, %v7452_v21 }
 0x6db   : > { %v7397_v25 = vpop.f32.mrf.mxu1 }
 0x6dc   : > { %v7768_v31 = vpop.f32.mrf.mxu0  ;;  %v7453_v42 = vadd.f32 %v7397_v25, %v14792_v19 }
 0x6dd   : > { %v10903_v15 = vpop.f32.mrf.mxu1 }
 0x6de   : > { %v10989_v28 = vpop.f32.mrf.mxu0  ;;  %v14975_v58 = vadd.f32 %v7768_v31, %v7453_v42 }
 0x6df   : > { %v7402_v60 = vpop.f32.mrf.mxu1 }
 0x6e0   : > { %v7773_v22 = vpop.f32.mrf.mxu0  ;;  %v7454_v56 = vadd.f32 %v7402_v60, %v14798_v7 }
 0x6e1   : > { %v10906_v48 = vpop.f32.mrf.mxu1 }
 0x6e2   : > { %v10992_v33 = vpop.f32.mrf.mxu0  ;;  %v14978_v16 = vadd.f32 %v7773_v22, %v7454_v56 }
 0x6e3   : > { %v7405_v18 = vpop.f32.mrf.mxu1 }
 0x6e4   : > { %v7776_v46 = vpop.f32.mrf.mxu0  ;;  %v7455_v51 = vadd.f32 %v7405_v18, %v14801_v13 }
 0x6e5   : > { %v10907_v30 = vpop.f32.mrf.mxu1 }
 0x6e6   : > { %v10993_v36 = vpop.f32.mrf.mxu0  ;;  %v14981_v4 = vadd.f32 %v7776_v46, %v7455_v51 }
 0x6e7   : > { %v7410_v19 = vpop.f32.mrf.mxu1 }
 0x6e8   : > { %v7781_v34 = vpop.f32.mrf.mxu0  ;;  %v7456_v21 = vadd.f32 %v7410_v19, %v14807_v32 }
 0x6e9   : > { %v10910_v49 = vpop.f32.mrf.mxu1 }
 0x6ea   : > { %v10996_v61 = vpop.f32.mrf.mxu0  ;;  %v14984_v25 = vadd.f32 %v7781_v34, %v7456_v21 }
 0x6eb   : > { %v7413_v7 = vpop.f32.mrf.mxu1 }
 0x6ec   : > { %v7784_v31 = vpop.f32.mrf.mxu0 }
 0x6ed   : > { %v10911_v42 = vpop.f32.mrf.mxu1 }
 0x6ee   : > { %v10997_v15 = vpop.f32.mrf.mxu0 }
 0x6ef   : > { %v7992_v28 = vpop.f32.mrf.mxu1 }
 0x6f0   : > { %v14987_v60 = vadd.f32 %v7992_v28, %v14813_v52 }
 0x6f1   : > { %v11002_v13 = vpop.f32.mrf.mxu1 }
 0x6f3   : > { %v7995_v22 = vpop.f32.mrf.mxu1 }
 0x6f4   : > { %v14990_v56 = vadd.f32 %v7995_v22, %v14816_v29 }
 0x6f5   : > { %v11003_v48 = vpop.f32.mrf.mxu1 }
 0x6f7   : > { %v8000_v33 = vpop.f32.mrf.mxu1 }
 0x6f8   : > { %v14993_v32 = vadd.f32 %v8000_v33, %v14822_v62 }
 0x6f9   : > { %v11006_v18 = vpop.f32.mrf.mxu1 }
 0x6fa   : > { %v8290_v18 = vlaneseq }
 0x6fb   : > { %v8003_v46 = vpop.f32.mrf.mxu1 }
 0x6fc   : > { %v14996_v51 = vadd.f32 %v8003_v46, %v14825_v35 }
 0x6fd   : > { %v11007_v30 = vpop.f32.mrf.mxu1 }
 0x6fe   : > { %v8291_v30 = vshrl.u32 %v8290_v18, 7 }
 0x6ff   : > { %v8008_v36 = vpop.f32.mrf.mxu1 }
 0x700   : > { %v14999_v52 = vadd.f32 %v8008_v36, %v14831_v11  ;;  %v8296_v36 = vsub.s32 1, %v8291_v30 }
 0x701   : > { %v11010_v19 = vpop.f32.mrf.mxu1 }
 0x703   : > { %v8011_v34 = vpop.f32.mrf.mxu1 }
 0x704   : > { %v15002_v29 = vadd.f32 %v8011_v34, %v14834_v63  ;;  %v8292_v34 = vsub.s32 0, %v8291_v30 }
 0x705   : > { %v11011_v21 = vpop.f32.mrf.mxu1 }
 0x707   : > { %v8016_v49 = vpop.f32.mrf.mxu1 }
 0x708   : > { %v15005_v62 = vadd.f32 %v8016_v49, %v14840_v26 }
 0x709   : > { %v11014_v61 = vpop.f32.mrf.mxu1 }
 0x70b   : > { %v8019_v7 = vpop.f32.mrf.mxu1 }
 0x70c   : > { %v15008_v35 = vadd.f32 %v8019_v7, %v14843_v9 }
 0x70d   : > { %v11015_v31 = vpop.f32.mrf.mxu1 }
 0x70e   : > { %v8300_v31 = vsub.s32 2, %v8291_v30 }
 0x70f   : > { %v8024_v42 = vpop.f32.mrf.mxu1 }
 0x710   : > { %v15011_v11 = vadd.f32 %v8024_v42, %v14849_v53 }
 0x711   : > { %v11018_v15 = vpop.f32.mrf.mxu1 }
 0x713   : > { %v8027_v28 = vpop.f32.mrf.mxu1 }
 0x714   : > { %v15014_v63 = vadd.f32 %v8027_v28, %v14852_v39  ;;  %v8288_v39 = vld [vmem:[%s15225_s6] sm:$0x7] }
 0x715   : > { %v11019_v13 = vpop.f32.mrf.mxu1  ;;  %v8297_v21 = vrot.slane %v8288_v39, %v8296_v36  ;;  %v15028_v49 = vrot.slane %v8288_v39, %v8292_v34 }
 0x717   : > { %v8032_v22 = vpop.f32.mrf.mxu1  ;;  %8374 = vmatprep.mubr.f32.mxu0 %v8297_v21 }
 0x718   : > { %v15017_v26 = vadd.f32 %v8032_v22, %v14858_v54 }
 0x719   : > { %v11022_v48 = vpop.f32.mrf.mxu1 }
 0x71b   : > { %v8035_v33 = vpop.f32.mrf.mxu1 }
 0x71c   : > { %v15020_v9 = vadd.f32 %v8035_v33, %v14861_v17 }
 0x71d   : > { %v11023_v46 = vpop.f32.mrf.mxu1 }
 0x71f   : > { %v8040_v53 = vpop.f32.mrf.mxu1 }
 0x720   : > { %v15023_v19 = vadd.f32 %v8040_v53, %v14867_v40  ;;  %v15032_v40 = vrot.slane %v8288_v39, %v8300_v31 }
 0x721   : > { %v11026_v54 = vpop.f32.mrf.mxu1 }
 0x722   : > { %15490 = vst [vmem:[#allocation6_spill] sm:$0xff] %v15032_v40 }
 0x723   : > { %v8043_v61 = vpop.f32.mrf.mxu1 }
 0x724   : > { %v8171_v17 = vadd.f32 %v8043_v61, %v14870_v59 }
 0x725   : > { %v11027_v7 = vpop.f32.mrf.mxu1 }
 0x727   : > { %v8048_v42 = vpop.f32.mrf.mxu1 }
 0x728   : > { %v8172_v15 = vadd.f32 %v8048_v42, %v14876_v8 }
 0x729   : > { %v11030_v28 = vpop.f32.mrf.mxu1 }
 0x72b   : > { %v8051_v13 = vpop.f32.mrf.mxu1 }
 0x72c   : > { %v8173_v22 = vadd.f32 %v8051_v13, %v14879_v50 }
 0x72d   : > { %v11031_v48 = vpop.f32.mrf.mxu1 }
 0x72f   : > { %v8056_v33 = vpop.f32.mrf.mxu1 }
 0x730   : > { %v15036_v18 = vadd.f32 %v8056_v33, %v14885_v41 }
 0x731   : > { %v11034_v46 = vpop.f32.mrf.mxu1 }
 0x733   : > { %v8059_v53 = vpop.f32.mrf.mxu1 }
 0x734   : > { %v15039_v59 = vadd.f32 %v8059_v53, %v14888_v20 }
 0x735   : > { %v11035_v30 = vpop.f32.mrf.mxu1 }
 0x737   : > { %v8064_v36 = vpop.f32.mrf.mxu1 }
 0x738   : > { %v15042_v8 = vadd.f32 %v8064_v36, %v14894_v47 }
 0x739   : > { %v11038_v39 = vpop.f32.mrf.mxu1 }
 0x73b   : > { %v8067_v34 = vpop.f32.mrf.mxu1 }
 0x73c   : > { %v15045_v54 = vadd.f32 %v8067_v34, %v14897_v43 }
 0x73d   : > { %v11039_v50 = vpop.f32.mrf.mxu1 }
 0x73f   : > { %v8072_v21 = vpop.f32.mrf.mxu1 }
 0x740   : > { %v15048_v41 = vadd.f32 %v8072_v21, %v14903_v55 }
 0x741   : > { %v11042_v61 = vpop.f32.mrf.mxu1 }
 0x743   : > { %v15050_v7 = vpop.f32.mrf.mxu1 }
 0x745   : > { %v11043_v20 = vpop.f32.mrf.mxu1 }
 0x747   : > { %v15052_v31 = vpop.f32.mrf.mxu1 }
 0x749   : > { %v11046_v42 = vpop.f32.mrf.mxu1 }
 0x74a   : > { %v15058_v42 = vld [vmem:[%s15223_s4] ss:$0 sm:$0xff] }
 0x74b   : > { %v8083_v28 = vpop.f32.mrf.mxu1 }
 0x74d   : > { %v11047_v47 = vpop.f32.mrf.mxu1 }
 0x74f   : > { %v8088_v13 = vpop.f32.mrf.mxu1 }
 0x751   : > { %v11050_v48 = vpop.f32.mrf.mxu1 }
 0x753   : > { %v8091_v33 = vpop.f32.mrf.mxu1 }
 0x755   : > { %v11051_v46 = vpop.f32.mrf.mxu1 }
 0x756   : > { %v8221_v46 = vadd.f32 %v15058_v42, %v8173_v22 }
 0x757   : > { %v8096_v43 = vpop.f32.mrf.mxu1 }
 0x759   : > { %v11054_v53 = vpop.f32.mrf.mxu1 }
 0x75b   : > { %v8099_v30 = vpop.f32.mrf.mxu1 }
 0x75d   : > { %v11055_v36 = vpop.f32.mrf.mxu1 }
 0x75f   : > { %v8104_v39 = vpop.f32.mrf.mxu1 }
 0x760   : > { %v8186_v36 = vadd.f32 %v8104_v39, %v14939_v0 }
 0x761   : > { %v11058_v55 = vpop.f32.mrf.mxu1 }
 0x762   : > { %v8234_v0 = vadd.f32 %v15058_v42, %v8186_v36  ;;  %v8216_v36 = vadd.f32 %v15058_v42, %v15017_v26 }
 0x763   : > { %v8107_v34 = vpop.f32.mrf.mxu1 }
 0x764   : > { %v8187_v47 = vadd.f32 %v8107_v34, %v14942_v5  ;;  %v8184_v34 = vadd.f32 %v8096_v43, %v14930_v23  ;;  %v8217_v23 = vadd.f32 %v15058_v42, %v15020_v9 }
 0x765   : > { %v11059_v50 = vpop.f32.mrf.mxu1 }
 0x766   : > { %v8235_v24 = vadd.f32 %v15058_v42, %v8187_v47 }
 0x767   : > { %v8112_v21 = vpop.f32.mrf.mxu1 }
 0x768   : > { %v8188_v20 = vadd.f32 %v8112_v21, %v14948_v14  ;;  %v8220_v14 = vadd.f32 %v15058_v42, %v8172_v15  ;;  %v8218_v15 = vadd.f32 %v15058_v42, %v15023_v19  ;;  %v8232_v19 = vadd.f32 %v15058_v42, %v8184_v34 }
 0x769   : > { %v11062_v61 = vpop.f32.mrf.mxu1 }
 0x76a   : > { %v8236_v55 = vadd.f32 %v15058_v42, %v8188_v20  ;;  %v8185_v61 = vadd.f32 %v8099_v30, %v14933_v38  ;;  %v8261_v20 = vmax.f32 %v8220_v14, 0.0  ;;  %v8183_v38 = vadd.f32 %v8091_v33, %v14924_v2 }
 0x76b   : > { %v8115_v40 = vpop.f32.mrf.mxu1  ;;  %v8259_v2 = vmax.f32 %v8218_v15, 0.0  ;;  %v8180_v14 = vadd.f32 %v15052_v31, %v14912_v6  ;;  %v8213_v6 = vadd.f32 %v15058_v42, %v15008_v35  ;;  %v8211_v35 = vadd.f32 %v15058_v42, %v15002_v29 }
 0x76c   : > { %v8189_v48 = vadd.f32 %v8115_v40, %v14951_v44  ;;  %v8219_v44 = vadd.f32 %v15058_v42, %v8171_v17  ;;  %v8262_v40 = vmax.f32 %v8221_v46, 0.0  ;;  %v8277_v39 = vmax.f32 %v8236_v55, 0.0 }
 0x76d   : > { %v11063_v53 = vpop.f32.mrf.mxu1  ;;  %v8233_v30 = vadd.f32 %v15058_v42, %v8185_v61  ;;  %v8276_v17 = vmax.f32 %v8235_v24, 0.0  ;;  %v8182_v46 = vadd.f32 %v8088_v13, %v14921_v3  ;;  %v8181_v24 = vadd.f32 %v8083_v28, %v14915_v10 }
 0x76e   : > { %v8237_v50 = vadd.f32 %v15058_v42, %v8189_v48  ;;  %v8260_v43 = vmax.f32 %v8219_v44, 0.0  ;;  %v8275_v53 = vmax.f32 %v8234_v0, 0.0  ;;  %v8231_v9 = vadd.f32 %v15058_v42, %v8183_v38 }
 0x76f   : > { %v15067_v21 = vpop.f32.mrf.mxu1  ;;  %v8274_v55 = vmax.f32 %v8233_v30, 0.0  ;;  %v8215_v3 = vadd.f32 %v15058_v42, %v15014_v63  ;;  %v8258_v13 = vmax.f32 %v8217_v23, 0.0  ;;  %v8230_v26 = vadd.f32 %v15058_v42, %v8182_v46 }
 0x770   : > { %v8278_v5 = vmax.f32 %v8237_v50, 0.0  ;;  %v8273_v61 = vmax.f32 %v8232_v19, 0.0  ;;  %v8214_v10 = vadd.f32 %v15058_v42, %v15011_v11  ;;  %v8257_v28 = vmax.f32 %v8216_v36, 0.0 }
 0x771   : > { %v11066_v22 = vpop.f32.mrf.mxu1  ;;  %v8179_v63 = vadd.f32 %v15050_v7, %v14906_v27  ;;  %v8229_v44 = vadd.f32 %v15058_v42, %v8181_v24  ;;  %v8256_v31 = vmax.f32 %v8215_v3, 0.0  ;;  %v8228_v34 = vadd.f32 %v15058_v42, %v8180_v14 }
 0x772   : > { %9488 = vmatprep.subr.mxu0 %v8278_v5  ;;  %v8271_v11 = vmax.f32 %v8230_v26, 0.0  ;;  %v8212_v0 = vadd.f32 %v15058_v42, %v15005_v62  ;;  %v8226_v30 = vadd.f32 %v15058_v42, %v15048_v41  ;;  %v8210_v62 = vadd.f32 %v15058_v42, %v14999_v52 }
 0x773   : > { %v15076_v48 = vpop.f32.mrf.mxu1  ;;  %9489 = vmatpush3.msra.mxu0 %v8262_v40  ;;  %v8272_v40 = vmax.f32 %v8231_v9, 0.0  ;;  %v8227_v27 = vadd.f32 %v15058_v42, %v8179_v63  ;;  %v8270_v7 = vmax.f32 %v8229_v44, 0.0  ;;  %v8209_v29 = vadd.f32 %v15058_v42, %v14996_v51 }
 0x774   : > { %9490 = vmatprep.subr.mxu0 %v8277_v39  ;;  %v8255_v39 = vmax.f32 %v8214_v10, 0.0  ;;  %v8253_v23 = vmax.f32 %v8212_v0, 0.0  ;;  %v8252_v19 = vmax.f32 %v8211_v35, 0.0  ;;  %v8224_v41 = vadd.f32 %v15058_v42, %v15042_v8 }
 0x775   : > { %v11067_v47 = vpop.f32.mrf.mxu1  ;;  %9491 = vmatpush3.msra.mxu0 %v8261_v20  ;;  %v8254_v20 = vmax.f32 %v8213_v6, 0.0  ;;  %v8268_v46 = vmax.f32 %v8227_v27, 0.0  ;;  %v8267_v36 = vmax.f32 %v8226_v30, 0.0  ;;  %v8208_v52 = vadd.f32 %v15058_v42, %v14993_v32  ;;  %v15491_v27 = vld [vmem:[#allocation9_spill] sm:$0xff]  ;;  %v15492_v30 = vld [vmem:[#allocation6_spill] sm:$0xff] }
 0x776   : > { %9492 = vmatprep.subr.mxu0 %v8276_v17  ;;  %v8269_v17 = vmax.f32 %v8228_v34, 0.0  ;;  %v8225_v47 = vadd.f32 %v15058_v42, %v15045_v54  ;;  %v8223_v54 = vadd.f32 %v15058_v42, %v15039_v59  ;;  %v8207_v51 = vadd.f32 %v15058_v42, %v14990_v56 }
 0x777   : > { %v15086_v33 = vpop.f32.mrf.mxu1  ;;  %9493 = vmatpush3.msra.mxu0 %v8260_v43  ;;  %v8222_v8 = vadd.f32 %v15058_v42, %v15036_v18  ;;  %v8206_v32 = vadd.f32 %v15058_v42, %v14987_v60 }
 0x778   : > { %9494 = vmatprep.subr.mxu0 %v8275_v53  ;;  %v8266_v9 = vmax.f32 %v8225_v47, 0.0  ;;  %v8264_v59 = vmax.f32 %v8223_v54, 0.0  ;;  %v8248_v26 = vmax.f32 %v8207_v51, 0.0 }
 0x779   : > { %v11070_v50 = vpop.f32.mrf.mxu1  ;;  %9495 = vmatpush3.msra.mxu0 %v8259_v2  ;;  %v8251_v2 = vmax.f32 %v8210_v62, 0.0  ;;  %v8263_v56 = vmax.f32 %v8222_v8, 0.0 }
 0x77a   : > { %9496 = vmatprep.subr.mxu0 %v8274_v55  ;;  %v8250_v55 = vmax.f32 %v8209_v29, 0.0  ;;  %v8249_v50 = vmax.f32 %v8208_v52, 0.0 }
 0x77b   : > { %v15097_v5 = vpop.f32.mrf.mxu1  ;;  %9497 = vmatpush3.msra.mxu0 %v8258_v13  ;;  %v8265_v13 = vmax.f32 %v8224_v41, 0.0 }
 0x77c   : > { %9498 = vmatprep.subr.mxu0 %v8273_v61 }
 0x77d   : > { %v11071_v22 = vpop.f32.mrf.mxu1  ;;  %9499 = vmatpush3.msra.mxu0 %v8257_v28  ;;  %v8247_v28 = vmax.f32 %v8206_v32, 0.0 }
 0x77e   : > { %9500 = vmatprep.subr.mxu0 %v8272_v40 }
 0x77f   : > { %v15107_v15 = vpop.f32.mrf.mxu1  ;;  %9501 = vmatpush3.msra.mxu0 %v8256_v31 }
 0x780   : > { %9502 = vmatprep.subr.mxu0 %v8271_v11 }
 0x781   : > { %v11074_v38 = vpop.f32.mrf.mxu1  ;;  %9503 = vmatpush3.msra.mxu0 %v8255_v39 }
 0x782   : > { %9504 = vmatprep.subr.mxu0 %v8270_v7  ;;  %v8190_v7 = vadd.f32 %v15067_v21, %v15491_v27 }
 0x783   : > { %v8139_v43 = vpop.f32.mrf.mxu1  ;;  %9505 = vmatpush3.msra.mxu0 %v8254_v20 }
 0x784   : > { %9506 = vmatprep.subr.mxu0 %v8269_v17  ;;  %v8195_v40 = vadd.f32 %v8139_v43, %v14975_v58  ;;  %v8193_v58 = vadd.f32 %v15097_v5, %v14969_v37  ;;  %v8450_v17 = vld [vmem:[%s15226_s7] sm:$0xff] }
 0x785   : > { %v11075_v53 = vpop.f32.mrf.mxu1  ;;  %9507 = vmatpush3.msra.mxu0 %v8253_v23 }
 0x786   : > { %9508 = vmatprep.subr.mxu0 %v8268_v46  ;;  %v8243_v11 = vadd.f32 %v15058_v42, %v8195_v40  ;;  %v8241_v37 = vadd.f32 %v15058_v42, %v8193_v58 }
 0x787   : > { %v8144_v24 = vpop.f32.mrf.mxu1  ;;  %9509 = vmatpush3.msra.mxu0 %v8252_v19  ;;  %v8452_v19 = vld [vmem:[%s15227_s8] sm:$0x1] }
 0x788   : > { %9510 = vmatprep.subr.mxu0 %v8267_v36  ;;  %v8196_v18 = vadd.f32 %v8144_v24, %v14978_v16  ;;  %v8194_v16 = vadd.f32 %v15107_v15, %v14972_v45  ;;  %v8191_v15 = vadd.f32 %v15076_v48, %v14960_v1  ;;  %v8284_v5 = vmax.f32 %v8243_v11, 0.0 }
 0x789   : > { %v11078_v3 = vpop.f32.mrf.mxu1  ;;  %9511 = vmatpush3.msra.mxu0 %v8251_v2  ;;  %v8282_v20 = vmax.f32 %v8241_v37, 0.0  ;;  %v8238_v1 = vadd.f32 %v15058_v42, %v8190_v7 }
 0x78a   : > { %9512 = vmatprep.subr.mxu0 %v8266_v9  ;;  %v8242_v39 = vadd.f32 %v15058_v42, %v8194_v16  ;;  %v8239_v35 = vadd.f32 %v15058_v42, %v8191_v15 }
 0x78b   : > { %v8147_v14 = vpop.f32.mrf.mxu1  ;;  %9513 = vmatpush3.msra.mxu0 %v8250_v55  ;;  %v8279_v21 = vmax.f32 %v8238_v1, 0.0 }
 0x78c   : > { %9514 = vmatprep.subr.mxu0 %v8265_v13  ;;  %v8197_v10 = vadd.f32 %v8147_v14, %v14981_v4  ;;  %v8280_v38 = vmax.f32 %v8239_v35, 0.0 }
 0x78d   : > { %v11079_v61 = vpop.f32.mrf.mxu1  ;;  %9515 = vmatpush3.msra.mxu0 %v8249_v50 }
 0x78e   : > { %9516 = vmatprep.subr.mxu0 %v8264_v59  ;;  %v8245_v6 = vadd.f32 %v15058_v42, %v8197_v10 }
 0x78f   : > { %v8152_v63 = vpop.f32.mrf.mxu1  ;;  %9517 = vmatpush3.msra.mxu0 %v8248_v26 }
 0x790   : > { %v8198_v44 = vadd.f32 %v8152_v63, %v14984_v25  ;;  %9518 = vmatprep.subr.mxu0 %v8263_v56  ;;  %v8244_v25 = vadd.f32 %v15058_v42, %v8196_v18  ;;  %v8286_v0 = vmax.f32 %v8245_v6, 0.0 }
 0x791   : > { %v11082_v60 = vpop.f32.mrf.mxu1  ;;  %9519 = vmatpush3.msra.mxu0 %v8247_v28 }
 0x792   : > { %v8246_v31 = vadd.f32 %v15058_v42, %v8198_v44  ;;  %8375 = vmatmul.mubr.f32.vlgmr.msra.gmra.mxu0 %v15028_v49  ;;  %11105 = vmatprep.subr.mxu0 %v15329_v57  ;;  %v8192_v49 = vadd.f32 %v15086_v33, %v14966_v12  ;;  %v8285_v45 = vmax.f32 %v8244_v25, 0.0  ;;  %v8283_v33 = vmax.f32 %v8242_v39, 0.0 }
 0x793   : > { %v8155_v4 = vpop.f32.mrf.mxu1  ;;  %11109 = vmatprep.mubr.msk.f32.mxu0 %vm11313_vm1, %v15329_v57 }
 0x794   : > { %v8287_v22 = vmax.f32 %v8246_v31, 0.0  ;;  %v8240_v12 = vadd.f32 %v15058_v42, %v8192_v49  ;;  %v8451_v42 = vld [vmem:[%s15226_s7 + $0x8] sm:$0xff] }
 0x795   : > { %v11083_v34 = vpop.f32.mrf.mxu1  ;;  %11106 = vmatpush3.msra.mxu0 %v8451_v42 }
 0x796   : > { %11085 = vmatpush3.msk.msra.mxu1 %vm5132_vm9, %v8287_v22  ;;  %v8281_v48 = vmax.f32 %v8240_v12, 0.0  ;;  %11107 = vmatprep.subr.mxu0 %v15329_v57 }
 0x797   : > { %11086 = vmatprep.subr.mxu1 %v15329_v57  ;;  %11108 = vmatpush3.msra.mxu0 %v8450_v17 }
 0x798   : > { %11087 = vmatpush3.msra.mxu1 %v8286_v0 }
 0x799   : > { %11088 = vmatprep.subr.mxu1 %v15329_v57 }
 0x79a   : > { %11089 = vmatpush3.msra.mxu1 %v8285_v45 }
 0x79b   : > { %11090 = vmatprep.subr.mxu1 %v15329_v57 }
 0x79c   : > { %11091 = vmatpush3.msra.mxu1 %v8284_v5 }
 0x79d   : > { %11092 = vmatprep.subr.mxu1 %v15329_v57 }
 0x79e   : > { %11093 = vmatpush3.msra.mxu1 %v8283_v33 }
 0x79f   : > { %11094 = vmatprep.subr.mxu1 %v15329_v57 }
 0x7a0   : > { %11095 = vmatpush3.msra.mxu1 %v8282_v20 }
 0x7a1   : > { %11096 = vmatprep.subr.mxu1 %v15329_v57 }
 0x7a2   : > { %11097 = vmatpush3.msra.mxu1 %v8281_v48 }
 0x7a3   : > { %11098 = vmatprep.subr.mxu1 %v15329_v57 }
 0x7a4   : > { %11099 = vmatpush3.msra.mxu1 %v8280_v38 }
 0x7a5   : > { %11100 = vmatprep.subr.mxu1 %v15329_v57 }
 0x7a6   : > { %11101 = vmatpush3.msra.mxu1 %v8279_v21 }
 0x7a7   : > { %11103 = vmatmul.mubr.msk.f32.vlgmr.msra.gmra.mxu1 %vm8304_vm12, %v15492_v30 }
 0x852   : > { %v9520_v62 = vpop.f32.mrf.mxu0 }
 0x854   : > { %v9521_v23 = vpop.f32.mrf.mxu0 }
 0x855   : > { %v9522_v43 = vadd.f32 %v9521_v23, %v9520_v62 }
 0x867   : > { %v8446_v47 = vpop.f32.mrf.mxu1 }
 0x868   : > { %v8447_v46 = vadd.f32 %v9522_v43, %v8446_v47 }
 0x869   : > { %v11104_v29 = vpop.f32.mrf.mxu1 }
 0x86a   : > { %11110 = vmatmul.mubr.msk.f32.vlgmr.msra.gmra.mxu0 %vm8453_vm13, %v8447_v46 }
 0x92a   : > { %v8523_v53 = vpop.f32.mrf.mxu0 }
 0x92b   : > { %v8524_v57 = vadd.f32 %v8523_v53, %v8452_v19 }
 0x92c   : > { %v11111_v41 = vpop.f32.mrf.mxu0 }
 0x92d   : > { %8527 = vst [vmem:[%s324_s24] sm:$0x1] %v8524_v57 }
 0x92e   : > { %11263 = shalt.err (!%p11260_p3)
}
 0x92f   : > { %s11264_s22 = scalar_lea.hbm %s15184_s28, 16  ;;  %s11268_s24 = scalar_lea.hbm %s15228_s9, 32 }
 0x930   : > { %p11265_p4 = scmp.ne.s32.totalorder %s15184_s28, %s11264_s22  ;;  %p11269_p9 = scmp.lt.s32.totalorder %s15184_s28, %s15228_s9 }
 0x931   : > { %p11270_p10 = scmp.lt.s32.totalorder %s11268_s24, %s11264_s22 }
 0x932   : > { %p11266_p7 = pnand %p11265_p4, %p11404_p5 }
 0x933   : > { %p11271_p11 = por %p11270_p10, %p11269_p9 }
 0x934   : > { %p11267_p8 = pneg %p11266_p7 }
 0x936   : > { %p11272_p12 = pnand %p11271_p11, %p11267_p8 }
 0x938   : > { %11275 = shalt.err (!%p11272_p12)
}
 0x939   : > { %11113 = dma.vmem_to_hbm [thread:$0]  (%p11404_p5), %s8542_s25, 16, %s15184_s28, %s8529_s14  }
 0x93a PF: > { %p11119_p13 = scmp.ge.s32.totalorder %s11310_s12, 2  ;;  %s8553_s29 = sand.u32 1, %s11298_s30  }
 0x93b   : > { %s8554_s16 = scalar_lea.sflag [#allocation4], %s8553_s29 }
 0x93c   : > { %p11116_p0 = pnand %p11119_p13, %p11408_p6 }
 0x93e   : > { %p11117_p1 = pneg %p11116_p0 }
 0x940   : > { %11293 = dma.done.wait (%p11117_p1), %s8554_s16, 16  }
 0x941   : > { %11295 = vsyncadd (%p11117_p1), %s8554_s16, 4294967280  ;;  %p19_p2 = scmp.ge.s32.totalorder %s11391_s15, 4   ;;  %s15493_s30 = smov %s11302_s10 }
 0x942   : > { %s15494_s10 = smov %s11306_s11  ;;  %s15495_s11 = smov %s11402_s18 }
 0x943   : > { %s15496_s12 = smov %s11391_s15  ;;  %21 = sbr.rel (!%p19_p2) target bundleno = 3 (0x3), region = 107 }
 0x948   :  { %8558 = vsyncpa [#allocation4], 1 }
 0x949   :  { %8560 = vsyncpa [#allocation4 + $0x1], 1 }

</bundles_post_ra>
